<compile_context>
chip_gen: v5e
topology: v5e:2x2
jax: 0.10.0
libtpu: 0.0.40
codegen_flags: <defaults>
</compile_context>

<pallas_src>
import math

import numpy as np

import jax
import jax.numpy as jnp
from jax.experimental import pallas as pl
from jax.experimental.pallas import tpu as pltpu


# ----------------------------------------------------------------------------
# Hardware helpers
# ----------------------------------------------------------------------------
_N_TC_CACHE = None


def _num_tensorcores():
    """Best-effort TensorCore count of the attached part (v5e/v6e: 1, v7x: 2)."""
    global _N_TC_CACHE
    if _N_TC_CACHE is None:
        n = 1
        try:
            dev = jax.devices()[0]
            nc = getattr(dev, "num_cores", None)
            if isinstance(nc, int) and nc > 0:
                n = nc
            elif "v7" in str(getattr(dev, "device_kind", "")).lower():
                n = 2
        except Exception:
            n = 1
        _N_TC_CACHE = n
    return _N_TC_CACHE


def _pick_tm(m, bytes_per_col, n_tc, vmem_budget=12 << 20):
    """Lane tile for the (Ppool, K, M) patch operand.

    * 1-TC parts (v5e/v6e): one full-M block (splitting only adds per-step
      overhead on a serial grid).
    * multi-TC parts (v7x): split M across cores, but only when each piece
      keeps >= 512 lanes.
    * Always keep the double-buffered patch tile under a VMEM budget.
    """
    tm = m
    if n_tc > 1 and m % n_tc == 0 and (m // n_tc) >= 512 and (m // n_tc) % 128 == 0:
        tm = m // n_tc
    while (tm > 128 and 2 * bytes_per_col * tm > vmem_budget
           and tm % 2 == 0 and (tm // 2) % 128 == 0):
        tm //= 2
    return tm


# ----------------------------------------------------------------------------
# Pallas kernel 1: fused conv-matmul (BN scale pre-folded) + shift + ReLU
#                  + (optional) maxpool over pool-tap slabs
# ----------------------------------------------------------------------------
def _conv_relu_pool_kernel(w_ref, p_ref, shift_ref, o_ref):
    """o = max over pool taps t of relu(W @ P[t] + shift).

    w_ref:     (Cout, K)         bf16, BN scale folded into W
    p_ref:     (Ppool, K, TM)    bf16 pool-tap-expanded im2col patches
    shift_ref: (Cout, 1)         f32  folded BN shift
    o_ref:     (Cout, TM)        bf16
    """
    r = None
    for t in range(p_ref.shape[0]):                       # statically unrolled
        z = jnp.dot(w_ref[...], p_ref[t], preferred_element_type=jnp.float32)
        z = jnp.maximum(z + shift_ref[...], 0.0)
        r = z if r is None else jnp.maximum(r, z)
    o_ref[...] = r.astype(o_ref.dtype)


def conv_relu_pool(wmat, patches, shift):
    """wmat:(Cout,K) bf16, patches:(Ppool,K,M) bf16, shift:(Cout,1) f32
    -> (Cout, M) bf16."""
    cout, k = wmat.shape
    ppool, k2, m = patches.shape
    assert k == k2
    n_tc = _num_tensorcores()
    tm = _pick_tm(m, ppool * k * 2, n_tc)
    grid = (m // tm,)
    return pl.pallas_call(
        _conv_relu_pool_kernel,
        out_shape=jax.ShapeDtypeStruct((cout, m), jnp.bfloat16),
        grid_spec=pltpu.PrefetchScalarGridSpec(
            num_scalar_prefetch=0,
            grid=grid,
            in_specs=[
                pl.BlockSpec((cout, k), lambda i: (0, 0)),       # weight (resident)
                pl.BlockSpec((ppool, k, tm), lambda i: (0, 0, i)),  # patch tile
                pl.BlockSpec((cout, 1), lambda i: (0, 0)),       # BN shift
            ],
            out_specs=pl.BlockSpec((cout, tm), lambda i: (0, i)),
        ),
        compiler_params=pltpu.CompilerParams(dimension_semantics=("parallel",)),
    )(wmat, patches, shift)


# ----------------------------------------------------------------------------
# Pallas kernel 2: fused tail
#   blocks 1..3 (conv+BN+ReLU+pool via selection matmuls) + avgpool
#   + quantum layer + fc1 + ReLU + Dropout(id) + fc2   -- all VMEM-resident
# ----------------------------------------------------------------------------
_QAMP = math.sqrt(1.01)      # cos(z) + 0.1*sin(z) == sqrt(1.01) * cos(z - atan(0.1))
_QPHI = math.atan(0.1)


def _tail_kernel(x0_ref,
                 s1_ref, wt1_ref, sh1_ref,
                 s2_ref, wt2_ref, sh2_ref,
                 s3_ref, wt3_ref, sh3_ref,
                 avg_ref, th_ref, thb_ref,
                 f1_ref, f1b_ref, f2_ref, f2b_ref,
                 o_ref):
    def conv_pool_block(x, s_ref, wt_ref, sh_ref):
        # Conv3x3/s1/p1 (+folded BN) + ReLU + MaxPool2x2/s2, all on VMEM values.
        # x: (Cin, Min) bf16; s_ref[t]: (Min, 4*Mq) 0/1 gather matrix;
        # wt_ref[t]: (Cout, Cin) bf16 (scale folded); sh_ref: (Cout, 1) f32.
        mexp = s_ref.shape[2]
        mq = mexp // 4                       # 4 = 2x2 pool taps (pool-tap major)
        z = None
        for t in range(s_ref.shape[0]):      # 9 conv taps, statically unrolled
            patches_t = jnp.dot(
                x, s_ref[t], preferred_element_type=jnp.float32
            ).astype(jnp.bfloat16)           # exact gather via 0/1 selection
            zt = jnp.dot(wt_ref[t], patches_t, preferred_element_type=jnp.float32)
            z = zt if z is None else z + zt
        z = jnp.maximum(z + sh_ref[...], 0.0)
        r = z[:, 0:mq]
        for p in range(1, 4):                # maxpool = max over pool-tap slabs
            r = jnp.maximum(r, z[:, p * mq:(p + 1) * mq])
        return r.astype(jnp.bfloat16)        # (Cout, Mq), Mq = N*Ho*Wo

    x = x0_ref[...]                                          # (16, N*8*8)
    x = conv_pool_block(x, s1_ref, wt1_ref, sh1_ref)         # (32, N*4*4)
    x = conv_pool_block(x, s2_ref, wt2_ref, sh2_ref)         # (64, N*2*2)
    x = conv_pool_block(x, s3_ref, wt3_ref, sh3_ref)         # (64, N*1*1)
    # AdaptiveAvgPool2d((1,1)) + flatten, transposed: feats_T = x @ avg -> (D, N)
    feats_t = jnp.dot(x.astype(jnp.float32), avg_ref[...],
                      preferred_element_type=jnp.float32)
    # QuantumInspiredLayer: cos(z) + 0.1*sin(z) == sqrt(1.01)*cos(z - atan(0.1))
    zq = jnp.dot(th_ref[...], feats_t,
                 preferred_element_type=jnp.float32) + thb_ref[...]
    q = _QAMP * jnp.cos(zq - _QPHI)
    # classifier: Linear -> ReLU -> Dropout(identity in eval) -> Linear
    h = jnp.maximum(
        jnp.dot(f1_ref[...], q, preferred_element_type=jnp.float32) + f1b_ref[...],
        0.0)
    o_ref[...] = (jnp.dot(f2_ref[...], h, preferred_element_type=jnp.float32)
                  + f2b_ref[...])


def tail_fused(x0, prep):
    """x0: (16, N*8*8) bf16 (block0 output)  ->  logits_T (num_classes, N) f32."""
    args = (x0,
            prep["b1_sel"], prep["b1_w"], prep["b1_shift"],
            prep["b2_sel"], prep["b2_w"], prep["b2_shift"],
            prep["b3_sel"], prep["b3_w"], prep["b3_shift"],
            prep["avg"], prep["theta"], prep["theta_b"],
            prep["fc1_w"], prep["fc1_b"], prep["fc2_w"], prep["fc2_b"])
    nc = prep["fc2_w"].shape[0]
    n = prep["avg"].shape[1]

    def full_spec(a):
        nd = a.ndim
        return pl.BlockSpec(a.shape, lambda i, _nd=nd: (0,) * _nd)

    return pl.pallas_call(
        _tail_kernel,
        out_shape=jax.ShapeDtypeStruct((nc, n), jnp.float32),
        grid_spec=pltpu.PrefetchScalarGridSpec(
            num_scalar_prefetch=0,
            grid=(1,),
            in_specs=[full_spec(a) for a in args],
            out_specs=pl.BlockSpec((nc, n), lambda i: (0, 0)),
        ),
        compiler_params=pltpu.CompilerParams(dimension_semantics=("arbitrary",)),
    )(*args)


# ----------------------------------------------------------------------------
# XLA-side glue: channel-major im2col (stem), pool-expanded patches (block 0)
# ----------------------------------------------------------------------------
def _im2col(x_cnhw, kh, kw, stride, pad, k_pad_to=16):
    """x:(C,N,H,W) -> patches_T (K,M); K ordered (C, kh, kw) to match PyTorch
    conv-weight flattening, M ordered (N, Ho, Wo).  K zero-padded to mult of 16
    (bf16 sublane packing); padding happens before any cast."""
    c, n, h, w = x_cnhw.shape
    xp = jnp.pad(x_cnhw, ((0, 0), (0, 0), (pad, pad), (pad, pad)))
    ho = (h + 2 * pad - kh) // stride + 1
    wo = (w + 2 * pad - kw) // stride + 1
    cols = []
    for i in range(kh):
        for j in range(kw):
            cols.append(xp[:, :, i:i + stride * ho:stride, j:j + stride * wo:stride])
    p = jnp.stack(cols, axis=1).reshape(c * kh * kw, n * ho * wo)
    kdim = c * kh * kw
    kpad = (-kdim) % k_pad_to
    if kpad:
        p = jnp.pad(p, ((0, kpad), (0, 0)))
    return p, (n, ho, wo)


def _pool_expanded_patches(x_cnhw, k_pad_to=16):
    """3x3/s1/p1 conv patches with the output columns expanded per 2x2/s2
    maxpool tap: returns (4, K, N*(H/2)*(W/2)) so the conv kernel can fuse the
    pool as a max over the leading axis."""
    c, n, h, w = x_cnhw.shape
    xp = jnp.pad(x_cnhw, ((0, 0), (0, 0), (1, 1), (1, 1)))
    cols = [xp[:, :, i:i + h, j:j + w] for i in range(3) for j in range(3)]
    p = jnp.stack(cols, axis=1).reshape(c * 9, n, h, w)
    taps = [p[:, :, pi::2, pj::2].reshape(c * 9, -1)
            for pi in range(2) for pj in range(2)]
    pe = jnp.stack(taps, axis=0)
    kpad = (-(c * 9)) % k_pad_to
    if kpad:
        pe = jnp.pad(pe, ((0, 0), (0, kpad), (0, 0)))
    return pe


# ----------------------------------------------------------------------------
# One-time parameter preparation (hoisted out of the forward path)
# ----------------------------------------------------------------------------
def _selection_matrix(n_batch, h):
    """0/1 matrices implementing the im2col gather of a 3x3/s1/p1 conv with the
    output columns expanded per 2x2/s2 maxpool tap:  patches_t = X @ S[t]."""
    ho = h // 2
    min_ = n_batch * h * h
    mq = n_batch * ho * ho
    s = np.zeros((9, min_, 4 * mq), np.float32)
    for ci in range(3):
        for cj in range(3):
            t = ci * 3 + cj
            for pi in range(2):
                for pj in range(2):
                    pt = pi * 2 + pj
                    for n in range(n_batch):
                        for io in range(ho):
                            for jo in range(ho):
                                y = 2 * io + pi - 1 + ci
                                x = 2 * jo + pj - 1 + cj
                                if 0 <= y < h and 0 <= x < h:
                                    col = ((pt * n_batch + n) * ho + io) * ho + jo
                                    row = (n * h + y) * h + x
                                    s[t, row, col] = 1.0
    return s


def prepare_params(params, *, batch, img_size, eps=1e-5):
    """Fold BN into the conv weights, pre-reshape/cast everything the kernels
    need.  Run once per parameter set (never inside the forward path)."""
    assert img_size % 64 == 0, "depths=4 pooling ladder needs img_size % 64 == 0"
    assert len(params["blocks"]) == 4
    prep = {}

    def fold(w, bn):
        scale = bn["gamma"] / jnp.sqrt(bn["var"] + eps)
        shift = (bn["beta"] - bn["mean"] * scale).astype(jnp.float32)
        return w * scale[:, None, None, None], shift

    def flat_pad(w):
        cout = w.shape[0]
        wmat = w.reshape(cout, -1)
        kpad = (-wmat.shape[1]) % 16
        if kpad:
            wmat = jnp.pad(wmat, ((0, 0), (0, kpad)))
        return wmat.astype(jnp.bfloat16)

    # stem: Conv(7,s2,p3)+BN+ReLU (its 3x3/s2 pool stays XLA-side)
    w, shift = fold(params["stem_conv"], params["stem_bn"])
    prep["stem_w"] = flat_pad(w)
    prep["stem_shift"] = shift.reshape(-1, 1)

    # block 0: Conv(3,s1,p1)+BN+ReLU+MaxPool(2,2)   (pool fused in-kernel)
    w, shift = fold(params["blocks"][0]["conv"], params["blocks"][0]["bn"])
    prep["b0_w"] = flat_pad(w)
    prep["b0_shift"] = shift.reshape(-1, 1)

    # blocks 1..3 + head: fully fused VMEM-resident tail kernel
    spatial = img_size // 8                      # spatial entering block 1
    sizes = [spatial, spatial // 2, spatial // 4]
    for b in (1, 2, 3):
        w, shift = fold(params["blocks"][b]["conv"], params["blocks"][b]["bn"])
        cout, cin, _, _ = w.shape
        wt = jnp.transpose(w, (2, 3, 0, 1)).reshape(9, cout, cin)
        prep[f"b{b}_w"] = wt.astype(jnp.bfloat16)
        prep[f"b{b}_shift"] = shift.reshape(cout, 1)
        prep[f"b{b}_sel"] = jnp.asarray(
            _selection_matrix(batch, sizes[b - 1]), dtype=jnp.bfloat16)

    # global average pool as a tiny (Mq3, N) matmul (spatial is 1x1 here)
    hf = sizes[2] // 2
    mq3 = batch * hf * hf
    avg = np.zeros((mq3, batch), np.float32)
    for n in range(batch):
        avg[n * hf * hf:(n + 1) * hf * hf, n] = 1.0 / (hf * hf)
    prep["avg"] = jnp.asarray(avg)

    # head weights in transposed-activation orientation -> no transposes needed
    prep["theta"] = params["theta"].astype(jnp.float32)
    prep["theta_b"] = params["theta_bias"].reshape(-1, 1).astype(jnp.float32)
    prep["fc1_w"] = params["fc1_w"].astype(jnp.float32)
    prep["fc1_b"] = params["fc1_b"].reshape(-1, 1).astype(jnp.float32)
    prep["fc2_w"] = params["fc2_w"].astype(jnp.float32)
    prep["fc2_b"] = params["fc2_b"].reshape(-1, 1).astype(jnp.float32)
    return prep


# ----------------------------------------------------------------------------
# Parameters (deterministic, synthetic) and forward pass
# ----------------------------------------------------------------------------
def init_params(key, in_chans=3, embed_dim=8, depths=4, num_classes=5):
    keys = iter(jax.random.split(key, 8 + depths))
    p = {}

    def conv_w(k, cout, cin, kh, kw):
        return jax.random.normal(k, (cout, cin, kh, kw), jnp.float32) * 0.05

    def bn(c):
        return dict(gamma=jnp.ones(c, jnp.float32), beta=jnp.zeros(c, jnp.float32),
                    mean=jnp.zeros(c, jnp.float32), var=jnp.ones(c, jnp.float32))

    p["stem_conv"] = conv_w(next(keys), embed_dim, in_chans, 7, 7)
    p["stem_bn"] = bn(embed_dim)

    p["blocks"] = []
    cin = embed_dim
    for i in range(depths):
        cout = embed_dim * (2 ** (i + 1) if i < depths - 1 else 2 ** i)
        p["blocks"].append(dict(conv=conv_w(next(keys), cout, cin, 3, 3), bn=bn(cout)))
        cin = cout

    final_dim = embed_dim * 2 ** (depths - 1)
    p["theta"] = jax.random.normal(next(keys), (final_dim, final_dim), jnp.float32) * 0.1
    p["theta_bias"] = jnp.zeros(final_dim, jnp.float32)
    p["fc1_w"] = jax.random.normal(next(keys), (512, final_dim), jnp.float32) * 0.05
    p["fc1_b"] = jnp.zeros(512, jnp.float32)
    p["fc2_w"] = jax.random.normal(next(keys), (num_classes, 512), jnp.float32) * 0.05
    p["fc2_b"] = jnp.zeros(num_classes, jnp.float32)
    return p


def qvitdr_forward(prep, x):
    # NCHW -> channel-major CNHW once; bf16 from here on (MXU consumes bf16).
    x = jnp.transpose(x, (1, 0, 2, 3)).astype(jnp.bfloat16)

    # ---- stem: Conv(7,s2,p3)+BN+ReLU (Pallas) + MaxPool(3,s2,p1) (XLA) ------
    p, (n, ho, wo) = _im2col(x, 7, 7, 2, 3)
    z = conv_relu_pool(prep["stem_w"], p[None], prep["stem_shift"])
    z = z.reshape(-1, n, ho, wo)
    # post-ReLU activations are >= 0, so a 0-padded max window == MaxPool2d(pad=1)
    z = jax.lax.reduce_window(z, jnp.array(0.0, z.dtype), jax.lax.max,
                              (1, 1, 3, 3), (1, 1, 2, 2),
                              ((0, 0), (0, 0), (1, 1), (1, 1)))

    # ---- block 0: Conv+BN+ReLU+MaxPool fused into one Pallas call -----------
    p0 = _pool_expanded_patches(z)                     # (4, 80, N*8*8)
    z = conv_relu_pool(prep["b0_w"], p0, prep["b0_shift"])   # (16, N*8*8) bf16

    # ---- blocks 1..3 + avgpool + quantum layer + classifier: one fused call -
    logits_t = tail_fused(z, prep)                     # (num_classes, N)
    return logits_t.T


if __name__ == "__main__":
    key = jax.random.PRNGKey(0)
    pkey, xkey = jax.random.split(key)
    # small config: img 64x64, embed_dim=8, depths=4, 5 classes, batch 2
    params = init_params(pkey, in_chans=3, embed_dim=8, depths=4, num_classes=5)
    x = jax.random.normal(xkey, (2, 3, 64, 64), jnp.float32)
    prep = prepare_params(params, batch=2, img_size=64)   # hoisted weight prep
    fwd = jax.jit(qvitdr_forward)
    out = jax.block_until_ready(fwd(prep, x))
    assert out.shape == (2, 5), out.shape
    assert bool(jnp.all(jnp.isfinite(out)))
    print("KERNEL_OK")
</pallas_src>

<mosaic_0001>
module attributes {stable_mosaic.version = 11 : i64} {
  func.func @_conv_relu_pool_kernel(%arg0: i32, %arg1: memref<8x160xbf16, #tpu.memory_space<vmem>>, %arg2: memref<1x160x2048xbf16, #tpu.memory_space<vmem>>, %arg3: memref<8x1xf32, #tpu.memory_space<vmem>>, %arg4: memref<8x2048xbf16, #tpu.memory_space<vmem>>) attributes {dimension_semantics = [#tpu.dimension_semantics<parallel>], iteration_bounds = array<i64: 1>, scalar_prefetch = 0 : i64, scratch_operands = 0 : i64, tpu.core_type = #tpu.core_type<tc>, window_params = [{pipeline_mode = #tpu.pipeline_mode<synchronous>, transform_indices = @transform_0, window_bounds = array<i64: 8, 160>}, {transform_indices = @transform_1, window_bounds = array<i64: 1, 160, 2048>}, {pipeline_mode = #tpu.pipeline_mode<synchronous>, transform_indices = @transform_2, window_bounds = array<i64: 8, 1>}, {transform_indices = @transform_3, window_bounds = array<i64: 8, 2048>}]} {
    %c0 = arith.constant 0 : index
    %c0_0 = arith.constant 0 : index
    %0 = vector.load %arg1[%c0, %c0_0] : memref<8x160xbf16, #tpu.memory_space<vmem>>, vector<8x160xbf16>
    %c0_1 = arith.constant 0 : index
    %c0_2 = arith.constant 0 : index
    %c0_3 = arith.constant 0 : index
    %1 = vector.load %arg2[%c0_1, %c0_2, %c0_3] : memref<1x160x2048xbf16, #tpu.memory_space<vmem>>, vector<1x160x2048xbf16>
    %2 = vector.shape_cast %1 : vector<1x160x2048xbf16> to vector<160x2048xbf16>
    %cst = arith.constant dense<0.000000e+00> : vector<8x2048xf32>
    %3 = tpu.matmul %0, %2, %cst {dimension_numbers = #tpu.dot_dimension_numbers<[1], [0], [0], [1], [0, 0, 1, 1], [], []>} : vector<8x160xbf16>, vector<160x2048xbf16>, vector<8x2048xf32> -> vector<8x2048xf32>
    %c0_4 = arith.constant 0 : index
    %c0_5 = arith.constant 0 : index
    %4 = vector.load %arg3[%c0_4, %c0_5] : memref<8x1xf32, #tpu.memory_space<vmem>>, vector<8x1xf32>
    %5 = vector.broadcast %4 : vector<8x1xf32> to vector<8x2048xf32>
    %6 = arith.addf %3, %5 : vector<8x2048xf32>
    %cst_6 = arith.constant 0.000000e+00 : f32
    %7 = vector.broadcast %cst_6 : f32 to vector<8x2048xf32>
    %8 = arith.maximumf %6, %7 : vector<8x2048xf32>
    %9 = arith.truncf %8 : vector<8x2048xf32> to vector<8x2048xbf16>
    %c0_7 = arith.constant 0 : index
    %c0_8 = arith.constant 0 : index
    %10 = vector.load %arg4[%c0_7, %c0_8] : memref<8x2048xbf16, #tpu.memory_space<vmem>>, vector<8x2048xbf16>
    tpu.vector_store %arg4[%c0_7, %c0_8], %9 {strides = array<i32>} : memref<8x2048xbf16, #tpu.memory_space<vmem>>, vector<8x2048xbf16>,
    return
  }
  func.func @transform_0(%arg0: i32) -> (i32, i32) {
    %c0_i32 = arith.constant 0 : i32
    %c0_i32_0 = arith.constant 0 : i32
    %c0_i32_1 = arith.constant 0 : i32
    return %c0_i32, %c0_i32_0 : i32, i32
  }
  func.func @transform_1(%arg0: i32) -> (i32, i32, i32) {
    %c0_i32 = arith.constant 0 : i32
    %c0_i32_0 = arith.constant 0 : i32
    %c0_i32_1 = arith.constant 0 : i32
    return %c0_i32, %c0_i32_0, %arg0 : i32, i32, i32
  }
  func.func @transform_2(%arg0: i32) -> (i32, i32) {
    %c0_i32 = arith.constant 0 : i32
    %c0_i32_0 = arith.constant 0 : i32
    %c0_i32_1 = arith.constant 0 : i32
    return %c0_i32, %c0_i32_0 : i32, i32
  }
  func.func @transform_3(%arg0: i32) -> (i32, i32) {
    %c0_i32 = arith.constant 0 : i32
    %c0_i32_0 = arith.constant 0 : i32
    return %c0_i32, %arg0 : i32, i32
  }
}

module attributes {stable_mosaic.version = 11 : i64} {
  func.func @_conv_relu_pool_kernel(%arg0: i32, %arg1: memref<16x80xbf16, #tpu.memory_space<vmem>>, %arg2: memref<4x80x128xbf16, #tpu.memory_space<vmem>>, %arg3: memref<16x1xf32, #tpu.memory_space<vmem>>, %arg4: memref<16x128xbf16, #tpu.memory_space<vmem>>) attributes {dimension_semantics = [#tpu.dimension_semantics<parallel>], iteration_bounds = array<i64: 1>, scalar_prefetch = 0 : i64, scratch_operands = 0 : i64, tpu.core_type = #tpu.core_type<tc>, window_params = [{pipeline_mode = #tpu.pipeline_mode<synchronous>, transform_indices = @transform_0, window_bounds = array<i64: 16, 80>}, {transform_indices = @transform_1, window_bounds = array<i64: 4, 80, 128>}, {pipeline_mode = #tpu.pipeline_mode<synchronous>, transform_indices = @transform_2, window_bounds = array<i64: 16, 1>}, {transform_indices = @transform_3, window_bounds = array<i64: 16, 128>}]} {
    %c0 = arith.constant 0 : index
    %c0_0 = arith.constant 0 : index
    %0 = vector.load %arg1[%c0, %c0_0] : memref<16x80xbf16, #tpu.memory_space<vmem>>, vector<16x80xbf16>
    %c0_1 = arith.constant 0 : index
    %c0_2 = arith.constant 0 : index
    %c0_3 = arith.constant 0 : index
    %1 = vector.load %arg2[%c0_1, %c0_2, %c0_3] : memref<4x80x128xbf16, #tpu.memory_space<vmem>>, vector<1x80x128xbf16>
    %2 = vector.shape_cast %1 : vector<1x80x128xbf16> to vector<80x128xbf16>
    %cst = arith.constant dense<0.000000e+00> : vector<16x128xf32>
    %3 = tpu.matmul %0, %2, %cst {dimension_numbers = #tpu.dot_dimension_numbers<[1], [0], [0], [1], [0, 0, 1, 1], [], []>} : vector<16x80xbf16>, vector<80x128xbf16>, vector<16x128xf32> -> vector<16x128xf32>
    %c0_4 = arith.constant 0 : index
    %c0_5 = arith.constant 0 : index
    %4 = vector.load %arg3[%c0_4, %c0_5] : memref<16x1xf32, #tpu.memory_space<vmem>>, vector<16x1xf32>
    %5 = vector.broadcast %4 : vector<16x1xf32> to vector<16x128xf32>
    %6 = arith.addf %3, %5 : vector<16x128xf32>
    %cst_6 = arith.constant 0.000000e+00 : f32
    %7 = vector.broadcast %cst_6 : f32 to vector<16x128xf32>
    %8 = arith.maximumf %6, %7 : vector<16x128xf32>
    %c0_7 = arith.constant 0 : index
    %c0_8 = arith.constant 0 : index
    %9 = vector.load %arg1[%c0_7, %c0_8] : memref<16x80xbf16, #tpu.memory_space<vmem>>, vector<16x80xbf16>
    %c1 = arith.constant 1 : index
    %c0_9 = arith.constant 0 : index
    %c0_10 = arith.constant 0 : index
    %10 = vector.load %arg2[%c1, %c0_9, %c0_10] : memref<4x80x128xbf16, #tpu.memory_space<vmem>>, vector<1x80x128xbf16>
    %11 = vector.shape_cast %10 : vector<1x80x128xbf16> to vector<80x128xbf16>
    %cst_11 = arith.constant dense<0.000000e+00> : vector<16x128xf32>
    %12 = tpu.matmul %9, %11, %cst_11 {dimension_numbers = #tpu.dot_dimension_numbers<[1], [0], [0], [1], [0, 0, 1, 1], [], []>} : vector<16x80xbf16>, vector<80x128xbf16>, vector<16x128xf32> -> vector<16x128xf32>
    %c0_12 = arith.constant 0 : index
    %c0_13 = arith.constant 0 : index
    %13 = vector.load %arg3[%c0_12, %c0_13] : memref<16x1xf32, #tpu.memory_space<vmem>>, vector<16x1xf32>
    %14 = vector.broadcast %13 : vector<16x1xf32> to vector<16x128xf32>
    %15 = arith.addf %12, %14 : vector<16x128xf32>
    %cst_14 = arith.constant 0.000000e+00 : f32
    %16 = vector.broadcast %cst_14 : f32 to vector<16x128xf32>
    %17 = arith.maximumf %15, %16 : vector<16x128xf32>
    %18 = arith.maximumf %8, %17 : vector<16x128xf32>
    %c0_15 = arith.constant 0 : index
    %c0_16 = arith.constant 0 : index
    %19 = vector.load %arg1[%c0_15, %c0_16] : memref<16x80xbf16, #tpu.memory_space<vmem>>, vector<16x80xbf16>
    %c2 = arith.constant 2 : index
    %c0_17 = arith.constant 0 : index
    %c0_18 = arith.constant 0 : index
    %20 = vector.load %arg2[%c2, %c0_17, %c0_18] : memref<4x80x128xbf16, #tpu.memory_space<vmem>>, vector<1x80x128xbf16>
    %21 = vector.shape_cast %20 : vector<1x80x128xbf16> to vector<80x128xbf16>
    %cst_19 = arith.constant dense<0.000000e+00> : vector<16x128xf32>
    %22 = tpu.matmul %19, %21, %cst_19 {dimension_numbers = #tpu.dot_dimension_numbers<[1], [0], [0], [1], [0, 0, 1, 1], [], []>} : vector<16x80xbf16>, vector<80x128xbf16>, vector<16x128xf32> -> vector<16x128xf32>
    %c0_20 = arith.constant 0 : index
    %c0_21 = arith.constant 0 : index
    %23 = vector.load %arg3[%c0_20, %c0_21] : memref<16x1xf32, #tpu.memory_space<vmem>>, vector<16x1xf32>
    %24 = vector.broadcast %23 : vector<16x1xf32> to vector<16x128xf32>
    %25 = arith.addf %22, %24 : vector<16x128xf32>
    %cst_22 = arith.constant 0.000000e+00 : f32
    %26 = vector.broadcast %cst_22 : f32 to vector<16x128xf32>
    %27 = arith.maximumf %25, %26 : vector<16x128xf32>
    %28 = arith.maximumf %18, %27 : vector<16x128xf32>
    %c0_23 = arith.constant 0 : index
    %c0_24 = arith.constant 0 : index
    %29 = vector.load %arg1[%c0_23, %c0_24] : memref<16x80xbf16, #tpu.memory_space<vmem>>, vector<16x80xbf16>
    %c3 = arith.constant 3 : index
    %c0_25 = arith.constant 0 : index
    %c0_26 = arith.constant 0 : index
    %30 = vector.load %arg2[%c3, %c0_25, %c0_26] : memref<4x80x128xbf16, #tpu.memory_space<vmem>>, vector<1x80x128xbf16>
    %31 = vector.shape_cast %30 : vector<1x80x128xbf16> to vector<80x128xbf16>
    %cst_27 = arith.constant dense<0.000000e+00> : vector<16x128xf32>
    %32 = tpu.matmul %29, %31, %cst_27 {dimension_numbers = #tpu.dot_dimension_numbers<[1], [0], [0], [1], [0, 0, 1, 1], [], []>} : vector<16x80xbf16>, vector<80x128xbf16>, vector<16x128xf32> -> vector<16x128xf32>
    %c0_28 = arith.constant 0 : index
    %c0_29 = arith.constant 0 : index
    %33 = vector.load %arg3[%c0_28, %c0_29] : memref<16x1xf32, #tpu.memory_space<vmem>>, vector<16x1xf32>
    %34 = vector.broadcast %33 : vector<16x1xf32> to vector<16x128xf32>
    %35 = arith.addf %32, %34 : vector<16x128xf32>
    %cst_30 = arith.constant 0.000000e+00 : f32
    %36 = vector.broadcast %cst_30 : f32 to vector<16x128xf32>
    %37 = arith.maximumf %35, %36 : vector<16x128xf32>
    %38 = arith.maximumf %28, %37 : vector<16x128xf32>
    %39 = arith.truncf %38 : vector<16x128xf32> to vector<16x128xbf16>
    %c0_31 = arith.constant 0 : index
    %c0_32 = arith.constant 0 : index
    %40 = vector.load %arg4[%c0_31, %c0_32] : memref<16x128xbf16, #tpu.memory_space<vmem>>, vector<16x128xbf16>
    tpu.vector_store %arg4[%c0_31, %c0_32], %39 {strides = array<i32>} : memref<16x128xbf16, #tpu.memory_space<vmem>>, vector<16x128xbf16>,
    return
  }
  func.func @transform_0(%arg0: i32) -> (i32, i32) {
    %c0_i32 = arith.constant 0 : i32
    %c0_i32_0 = arith.constant 0 : i32
    %c0_i32_1 = arith.constant 0 : i32
    return %c0_i32, %c0_i32_0 : i32, i32
  }
  func.func @transform_1(%arg0: i32) -> (i32, i32, i32) {
    %c0_i32 = arith.constant 0 : i32
    %c0_i32_0 = arith.constant 0 : i32
    %c0_i32_1 = arith.constant 0 : i32
    return %c0_i32, %c0_i32_0, %arg0 : i32, i32, i32
  }
  func.func @transform_2(%arg0: i32) -> (i32, i32) {
    %c0_i32 = arith.constant 0 : i32
    %c0_i32_0 = arith.constant 0 : i32
    %c0_i32_1 = arith.constant 0 : i32
    return %c0_i32, %c0_i32_0 : i32, i32
  }
  func.func @transform_3(%arg0: i32) -> (i32, i32) {
    %c0_i32 = arith.constant 0 : i32
    %c0_i32_0 = arith.constant 0 : i32
    return %c0_i32, %arg0 : i32, i32
  }
}

module attributes {stable_mosaic.version = 11 : i64} {
  func.func @_tail_kernel(%arg0: i32, %arg1: memref<16x128xbf16, #tpu.memory_space<vmem>>, %arg2: memref<9x128x128xbf16, #tpu.memory_space<vmem>>, %arg3: memref<9x32x16xbf16, #tpu.memory_space<vmem>>, %arg4: memref<32x1xf32, #tpu.memory_space<vmem>>, %arg5: memref<9x32x32xbf16, #tpu.memory_space<vmem>>, %arg6: memref<9x64x32xbf16, #tpu.memory_space<vmem>>, %arg7: memref<64x1xf32, #tpu.memory_space<vmem>>, %arg8: memref<9x8x8xbf16, #tpu.memory_space<vmem>>, %arg9: memref<9x64x64xbf16, #tpu.memory_space<vmem>>, %arg10: memref<64x1xf32, #tpu.memory_space<vmem>>, %arg11: memref<2x2xf32, #tpu.memory_space<vmem>>, %arg12: memref<64x64xf32, #tpu.memory_space<vmem>>, %arg13: memref<64x1xf32, #tpu.memory_space<vmem>>, %arg14: memref<512x64xf32, #tpu.memory_space<vmem>>, %arg15: memref<512x1xf32, #tpu.memory_space<vmem>>, %arg16: memref<5x512xf32, #tpu.memory_space<vmem>>, %arg17: memref<5x1xf32, #tpu.memory_space<vmem>>, %arg18: memref<5x2xf32, #tpu.memory_space<vmem>>) attributes {dimension_semantics = [#tpu.dimension_semantics<arbitrary>], iteration_bounds = array<i64: 1>, scalar_prefetch = 0 : i64, scratch_operands = 0 : i64, tpu.core_type = #tpu.core_type<tc>, window_params = [{pipeline_mode = #tpu.pipeline_mode<synchronous>, transform_indices = @transform_0, window_bounds = array<i64: 16, 128>}, {pipeline_mode = #tpu.pipeline_mode<synchronous>, transform_indices = @transform_1, window_bounds = array<i64: 9, 128, 128>}, {pipeline_mode = #tpu.pipeline_mode<synchronous>, transform_indices = @transform_2, window_bounds = array<i64: 9, 32, 16>}, {pipeline_mode = #tpu.pipeline_mode<synchronous>, transform_indices = @transform_3, window_bounds = array<i64: 32, 1>}, {pipeline_mode = #tpu.pipeline_mode<synchronous>, transform_indices = @transform_4, window_bounds = array<i64: 9, 32, 32>}, {pipeline_mode = #tpu.pipeline_mode<synchronous>, transform_indices = @transform_5, window_bounds = array<i64: 9, 64, 32>}, {pipeline_mode = #tpu.pipeline_mode<synchronous>, transform_indices = @transform_6, window_bounds = array<i64: 64, 1>}, {pipeline_mode = #tpu.pipeline_mode<synchronous>, transform_indices = @transform_7, window_bounds = array<i64: 9, 8, 8>}, {pipeline_mode = #tpu.pipeline_mode<synchronous>, transform_indices = @transform_8, window_bounds = array<i64: 9, 64, 64>}, {pipeline_mode = #tpu.pipeline_mode<synchronous>, transform_indices = @transform_9, window_bounds = array<i64: 64, 1>}, {pipeline_mode = #tpu.pipeline_mode<synchronous>, transform_indices = @transform_10, window_bounds = array<i64: 2, 2>}, {pipeline_mode = #tpu.pipeline_mode<synchronous>, transform_indices = @transform_11, window_bounds = array<i64: 64, 64>}, {pipeline_mode = #tpu.pipeline_mode<synchronous>, transform_indices = @transform_12, window_bounds = array<i64: 64, 1>}, {pipeline_mode = #tpu.pipeline_mode<synchronous>, transform_indices = @transform_13, window_bounds = array<i64: 512, 64>}, {pipeline_mode = #tpu.pipeline_mode<synchronous>, transform_indices = @transform_14, window_bounds = array<i64: 512, 1>}, {pipeline_mode = #tpu.pipeline_mode<synchronous>, transform_indices = @transform_15, window_bounds = array<i64: 5, 512>}, {pipeline_mode = #tpu.pipeline_mode<synchronous>, transform_indices = @transform_16, window_bounds = array<i64: 5, 1>}, {pipeline_mode = #tpu.pipeline_mode<synchronous>, transform_indices = @transform_17, window_bounds = array<i64: 5, 2>}]} {
    %c0 = arith.constant 0 : index
    %c0_0 = arith.constant 0 : index
    %0 = vector.load %arg1[%c0, %c0_0] : memref<16x128xbf16, #tpu.memory_space<vmem>>, vector<16x128xbf16>
    %c0_1 = arith.constant 0 : index
    %c0_2 = arith.constant 0 : index
    %c0_3 = arith.constant 0 : index
    %1 = vector.load %arg2[%c0_1, %c0_2, %c0_3] : memref<9x128x128xbf16, #tpu.memory_space<vmem>>, vector<1x128x128xbf16>
    %2 = vector.shape_cast %1 : vector<1x128x128xbf16> to vector<128x128xbf16>
    %cst = arith.constant dense<0.000000e+00> : vector<16x128xf32>
    %3 = tpu.matmul %0, %2, %cst {dimension_numbers = #tpu.dot_dimension_numbers<[1], [0], [0], [1], [0, 0, 1, 1], [], []>} : vector<16x128xbf16>, vector<128x128xbf16>, vector<16x128xf32> -> vector<16x128xf32>
    %4 = arith.truncf %3 : vector<16x128xf32> to vector<16x128xbf16>
    %c0_4 = arith.constant 0 : index
    %c0_5 = arith.constant 0 : index
    %c0_6 = arith.constant 0 : index
    %5 = vector.load %arg3[%c0_4, %c0_5, %c0_6] : memref<9x32x16xbf16, #tpu.memory_space<vmem>>, vector<1x32x16xbf16>
    %6 = vector.shape_cast %5 : vector<1x32x16xbf16> to vector<32x16xbf16>
    %cst_7 = arith.constant dense<0.000000e+00> : vector<32x128xf32>
    %7 = tpu.matmul %6, %4, %cst_7 {dimension_numbers = #tpu.dot_dimension_numbers<[1], [0], [0], [1], [0, 0, 1, 1], [], []>} : vector<32x16xbf16>, vector<16x128xbf16>, vector<32x128xf32> -> vector<32x128xf32>
    %c1 = arith.constant 1 : index
    %c0_8 = arith.constant 0 : index
    %c0_9 = arith.constant 0 : index
    %8 = vector.load %arg2[%c1, %c0_8, %c0_9] : memref<9x128x128xbf16, #tpu.memory_space<vmem>>, vector<1x128x128xbf16>
    %9 = vector.shape_cast %8 : vector<1x128x128xbf16> to vector<128x128xbf16>
    %cst_10 = arith.constant dense<0.000000e+00> : vector<16x128xf32>
    %10 = tpu.matmul %0, %9, %cst_10 {dimension_numbers = #tpu.dot_dimension_numbers<[1], [0], [0], [1], [0, 0, 1, 1], [], []>} : vector<16x128xbf16>, vector<128x128xbf16>, vector<16x128xf32> -> vector<16x128xf32>
    %11 = arith.truncf %10 : vector<16x128xf32> to vector<16x128xbf16>
    %c1_11 = arith.constant 1 : index
    %c0_12 = arith.constant 0 : index
    %c0_13 = arith.constant 0 : index
    %12 = vector.load %arg3[%c1_11, %c0_12, %c0_13] : memref<9x32x16xbf16, #tpu.memory_space<vmem>>, vector<1x32x16xbf16>
    %13 = vector.shape_cast %12 : vector<1x32x16xbf16> to vector<32x16xbf16>
    %cst_14 = arith.constant dense<0.000000e+00> : vector<32x128xf32>
    %14 = tpu.matmul %13, %11, %cst_14 {dimension_numbers = #tpu.dot_dimension_numbers<[1], [0], [0], [1], [0, 0, 1, 1], [], []>} : vector<32x16xbf16>, vector<16x128xbf16>, vector<32x128xf32> -> vector<32x128xf32>
    %15 = arith.addf %7, %14 : vector<32x128xf32>
    %c2 = arith.constant 2 : index
    %c0_15 = arith.constant 0 : index
    %c0_16 = arith.constant 0 : index
    %16 = vector.load %arg2[%c2, %c0_15, %c0_16] : memref<9x128x128xbf16, #tpu.memory_space<vmem>>, vector<1x128x128xbf16>
    %17 = vector.shape_cast %16 : vector<1x128x128xbf16> to vector<128x128xbf16>
    %cst_17 = arith.constant dense<0.000000e+00> : vector<16x128xf32>
    %18 = tpu.matmul %0, %17, %cst_17 {dimension_numbers = #tpu.dot_dimension_numbers<[1], [0], [0], [1], [0, 0, 1, 1], [], []>} : vector<16x128xbf16>, vector<128x128xbf16>, vector<16x128xf32> -> vector<16x128xf32>
    %19 = arith.truncf %18 : vector<16x128xf32> to vector<16x128xbf16>
    %c2_18 = arith.constant 2 : index
    %c0_19 = arith.constant 0 : index
    %c0_20 = arith.constant 0 : index
    %20 = vector.load %arg3[%c2_18, %c0_19, %c0_20] : memref<9x32x16xbf16, #tpu.memory_space<vmem>>, vector<1x32x16xbf16>
    %21 = vector.shape_cast %20 : vector<1x32x16xbf16> to vector<32x16xbf16>
    %cst_21 = arith.constant dense<0.000000e+00> : vector<32x128xf32>
    %22 = tpu.matmul %21, %19, %cst_21 {dimension_numbers = #tpu.dot_dimension_numbers<[1], [0], [0], [1], [0, 0, 1, 1], [], []>} : vector<32x16xbf16>, vector<16x128xbf16>, vector<32x128xf32> -> vector<32x128xf32>
    %23 = arith.addf %15, %22 : vector<32x128xf32>
    %c3 = arith.constant 3 : index
    %c0_22 = arith.constant 0 : index
    %c0_23 = arith.constant 0 : index
    %24 = vector.load %arg2[%c3, %c0_22, %c0_23] : memref<9x128x128xbf16, #tpu.memory_space<vmem>>, vector<1x128x128xbf16>
    %25 = vector.shape_cast %24 : vector<1x128x128xbf16> to vector<128x128xbf16>
    %cst_24 = arith.constant dense<0.000000e+00> : vector<16x128xf32>
    %26 = tpu.matmul %0, %25, %cst_24 {dimension_numbers = #tpu.dot_dimension_numbers<[1], [0], [0], [1], [0, 0, 1, 1], [], []>} : vector<16x128xbf16>, vector<128x128xbf16>, vector<16x128xf32> -> vector<16x128xf32>
    %27 = arith.truncf %26 : vector<16x128xf32> to vector<16x128xbf16>
    %c3_25 = arith.constant 3 : index
    %c0_26 = arith.constant 0 : index
    %c0_27 = arith.constant 0 : index
    %28 = vector.load %arg3[%c3_25, %c0_26, %c0_27] : memref<9x32x16xbf16, #tpu.memory_space<vmem>>, vector<1x32x16xbf16>
    %29 = vector.shape_cast %28 : vector<1x32x16xbf16> to vector<32x16xbf16>
    %cst_28 = arith.constant dense<0.000000e+00> : vector<32x128xf32>
    %30 = tpu.matmul %29, %27, %cst_28 {dimension_numbers = #tpu.dot_dimension_numbers<[1], [0], [0], [1], [0, 0, 1, 1], [], []>} : vector<32x16xbf16>, vector<16x128xbf16>, vector<32x128xf32> -> vector<32x128xf32>
    %31 = arith.addf %23, %30 : vector<32x128xf32>
    %c4 = arith.constant 4 : index
    %c0_29 = arith.constant 0 : index
    %c0_30 = arith.constant 0 : index
    %32 = vector.load %arg2[%c4, %c0_29, %c0_30] : memref<9x128x128xbf16, #tpu.memory_space<vmem>>, vector<1x128x128xbf16>
    %33 = vector.shape_cast %32 : vector<1x128x128xbf16> to vector<128x128xbf16>
    %cst_31 = arith.constant dense<0.000000e+00> : vector<16x128xf32>
    %34 = tpu.matmul %0, %33, %cst_31 {dimension_numbers = #tpu.dot_dimension_numbers<[1], [0], [0], [1], [0, 0, 1, 1], [], []>} : vector<16x128xbf16>, vector<128x128xbf16>, vector<16x128xf32> -> vector<16x128xf32>
    %35 = arith.truncf %34 : vector<16x128xf32> to vector<16x128xbf16>
    %c4_32 = arith.constant 4 : index
    %c0_33 = arith.constant 0 : index
    %c0_34 = arith.constant 0 : index
    %36 = vector.load %arg3[%c4_32, %c0_33, %c0_34] : memref<9x32x16xbf16, #tpu.memory_space<vmem>>, vector<1x32x16xbf16>
    %37 = vector.shape_cast %36 : vector<1x32x16xbf16> to vector<32x16xbf16>
    %cst_35 = arith.constant dense<0.000000e+00> : vector<32x128xf32>
    %38 = tpu.matmul %37, %35, %cst_35 {dimension_numbers = #tpu.dot_dimension_numbers<[1], [0], [0], [1], [0, 0, 1, 1], [], []>} : vector<32x16xbf16>, vector<16x128xbf16>, vector<32x128xf32> -> vector<32x128xf32>
    %39 = arith.addf %31, %38 : vector<32x128xf32>
    %c5 = arith.constant 5 : index
    %c0_36 = arith.constant 0 : index
    %c0_37 = arith.constant 0 : index
    %40 = vector.load %arg2[%c5, %c0_36, %c0_37] : memref<9x128x128xbf16, #tpu.memory_space<vmem>>, vector<1x128x128xbf16>
    %41 = vector.shape_cast %40 : vector<1x128x128xbf16> to vector<128x128xbf16>
    %cst_38 = arith.constant dense<0.000000e+00> : vector<16x128xf32>
    %42 = tpu.matmul %0, %41, %cst_38 {dimension_numbers = #tpu.dot_dimension_numbers<[1], [0], [0], [1], [0, 0, 1, 1], [], []>} : vector<16x128xbf16>, vector<128x128xbf16>, vector<16x128xf32> -> vector<16x128xf32>
    %43 = arith.truncf %42 : vector<16x128xf32> to vector<16x128xbf16>
    %c5_39 = arith.constant 5 : index
    %c0_40 = arith.constant 0 : index
    %c0_41 = arith.constant 0 : index
    %44 = vector.load %arg3[%c5_39, %c0_40, %c0_41] : memref<9x32x16xbf16, #tpu.memory_space<vmem>>, vector<1x32x16xbf16>
    %45 = vector.shape_cast %44 : vector<1x32x16xbf16> to vector<32x16xbf16>
    %cst_42 = arith.constant dense<0.000000e+00> : vector<32x128xf32>
    %46 = tpu.matmul %45, %43, %cst_42 {dimension_numbers = #tpu.dot_dimension_numbers<[1], [0], [0], [1], [0, 0, 1, 1], [], []>} : vector<32x16xbf16>, vector<16x128xbf16>, vector<32x128xf32> -> vector<32x128xf32>
    %47 = arith.addf %39, %46 : vector<32x128xf32>
    %c6 = arith.constant 6 : index
    %c0_43 = arith.constant 0 : index
    %c0_44 = arith.constant 0 : index
    %48 = vector.load %arg2[%c6, %c0_43, %c0_44] : memref<9x128x128xbf16, #tpu.memory_space<vmem>>, vector<1x128x128xbf16>
    %49 = vector.shape_cast %48 : vector<1x128x128xbf16> to vector<128x128xbf16>
    %cst_45 = arith.constant dense<0.000000e+00> : vector<16x128xf32>
    %50 = tpu.matmul %0, %49, %cst_45 {dimension_numbers = #tpu.dot_dimension_numbers<[1], [0], [0], [1], [0, 0, 1, 1], [], []>} : vector<16x128xbf16>, vector<128x128xbf16>, vector<16x128xf32> -> vector<16x128xf32>
    %51 = arith.truncf %50 : vector<16x128xf32> to vector<16x128xbf16>
    %c6_46 = arith.constant 6 : index
    %c0_47 = arith.constant 0 : index
    %c0_48 = arith.constant 0 : index
    %52 = vector.load %arg3[%c6_46, %c0_47, %c0_48] : memref<9x32x16xbf16, #tpu.memory_space<vmem>>, vector<1x32x16xbf16>
    %53 = vector.shape_cast %52 : vector<1x32x16xbf16> to vector<32x16xbf16>
    %cst_49 = arith.constant dense<0.000000e+00> : vector<32x128xf32>
    %54 = tpu.matmul %53, %51, %cst_49 {dimension_numbers = #tpu.dot_dimension_numbers<[1], [0], [0], [1], [0, 0, 1, 1], [], []>} : vector<32x16xbf16>, vector<16x128xbf16>, vector<32x128xf32> -> vector<32x128xf32>
    %55 = arith.addf %47, %54 : vector<32x128xf32>
    %c7 = arith.constant 7 : index
    %c0_50 = arith.constant 0 : index
    %c0_51 = arith.constant 0 : index
    %56 = vector.load %arg2[%c7, %c0_50, %c0_51] : memref<9x128x128xbf16, #tpu.memory_space<vmem>>, vector<1x128x128xbf16>
    %57 = vector.shape_cast %56 : vector<1x128x128xbf16> to vector<128x128xbf16>
    %cst_52 = arith.constant dense<0.000000e+00> : vector<16x128xf32>
    %58 = tpu.matmul %0, %57, %cst_52 {dimension_numbers = #tpu.dot_dimension_numbers<[1], [0], [0], [1], [0, 0, 1, 1], [], []>} : vector<16x128xbf16>, vector<128x128xbf16>, vector<16x128xf32> -> vector<16x128xf32>
    %59 = arith.truncf %58 : vector<16x128xf32> to vector<16x128xbf16>
    %c7_53 = arith.constant 7 : index
    %c0_54 = arith.constant 0 : index
    %c0_55 = arith.constant 0 : index
    %60 = vector.load %arg3[%c7_53, %c0_54, %c0_55] : memref<9x32x16xbf16, #tpu.memory_space<vmem>>, vector<1x32x16xbf16>
    %61 = vector.shape_cast %60 : vector<1x32x16xbf16> to vector<32x16xbf16>
    %cst_56 = arith.constant dense<0.000000e+00> : vector<32x128xf32>
    %62 = tpu.matmul %61, %59, %cst_56 {dimension_numbers = #tpu.dot_dimension_numbers<[1], [0], [0], [1], [0, 0, 1, 1], [], []>} : vector<32x16xbf16>, vector<16x128xbf16>, vector<32x128xf32> -> vector<32x128xf32>
    %63 = arith.addf %55, %62 : vector<32x128xf32>
    %c8 = arith.constant 8 : index
    %c0_57 = arith.constant 0 : index
    %c0_58 = arith.constant 0 : index
    %64 = vector.load %arg2[%c8, %c0_57, %c0_58] : memref<9x128x128xbf16, #tpu.memory_space<vmem>>, vector<1x128x128xbf16>
    %65 = vector.shape_cast %64 : vector<1x128x128xbf16> to vector<128x128xbf16>
    %cst_59 = arith.constant dense<0.000000e+00> : vector<16x128xf32>
    %66 = tpu.matmul %0, %65, %cst_59 {dimension_numbers = #tpu.dot_dimension_numbers<[1], [0], [0], [1], [0, 0, 1, 1], [], []>} : vector<16x128xbf16>, vector<128x128xbf16>, vector<16x128xf32> -> vector<16x128xf32>
    %67 = arith.truncf %66 : vector<16x128xf32> to vector<16x128xbf16>
    %c8_60 = arith.constant 8 : index
    %c0_61 = arith.constant 0 : index
    %c0_62 = arith.constant 0 : index
    %68 = vector.load %arg3[%c8_60, %c0_61, %c0_62] : memref<9x32x16xbf16, #tpu.memory_space<vmem>>, vector<1x32x16xbf16>
    %69 = vector.shape_cast %68 : vector<1x32x16xbf16> to vector<32x16xbf16>
    %cst_63 = arith.constant dense<0.000000e+00> : vector<32x128xf32>
    %70 = tpu.matmul %69, %67, %cst_63 {dimension_numbers = #tpu.dot_dimension_numbers<[1], [0], [0], [1], [0, 0, 1, 1], [], []>} : vector<32x16xbf16>, vector<16x128xbf16>, vector<32x128xf32> -> vector<32x128xf32>
    %71 = arith.addf %63, %70 : vector<32x128xf32>
    %c0_64 = arith.constant 0 : index
    %c0_65 = arith.constant 0 : index
    %72 = vector.load %arg4[%c0_64, %c0_65] : memref<32x1xf32, #tpu.memory_space<vmem>>, vector<32x1xf32>
    %73 = vector.broadcast %72 : vector<32x1xf32> to vector<32x128xf32>
    %74 = arith.addf %71, %73 : vector<32x128xf32>
    %cst_66 = arith.constant 0.000000e+00 : f32
    %75 = vector.broadcast %cst_66 : f32 to vector<32x128xf32>
    %76 = arith.maximumf %74, %75 : vector<32x128xf32>
    %77 = vector.extract_strided_slice %76 {offsets = [0, 0], sizes = [32, 32], strides = [1, 1]} : vector<32x128xf32> to vector<32x32xf32>
    %78 = vector.extract_strided_slice %76 {offsets = [0, 32], sizes = [32, 32], strides = [1, 1]} : vector<32x128xf32> to vector<32x32xf32>
    %79 = arith.maximumf %77, %78 : vector<32x32xf32>
    %80 = vector.extract_strided_slice %76 {offsets = [0, 64], sizes = [32, 32], strides = [1, 1]} : vector<32x128xf32> to vector<32x32xf32>
    %81 = arith.maximumf %79, %80 : vector<32x32xf32>
    %82 = vector.extract_strided_slice %76 {offsets = [0, 96], sizes = [32, 32], strides = [1, 1]} : vector<32x128xf32> to vector<32x32xf32>
    %83 = arith.maximumf %81, %82 : vector<32x32xf32>
    %84 = arith.truncf %83 : vector<32x32xf32> to vector<32x32xbf16>
    %c0_67 = arith.constant 0 : index
    %c0_68 = arith.constant 0 : index
    %c0_69 = arith.constant 0 : index
    %85 = vector.load %arg5[%c0_67, %c0_68, %c0_69] : memref<9x32x32xbf16, #tpu.memory_space<vmem>>, vector<1x32x32xbf16>
    %86 = vector.shape_cast %85 : vector<1x32x32xbf16> to vector<32x32xbf16>
    %cst_70 = arith.constant dense<0.000000e+00> : vector<32x32xf32>
    %87 = tpu.matmul %84, %86, %cst_70 {dimension_numbers = #tpu.dot_dimension_numbers<[1], [0], [0], [1], [0, 0, 1, 1], [], []>} : vector<32x32xbf16>, vector<32x32xbf16>, vector<32x32xf32> -> vector<32x32xf32>
    %88 = arith.truncf %87 : vector<32x32xf32> to vector<32x32xbf16>
    %c0_71 = arith.constant 0 : index
    %c0_72 = arith.constant 0 : index
    %c0_73 = arith.constant 0 : index
    %89 = vector.load %arg6[%c0_71, %c0_72, %c0_73] : memref<9x64x32xbf16, #tpu.memory_space<vmem>>, vector<1x64x32xbf16>
    %90 = vector.shape_cast %89 : vector<1x64x32xbf16> to vector<64x32xbf16>
    %cst_74 = arith.constant dense<0.000000e+00> : vector<64x32xf32>
    %91 = tpu.matmul %90, %88, %cst_74 {dimension_numbers = #tpu.dot_dimension_numbers<[1], [0], [0], [1], [0, 0, 1, 1], [], []>} : vector<64x32xbf16>, vector<32x32xbf16>, vector<64x32xf32> -> vector<64x32xf32>
    %c1_75 = arith.constant 1 : index
    %c0_76 = arith.constant 0 : index
    %c0_77 = arith.constant 0 : index
    %92 = vector.load %arg5[%c1_75, %c0_76, %c0_77] : memref<9x32x32xbf16, #tpu.memory_space<vmem>>, vector<1x32x32xbf16>
    %93 = vector.shape_cast %92 : vector<1x32x32xbf16> to vector<32x32xbf16>
    %cst_78 = arith.constant dense<0.000000e+00> : vector<32x32xf32>
    %94 = tpu.matmul %84, %93, %cst_78 {dimension_numbers = #tpu.dot_dimension_numbers<[1], [0], [0], [1], [0, 0, 1, 1], [], []>} : vector<32x32xbf16>, vector<32x32xbf16>, vector<32x32xf32> -> vector<32x32xf32>
    %95 = arith.truncf %94 : vector<32x32xf32> to vector<32x32xbf16>
    %c1_79 = arith.constant 1 : index
    %c0_80 = arith.constant 0 : index
    %c0_81 = arith.constant 0 : index
    %96 = vector.load %arg6[%c1_79, %c0_80, %c0_81] : memref<9x64x32xbf16, #tpu.memory_space<vmem>>, vector<1x64x32xbf16>
    %97 = vector.shape_cast %96 : vector<1x64x32xbf16> to vector<64x32xbf16>
    %cst_82 = arith.constant dense<0.000000e+00> : vector<64x32xf32>
    %98 = tpu.matmul %97, %95, %cst_82 {dimension_numbers = #tpu.dot_dimension_numbers<[1], [0], [0], [1], [0, 0, 1, 1], [], []>} : vector<64x32xbf16>, vector<32x32xbf16>, vector<64x32xf32> -> vector<64x32xf32>
    %99 = arith.addf %91, %98 : vector<64x32xf32>
    %c2_83 = arith.constant 2 : index
    %c0_84 = arith.constant 0 : index
    %c0_85 = arith.constant 0 : index
    %100 = vector.load %arg5[%c2_83, %c0_84, %c0_85] : memref<9x32x32xbf16, #tpu.memory_space<vmem>>, vector<1x32x32xbf16>
    %101 = vector.shape_cast %100 : vector<1x32x32xbf16> to vector<32x32xbf16>
    %cst_86 = arith.constant dense<0.000000e+00> : vector<32x32xf32>
    %102 = tpu.matmul %84, %101, %cst_86 {dimension_numbers = #tpu.dot_dimension_numbers<[1], [0], [0], [1], [0, 0, 1, 1], [], []>} : vector<32x32xbf16>, vector<32x32xbf16>, vector<32x32xf32> -> vector<32x32xf32>
    %103 = arith.truncf %102 : vector<32x32xf32> to vector<32x32xbf16>
    %c2_87 = arith.constant 2 : index
    %c0_88 = arith.constant 0 : index
    %c0_89 = arith.constant 0 : index
    %104 = vector.load %arg6[%c2_87, %c0_88, %c0_89] : memref<9x64x32xbf16, #tpu.memory_space<vmem>>, vector<1x64x32xbf16>
    %105 = vector.shape_cast %104 : vector<1x64x32xbf16> to vector<64x32xbf16>
    %cst_90 = arith.constant dense<0.000000e+00> : vector<64x32xf32>
    %106 = tpu.matmul %105, %103, %cst_90 {dimension_numbers = #tpu.dot_dimension_numbers<[1], [0], [0], [1], [0, 0, 1, 1], [], []>} : vector<64x32xbf16>, vector<32x32xbf16>, vector<64x32xf32> -> vector<64x32xf32>
    %107 = arith.addf %99, %106 : vector<64x32xf32>
    %c3_91 = arith.constant 3 : index
    %c0_92 = arith.constant 0 : index
    %c0_93 = arith.constant 0 : index
    %108 = vector.load %arg5[%c3_91, %c0_92, %c0_93] : memref<9x32x32xbf16, #tpu.memory_space<vmem>>, vector<1x32x32xbf16>
    %109 = vector.shape_cast %108 : vector<1x32x32xbf16> to vector<32x32xbf16>
    %cst_94 = arith.constant dense<0.000000e+00> : vector<32x32xf32>
    %110 = tpu.matmul %84, %109, %cst_94 {dimension_numbers = #tpu.dot_dimension_numbers<[1], [0], [0], [1], [0, 0, 1, 1], [], []>} : vector<32x32xbf16>, vector<32x32xbf16>, vector<32x32xf32> -> vector<32x32xf32>
    %111 = arith.truncf %110 : vector<32x32xf32> to vector<32x32xbf16>
    %c3_95 = arith.constant 3 : index
    %c0_96 = arith.constant 0 : index
    %c0_97 = arith.constant 0 : index
    %112 = vector.load %arg6[%c3_95, %c0_96, %c0_97] : memref<9x64x32xbf16, #tpu.memory_space<vmem>>, vector<1x64x32xbf16>
    %113 = vector.shape_cast %112 : vector<1x64x32xbf16> to vector<64x32xbf16>
    %cst_98 = arith.constant dense<0.000000e+00> : vector<64x32xf32>
    %114 = tpu.matmul %113, %111, %cst_98 {dimension_numbers = #tpu.dot_dimension_numbers<[1], [0], [0], [1], [0, 0, 1, 1], [], []>} : vector<64x32xbf16>, vector<32x32xbf16>, vector<64x32xf32> -> vector<64x32xf32>
    %115 = arith.addf %107, %114 : vector<64x32xf32>
    %c4_99 = arith.constant 4 : index
    %c0_100 = arith.constant 0 : index
    %c0_101 = arith.constant 0 : index
    %116 = vector.load %arg5[%c4_99, %c0_100, %c0_101] : memref<9x32x32xbf16, #tpu.memory_space<vmem>>, vector<1x32x32xbf16>
    %117 = vector.shape_cast %116 : vector<1x32x32xbf16> to vector<32x32xbf16>
    %cst_102 = arith.constant dense<0.000000e+00> : vector<32x32xf32>
    %118 = tpu.matmul %84, %117, %cst_102 {dimension_numbers = #tpu.dot_dimension_numbers<[1], [0], [0], [1], [0, 0, 1, 1], [], []>} : vector<32x32xbf16>, vector<32x32xbf16>, vector<32x32xf32> -> vector<32x32xf32>
    %119 = arith.truncf %118 : vector<32x32xf32> to vector<32x32xbf16>
    %c4_103 = arith.constant 4 : index
    %c0_104 = arith.constant 0 : index
    %c0_105 = arith.constant 0 : index
    %120 = vector.load %arg6[%c4_103, %c0_104, %c0_105] : memref<9x64x32xbf16, #tpu.memory_space<vmem>>, vector<1x64x32xbf16>
    %121 = vector.shape_cast %120 : vector<1x64x32xbf16> to vector<64x32xbf16>
    %cst_106 = arith.constant dense<0.000000e+00> : vector<64x32xf32>
    %122 = tpu.matmul %121, %119, %cst_106 {dimension_numbers = #tpu.dot_dimension_numbers<[1], [0], [0], [1], [0, 0, 1, 1], [], []>} : vector<64x32xbf16>, vector<32x32xbf16>, vector<64x32xf32> -> vector<64x32xf32>
    %123 = arith.addf %115, %122 : vector<64x32xf32>
    %c5_107 = arith.constant 5 : index
    %c0_108 = arith.constant 0 : index
    %c0_109 = arith.constant 0 : index
    %124 = vector.load %arg5[%c5_107, %c0_108, %c0_109] : memref<9x32x32xbf16, #tpu.memory_space<vmem>>, vector<1x32x32xbf16>
    %125 = vector.shape_cast %124 : vector<1x32x32xbf16> to vector<32x32xbf16>
    %cst_110 = arith.constant dense<0.000000e+00> : vector<32x32xf32>
    %126 = tpu.matmul %84, %125, %cst_110 {dimension_numbers = #tpu.dot_dimension_numbers<[1], [0], [0], [1], [0, 0, 1, 1], [], []>} : vector<32x32xbf16>, vector<32x32xbf16>, vector<32x32xf32> -> vector<32x32xf32>
    %127 = arith.truncf %126 : vector<32x32xf32> to vector<32x32xbf16>
    %c5_111 = arith.constant 5 : index
    %c0_112 = arith.constant 0 : index
    %c0_113 = arith.constant 0 : index
    %128 = vector.load %arg6[%c5_111, %c0_112, %c0_113] : memref<9x64x32xbf16, #tpu.memory_space<vmem>>, vector<1x64x32xbf16>
    %129 = vector.shape_cast %128 : vector<1x64x32xbf16> to vector<64x32xbf16>
    %cst_114 = arith.constant dense<0.000000e+00> : vector<64x32xf32>
    %130 = tpu.matmul %129, %127, %cst_114 {dimension_numbers = #tpu.dot_dimension_numbers<[1], [0], [0], [1], [0, 0, 1, 1], [], []>} : vector<64x32xbf16>, vector<32x32xbf16>, vector<64x32xf32> -> vector<64x32xf32>
    %131 = arith.addf %123, %130 : vector<64x32xf32>
    %c6_115 = arith.constant 6 : index
    %c0_116 = arith.constant 0 : index
    %c0_117 = arith.constant 0 : index
    %132 = vector.load %arg5[%c6_115, %c0_116, %c0_117] : memref<9x32x32xbf16, #tpu.memory_space<vmem>>, vector<1x32x32xbf16>
    %133 = vector.shape_cast %132 : vector<1x32x32xbf16> to vector<32x32xbf16>
    %cst_118 = arith.constant dense<0.000000e+00> : vector<32x32xf32>
    %134 = tpu.matmul %84, %133, %cst_118 {dimension_numbers = #tpu.dot_dimension_numbers<[1], [0], [0], [1], [0, 0, 1, 1], [], []>} : vector<32x32xbf16>, vector<32x32xbf16>, vector<32x32xf32> -> vector<32x32xf32>
    %135 = arith.truncf %134 : vector<32x32xf32> to vector<32x32xbf16>
    %c6_119 = arith.constant 6 : index
    %c0_120 = arith.constant 0 : index
    %c0_121 = arith.constant 0 : index
    %136 = vector.load %arg6[%c6_119, %c0_120, %c0_121] : memref<9x64x32xbf16, #tpu.memory_space<vmem>>, vector<1x64x32xbf16>
    %137 = vector.shape_cast %136 : vector<1x64x32xbf16> to vector<64x32xbf16>
    %cst_122 = arith.constant dense<0.000000e+00> : vector<64x32xf32>
    %138 = tpu.matmul %137, %135, %cst_122 {dimension_numbers = #tpu.dot_dimension_numbers<[1], [0], [0], [1], [0, 0, 1, 1], [], []>} : vector<64x32xbf16>, vector<32x32xbf16>, vector<64x32xf32> -> vector<64x32xf32>
    %139 = arith.addf %131, %138 : vector<64x32xf32>
    %c7_123 = arith.constant 7 : index
    %c0_124 = arith.constant 0 : index
    %c0_125 = arith.constant 0 : index
    %140 = vector.load %arg5[%c7_123, %c0_124, %c0_125] : memref<9x32x32xbf16, #tpu.memory_space<vmem>>, vector<1x32x32xbf16>
    %141 = vector.shape_cast %140 : vector<1x32x32xbf16> to vector<32x32xbf16>
    %cst_126 = arith.constant dense<0.000000e+00> : vector<32x32xf32>
    %142 = tpu.matmul %84, %141, %cst_126 {dimension_numbers = #tpu.dot_dimension_numbers<[1], [0], [0], [1], [0, 0, 1, 1], [], []>} : vector<32x32xbf16>, vector<32x32xbf16>, vector<32x32xf32> -> vector<32x32xf32>
    %143 = arith.truncf %142 : vector<32x32xf32> to vector<32x32xbf16>
    %c7_127 = arith.constant 7 : index
    %c0_128 = arith.constant 0 : index
    %c0_129 = arith.constant 0 : index
    %144 = vector.load %arg6[%c7_127, %c0_128, %c0_129] : memref<9x64x32xbf16, #tpu.memory_space<vmem>>, vector<1x64x32xbf16>
    %145 = vector.shape_cast %144 : vector<1x64x32xbf16> to vector<64x32xbf16>
    %cst_130 = arith.constant dense<0.000000e+00> : vector<64x32xf32>
    %146 = tpu.matmul %145, %143, %cst_130 {dimension_numbers = #tpu.dot_dimension_numbers<[1], [0], [0], [1], [0, 0, 1, 1], [], []>} : vector<64x32xbf16>, vector<32x32xbf16>, vector<64x32xf32> -> vector<64x32xf32>
    %147 = arith.addf %139, %146 : vector<64x32xf32>
    %c8_131 = arith.constant 8 : index
    %c0_132 = arith.constant 0 : index
    %c0_133 = arith.constant 0 : index
    %148 = vector.load %arg5[%c8_131, %c0_132, %c0_133] : memref<9x32x32xbf16, #tpu.memory_space<vmem>>, vector<1x32x32xbf16>
    %149 = vector.shape_cast %148 : vector<1x32x32xbf16> to vector<32x32xbf16>
    %cst_134 = arith.constant dense<0.000000e+00> : vector<32x32xf32>
    %150 = tpu.matmul %84, %149, %cst_134 {dimension_numbers = #tpu.dot_dimension_numbers<[1], [0], [0], [1], [0, 0, 1, 1], [], []>} : vector<32x32xbf16>, vector<32x32xbf16>, vector<32x32xf32> -> vector<32x32xf32>
    %151 = arith.truncf %150 : vector<32x32xf32> to vector<32x32xbf16>
    %c8_135 = arith.constant 8 : index
    %c0_136 = arith.constant 0 : index
    %c0_137 = arith.constant 0 : index
    %152 = vector.load %arg6[%c8_135, %c0_136, %c0_137] : memref<9x64x32xbf16, #tpu.memory_space<vmem>>, vector<1x64x32xbf16>
    %153 = vector.shape_cast %152 : vector<1x64x32xbf16> to vector<64x32xbf16>
    %cst_138 = arith.constant dense<0.000000e+00> : vector<64x32xf32>
    %154 = tpu.matmul %153, %151, %cst_138 {dimension_numbers = #tpu.dot_dimension_numbers<[1], [0], [0], [1], [0, 0, 1, 1], [], []>} : vector<64x32xbf16>, vector<32x32xbf16>, vector<64x32xf32> -> vector<64x32xf32>
    %155 = arith.addf %147, %154 : vector<64x32xf32>
    %c0_139 = arith.constant 0 : index
    %c0_140 = arith.constant 0 : index
    %156 = vector.load %arg7[%c0_139, %c0_140] : memref<64x1xf32, #tpu.memory_space<vmem>>, vector<64x1xf32>
    %157 = vector.broadcast %156 : vector<64x1xf32> to vector<64x32xf32>
    %158 = arith.addf %155, %157 : vector<64x32xf32>
    %cst_141 = arith.constant 0.000000e+00 : f32
    %159 = vector.broadcast %cst_141 : f32 to vector<64x32xf32>
    %160 = arith.maximumf %158, %159 : vector<64x32xf32>
    %161 = vector.extract_strided_slice %160 {offsets = [0, 0], sizes = [64, 8], strides = [1, 1]} : vector<64x32xf32> to vector<64x8xf32>
    %162 = vector.extract_strided_slice %160 {offsets = [0, 8], sizes = [64, 8], strides = [1, 1]} : vector<64x32xf32> to vector<64x8xf32>
    %163 = arith.maximumf %161, %162 : vector<64x8xf32>
    %164 = vector.extract_strided_slice %160 {offsets = [0, 16], sizes = [64, 8], strides = [1, 1]} : vector<64x32xf32> to vector<64x8xf32>
    %165 = arith.maximumf %163, %164 : vector<64x8xf32>
    %166 = vector.extract_strided_slice %160 {offsets = [0, 24], sizes = [64, 8], strides = [1, 1]} : vector<64x32xf32> to vector<64x8xf32>
    %167 = arith.maximumf %165, %166 : vector<64x8xf32>
    %168 = arith.truncf %167 : vector<64x8xf32> to vector<64x8xbf16>
    %c0_142 = arith.constant 0 : index
    %c0_143 = arith.constant 0 : index
    %c0_144 = arith.constant 0 : index
    %169 = vector.load %arg8[%c0_142, %c0_143, %c0_144] : memref<9x8x8xbf16, #tpu.memory_space<vmem>>, vector<1x8x8xbf16>
    %170 = vector.shape_cast %169 : vector<1x8x8xbf16> to vector<8x8xbf16>
    %cst_145 = arith.constant dense<0.000000e+00> : vector<64x8xf32>
    %171 = tpu.matmul %168, %170, %cst_145 {dimension_numbers = #tpu.dot_dimension_numbers<[1], [0], [0], [1], [0, 0, 1, 1], [], []>} : vector<64x8xbf16>, vector<8x8xbf16>, vector<64x8xf32> -> vector<64x8xf32>
    %172 = arith.truncf %171 : vector<64x8xf32> to vector<64x8xbf16>
    %c0_146 = arith.constant 0 : index
    %c0_147 = arith.constant 0 : index
    %c0_148 = arith.constant 0 : index
    %173 = vector.load %arg9[%c0_146, %c0_147, %c0_148] : memref<9x64x64xbf16, #tpu.memory_space<vmem>>, vector<1x64x64xbf16>
    %174 = vector.shape_cast %173 : vector<1x64x64xbf16> to vector<64x64xbf16>
    %cst_149 = arith.constant dense<0.000000e+00> : vector<64x8xf32>
    %175 = tpu.matmul %174, %172, %cst_149 {dimension_numbers = #tpu.dot_dimension_numbers<[1], [0], [0], [1], [0, 0, 1, 1], [], []>} : vector<64x64xbf16>, vector<64x8xbf16>, vector<64x8xf32> -> vector<64x8xf32>
    %c1_150 = arith.constant 1 : index
    %c0_151 = arith.constant 0 : index
    %c0_152 = arith.constant 0 : index
    %176 = vector.load %arg8[%c1_150, %c0_151, %c0_152] : memref<9x8x8xbf16, #tpu.memory_space<vmem>>, vector<1x8x8xbf16>
    %177 = vector.shape_cast %176 : vector<1x8x8xbf16> to vector<8x8xbf16>
    %cst_153 = arith.constant dense<0.000000e+00> : vector<64x8xf32>
    %178 = tpu.matmul %168, %177, %cst_153 {dimension_numbers = #tpu.dot_dimension_numbers<[1], [0], [0], [1], [0, 0, 1, 1], [], []>} : vector<64x8xbf16>, vector<8x8xbf16>, vector<64x8xf32> -> vector<64x8xf32>
    %179 = arith.truncf %178 : vector<64x8xf32> to vector<64x8xbf16>
    %c1_154 = arith.constant 1 : index
    %c0_155 = arith.constant 0 : index
    %c0_156 = arith.constant 0 : index
    %180 = vector.load %arg9[%c1_154, %c0_155, %c0_156] : memref<9x64x64xbf16, #tpu.memory_space<vmem>>, vector<1x64x64xbf16>
    %181 = vector.shape_cast %180 : vector<1x64x64xbf16> to vector<64x64xbf16>
    %cst_157 = arith.constant dense<0.000000e+00> : vector<64x8xf32>
    %182 = tpu.matmul %181, %179, %cst_157 {dimension_numbers = #tpu.dot_dimension_numbers<[1], [0], [0], [1], [0, 0, 1, 1], [], []>} : vector<64x64xbf16>, vector<64x8xbf16>, vector<64x8xf32> -> vector<64x8xf32>
    %183 = arith.addf %175, %182 : vector<64x8xf32>
    %c2_158 = arith.constant 2 : index
    %c0_159 = arith.constant 0 : index
    %c0_160 = arith.constant 0 : index
    %184 = vector.load %arg8[%c2_158, %c0_159, %c0_160] : memref<9x8x8xbf16, #tpu.memory_space<vmem>>, vector<1x8x8xbf16>
    %185 = vector.shape_cast %184 : vector<1x8x8xbf16> to vector<8x8xbf16>
    %cst_161 = arith.constant dense<0.000000e+00> : vector<64x8xf32>
    %186 = tpu.matmul %168, %185, %cst_161 {dimension_numbers = #tpu.dot_dimension_numbers<[1], [0], [0], [1], [0, 0, 1, 1], [], []>} : vector<64x8xbf16>, vector<8x8xbf16>, vector<64x8xf32> -> vector<64x8xf32>
    %187 = arith.truncf %186 : vector<64x8xf32> to vector<64x8xbf16>
    %c2_162 = arith.constant 2 : index
    %c0_163 = arith.constant 0 : index
    %c0_164 = arith.constant 0 : index
    %188 = vector.load %arg9[%c2_162, %c0_163, %c0_164] : memref<9x64x64xbf16, #tpu.memory_space<vmem>>, vector<1x64x64xbf16>
    %189 = vector.shape_cast %188 : vector<1x64x64xbf16> to vector<64x64xbf16>
    %cst_165 = arith.constant dense<0.000000e+00> : vector<64x8xf32>
    %190 = tpu.matmul %189, %187, %cst_165 {dimension_numbers = #tpu.dot_dimension_numbers<[1], [0], [0], [1], [0, 0, 1, 1], [], []>} : vector<64x64xbf16>, vector<64x8xbf16>, vector<64x8xf32> -> vector<64x8xf32>
    %191 = arith.addf %183, %190 : vector<64x8xf32>
    %c3_166 = arith.constant 3 : index
    %c0_167 = arith.constant 0 : index
    %c0_168 = arith.constant 0 : index
    %192 = vector.load %arg8[%c3_166, %c0_167, %c0_168] : memref<9x8x8xbf16, #tpu.memory_space<vmem>>, vector<1x8x8xbf16>
    %193 = vector.shape_cast %192 : vector<1x8x8xbf16> to vector<8x8xbf16>
    %cst_169 = arith.constant dense<0.000000e+00> : vector<64x8xf32>
    %194 = tpu.matmul %168, %193, %cst_169 {dimension_numbers = #tpu.dot_dimension_numbers<[1], [0], [0], [1], [0, 0, 1, 1], [], []>} : vector<64x8xbf16>, vector<8x8xbf16>, vector<64x8xf32> -> vector<64x8xf32>
    %195 = arith.truncf %194 : vector<64x8xf32> to vector<64x8xbf16>
    %c3_170 = arith.constant 3 : index
    %c0_171 = arith.constant 0 : index
    %c0_172 = arith.constant 0 : index
    %196 = vector.load %arg9[%c3_170, %c0_171, %c0_172] : memref<9x64x64xbf16, #tpu.memory_space<vmem>>, vector<1x64x64xbf16>
    %197 = vector.shape_cast %196 : vector<1x64x64xbf16> to vector<64x64xbf16>
    %cst_173 = arith.constant dense<0.000000e+00> : vector<64x8xf32>
    %198 = tpu.matmul %197, %195, %cst_173 {dimension_numbers = #tpu.dot_dimension_numbers<[1], [0], [0], [1], [0, 0, 1, 1], [], []>} : vector<64x64xbf16>, vector<64x8xbf16>, vector<64x8xf32> -> vector<64x8xf32>
    %199 = arith.addf %191, %198 : vector<64x8xf32>
    %c4_174 = arith.constant 4 : index
    %c0_175 = arith.constant 0 : index
    %c0_176 = arith.constant 0 : index
    %200 = vector.load %arg8[%c4_174, %c0_175, %c0_176] : memref<9x8x8xbf16, #tpu.memory_space<vmem>>, vector<1x8x8xbf16>
    %201 = vector.shape_cast %200 : vector<1x8x8xbf16> to vector<8x8xbf16>
    %cst_177 = arith.constant dense<0.000000e+00> : vector<64x8xf32>
    %202 = tpu.matmul %168, %201, %cst_177 {dimension_numbers = #tpu.dot_dimension_numbers<[1], [0], [0], [1], [0, 0, 1, 1], [], []>} : vector<64x8xbf16>, vector<8x8xbf16>, vector<64x8xf32> -> vector<64x8xf32>
    %203 = arith.truncf %202 : vector<64x8xf32> to vector<64x8xbf16>
    %c4_178 = arith.constant 4 : index
    %c0_179 = arith.constant 0 : index
    %c0_180 = arith.constant 0 : index
    %204 = vector.load %arg9[%c4_178, %c0_179, %c0_180] : memref<9x64x64xbf16, #tpu.memory_space<vmem>>, vector<1x64x64xbf16>
    %205 = vector.shape_cast %204 : vector<1x64x64xbf16> to vector<64x64xbf16>
    %cst_181 = arith.constant dense<0.000000e+00> : vector<64x8xf32>
    %206 = tpu.matmul %205, %203, %cst_181 {dimension_numbers = #tpu.dot_dimension_numbers<[1], [0], [0], [1], [0, 0, 1, 1], [], []>} : vector<64x64xbf16>, vector<64x8xbf16>, vector<64x8xf32> -> vector<64x8xf32>
    %207 = arith.addf %199, %206 : vector<64x8xf32>
    %c5_182 = arith.constant 5 : index
    %c0_183 = arith.constant 0 : index
    %c0_184 = arith.constant 0 : index
    %208 = vector.load %arg8[%c5_182, %c0_183, %c0_184] : memref<9x8x8xbf16, #tpu.memory_space<vmem>>, vector<1x8x8xbf16>
    %209 = vector.shape_cast %208 : vector<1x8x8xbf16> to vector<8x8xbf16>
    %cst_185 = arith.constant dense<0.000000e+00> : vector<64x8xf32>
    %210 = tpu.matmul %168, %209, %cst_185 {dimension_numbers = #tpu.dot_dimension_numbers<[1], [0], [0], [1], [0, 0, 1, 1], [], []>} : vector<64x8xbf16>, vector<8x8xbf16>, vector<64x8xf32> -> vector<64x8xf32>
    %211 = arith.truncf %210 : vector<64x8xf32> to vector<64x8xbf16>
    %c5_186 = arith.constant 5 : index
    %c0_187 = arith.constant 0 : index
    %c0_188 = arith.constant 0 : index
    %212 = vector.load %arg9[%c5_186, %c0_187, %c0_188] : memref<9x64x64xbf16, #tpu.memory_space<vmem>>, vector<1x64x64xbf16>
    %213 = vector.shape_cast %212 : vector<1x64x64xbf16> to vector<64x64xbf16>
    %cst_189 = arith.constant dense<0.000000e+00> : vector<64x8xf32>
    %214 = tpu.matmul %213, %211, %cst_189 {dimension_numbers = #tpu.dot_dimension_numbers<[1], [0], [0], [1], [0, 0, 1, 1], [], []>} : vector<64x64xbf16>, vector<64x8xbf16>, vector<64x8xf32> -> vector<64x8xf32>
    %215 = arith.addf %207, %214 : vector<64x8xf32>
    %c6_190 = arith.constant 6 : index
    %c0_191 = arith.constant 0 : index
    %c0_192 = arith.constant 0 : index
    %216 = vector.load %arg8[%c6_190, %c0_191, %c0_192] : memref<9x8x8xbf16, #tpu.memory_space<vmem>>, vector<1x8x8xbf16>
    %217 = vector.shape_cast %216 : vector<1x8x8xbf16> to vector<8x8xbf16>
    %cst_193 = arith.constant dense<0.000000e+00> : vector<64x8xf32>
    %218 = tpu.matmul %168, %217, %cst_193 {dimension_numbers = #tpu.dot_dimension_numbers<[1], [0], [0], [1], [0, 0, 1, 1], [], []>} : vector<64x8xbf16>, vector<8x8xbf16>, vector<64x8xf32> -> vector<64x8xf32>
    %219 = arith.truncf %218 : vector<64x8xf32> to vector<64x8xbf16>
    %c6_194 = arith.constant 6 : index
    %c0_195 = arith.constant 0 : index
    %c0_196 = arith.constant 0 : index
    %220 = vector.load %arg9[%c6_194, %c0_195, %c0_196] : memref<9x64x64xbf16, #tpu.memory_space<vmem>>, vector<1x64x64xbf16>
    %221 = vector.shape_cast %220 : vector<1x64x64xbf16> to vector<64x64xbf16>
    %cst_197 = arith.constant dense<0.000000e+00> : vector<64x8xf32>
    %222 = tpu.matmul %221, %219, %cst_197 {dimension_numbers = #tpu.dot_dimension_numbers<[1], [0], [0], [1], [0, 0, 1, 1], [], []>} : vector<64x64xbf16>, vector<64x8xbf16>, vector<64x8xf32> -> vector<64x8xf32>
    %223 = arith.addf %215, %222 : vector<64x8xf32>
    %c7_198 = arith.constant 7 : index
    %c0_199 = arith.constant 0 : index
    %c0_200 = arith.constant 0 : index
    %224 = vector.load %arg8[%c7_198, %c0_199, %c0_200] : memref<9x8x8xbf16, #tpu.memory_space<vmem>>, vector<1x8x8xbf16>
    %225 = vector.shape_cast %224 : vector<1x8x8xbf16> to vector<8x8xbf16>
    %cst_201 = arith.constant dense<0.000000e+00> : vector<64x8xf32>
    %226 = tpu.matmul %168, %225, %cst_201 {dimension_numbers = #tpu.dot_dimension_numbers<[1], [0], [0], [1], [0, 0, 1, 1], [], []>} : vector<64x8xbf16>, vector<8x8xbf16>, vector<64x8xf32> -> vector<64x8xf32>
    %227 = arith.truncf %226 : vector<64x8xf32> to vector<64x8xbf16>
    %c7_202 = arith.constant 7 : index
    %c0_203 = arith.constant 0 : index
    %c0_204 = arith.constant 0 : index
    %228 = vector.load %arg9[%c7_202, %c0_203, %c0_204] : memref<9x64x64xbf16, #tpu.memory_space<vmem>>, vector<1x64x64xbf16>
    %229 = vector.shape_cast %228 : vector<1x64x64xbf16> to vector<64x64xbf16>
    %cst_205 = arith.constant dense<0.000000e+00> : vector<64x8xf32>
    %230 = tpu.matmul %229, %227, %cst_205 {dimension_numbers = #tpu.dot_dimension_numbers<[1], [0], [0], [1], [0, 0, 1, 1], [], []>} : vector<64x64xbf16>, vector<64x8xbf16>, vector<64x8xf32> -> vector<64x8xf32>
    %231 = arith.addf %223, %230 : vector<64x8xf32>
    %c8_206 = arith.constant 8 : index
    %c0_207 = arith.constant 0 : index
    %c0_208 = arith.constant 0 : index
    %232 = vector.load %arg8[%c8_206, %c0_207, %c0_208] : memref<9x8x8xbf16, #tpu.memory_space<vmem>>, vector<1x8x8xbf16>
    %233 = vector.shape_cast %232 : vector<1x8x8xbf16> to vector<8x8xbf16>
    %cst_209 = arith.constant dense<0.000000e+00> : vector<64x8xf32>
    %234 = tpu.matmul %168, %233, %cst_209 {dimension_numbers = #tpu.dot_dimension_numbers<[1], [0], [0], [1], [0, 0, 1, 1], [], []>} : vector<64x8xbf16>, vector<8x8xbf16>, vector<64x8xf32> -> vector<64x8xf32>
    %235 = arith.truncf %234 : vector<64x8xf32> to vector<64x8xbf16>
    %c8_210 = arith.constant 8 : index
    %c0_211 = arith.constant 0 : index
    %c0_212 = arith.constant 0 : index
    %236 = vector.load %arg9[%c8_210, %c0_211, %c0_212] : memref<9x64x64xbf16, #tpu.memory_space<vmem>>, vector<1x64x64xbf16>
    %237 = vector.shape_cast %236 : vector<1x64x64xbf16> to vector<64x64xbf16>
    %cst_213 = arith.constant dense<0.000000e+00> : vector<64x8xf32>
    %238 = tpu.matmul %237, %235, %cst_213 {dimension_numbers = #tpu.dot_dimension_numbers<[1], [0], [0], [1], [0, 0, 1, 1], [], []>} : vector<64x64xbf16>, vector<64x8xbf16>, vector<64x8xf32> -> vector<64x8xf32>
    %239 = arith.addf %231, %238 : vector<64x8xf32>
    %c0_214 = arith.constant 0 : index
    %c0_215 = arith.constant 0 : index
    %240 = vector.load %arg10[%c0_214, %c0_215] : memref<64x1xf32, #tpu.memory_space<vmem>>, vector<64x1xf32>
    %241 = vector.broadcast %240 : vector<64x1xf32> to vector<64x8xf32>
    %242 = arith.addf %239, %241 : vector<64x8xf32>
    %cst_216 = arith.constant 0.000000e+00 : f32
    %243 = vector.broadcast %cst_216 : f32 to vector<64x8xf32>
    %244 = arith.maximumf %242, %243 : vector<64x8xf32>
    %245 = vector.extract_strided_slice %244 {offsets = [0, 0], sizes = [64, 2], strides = [1, 1]} : vector<64x8xf32> to vector<64x2xf32>
    %246 = vector.extract_strided_slice %244 {offsets = [0, 2], sizes = [64, 2], strides = [1, 1]} : vector<64x8xf32> to vector<64x2xf32>
    %247 = arith.maximumf %245, %246 : vector<64x2xf32>
    %248 = vector.extract_strided_slice %244 {offsets = [0, 4], sizes = [64, 2], strides = [1, 1]} : vector<64x8xf32> to vector<64x2xf32>
    %249 = arith.maximumf %247, %248 : vector<64x2xf32>
    %250 = vector.extract_strided_slice %244 {offsets = [0, 6], sizes = [64, 2], strides = [1, 1]} : vector<64x8xf32> to vector<64x2xf32>
    %251 = arith.maximumf %249, %250 : vector<64x2xf32>
    %252 = arith.truncf %251 : vector<64x2xf32> to vector<64x2xbf16>
    %253 = arith.extf %252 : vector<64x2xbf16> to vector<64x2xf32>
    %c0_217 = arith.constant 0 : index
    %c0_218 = arith.constant 0 : index
    %254 = vector.load %arg11[%c0_217, %c0_218] : memref<2x2xf32, #tpu.memory_space<vmem>>, vector<2x2xf32>
    %cst_219 = arith.constant dense<0.000000e+00> : vector<64x2xf32>
    %255 = tpu.matmul %253, %254, %cst_219 {dimension_numbers = #tpu.dot_dimension_numbers<[1], [0], [0], [1], [0, 0, 1, 1], [], []>} : vector<64x2xf32>, vector<2x2xf32>, vector<64x2xf32> -> vector<64x2xf32>
    %c0_220 = arith.constant 0 : index
    %c0_221 = arith.constant 0 : index
    %256 = vector.load %arg12[%c0_220, %c0_221] : memref<64x64xf32, #tpu.memory_space<vmem>>, vector<64x64xf32>
    %cst_222 = arith.constant dense<0.000000e+00> : vector<64x2xf32>
    %257 = tpu.matmul %256, %255, %cst_222 {dimension_numbers = #tpu.dot_dimension_numbers<[1], [0], [0], [1], [0, 0, 1, 1], [], []>} : vector<64x64xf32>, vector<64x2xf32>, vector<64x2xf32> -> vector<64x2xf32>
    %c0_223 = arith.constant 0 : index
    %c0_224 = arith.constant 0 : index
    %258 = vector.load %arg13[%c0_223, %c0_224] : memref<64x1xf32, #tpu.memory_space<vmem>>, vector<64x1xf32>
    %259 = vector.broadcast %258 : vector<64x1xf32> to vector<64x2xf32>
    %260 = arith.addf %257, %259 : vector<64x2xf32>
    %cst_225 = arith.constant 0.0996686518 : f32
    %261 = vector.broadcast %cst_225 : f32 to vector<64x2xf32>
    %262 = arith.subf %260, %261 : vector<64x2xf32>
    %263 = math.cos %262 : vector<64x2xf32>
    %cst_226 = arith.constant 1.0049876 : f32
    %264 = vector.broadcast %cst_226 : f32 to vector<64x2xf32>
    %265 = arith.mulf %264, %263 : vector<64x2xf32>
    %c0_227 = arith.constant 0 : index
    %c0_228 = arith.constant 0 : index
    %266 = vector.load %arg14[%c0_227, %c0_228] : memref<512x64xf32, #tpu.memory_space<vmem>>, vector<512x64xf32>
    %cst_229 = arith.constant dense<0.000000e+00> : vector<512x2xf32>
    %267 = tpu.matmul %266, %265, %cst_229 {dimension_numbers = #tpu.dot_dimension_numbers<[1], [0], [0], [1], [0, 0, 1, 1], [], []>} : vector<512x64xf32>, vector<64x2xf32>, vector<512x2xf32> -> vector<512x2xf32>
    %c0_230 = arith.constant 0 : index
    %c0_231 = arith.constant 0 : index
    %268 = vector.load %arg15[%c0_230, %c0_231] : memref<512x1xf32, #tpu.memory_space<vmem>>, vector<512x1xf32>
    %269 = vector.broadcast %268 : vector<512x1xf32> to vector<512x2xf32>
    %270 = arith.addf %267, %269 : vector<512x2xf32>
    %cst_232 = arith.constant 0.000000e+00 : f32
    %271 = vector.broadcast %cst_232 : f32 to vector<512x2xf32>
    %272 = arith.maximumf %270, %271 : vector<512x2xf32>
    %c0_233 = arith.constant 0 : index
    %c0_234 = arith.constant 0 : index
    %273 = vector.load %arg16[%c0_233, %c0_234] : memref<5x512xf32, #tpu.memory_space<vmem>>, vector<5x512xf32>
    %cst_235 = arith.constant dense<0.000000e+00> : vector<5x2xf32>
    %274 = tpu.matmul %273, %272, %cst_235 {dimension_numbers = #tpu.dot_dimension_numbers<[1], [0], [0], [1], [0, 0, 1, 1], [], []>} : vector<5x512xf32>, vector<512x2xf32>, vector<5x2xf32> -> vector<5x2xf32>
    %c0_236 = arith.constant 0 : index
    %c0_237 = arith.constant 0 : index
    %275 = vector.load %arg17[%c0_236, %c0_237] : memref<5x1xf32, #tpu.memory_space<vmem>>, vector<5x1xf32>
    %276 = vector.broadcast %275 : vector<5x1xf32> to vector<5x2xf32>
    %277 = arith.addf %274, %276 : vector<5x2xf32>
    %c0_238 = arith.constant 0 : index
    %c0_239 = arith.constant 0 : index
    %278 = vector.load %arg18[%c0_238, %c0_239] : memref<5x2xf32, #tpu.memory_space<vmem>>, vector<5x2xf32>
    tpu.vector_store %arg18[%c0_238, %c0_239], %277 {strides = array<i32>} : memref<5x2xf32, #tpu.memory_space<vmem>>, vector<5x2xf32>,
    return
  }
  func.func @transform_0(%arg0: i32) -> (i32, i32) {
    %c0_i32 = arith.constant 0 : i32
    %c0_i32_0 = arith.constant 0 : i32
    %c0_i32_1 = arith.constant 0 : i32
    return %c0_i32, %c0_i32_0 : i32, i32
  }
  func.func @transform_1(%arg0: i32) -> (i32, i32, i32) {
    %c0_i32 = arith.constant 0 : i32
    %c0_i32_0 = arith.constant 0 : i32
    %c0_i32_1 = arith.constant 0 : i32
    %c0_i32_2 = arith.constant 0 : i32
    return %c0_i32, %c0_i32_0, %c0_i32_1 : i32, i32, i32
  }
  func.func @transform_2(%arg0: i32) -> (i32, i32, i32) {
    %c0_i32 = arith.constant 0 : i32
    %c0_i32_0 = arith.constant 0 : i32
    %c0_i32_1 = arith.constant 0 : i32
    %c0_i32_2 = arith.constant 0 : i32
    return %c0_i32, %c0_i32_0, %c0_i32_1 : i32, i32, i32
  }
  func.func @transform_3(%arg0: i32) -> (i32, i32) {
    %c0_i32 = arith.constant 0 : i32
    %c0_i32_0 = arith.constant 0 : i32
    %c0_i32_1 = arith.constant 0 : i32
    return %c0_i32, %c0_i32_0 : i32, i32
  }
  func.func @transform_4(%arg0: i32) -> (i32, i32, i32) {
    %c0_i32 = arith.constant 0 : i32
    %c0_i32_0 = arith.constant 0 : i32
    %c0_i32_1 = arith.constant 0 : i32
    %c0_i32_2 = arith.constant 0 : i32
    return %c0_i32, %c0_i32_0, %c0_i32_1 : i32, i32, i32
  }
  func.func @transform_5(%arg0: i32) -> (i32, i32, i32) {
    %c0_i32 = arith.constant 0 : i32
    %c0_i32_0 = arith.constant 0 : i32
    %c0_i32_1 = arith.constant 0 : i32
    %c0_i32_2 = arith.constant 0 : i32
    return %c0_i32, %c0_i32_0, %c0_i32_1 : i32, i32, i32
  }
  func.func @transform_6(%arg0: i32) -> (i32, i32) {
    %c0_i32 = arith.constant 0 : i32
    %c0_i32_0 = arith.constant 0 : i32
    %c0_i32_1 = arith.constant 0 : i32
    return %c0_i32, %c0_i32_0 : i32, i32
  }
  func.func @transform_7(%arg0: i32) -> (i32, i32, i32) {
    %c0_i32 = arith.constant 0 : i32
    %c0_i32_0 = arith.constant 0 : i32
    %c0_i32_1 = arith.constant 0 : i32
    %c0_i32_2 = arith.constant 0 : i32
    return %c0_i32, %c0_i32_0, %c0_i32_1 : i32, i32, i32
  }
  func.func @transform_8(%arg0: i32) -> (i32, i32, i32) {
    %c0_i32 = arith.constant 0 : i32
    %c0_i32_0 = arith.constant 0 : i32
    %c0_i32_1 = arith.constant 0 : i32
    %c0_i32_2 = arith.constant 0 : i32
    return %c0_i32, %c0_i32_0, %c0_i32_1 : i32, i32, i32
  }
  func.func @transform_9(%arg0: i32) -> (i32, i32) {
    %c0_i32 = arith.constant 0 : i32
    %c0_i32_0 = arith.constant 0 : i32
    %c0_i32_1 = arith.constant 0 : i32
    return %c0_i32, %c0_i32_0 : i32, i32
  }
  func.func @transform_10(%arg0: i32) -> (i32, i32) {
    %c0_i32 = arith.constant 0 : i32
    %c0_i32_0 = arith.constant 0 : i32
    %c0_i32_1 = arith.constant 0 : i32
    return %c0_i32, %c0_i32_0 : i32, i32
  }
  func.func @transform_11(%arg0: i32) -> (i32, i32) {
    %c0_i32 = arith.constant 0 : i32
    %c0_i32_0 = arith.constant 0 : i32
    %c0_i32_1 = arith.constant 0 : i32
    return %c0_i32, %c0_i32_0 : i32, i32
  }
  func.func @transform_12(%arg0: i32) -> (i32, i32) {
    %c0_i32 = arith.constant 0 : i32
    %c0_i32_0 = arith.constant 0 : i32
    %c0_i32_1 = arith.constant 0 : i32
    return %c0_i32, %c0_i32_0 : i32, i32
  }
  func.func @transform_13(%arg0: i32) -> (i32, i32) {
    %c0_i32 = arith.constant 0 : i32
    %c0_i32_0 = arith.constant 0 : i32
    %c0_i32_1 = arith.constant 0 : i32
    return %c0_i32, %c0_i32_0 : i32, i32
  }
  func.func @transform_14(%arg0: i32) -> (i32, i32) {
    %c0_i32 = arith.constant 0 : i32
    %c0_i32_0 = arith.constant 0 : i32
    %c0_i32_1 = arith.constant 0 : i32
    return %c0_i32, %c0_i32_0 : i32, i32
  }
  func.func @transform_15(%arg0: i32) -> (i32, i32) {
    %c0_i32 = arith.constant 0 : i32
    %c0_i32_0 = arith.constant 0 : i32
    %c0_i32_1 = arith.constant 0 : i32
    return %c0_i32, %c0_i32_0 : i32, i32
  }
  func.func @transform_16(%arg0: i32) -> (i32, i32) {
    %c0_i32 = arith.constant 0 : i32
    %c0_i32_0 = arith.constant 0 : i32
    %c0_i32_1 = arith.constant 0 : i32
    return %c0_i32, %c0_i32_0 : i32, i32
  }
  func.func @transform_17(%arg0: i32) -> (i32, i32) {
    %c0_i32 = arith.constant 0 : i32
    %c0_i32_0 = arith.constant 0 : i32
    %c0_i32_1 = arith.constant 0 : i32
    return %c0_i32, %c0_i32_0 : i32, i32
  }
}

</mosaic_0001>

<bundles_post_ra>
// kernel: qvitdr_forward.3
= control target key start
LH: loop header
LB: loop body
LE: loop exit
PB: predicated region body
PF: predicated region fallthrough
CT: control target
= control target key end

     0   :  { %vm988_vm0 = vcmask 261120   ;;  %s3347_s1 = inlined_call_operand.vmem [shape: bf16[1,160,2048], index: 1, kind: input, shape index: {}]   ;;  %s3348_s0 = inlined_call_operand.vmem [shape: bf16[8,160], index: 0, kind: input, shape index: {}]   ;;  %s3349_s2 = inlined_call_operand.vmem [shape: f32[8,1], index: 2, kind: input, shape index: {}]   ;;  %s3350_s3 = inlined_call_operand.vmem [shape: bf16[8,2048], index: 3, kind: output, shape index: {}]  }
   0x1   :  { %v1894_v0 = vld [vmem:[%s3347_s1 + $0x380] sm:$0xf]  ;;  %v2244_v5 = vld [vmem:[%s3347_s1 + $0x484] sm:$0xf]  ;;  %v1902_v9 = vld [vmem:[%s3347_s1 + $0x388] sm:$0xf] }
   0x2   :  { %v2220_v1 = vld [vmem:[%s3347_s1 + $0x3bc] sm:$0xf0]  ;;  %v2024_v6 = vld [vmem:[%s3347_s1 + $0x4c0] sm:$0xf0]  ;;  %v2221_v10 = vld [vmem:[%s3347_s1 + $0x3c4] sm:$0xf0] }
   0x3   :  { %v2022_v2 = vld [vmem:[%s3347_s1 + $0x480] sm:$0xf]  ;;  %v1895_v3 = vor.u32 %v2220_v1, %v1894_v0  ;;  %v2027_v8 = vor.u32 %v2244_v5, %v2024_v6  ;;  %v1903_v12 = vor.u32 %v2221_v10, %v1902_v9  ;;  %v2228_v18 = vld [vmem:[%s3347_s1 + $0x404] sm:$0xf]  ;;  %v1838_v20 = vld [vmem:[%s3347_s1 + $0x308] sm:$0xf] }
   0x4   :  { %v2252_v4 = vld [vmem:[%s3347_s1 + $0x4bc] sm:$0xf0]  ;;  %v1960_v19 = vld [vmem:[%s3347_s1 + $0x440] sm:$0xf0]  ;;  %v2205_v22 = vld [vmem:[%s3347_s1 + $0x344] sm:$0xf0] }
   0x5   :  { %v2023_v7 = vor.u32 %v2252_v4, %v2022_v2  ;;  %v1830_v11 = vld [vmem:[%s3347_s1 + $0x300] sm:$0xf]  ;;  %992 = vmatpush.bf16.msra.mxu0 %v1895_v3  ;;  %1037 = vmatpush.bf16.msra.mxu3 %v2027_v8  ;;  %v1963_v21 = vor.u32 %v2228_v18, %v1960_v19  ;;  %v2212_v23 = vld [vmem:[%s3347_s1 + $0x384] sm:$0xf]  ;;  %v1839_v25 = vor.u32 %v2205_v22, %v1838_v20  ;;  %v2030_v27 = vld [vmem:[%s3347_s1 + $0x488] sm:$0xf] }
   0x6   :  { %v2204_v13 = vld [vmem:[%s3347_s1 + $0x33c] sm:$0xf0]  ;;  %1044 = vmatpush.bf16.msra.mxu1 %v1903_v12  ;;  %v1896_v24 = vld [vmem:[%s3347_s1 + $0x3c0] sm:$0xf0]  ;;  %v2253_v28 = vld [vmem:[%s3347_s1 + $0x4c4] sm:$0xf0] }
   0x7   :  { %v1958_v14 = vld [vmem:[%s3347_s1 + $0x400] sm:$0xf]  ;;  %1011 = vmatpush.bf16.msra.mxu2 %v2023_v7  ;;  %v1831_v16 = vor.u32 %v2204_v13, %v1830_v11  ;;  %v1899_v26 = vor.u32 %v2212_v23, %v1896_v24  ;;  %v2031_v30 = vor.u32 %v2253_v28, %v2030_v27  ;;  %v1774_v32 = vld [vmem:[%s3347_s1 + $0x288] sm:$0xf]  ;;  %v2196_v35 = vld [vmem:[%s3347_s1 + $0x304] sm:$0xf] }
   0x8   :  { %v2236_v15 = vld [vmem:[%s3347_s1 + $0x43c] sm:$0xf0]  ;;  %v2189_v33 = vld [vmem:[%s3347_s1 + $0x2c4] sm:$0xf0]  ;;  %v1832_v36 = vld [vmem:[%s3347_s1 + $0x340] sm:$0xf0] }
   0x9   :  { %v1959_v17 = vor.u32 %v2236_v15, %v1958_v14  ;;  %v1766_v29 = vld [vmem:[%s3347_s1 + $0x280] sm:$0xf]  ;;  %993 = vmatpush.bf16.msra.mxu0 %v1831_v16  ;;  %1038 = vmatpush.bf16.msra.mxu3 %v1963_v21  ;;  %v1775_v38 = vor.u32 %v2189_v33, %v1774_v32  ;;  %v1835_v39 = vor.u32 %v2196_v35, %v1832_v36  ;;  %v1966_v41 = vld [vmem:[%s3347_s1 + $0x408] sm:$0xf]  ;;  %v2213_v43 = vld [vmem:[%s3347_s1 + $0x38c] sm:$0xf] }
   0xa   :  { %v2188_v31 = vld [vmem:[%s3347_s1 + $0x2bc] sm:$0xf0]  ;;  %1045 = vmatpush.bf16.msra.mxu1 %v1839_v25  ;;  %v2237_v42 = vld [vmem:[%s3347_s1 + $0x444] sm:$0xf0]  ;;  %v1904_v44 = vld [vmem:[%s3347_s1 + $0x3c8] sm:$0xf0] }
   0xb   :  { %1012 = vmatpush.bf16.msra.mxu2 %v1959_v17  ;;  %v1767_v34 = vor.u32 %v2188_v31, %v1766_v29  ;;  %v2364_v37 = vld [vmem:[%s3348_s0] sm:$0xff]  ;;  %v1967_v48 = vor.u32 %v2237_v42, %v1966_v41  ;;  %v1710_v50 = vld [vmem:[%s3347_s1 + $0x208] sm:$0xf]  ;;  %v1907_v53 = vor.u32 %v2213_v43, %v1904_v44  ;;  %v2197_v55 = vld [vmem:[%s3347_s1 + $0x30c] sm:$0xf] }
   0xc   :  { %v184_v40 = vunpack.c.h.b16 %v2364_v37  ;;  %v1702_v45 = vld [vmem:[%s3347_s1 + $0x200] sm:$0xf]  ;;  %v2173_v51 = vld [vmem:[%s3347_s1 + $0x244] sm:$0xf0]  ;;  %v2180_v52 = vld [vmem:[%s3347_s1 + $0x284] sm:$0xf] }
   0xd   :  { %1063 = vmatpush.bf16.msrb.mxu3 %v2031_v30  ;;  %v2172_v46 = vld [vmem:[%s3347_s1 + $0x23c] sm:$0xf0]  ;;  %994 = vmatpush.bf16.msra.mxu0 %v1767_v34  ;;  %v1768_v54 = vld [vmem:[%s3347_s1 + $0x2c0] sm:$0xf0]  ;;  %v1840_v56 = vld [vmem:[%s3347_s1 + $0x348] sm:$0xf0]  ;;  %v1711_v57 = vor.u32 %v2173_v51, %v1710_v50 }
   0xe   :  { %v2385_v47 = vpack.c.b16 %v184_v40, %v184_v40  ;;  %v1703_v49 = vor.u32 %v2172_v46, %v1702_v45  ;;  %1046 = vmatpush.bf16.msra.mxu1 %v1775_v38  ;;  %v1771_v58 = vor.u32 %v2180_v52, %v1768_v54  ;;  %v1638_v59 = vld [vmem:[%s3347_s1 + $0x180] sm:$0xf]  ;;  %v1646_v61 = vld [vmem:[%s3347_s1 + $0x188] sm:$0xf]  ;;  %v2164_v63 = vld [vmem:[%s3347_s1 + $0x204] sm:$0xf]  ;;  %v1843_v2 = vor.u32 %v2197_v55, %v1840_v56 }
   0xf   :  { %1018 = vmatpush.bf16.msrb.mxu2 %v1899_v26  ;;  %v2156_v60 = vld [vmem:[%s3347_s1 + $0x1bc] sm:$0xf0]  ;;  %v2157_v62 = vld [vmem:[%s3347_s1 + $0x1c4] sm:$0xf0]  ;;  %v1704_v0 = vld [vmem:[%s3347_s1 + $0x240] sm:$0xf0]  ;;  %v183_v40 = vunpack.c.l.b16 %v2364_v37 }
  0x10   :  { %2085 = vmatmul.msk.bf16.vlgmr.msra.gmra.mxu3 %vm988_vm0, %v2385_v47  ;;  %2084 = vmatmul.msk.bf16.vlgmr.msra.gmra.mxu2 %vm988_vm0, %v2385_v47  ;;  %v1639_v1 = vor.u32 %v2156_v60, %v1638_v59  ;;  %v1574_v3 = vld [vmem:[%s3347_s1 + $0x100] sm:$0xf]  ;;  %v1647_v5 = vor.u32 %v2157_v62, %v1646_v61  ;;  %v1707_v6 = vor.u32 %v2164_v63, %v1704_v0  ;;  %v2181_v7 = vld [vmem:[%s3347_s1 + $0x28c] sm:$0xf]  ;;  %v1582_v9 = vld [vmem:[%s3347_s1 + $0x108] sm:$0xf] }
  0x11   :  { %1064 = vmatpush.bf16.msrb.mxu3 %v1967_v48  ;;  %995 = vmatpush.bf16.msra.mxu0 %v1703_v49  ;;  %v2140_v4 = vld [vmem:[%s3347_s1 + $0x13c] sm:$0xf0]  ;;  %v1776_v8 = vld [vmem:[%s3347_s1 + $0x2c8] sm:$0xf0]  ;;  %v2141_v10 = vld [vmem:[%s3347_s1 + $0x144] sm:$0xf0]  ;;  %v2526_v52 = vpack.c.b16 %v183_v40, %v183_v40 }
  0x12   :  { %1047 = vmatpush.bf16.msra.mxu1 %v1711_v57  ;;  %v2148_v11 = vld [vmem:[%s3347_s1 + $0x184] sm:$0xf]  ;;  %v1575_v13 = vor.u32 %v2140_v4, %v1574_v3  ;;  %v1779_v14 = vor.u32 %v2181_v7, %v1776_v8  ;;  %v1510_v15 = vld [vmem:[%s3347_s1 + $0x80] sm:$0xf]  ;;  %v1583_v17 = vor.u32 %v2141_v10, %v1582_v9  ;;  %v2165_v19 = vld [vmem:[%s3347_s1 + $0x20c] sm:$0xf] }
  0x13   :  { %1019 = vmatpush.bf16.msrb.mxu2 %v1835_v39  ;;  %v1640_v12 = vld [vmem:[%s3347_s1 + $0x1c0] sm:$0xf0]  ;;  %v2124_v16 = vld [vmem:[%s3347_s1 + $0xbc] sm:$0xf0]  ;;  %v1712_v20 = vld [vmem:[%s3347_s1 + $0x248] sm:$0xf0] }
  0x14   :  { %v1643_v18 = vor.u32 %v2148_v11, %v1640_v12  ;;  %v1518_v21 = vld [vmem:[%s3347_s1 + $0x88] sm:$0xf]  ;;  %v2132_v23 = vld [vmem:[%s3347_s1 + $0x104] sm:$0xf]  ;;  %v1511_v25 = vor.u32 %v2124_v16, %v1510_v15  ;;  %v2149_v26 = vld [vmem:[%s3347_s1 + $0x18c] sm:$0xf]  ;;  %v1715_v27 = vor.u32 %v2165_v19, %v1712_v20 }
  0x15   :  { %1070 = vmatpush.bf16.msra.mxu3 %v1907_v53  ;;  %996 = vmatpush.bf16.msra.mxu0 %v1639_v1  ;;  %v2125_v22 = vld [vmem:[%s3347_s1 + $0xc4] sm:$0xf0]  ;;  %v1576_v24 = vld [vmem:[%s3347_s1 + $0x140] sm:$0xf0]  ;;  %v1648_v28 = vld [vmem:[%s3347_s1 + $0x1c8] sm:$0xf0] }
  0x16   :  { %1048 = vmatpush.bf16.msra.mxu1 %v1647_v5  ;;  %v1446_v29 = vld [vmem:[%s3347_s1] sm:$0xf]  ;;  %v1519_v31 = vor.u32 %v2125_v22, %v1518_v21  ;;  %v1579_v32 = vor.u32 %v2132_v23, %v1576_v24  ;;  %v1454_v33 = vld [vmem:[%s3347_s1 + $0x8] sm:$0xf]  ;;  %v2245_v34 = vld [vmem:[%s3347_s1 + $0x48c] sm:$0xf]  ;;  %v1651_v43 = vor.u32 %v2149_v26, %v1648_v28 }
  0x17   :  { %1020 = vmatpush.bf16.msrb.mxu2 %v1771_v58  ;;  %v2108_v30 = vld [vmem:[%s3347_s1 + $0x3c] sm:$0xf0]  ;;  %v2032_v35 = vld [vmem:[%s3347_s1 + $0x4c8] sm:$0xf0]  ;;  %v2109_v36 = vld [vmem:[%s3347_s1 + $0x44] sm:$0xf0] }
  0x18   :  { %v2116_v38 = vld [vmem:[%s3347_s1 + $0x84] sm:$0xf]  ;;  %v1447_v41 = vor.u32 %v2108_v30, %v1446_v29  ;;  %v2038_v42 = vld [vmem:[%s3347_s1 + $0x490] sm:$0xf]  ;;  %v2035_v44 = vor.u32 %v2245_v34, %v2032_v35  ;;  %v2133_v45 = vld [vmem:[%s3347_s1 + $0x10c] sm:$0xf]  ;;  %v1455_v37 = vor.u32 %v2109_v36, %v1454_v33 }
  0x19   :  { %1071 = vmatpush.bf16.msra.mxu3 %v1843_v2  ;;  %997 = vmatpush.bf16.msra.mxu0 %v1575_v13  ;;  %v1512_v39 = vld [vmem:[%s3347_s1 + $0xc0] sm:$0xf0]  ;;  %v2254_v46 = vld [vmem:[%s3347_s1 + $0x4cc] sm:$0xf0]  ;;  %v1584_v49 = vld [vmem:[%s3347_s1 + $0x148] sm:$0xf0] }
  0x1a   :  { %1049 = vmatpush.bf16.msra.mxu1 %v1583_v17  ;;  %v1515_v48 = vor.u32 %v2116_v38, %v1512_v39  ;;  %v2100_v50 = vld [vmem:[%s3347_s1 + $0x4] sm:$0xf]  ;;  %v2229_v53 = vld [vmem:[%s3347_s1 + $0x40c] sm:$0xf]  ;;  %v1910_v55 = vld [vmem:[%s3347_s1 + $0x390] sm:$0xf]  ;;  %v2039_v56 = vor.u32 %v2254_v46, %v2038_v42  ;;  %v1587_v60 = vor.u32 %v2133_v45, %v1584_v49 }
  0x1b   :  { %1021 = vmatpush.bf16.msrb.mxu2 %v1707_v6  ;;  %v1448_v51 = vld [vmem:[%s3347_s1 + $0x40] sm:$0xf0]  ;;  %v1968_v54 = vld [vmem:[%s3347_s1 + $0x448] sm:$0xf0]  ;;  %v2222_v57 = vld [vmem:[%s3347_s1 + $0x3cc] sm:$0xf0] }
  0x1c   :  { %v2214_v58 = vld [vmem:[%s3347_s1 + $0x394] sm:$0xf]  ;;  %v1974_v61 = vld [vmem:[%s3347_s1 + $0x410] sm:$0xf]  ;;  %v1451_v63 = vor.u32 %v2100_v50, %v1448_v51  ;;  %v1971_v0 = vor.u32 %v2229_v53, %v1968_v54  ;;  %v2117_v1 = vld [vmem:[%s3347_s1 + $0x8c] sm:$0xf]  ;;  %v1911_v3 = vor.u32 %v2222_v57, %v1910_v55 }
  0x1d   :  { %1072 = vmatpush.bf16.msra.mxu3 %v1779_v14  ;;  %998 = vmatpush.bf16.msra.mxu0 %v1511_v25  ;;  %v1912_v59 = vld [vmem:[%s3347_s1 + $0x3d0] sm:$0xf0]  ;;  %v2238_v62 = vld [vmem:[%s3347_s1 + $0x44c] sm:$0xf0]  ;;  %v1520_v2 = vld [vmem:[%s3347_s1 + $0xc8] sm:$0xf0] }
  0x1e   :  { %1050 = vmatpush.bf16.msra.mxu1 %v1519_v31  ;;  %v1915_v4 = vor.u32 %v2214_v58, %v1912_v59  ;;  %v1846_v5 = vld [vmem:[%s3347_s1 + $0x310] sm:$0xf]  ;;  %v2246_v6 = vld [vmem:[%s3347_s1 + $0x494] sm:$0xf]  ;;  %v1975_v11 = vor.u32 %v2238_v62, %v1974_v61  ;;  %v1523_v12 = vor.u32 %v2117_v1, %v1520_v2  ;;  %v2101_v13 = vld [vmem:[%s3347_s1 + $0xc] sm:$0xf] }
  0x1f   :  { %1022 = vmatpush.bf16.msrb.mxu2 %v1643_v18  ;;  %v2040_v7 = vld [vmem:[%s3347_s1 + $0x4d0] sm:$0xf0]  ;;  %v2206_v8 = vld [vmem:[%s3347_s1 + $0x34c] sm:$0xf0]  ;;  %v1456_v14 = vld [vmem:[%s3347_s1 + $0x48] sm:$0xf0] }
  0x20   :  { %2086 = vmatmul.msk.bf16.vlgmr.msrb.gmra.mxu3 %vm988_vm0, %v2385_v47  ;;  %v2198_v9 = vld [vmem:[%s3347_s1 + $0x314] sm:$0xf]  ;;  %v1918_v15 = vld [vmem:[%s3347_s1 + $0x398] sm:$0xf]  ;;  %v1782_v17 = vld [vmem:[%s3347_s1 + $0x290] sm:$0xf]  ;;  %v2043_v18 = vor.u32 %v2246_v6, %v2040_v7  ;;  %v1847_v19 = vor.u32 %v2206_v8, %v1846_v5  ;;  %v1459_v28 = vor.u32 %v2101_v13, %v1456_v14 }
  0x21   :  { %1073 = vmatpush.bf16.msra.mxu3 %v1715_v27  ;;  %999 = vmatpush.bf16.msra.mxu0 %v1447_v41  ;;  %v1848_v10 = vld [vmem:[%s3347_s1 + $0x350] sm:$0xf0]  ;;  %v2223_v16 = vld [vmem:[%s3347_s1 + $0x3d4] sm:$0xf0]  ;;  %v176_v23 = vld [vmem:[%s3349_s2] sm:$0xff]  ;;  %v2262_v27 = vmov 0  }
  0x22   :  { %1051 = vmatpush.bf16.msra.mxu1 %v1455_v37  ;;  %v1851_v20 = vor.u32 %v2198_v9, %v1848_v10  ;;  %v2230_v21 = vld [vmem:[%s3347_s1 + $0x414] sm:$0xf]  ;;  %v2190_v24 = vld [vmem:[%s3347_s1 + $0x2cc] sm:$0xf0]  ;;  %2261 = vset.pattern.permute.xlu0 %v2262_v27  ;;  %v1919_v29 = vor.u32 %v2223_v16, %v1918_v15  ;;  %v1854_v33 = vld [vmem:[%s3347_s1 + $0x318] sm:$0xf] }
  0x23   :  { %1023 = vmatpush.bf16.msrb.mxu2 %v1579_v32  ;;  %v1976_v22 = vld [vmem:[%s3347_s1 + $0x450] sm:$0xf0]  ;;  %179 = vperm.xlu0 %2261, %v176_v23   ;;  %v1783_v31 = vor.u32 %v2190_v24, %v1782_v17  ;;  %v2207_v34 = vld [vmem:[%s3347_s1 + $0x354] sm:$0xf0]  ;;  %v1718_v35 = vld [vmem:[%s3347_s1 + $0x210] sm:$0xf] }
  0x24   :  { %1000 = vmatmul.bf16.vlgmr.msra.gmra.mxu0 %v2526_v52  ;;  %v2182_v25 = vld [vmem:[%s3347_s1 + $0x294] sm:$0xf]  ;;  %v1979_v30 = vor.u32 %v2230_v21, %v1976_v22  ;;  %v2174_v36 = vld [vmem:[%s3347_s1 + $0x24c] sm:$0xf0]  ;;  %v1855_v40 = vor.u32 %v2207_v34, %v1854_v33  ;;  %v2215_v41 = vld [vmem:[%s3347_s1 + $0x39c] sm:$0xf] }
  0x25   :  { %1074 = vmatpush.bf16.msra.mxu3 %v1651_v43  ;;  %1089 = vmatpush.bf16.msrb.mxu0 %v2035_v44  ;;  %v1784_v26 = vld [vmem:[%s3347_s1 + $0x2d0] sm:$0xf0]  ;;  %v1920_v42 = vld [vmem:[%s3347_s1 + $0x3d8] sm:$0xf0]  ;;  %v1719_v43 = vor.u32 %v2174_v36, %v1718_v35  ;;  %v1790_v45 = vld [vmem:[%s3347_s1 + $0x298] sm:$0xf] }
  0x26   :  { %1115 = vmatpush.bf16.msrb.mxu1 %v2039_v56  ;;  %v1787_v32 = vor.u32 %v2182_v25, %v1784_v26  ;;  %v2166_v38 = vld [vmem:[%s3347_s1 + $0x214] sm:$0xf]  ;;  %v2191_v46 = vld [vmem:[%s3347_s1 + $0x2d4] sm:$0xf0]  ;;  %v1654_v37 = vld [vmem:[%s3347_s1 + $0x190] sm:$0xf]  ;;  %v1923_v51 = vor.u32 %v2215_v41, %v1920_v42 }
  0x27   :  { %1024 = vmatpush.bf16.msrb.mxu2 %v1515_v48  ;;  %1052 = vmatmul.bf16.vlgmr.msra.gmra.mxu1 %v2526_v52  ;;  %v1720_v39 = vld [vmem:[%s3347_s1 + $0x250] sm:$0xf0]  ;;  %v2158_v48 = vld [vmem:[%s3347_s1 + $0x1cc] sm:$0xf0]  ;;  %v1791_v53 = vor.u32 %v2191_v46, %v1790_v45  ;;  %v2199_v54 = vld [vmem:[%s3347_s1 + $0x31c] sm:$0xf] }
  0x28   :  { %v1723_v44 = vor.u32 %v2166_v38, %v1720_v39  ;;  %v2150_v49 = vld [vmem:[%s3347_s1 + $0x194] sm:$0xf]  ;;  %v1856_v55 = vld [vmem:[%s3347_s1 + $0x358] sm:$0xf0]  ;;  %v1655_v56 = vor.u32 %v2158_v48, %v1654_v37  ;;  %v1726_v58 = vld [vmem:[%s3347_s1 + $0x218] sm:$0xf] }
  0x29   :  { %1075 = vmatpush.bf16.msra.mxu3 %v1587_v60  ;;  %1090 = vmatpush.bf16.msrb.mxu0 %v1971_v0  ;;  %v1656_v50 = vld [vmem:[%s3347_s1 + $0x1d0] sm:$0xf0]  ;;  %v2175_v59 = vld [vmem:[%s3347_s1 + $0x254] sm:$0xf0]  ;;  %v1590_v60 = vld [vmem:[%s3347_s1 + $0x110] sm:$0xf]  ;;  %v1859_v0 = vor.u32 %v2199_v54, %v1856_v55 }
  0x2a   :  { %1116 = vmatpush.bf16.msrb.mxu1 %v1975_v11  ;;  %v1659_v57 = vor.u32 %v2150_v49, %v1656_v50  ;;  %v2142_v61 = vld [vmem:[%s3347_s1 + $0x14c] sm:$0xf0]  ;;  %v2134_v62 = vld [vmem:[%s3347_s1 + $0x114] sm:$0xf]  ;;  %v1727_v1 = vor.u32 %v2175_v59, %v1726_v58  ;;  %v2183_v2 = vld [vmem:[%s3347_s1 + $0x29c] sm:$0xf] }
  0x2b   :  { %1025 = vmatpush.bf16.msrb.mxu2 %v1451_v63  ;;  %v1592_v63 = vld [vmem:[%s3347_s1 + $0x150] sm:$0xf0]  ;;  %v1662_v6 = vld [vmem:[%s3347_s1 + $0x198] sm:$0xf]  ;;  %v1526_v8 = vld [vmem:[%s3347_s1 + $0x90] sm:$0xf] }
  0x2c   :  { %v1595_v5 = vor.u32 %v2134_v62, %v1592_v63  ;;  %v2159_v7 = vld [vmem:[%s3347_s1 + $0x1d4] sm:$0xf0]  ;;  %v2126_v9 = vld [vmem:[%s3347_s1 + $0xcc] sm:$0xf0]  ;;  %v2118_v10 = vld [vmem:[%s3347_s1 + $0x94] sm:$0xf] }
  0x2d   :  { %1122 = vmatpush.bf16.msra.mxu0 %v1915_v4  ;;  %1076 = vmatpush.bf16.msra.mxu3 %v1523_v12  ;;  %v1591_v4 = vor.u32 %v2142_v61, %v1590_v60  ;;  %v1528_v11 = vld [vmem:[%s3347_s1 + $0xd0] sm:$0xf0]  ;;  %v1663_v13 = vor.u32 %v2159_v7, %v1662_v6  ;;  %v2167_v14 = vld [vmem:[%s3347_s1 + $0x21c] sm:$0xf]  ;;  %v1598_v16 = vld [vmem:[%s3347_s1 + $0x118] sm:$0xf]  ;;  %v1527_v17 = vor.u32 %v2126_v9, %v1526_v8 }
  0x2e   :  { %1026 = vmatmul.bf16.vlgmr.msrb.gmra.mxu2 %v2526_v52  ;;  %1141 = vmatpush.bf16.msra.mxu1 %v2043_v18  ;;  %v1728_v15 = vld [vmem:[%s3347_s1 + $0x258] sm:$0xf0]  ;;  %v1531_v18 = vor.u32 %v2118_v10, %v1528_v11  ;;  %v2110_v21 = vld [vmem:[%s3347_s1 + $0x4c] sm:$0xf0]  ;;  %v2102_v22 = vld [vmem:[%s3347_s1 + $0x14] sm:$0xf] }
  0x2f   :  { %1096 = vmatpush.bf16.msra.mxu2 %v1911_v3  ;;  %v1792_v3 = vld [vmem:[%s3347_s1 + $0x2d8] sm:$0xf0]  ;;  %v1464_v23 = vld [vmem:[%s3347_s1 + $0x50] sm:$0xf0]  ;;  %v2046_v24 = vld [vmem:[%s3347_s1 + $0x498] sm:$0xf] }
  0x30   :  { %v1795_v12 = vor.u32 %v2183_v2, %v1792_v3  ;;  %v2255_v25 = vld [vmem:[%s3347_s1 + $0x4d4] sm:$0xf0]  ;;  %v2247_v26 = vld [vmem:[%s3347_s1 + $0x49c] sm:$0xf]  ;;  %v2224_v45 = vld [vmem:[%s3347_s1 + $0x3dc] sm:$0xf0] }
  0x31   :  { %1123 = vmatpush.bf16.msra.mxu0 %v1851_v20  ;;  %1077 = vmatpush.bf16.msra.mxu3 %v1459_v28  ;;  %v1462_v20 = vld [vmem:[%s3347_s1 + $0x10] sm:$0xf]  ;;  %v2048_v27 = vld [vmem:[%s3347_s1 + $0x4d8] sm:$0xf0]  ;;  %v1731_v28 = vor.u32 %v2167_v14, %v1728_v15  ;;  %v1534_v34 = vld [vmem:[%s3347_s1 + $0x98] sm:$0xf]  ;;  %v2047_v35 = vor.u32 %v2255_v25, %v2046_v24 }
  0x32   :  { %1142 = vmatpush.bf16.msra.mxu1 %v1979_v30  ;;  %v1463_v30 = vor.u32 %v2110_v21, %v1462_v20  ;;  %v1664_v33 = vld [vmem:[%s3347_s1 + $0x1d8] sm:$0xf0]  ;;  %v2051_v36 = vor.u32 %v2247_v26, %v2048_v27  ;;  %v2127_v38 = vld [vmem:[%s3347_s1 + $0xd4] sm:$0xf0]  ;;  %v2216_v46 = vld [vmem:[%s3347_s1 + $0x3a4] sm:$0xf] }
  0x33   :  { %1097 = vmatpush.bf16.msra.mxu2 %v1847_v19  ;;  %v2143_v19 = vld [vmem:[%s3347_s1 + $0x154] sm:$0xf0]  ;;  %v2231_v41 = vld [vmem:[%s3347_s1 + $0x41c] sm:$0xf]  ;;  %v1928_v37 = vld [vmem:[%s3347_s1 + $0x3e0] sm:$0xf0]  ;;  %v1535_v48 = vor.u32 %v2127_v38, %v1534_v34 }
  0x34   :  { %1078 = vmatmul.bf16.vlgmr.msra.gmra.mxu3 %v2526_v52  ;;  %2087 = vmatmul.msk.bf16.vlgmr.msrb.gmra.mxu0 %vm988_vm0, %v2385_v47  ;;  %v1982_v39 = vld [vmem:[%s3347_s1 + $0x418] sm:$0xf]  ;;  %v1984_v42 = vld [vmem:[%s3347_s1 + $0x458] sm:$0xf0]  ;;  %v2054_v58 = vld [vmem:[%s3347_s1 + $0x4a0] sm:$0xf] }
  0x35   :  { %1148 = vmatpush.bf16.msrb.mxu3 %v1919_v29  ;;  %1124 = vmatpush.bf16.msra.mxu0 %v1787_v32  ;;  %v1599_v29 = vor.u32 %v2143_v19, %v1598_v16  ;;  %v2151_v32 = vld [vmem:[%s3347_s1 + $0x19c] sm:$0xf]  ;;  %v1470_v54 = vld [vmem:[%s3347_s1 + $0x18] sm:$0xf]  ;;  %v2256_v59 = vld [vmem:[%s3347_s1 + $0x4dc] sm:$0xf0] }
  0x36   :  { %v2135_v49 = vld [vmem:[%s3347_s1 + $0x11c] sm:$0xf]  ;;  %v2111_v55 = vld [vmem:[%s3347_s1 + $0x54] sm:$0xf0]  ;;  %v1862_v60 = vld [vmem:[%s3347_s1 + $0x320] sm:$0xf] }
  0x37   :  { %1098 = vmatpush.bf16.msra.mxu2 %v1783_v31  ;;  %2088 = vmatmul.msk.bf16.vlgmr.msrb.gmra.mxu1 %vm988_vm0, %v2385_v47  ;;  %v1467_v31 = vor.u32 %v2102_v22, %v1464_v23  ;;  %v1600_v50 = vld [vmem:[%s3347_s1 + $0x158] sm:$0xf0]  ;;  %v2208_v62 = vld [vmem:[%s3347_s1 + $0x35c] sm:$0xf0]  ;;  %v2200_v63 = vld [vmem:[%s3347_s1 + $0x324] sm:$0xf] }
  0x38   :  { %1174 = vmatpush.bf16.msrb.mxu1 %v1923_v51  ;;  %v1603_v61 = vor.u32 %v2135_v49, %v1600_v50  ;;  %v2119_v2 = vld [vmem:[%s3347_s1 + $0x9c] sm:$0xf]  ;;  %v1863_v6 = vor.u32 %v2208_v62, %v1862_v60  ;;  %v2240_v8 = vld [vmem:[%s3347_s1 + $0x45c] sm:$0xf0]  ;;  %v1934_v10 = vld [vmem:[%s3347_s1 + $0x3a8] sm:$0xf] }
  0x39   :  { %1149 = vmatpush.bf16.msrb.mxu3 %v1855_v40  ;;  %1125 = vmatpush.bf16.msra.mxu0 %v1723_v44  ;;  %v2239_v40 = vld [vmem:[%s3347_s1 + $0x454] sm:$0xf0]  ;;  %v1667_v44 = vor.u32 %v2151_v32, %v1664_v33  ;;  %v1536_v3 = vld [vmem:[%s3347_s1 + $0xd8] sm:$0xf0]  ;;  %v2192_v14 = vld [vmem:[%s3347_s1 + $0x2dc] sm:$0xf0] }
  0x3a   :  { %v1983_v51 = vor.u32 %v2239_v40, %v1982_v39  ;;  %v2103_v9 = vld [vmem:[%s3347_s1 + $0x1c] sm:$0xf]  ;;  %v1539_v11 = vor.u32 %v2119_v2, %v1536_v3  ;;  %v2184_v16 = vld [vmem:[%s3347_s1 + $0x2a4] sm:$0xf]  ;;  %v1870_v23 = vld [vmem:[%s3347_s1 + $0x328] sm:$0xf] }
  0x3b   :  { %1099 = vmatpush.bf16.msra.mxu2 %v1719_v43  ;;  %v1926_v43 = vld [vmem:[%s3347_s1 + $0x3a0] sm:$0xf]  ;;  %v1472_v15 = vld [vmem:[%s3347_s1 + $0x58] sm:$0xf0]  ;;  %v2248_v19 = vld [vmem:[%s3347_s1 + $0x4a4] sm:$0xf] }
  0x3c   :  { %1175 = vmatpush.bf16.msrb.mxu1 %v1859_v0  ;;  %v1864_v0 = vld [vmem:[%s3347_s1 + $0x360] sm:$0xf0]  ;;  %v1475_v24 = vor.u32 %v2103_v9, %v1472_v15  ;;  %v2209_v26 = vld [vmem:[%s3347_s1 + $0x364] sm:$0xf0]  ;;  %v1734_v27 = vld [vmem:[%s3347_s1 + $0x220] sm:$0xf] }
  0x3d   :  { %1150 = vmatpush.bf16.msrb.mxu3 %v1791_v53  ;;  %1126 = vmatpush.bf16.msra.mxu0 %v1659_v57  ;;  %v1987_v53 = vor.u32 %v2231_v41, %v1984_v42  ;;  %v1931_v57 = vor.u32 %v2216_v46, %v1928_v37  ;;  %v1867_v7 = vor.u32 %v2200_v63, %v1864_v0  ;;  %v2056_v20 = vld [vmem:[%s3347_s1 + $0x4e0] sm:$0xf0]  ;;  %v1936_v38 = vld [vmem:[%s3347_s1 + $0x3e8] sm:$0xf0]  ;;  %v1806_v40 = vld [vmem:[%s3347_s1 + $0x2a8] sm:$0xf] }
  0x3e   :  { %v2232_v32 = vld [vmem:[%s3347_s1 + $0x424] sm:$0xf]  ;;  %v1871_v34 = vor.u32 %v2209_v26, %v1870_v23  ;;  %v2193_v41 = vld [vmem:[%s3347_s1 + $0x2e4] sm:$0xf0]  ;;  %v1670_v42 = vld [vmem:[%s3347_s1 + $0x1a0] sm:$0xf] }
  0x3f   :  { %1100 = vmatpush.bf16.msra.mxu2 %v1655_v56  ;;  %v1927_v56 = vor.u32 %v2224_v45, %v1926_v43  ;;  %v1992_v33 = vld [vmem:[%s3347_s1 + $0x460] sm:$0xf0]  ;;  %v2201_v49 = vld [vmem:[%s3347_s1 + $0x32c] sm:$0xf]  ;;  %v1678_v2 = vld [vmem:[%s3347_s1 + $0x1a8] sm:$0xf] }
  0x40   :  { %1176 = vmatpush.bf16.msrb.mxu1 %v1795_v12  ;;  %v2225_v12 = vld [vmem:[%s3347_s1 + $0x3e4] sm:$0xf0]  ;;  %v1995_v43 = vor.u32 %v2232_v32, %v1992_v33  ;;  %v2152_v45 = vld [vmem:[%s3347_s1 + $0x1a4] sm:$0xf]  ;;  %v1872_v50 = vld [vmem:[%s3347_s1 + $0x368] sm:$0xf0] }
  0x41   :  { %1151 = vmatpush.bf16.msrb.mxu3 %v1727_v1  ;;  %1127 = vmatpush.bf16.msra.mxu0 %v1595_v5  ;;  %v1471_v1 = vor.u32 %v2111_v55, %v1470_v54  ;;  %v1990_v5 = vld [vmem:[%s3347_s1 + $0x420] sm:$0xf]  ;;  %v1935_v21 = vor.u32 %v2225_v12, %v1934_v10  ;;  %v1672_v46 = vld [vmem:[%s3347_s1 + $0x1e0] sm:$0xf0]  ;;  %v1742_v54 = vld [vmem:[%s3347_s1 + $0x228] sm:$0xf]  ;;  %v1875_v60 = vor.u32 %v2201_v49, %v1872_v50 }
  0x42   :  { %v2177_v55 = vld [vmem:[%s3347_s1 + $0x264] sm:$0xf0]  ;;  %v2185_v62 = vld [vmem:[%s3347_s1 + $0x2ac] sm:$0xf] }
  0x43   :  { %1101 = vmatpush.bf16.msra.mxu2 %v1591_v4  ;;  %v2055_v4 = vor.u32 %v2256_v59, %v2054_v58  ;;  %v2136_v58 = vld [vmem:[%s3347_s1 + $0x124] sm:$0xf]  ;;  %v1808_v63 = vld [vmem:[%s3347_s1 + $0x2e8] sm:$0xf0]  ;;  %v2161_v3 = vld [vmem:[%s3347_s1 + $0x1e4] sm:$0xf0] }
  0x44   :  { %1177 = vmatpush.bf16.msrb.mxu1 %v1731_v28  ;;  %v2176_v28 = vld [vmem:[%s3347_s1 + $0x25c] sm:$0xf0]  ;;  %v1608_v59 = vld [vmem:[%s3347_s1 + $0x160] sm:$0xf0]  ;;  %v1679_v9 = vor.u32 %v2161_v3, %v1678_v2  ;;  %v2169_v10 = vld [vmem:[%s3347_s1 + $0x22c] sm:$0xf] }
  0x45   :  { %1152 = vmatpush.bf16.msrb.mxu3 %v1663_v13  ;;  %1128 = vmatpush.bf16.msra.mxu0 %v1531_v18  ;;  %v1798_v13 = vld [vmem:[%s3347_s1 + $0x2a0] sm:$0xf]  ;;  %v1991_v18 = vor.u32 %v2240_v8, %v1990_v5  ;;  %v1811_v8 = vor.u32 %v2185_v62, %v1808_v63  ;;  %v1614_v12 = vld [vmem:[%s3347_s1 + $0x128] sm:$0xf]  ;;  %v2064_v23 = vld [vmem:[%s3347_s1 + $0x4e8] sm:$0xf0] }
  0x46   :  { %v1799_v22 = vor.u32 %v2192_v14, %v1798_v13  ;;  %v2128_v5 = vld [vmem:[%s3347_s1 + $0xdc] sm:$0xf0]  ;;  %v2145_v15 = vld [vmem:[%s3347_s1 + $0x164] sm:$0xf0]  ;;  %v2121_v62 = vld [vmem:[%s3347_s1 + $0xac] sm:$0xf] }
  0x47   :  { %1102 = vmatpush.bf16.msra.mxu2 %v1527_v17  ;;  %2089 = vmatmul.msk.bf16.vlgmr.msra.gmra.mxu1 %vm988_vm0, %v2385_v47  ;;  %v1800_v17 = vld [vmem:[%s3347_s1 + $0x2e0] sm:$0xf0]  ;;  %v2129_v33 = vld [vmem:[%s3347_s1 + $0xe4] sm:$0xf0]  ;;  %v1552_v63 = vld [vmem:[%s3347_s1 + $0xe8] sm:$0xf0] }
  0x48   :  { %1178 = vmatpush.bf16.msrb.mxu1 %v1667_v44  ;;  %v1803_v25 = vor.u32 %v2184_v16, %v1800_v17  ;;  %v2160_v44 = vld [vmem:[%s3347_s1 + $0x1dc] sm:$0xf0]  ;;  %v1486_v49 = vld [vmem:[%s3347_s1 + $0x28] sm:$0xf] }
  0x49   :  { %1153 = vmatpush.bf16.msrb.mxu3 %v1599_v29  ;;  %1129 = vmatpush.bf16.msra.mxu0 %v1467_v31  ;;  %v2059_v29 = vor.u32 %v2248_v19, %v2056_v20  ;;  %v1736_v31 = vld [vmem:[%s3347_s1 + $0x260] sm:$0xf0]  ;;  %v1478_v16 = vld [vmem:[%s3347_s1 + $0x20] sm:$0xf]  ;;  %v2062_v20 = vld [vmem:[%s3347_s1 + $0x4a8] sm:$0xf] }
  0x4a   :  { %v2112_v17 = vld [vmem:[%s3347_s1 + $0x5c] sm:$0xf0]  ;;  %v1480_v19 = vld [vmem:[%s3347_s1 + $0x60] sm:$0xf0]  ;;  %v2113_v50 = vld [vmem:[%s3347_s1 + $0x64] sm:$0xf0] }
  0x4b   :  { %1103 = vmatpush.bf16.msra.mxu2 %v1463_v30  ;;  %v2168_v30 = vld [vmem:[%s3347_s1 + $0x224] sm:$0xf]  ;;  %v1479_v26 = vor.u32 %v2112_v17, %v1478_v16  ;;  %v2072_v16 = vld [vmem:[%s3347_s1 + $0x4f0] sm:$0xf0] }
  0x4c   :  { %1130 = vmatmul.bf16.vlgmr.msra.gmra.mxu0 %v2526_v52  ;;  %1179 = vmatpush.bf16.msrb.mxu1 %v1603_v61  ;;  %v1739_v39 = vor.u32 %v2168_v30, %v1736_v31  ;;  %v1743_v61 = vor.u32 %v2177_v55, %v1742_v54  ;;  %v1550_v30 = vld [vmem:[%s3347_s1 + $0xa8] sm:$0xf]  ;;  %v2070_v54 = vld [vmem:[%s3347_s1 + $0x4b0] sm:$0xf] }
  0x4d   :  { %1193 = vmatpush.bf16.msrb.mxu0 %v2051_v36  ;;  %1154 = vmatpush.bf16.msrb.mxu3 %v1535_v48  ;;  %v2217_v36 = vld [vmem:[%s3347_s1 + $0x3ac] sm:$0xf]  ;;  %v1807_v48 = vor.u32 %v2193_v41, %v1806_v40  ;;  %v2226_v41 = vld [vmem:[%s3347_s1 + $0x3ec] sm:$0xf0] }
  0x4e   :  { %1104 = vmatmul.bf16.vlgmr.msra.gmra.mxu2 %v2526_v52  ;;  %v1939_v37 = vor.u32 %v2217_v36, %v1936_v38  ;;  %v2233_v36 = vld [vmem:[%s3347_s1 + $0x42c] sm:$0xf]  ;;  %v2258_v55 = vld [vmem:[%s3347_s1 + $0x4ec] sm:$0xf0] }
  0x4f   :  { %1167 = vmatpush.bf16.msrb.mxu2 %v2047_v35  ;;  %v1735_v35 = vor.u32 %v2176_v28, %v1734_v27  ;;  %v2153_v28 = vld [vmem:[%s3347_s1 + $0x1ac] sm:$0xf] }
  0x50   :  { %1180 = vmatpush.bf16.msrb.mxu1 %v1539_v11  ;;  %v1744_v11 = vld [vmem:[%s3347_s1 + $0x268] sm:$0xf0] }
  0x51   :  { %1194 = vmatpush.bf16.msrb.mxu0 %v1987_v53  ;;  %1155 = vmatpush.bf16.msrb.mxu3 %v1471_v1  ;;  %v1675_v53 = vor.u32 %v2152_v45, %v1672_v46  ;;  %v1611_v1 = vor.u32 %v2136_v58, %v1608_v59  ;;  %v2000_v38 = vld [vmem:[%s3347_s1 + $0x468] sm:$0xf0]  ;;  %v2210_v58 = vld [vmem:[%s3347_s1 + $0x36c] sm:$0xf0]  ;;  %v2202_v59 = vld [vmem:[%s3347_s1 + $0x334] sm:$0xf] }
  0x52   :  { %v2137_v45 = vld [vmem:[%s3347_s1 + $0x12c] sm:$0xf] }
  0x53   :  { %1168 = vmatpush.bf16.msrb.mxu2 %v1983_v51  ;;  %v1671_v51 = vor.u32 %v2160_v44, %v1670_v42  ;;  %v2218_v42 = vld [vmem:[%s3347_s1 + $0x3b4] sm:$0xf]  ;;  %v1551_v44 = vor.u32 %v2129_v33, %v1550_v30  ;;  %v1616_v46 = vld [vmem:[%s3347_s1 + $0x168] sm:$0xf0] }
  0x54   :  { %1156 = vmatmul.bf16.vlgmr.msrb.gmra.mxu3 %v2526_v52  ;;  %1181 = vmatpush.bf16.msrb.mxu1 %v1475_v24  ;;  %v1747_v24 = vor.u32 %v2169_v10, %v1744_v11  ;;  %v2194_v10 = vld [vmem:[%s3347_s1 + $0x2ec] sm:$0xf0]  ;;  %v1488_v11 = vld [vmem:[%s3347_s1 + $0x68] sm:$0xf0] }
  0x55   :  { %1226 = vmatpush.bf16.msra.mxu0 %v1931_v57  ;;  %1219 = vmatpush.bf16.msra.mxu3 %v2055_v4  ;;  %v2144_v57 = vld [vmem:[%s3347_s1 + $0x15c] sm:$0xf0] }
  0x56   :  { %v1542_v4 = vld [vmem:[%s3347_s1 + $0xa0] sm:$0xf] }
  0x57   :  { %1200 = vmatpush.bf16.msra.mxu2 %v1927_v56  ;;  %v1606_v56 = vld [vmem:[%s3347_s1 + $0x120] sm:$0xf]  ;;  %1182 = vmatmul.bf16.vlgmr.msrb.gmra.mxu1 %v2526_v52  ;;  %v1543_v13 = vor.u32 %v2128_v5, %v1542_v4  ;;  %v2242_v4 = vld [vmem:[%s3347_s1 + $0x46c] sm:$0xf0]  ;;  %v2105_v5 = vld [vmem:[%s3347_s1 + $0x2c] sm:$0xf] }
  0x58   :  { %1245 = vmatpush.bf16.msra.mxu1 %v2059_v29  ;;  %v1607_v0 = vor.u32 %v2144_v57, %v1606_v56  ;;  %v1680_v29 = vld [vmem:[%s3347_s1 + $0x1e8] sm:$0xf0]  ;;  %v1878_v56 = vld [vmem:[%s3347_s1 + $0x330] sm:$0xf]  ;;  %v1619_v57 = vor.u32 %v2137_v45, %v1616_v46  ;;  %v2203_v45 = vld [vmem:[%s3347_s1 + $0x33c] sm:$0xf] }
  0x59   :  { %1227 = vmatpush.bf16.msra.mxu0 %v1867_v7  ;;  %1220 = vmatpush.bf16.msra.mxu3 %v1991_v18  ;;  %v1544_v7 = vld [vmem:[%s3347_s1 + $0xe0] sm:$0xf0]  ;;  %v1683_v40 = vor.u32 %v2153_v28, %v1680_v29  ;;  %v1879_v2 = vor.u32 %v2210_v58, %v1878_v56  ;;  %v2234_v28 = vld [vmem:[%s3347_s1 + $0x434] sm:$0xf]  ;;  %v1888_v46 = vld [vmem:[%s3347_s1 + $0x378] sm:$0xf0] }
  0x5a   :  { %v2104_v18 = vld [vmem:[%s3347_s1 + $0x24] sm:$0xf]  ;;  %v2008_v29 = vld [vmem:[%s3347_s1 + $0x470] sm:$0xf0]  ;;  %v1891_v56 = vor.u32 %v2203_v45, %v1888_v46  ;;  %v2187_v58 = vld [vmem:[%s3347_s1 + $0x2bc] sm:$0xf] }
  0x5b   :  { %1201 = vmatpush.bf16.msra.mxu2 %v1863_v6  ;;  %v2120_v6 = vld [vmem:[%s3347_s1 + $0xa4] sm:$0xf]  ;;  %v1483_v27 = vor.u32 %v2104_v18, %v1480_v19  ;;  %v1491_v19 = vor.u32 %v2105_v5, %v1488_v11  ;;  %v2147_v11 = vld [vmem:[%s3347_s1 + $0x174] sm:$0xf0]  ;;  %v1568_v45 = vld [vmem:[%s3347_s1 + $0xf8] sm:$0xf0] }
  0x5c   :  { %1246 = vmatpush.bf16.msra.mxu1 %v1995_v43  ;;  %2091 = vmatmul.msk.bf16.vlgmr.msrb.gmra.mxu0 %vm988_vm0, %v2385_v47  ;;  %v1547_v14 = vor.u32 %v2120_v6, %v1544_v7  ;;  %v1944_v43 = vld [vmem:[%s3347_s1 + $0x3f0] sm:$0xf0]  ;;  %v1950_v6 = vld [vmem:[%s3347_s1 + $0x3b8] sm:$0xf]  ;;  %v1555_v7 = vor.u32 %v2121_v62, %v1552_v63 }
  0x5d   :  { %1252 = vmatpush.bf16.msrb.mxu3 %v1935_v21  ;;  %1228 = vmatpush.bf16.msra.mxu0 %v1803_v25  ;;  %v2257_v21 = vld [vmem:[%s3347_s1 + $0x4e4] sm:$0xf0]  ;;  %v1615_v25 = vor.u32 %v2145_v15, %v1614_v12  ;;  %v2186_v12 = vld [vmem:[%s3347_s1 + $0x2b4] sm:$0xf]  ;;  %v1694_v62 = vld [vmem:[%s3347_s1 + $0x1b8] sm:$0xf] }
  0x5e   :  { %2090 = vmatmul.msk.bf16.vlgmr.msrb.gmra.mxu2 %vm988_vm0, %v2385_v47  ;;  %v2063_v31 = vor.u32 %v2257_v21, %v2062_v20  ;;  %v2250_v15 = vld [vmem:[%s3347_s1 + $0x4b4] sm:$0xf]  ;;  %v1886_v21 = vld [vmem:[%s3347_s1 + $0x338] sm:$0xf] }
  0x5f   :  { %1202 = vmatpush.bf16.msra.mxu2 %v1799_v22  ;;  %v2249_v22 = vld [vmem:[%s3347_s1 + $0x4ac] sm:$0xf]  ;;  %v2163_v63 = vld [vmem:[%s3347_s1 + $0x1f4] sm:$0xf0] }
  0x60   :  { %1278 = vmatpush.bf16.msrb.mxu1 %v1939_v37  ;;  %v2067_v32 = vor.u32 %v2249_v22, %v2064_v23  ;;  %v2211_v22 = vld [vmem:[%s3347_s1 + $0x374] sm:$0xf0]  ;;  %v1750_v23 = vld [vmem:[%s3347_s1 + $0x230] sm:$0xf]  ;;  %v1695_v5 = vor.u32 %v2163_v63, %v1694_v62 }
  0x61   :  { %1253 = vmatpush.bf16.msrb.mxu3 %v1871_v34  ;;  %1229 = vmatpush.bf16.msra.mxu0 %v1739_v39  ;;  %v1998_v34 = vld [vmem:[%s3347_s1 + $0x428] sm:$0xf]  ;;  %v1942_v39 = vld [vmem:[%s3347_s1 + $0x3b0] sm:$0xf]  ;;  %v1887_v30 = vor.u32 %v2211_v22, %v1886_v21  ;;  %v2155_v22 = vld [vmem:[%s3347_s1 + $0x1bc] sm:$0xf] }
  0x63   :  { %1203 = vmatpush.bf16.msra.mxu2 %v1735_v35  ;;  %v2241_v35 = vld [vmem:[%s3347_s1 + $0x464] sm:$0xf0] }
  0x64   :  { %1279 = vmatpush.bf16.msrb.mxu1 %v1875_v60  ;;  %2092 = vmatmul.msk.bf16.vlgmr.msra.gmra.mxu3 %vm988_vm0, %v2385_v47  ;;  %v1999_v37 = vor.u32 %v2241_v35, %v1998_v34  ;;  %v1880_v60 = vld [vmem:[%s3347_s1 + $0x370] sm:$0xf0]  ;;  %v1822_v35 = vld [vmem:[%s3347_s1 + $0x2b8] sm:$0xf] }
  0x65   :  { %1254 = vmatpush.bf16.msrb.mxu3 %v1807_v48  ;;  %1230 = vmatpush.bf16.msra.mxu0 %v1675_v53  ;;  %v2003_v48 = vor.u32 %v2233_v36, %v2000_v38  ;;  %v1947_v53 = vor.u32 %v2218_v42, %v1944_v43  ;;  %v1883_v3 = vor.u32 %v2202_v59, %v1880_v60  ;;  %v2195_v36 = vld [vmem:[%s3347_s1 + $0x2f4] sm:$0xf0]  ;;  %v1686_v38 = vld [vmem:[%s3347_s1 + $0x1b0] sm:$0xf]  ;;  %v1688_v42 = vld [vmem:[%s3347_s1 + $0x1f0] sm:$0xf0] }
  0x66   :  { %v1824_v59 = vld [vmem:[%s3347_s1 + $0x2f8] sm:$0xf0] }
  0x67   :  { %1204 = vmatpush.bf16.msra.mxu2 %v1671_v51  ;;  %2093 = vmatmul.msk.bf16.vlgmr.msra.gmra.mxu1 %vm988_vm0, %v2385_v47  ;;  %v1943_v51 = vor.u32 %v2226_v41, %v1942_v39  ;;  %v2011_v39 = vor.u32 %v2234_v28, %v2008_v29  ;;  %v2154_v41 = vld [vmem:[%s3347_s1 + $0x1b4] sm:$0xf] }
  0x68   :  { %1280 = vmatpush.bf16.msrb.mxu1 %v1811_v8  ;;  %v2227_v8 = vld [vmem:[%s3347_s1 + $0x3f4] sm:$0xf0] }
  0x69   :  { %1255 = vmatpush.bf16.msrb.mxu3 %v1743_v61  ;;  %1231 = vmatpush.bf16.msra.mxu0 %v1611_v1  ;;  %v1487_v61 = vor.u32 %v2113_v50, %v1486_v49  ;;  %v2006_v1 = vld [vmem:[%s3347_s1 + $0x430] sm:$0xf]  ;;  %v1951_v17 = vor.u32 %v2227_v8, %v1950_v6  ;;  %v1758_v49 = vld [vmem:[%s3347_s1 + $0x238] sm:$0xf]  ;;  %v2171_v6 = vld [vmem:[%s3347_s1 + $0x23c] sm:$0xf] }
  0x6a   :  { %v2179_v50 = vld [vmem:[%s3347_s1 + $0x274] sm:$0xf0] }
  0x6b   :  { %1205 = vmatpush.bf16.msra.mxu2 %v1607_v0  ;;  %v2071_v0 = vor.u32 %v2258_v55, %v2070_v54  ;;  %v2138_v54 = vld [vmem:[%s3347_s1 + $0x134] sm:$0xf]  ;;  %v1630_v8 = vld [vmem:[%s3347_s1 + $0x138] sm:$0xf] }
  0x6c   :  { %1281 = vmatpush.bf16.msrb.mxu1 %v1747_v24  ;;  %v2075_v24 = vor.u32 %v2250_v15, %v2072_v16  ;;  %v1624_v55 = vld [vmem:[%s3347_s1 + $0x170] sm:$0xf0]  ;;  %v2078_v16 = vld [vmem:[%s3347_s1 + $0x4b8] sm:$0xf]  ;;  %v1631_v21 = vor.u32 %v2147_v11, %v1630_v8 }
  0x6d   :  { %1256 = vmatpush.bf16.msrb.mxu3 %v1679_v9  ;;  %1232 = vmatpush.bf16.msra.mxu0 %v1547_v14  ;;  %v1814_v9 = vld [vmem:[%s3347_s1 + $0x2b0] sm:$0xf]  ;;  %v2007_v14 = vor.u32 %v2242_v4, %v2006_v1  ;;  %v1827_v4 = vor.u32 %v2187_v58, %v1824_v59  ;;  %v1496_v15 = vld [vmem:[%s3347_s1 + $0x70] sm:$0xf0] }
  0x6e   :  { %v1815_v18 = vor.u32 %v2194_v10, %v1814_v9  ;;  %v2130_v1 = vld [vmem:[%s3347_s1 + $0xec] sm:$0xf0] }
  0x6f   :  { %1206 = vmatpush.bf16.msra.mxu2 %v1543_v13  ;;  %v1816_v13 = vld [vmem:[%s3347_s1 + $0x2f0] sm:$0xf0] }
  0x70   :  { %1282 = vmatpush.bf16.msrb.mxu1 %v1683_v40  ;;  %v1819_v20 = vor.u32 %v2186_v12, %v1816_v13  ;;  %v2162_v40 = vld [vmem:[%s3347_s1 + $0x1ec] sm:$0xf0] }
  0x71   :  { %1257 = vmatpush.bf16.msrb.mxu3 %v1615_v25  ;;  %1233 = vmatpush.bf16.msra.mxu0 %v1483_v27  ;;  %v2178_v25 = vld [vmem:[%s3347_s1 + $0x26c] sm:$0xf0]  ;;  %v1752_v27 = vld [vmem:[%s3347_s1 + $0x270] sm:$0xf0] }
  0x72   :  { %v1751_v33 = vor.u32 %v2178_v25, %v1750_v23  ;;  %v1494_v12 = vld [vmem:[%s3347_s1 + $0x30] sm:$0xf]  ;;  %v1696_v23 = vld [vmem:[%s3347_s1 + $0x1f8] sm:$0xf0] }
  0x73   :  { %1207 = vmatpush.bf16.msra.mxu2 %v1479_v26  ;;  %v2170_v26 = vld [vmem:[%s3347_s1 + $0x234] sm:$0xf]  ;;  %v2114_v13 = vld [vmem:[%s3347_s1 + $0x6c] sm:$0xf0] }
  0x74   :  { %1234 = vmatmul.bf16.vlgmr.msra.gmra.mxu0 %v2526_v52  ;;  %1283 = vmatpush.bf16.msrb.mxu1 %v1619_v57  ;;  %v1755_v34 = vor.u32 %v2170_v26, %v1752_v27  ;;  %v1759_v57 = vor.u32 %v2179_v50, %v1758_v49  ;;  %v1566_v26 = vld [vmem:[%s3347_s1 + $0xb8] sm:$0xf]  ;;  %v1504_v49 = vld [vmem:[%s3347_s1 + $0x78] sm:$0xf0] }
  0x75   :  { %1297 = vmatpush.bf16.msrb.mxu0 %v2067_v32  ;;  %1258 = vmatpush.bf16.msrb.mxu3 %v1551_v44  ;;  %v1952_v32 = vld [vmem:[%s3347_s1 + $0x3f8] sm:$0xf0]  ;;  %v1823_v44 = vor.u32 %v2195_v36, %v1822_v35  ;;  %v2131_v27 = vld [vmem:[%s3347_s1 + $0xf4] sm:$0xf0] }
  0x76   :  { %1208 = vmatmul.bf16.vlgmr.msra.gmra.mxu2 %v2526_v52  ;;  %v2139_v35 = vld [vmem:[%s3347_s1 + $0x13c] sm:$0xf] }
  0x77   :  { %1271 = vmatpush.bf16.msrb.mxu2 %v2063_v31  ;;  %v2219_v31 = vld [vmem:[%s3347_s1 + $0x3bc] sm:$0xf] }
  0x78   :  { %1284 = vmatpush.bf16.msrb.mxu1 %v1555_v7  ;;  %v1955_v43 = vor.u32 %v2219_v31, %v1952_v32  ;;  %v1760_v7 = vld [vmem:[%s3347_s1 + $0x278] sm:$0xf0]  ;;  %v1699_v31 = vor.u32 %v2155_v22, %v1696_v23  ;;  %v2243_v32 = vld [vmem:[%s3347_s1 + $0x474] sm:$0xf0] }
  0x79   :  { %1298 = vmatpush.bf16.msrb.mxu0 %v2003_v48  ;;  %1259 = vmatpush.bf16.msrb.mxu3 %v1487_v61  ;;  %v1691_v48 = vor.u32 %v2154_v41, %v1688_v42  ;;  %v1627_v61 = vor.u32 %v2138_v54, %v1624_v55  ;;  %v1632_v36 = vld [vmem:[%s3347_s1 + $0x178] sm:$0xf0] }
  0x7b   :  { %1272 = vmatpush.bf16.msrb.mxu2 %v1999_v37  ;;  %v1687_v37 = vor.u32 %v2162_v40, %v1686_v38  ;;  %v1567_v38 = vor.u32 %v2131_v27, %v1566_v26  ;;  %v2115_v40 = vld [vmem:[%s3347_s1 + $0x74] sm:$0xf0] }
  0x7c   :  { %1260 = vmatmul.bf16.vlgmr.msrb.gmra.mxu3 %v2526_v52  ;;  %1285 = vmatpush.bf16.msrb.mxu1 %v1491_v19  ;;  %v2251_v19 = vld [vmem:[%s3347_s1 + $0x4bc] sm:$0xf] }
  0x7d   :  { %1330 = vmatpush.bf16.msra.mxu0 %v1947_v53  ;;  %1323 = vmatpush.bf16.msra.mxu3 %v2071_v0  ;;  %v2146_v53 = vld [vmem:[%s3347_s1 + $0x16c] sm:$0xf0] }
  0x7e   :  { %v1558_v0 = vld [vmem:[%s3347_s1 + $0xb0] sm:$0xf] }
  0x7f   :  { %1304 = vmatpush.bf16.msra.mxu2 %v1943_v51  ;;  %1286 = vmatmul.bf16.vlgmr.msrb.gmra.mxu1 %v2526_v52  ;;  %v1622_v51 = vld [vmem:[%s3347_s1 + $0x130] sm:$0xf]  ;;  %v1559_v9 = vor.u32 %v2130_v1, %v1558_v0 }
  0x80   :  { %1349 = vmatpush.bf16.msra.mxu1 %v2075_v24  ;;  %v1623_v60 = vor.u32 %v2146_v53, %v1622_v51  ;;  %v1495_v24 = vor.u32 %v2114_v13, %v1494_v12 }
  0x81   :  { %1331 = vmatpush.bf16.msra.mxu0 %v1883_v3  ;;  %1324 = vmatpush.bf16.msra.mxu3 %v2007_v14  ;;  %v1560_v3 = vld [vmem:[%s3347_s1 + $0xf0] sm:$0xf0] }
  0x82   :  { %v2106_v14 = vld [vmem:[%s3347_s1 + $0x34] sm:$0xf] }
  0x83   :  { %1305 = vmatpush.bf16.msra.mxu2 %v1879_v2  ;;  %v2122_v2 = vld [vmem:[%s3347_s1 + $0xb4] sm:$0xf]  ;;  %v1499_v25 = vor.u32 %v2106_v14, %v1496_v15 }
  0x84   :  { %1350 = vmatpush.bf16.msra.mxu1 %v2011_v39  ;;  %2095 = vmatmul.msk.bf16.vlgmr.msrb.gmra.mxu0 %vm988_vm0, %v2385_v47  ;;  %v1563_v10 = vor.u32 %v2122_v2, %v1560_v3  ;;  %v1502_v39 = vld [vmem:[%s3347_s1 + $0x38] sm:$0xf] }
  0x85   :  { %1356 = vmatpush.bf16.msrb.mxu3 %v1951_v17  ;;  %1332 = vmatpush.bf16.msra.mxu0 %v1819_v20  ;;  %v1763_v17 = vor.u32 %v2171_v6, %v1760_v7  ;;  %v2080_v20 = vld [vmem:[%s3347_s1 + $0x4f8] sm:$0xf0]  ;;  %v1503_v46 = vor.u32 %v2115_v40, %v1502_v39 }
  0x86   :  { %2094 = vmatmul.msk.bf16.vlgmr.msrb.gmra.mxu2 %vm988_vm0, %v2385_v47  ;;  %v2083_v29 = vor.u32 %v2251_v19, %v2080_v20 }
  0x87   :  { %1306 = vmatpush.bf16.msra.mxu2 %v1815_v18  ;;  %v2259_v18 = vld [vmem:[%s3347_s1 + $0x4f4] sm:$0xf0] }
  0x88   :  { %1382 = vmatpush.bf16.msrb.mxu1 %v1955_v43  ;;  %v2079_v28 = vor.u32 %v2259_v18, %v2078_v16  ;;  %v1635_v43 = vor.u32 %v2139_v35, %v1632_v36 }
  0x89   :  { %1357 = vmatpush.bf16.msrb.mxu3 %v1887_v30  ;;  %1333 = vmatpush.bf16.msra.mxu0 %v1755_v34  ;;  %v2014_v30 = vld [vmem:[%s3347_s1 + $0x438] sm:$0xf]  ;;  %v2016_v34 = vld [vmem:[%s3347_s1 + $0x478] sm:$0xf0] }
  0x8a   :  { %v2015_v41 = vor.u32 %v2243_v32, %v2014_v30 }
  0x8b   :  { %1307 = vmatpush.bf16.msra.mxu2 %v1751_v33  ;;  %v2235_v33 = vld [vmem:[%s3347_s1 + $0x43c] sm:$0xf] }
  0x8c   :  { %1383 = vmatpush.bf16.msrb.mxu1 %v1891_v56  ;;  %2096 = vmatmul.msk.bf16.vlgmr.msra.gmra.mxu3 %vm988_vm0, %v2385_v47  ;;  %v2019_v42 = vor.u32 %v2235_v33, %v2016_v34 }
  0x8d   :  { %1358 = vmatpush.bf16.msrb.mxu3 %v1823_v44  ;;  %1334 = vmatpush.bf16.msra.mxu0 %v1691_v48  ;;  %v2123_v44 = vld [vmem:[%s3347_s1 + $0xbc] sm:$0xf] }
  0x8e   :  { %v2107_v48 = vld [vmem:[%s3347_s1 + $0x3c] sm:$0xf] }
  0x8f   :  { %1308 = vmatpush.bf16.msra.mxu2 %v1687_v37  ;;  %2097 = vmatmul.msk.bf16.vlgmr.msra.gmra.mxu1 %vm988_vm0, %v2385_v47  ;;  %v1571_v37 = vor.u32 %v2123_v44, %v1568_v45  ;;  %v1507_v53 = vor.u32 %v2107_v48, %v1504_v49 }
  0x90   :  { %1384 = vmatpush.bf16.msrb.mxu1 %v1827_v4 }
  0x91   :  { %1359 = vmatpush.bf16.msrb.mxu3 %v1759_v57  ;;  %1335 = vmatpush.bf16.msra.mxu0 %v1627_v61 }
  0x93   :  { %1309 = vmatpush.bf16.msra.mxu2 %v1623_v60  ;;  %v1040_v50 = vpop.f32.mrf.mxu3  ;;  %v1014_v51 = vpop.f32.mrf.mxu2 }
  0x94   :  { %1385 = vmatpush.bf16.msrb.mxu1 %v1763_v17 }
  0x95   :  { %1360 = vmatpush.bf16.msrb.mxu3 %v1695_v5  ;;  %1336 = vmatpush.bf16.msra.mxu0 %v1563_v10  ;;  %v3305_v59 = vpop.permute.xlu0 %179 }
  0x97   :  { %1310 = vmatpush.bf16.msra.mxu2 %v1559_v9 }
  0x98   :  { %1386 = vmatpush.bf16.msrb.mxu1 %v1699_v31 }
  0x99   :  { %1361 = vmatpush.bf16.msrb.mxu3 %v1631_v21  ;;  %1337 = vmatpush.bf16.msra.mxu0 %v1499_v25 }
  0x9b   :  { %1311 = vmatpush.bf16.msra.mxu2 %v1495_v24  ;;  %v1042_v54 = vpop.f32.mrf.mxu3  ;;  %v1016_v55 = vpop.f32.mrf.mxu2 }
  0x9c   :  { %1338 = vmatmul.bf16.vlgmr.msra.gmra.mxu0 %v2526_v52  ;;  %1387 = vmatpush.bf16.msrb.mxu1 %v1635_v43 }
  0x9d   :  { %1401 = vmatpush.bf16.msrb.mxu0 %v2083_v29  ;;  %1362 = vmatpush.bf16.msrb.mxu3 %v1567_v38 }
  0x9e   :  { %1312 = vmatmul.bf16.vlgmr.msra.gmra.mxu2 %v2526_v52 }
  0x9f   :  { %1375 = vmatpush.bf16.msrb.mxu2 %v2079_v28 }
  0xa0   :  { %1388 = vmatpush.bf16.msrb.mxu1 %v1571_v37 }
  0xa1   :  { %1402 = vmatpush.bf16.msrb.mxu0 %v2019_v42  ;;  %1363 = vmatpush.bf16.msrb.mxu3 %v1503_v46  ;;  %v1001_v56 = vpop.f32.mrf.mxu0 }
  0xa2   :  { %v1002_v61 = vadd.f32 %v1001_v56, %v3305_v59 }
  0xa3   :  { %1376 = vmatpush.bf16.msrb.mxu2 %v2015_v41  ;;  %v1066_v58 = vpop.f32.mrf.mxu3 }
  0xa4   :  { %1364 = vmatmul.bf16.vlgmr.msrb.gmra.mxu3 %v2526_v52  ;;  %1389 = vmatpush.bf16.msrb.mxu1 %v1507_v53  ;;  %v1053_v57 = vpop.f32.mrf.mxu1 }
  0xa5   :  { %v1054_v3 = vadd.f32 %v1053_v57, %v3305_v59 }
  0xa7   :  { %1390 = vmatmul.bf16.vlgmr.msrb.gmra.mxu1 %v2526_v52  ;;  %v1015_v52 = vadd.f32 %v1014_v51, %v1002_v61  ;;  %v1067_v10 = vadd.f32 %v1066_v58, %v1054_v3 }
  0xa9   :  { %v1003_v60 = vpop.f32.mrf.mxu0  ;;  %v1408_v4 = vmax.f32 %v1015_v52, 0.0  ;;  %v1410_v13 = vmax.f32 %v1067_v10, 0.0 }
  0xab   :  { %v1068_v63 = vpop.f32.mrf.mxu3 }
  0xac   :  { %2099 = vmatmul.msk.bf16.vlgmr.msrb.gmra.mxu0 %vm988_vm0, %v2385_v47  ;;  %v1055_v62 = vpop.f32.mrf.mxu1 }
  0xae   :  { %2098 = vmatmul.msk.bf16.vlgmr.msrb.gmra.mxu2 %vm988_vm0, %v2385_v47 }
  0xb1   :  { %v1027_v0 = vpop.f32.mrf.mxu2  ;;  %v1092_v47 = vpop.f32.mrf.mxu0 }
  0xb2   :  { %v1028_v1 = vadd.f32 %v1027_v0, %v3305_v59 }
  0xb4   :  { %v1041_v2 = vadd.f32 %v1040_v50, %v1028_v1  ;;  %v1118_v6 = vpop.f32.mrf.mxu1 }
  0xb6   :  { %v1409_v5 = vmax.f32 %v1041_v2, 0.0 }
  0xb7   :  { %v1079_v8 = vpop.f32.mrf.mxu3 }
  0xb8   :  { %v1424_v7 = vpack.c.bf16 %v1409_v5, %v1408_v4  ;;  %v1080_v9 = vadd.f32 %v1079_v8, %v3305_v59 }
  0xb9   :  { %v1029_v11 = vpop.f32.mrf.mxu2  ;;  %v1094_v15 = vpop.f32.mrf.mxu0 }
  0xba   :  { %1432 = vst [vmem:[%s3350_s3] sm:$0xff] %v1424_v7  ;;  %v1093_v12 = vadd.f32 %v1092_v47, %v1080_v9 }
  0xbc   :  { %v1411_v14 = vmax.f32 %v1093_v12, 0.0  ;;  %v1120_v17 = vpop.f32.mrf.mxu1 }
  0xbe   :  { %v1425_v16 = vpack.c.bf16 %v1411_v14, %v1410_v13 }
  0xbf   :  { %v1081_v18 = vpop.f32.mrf.mxu3 }
  0xc0   :  { %1433 = vst [vmem:[%s3350_s3 + $0x8] sm:$0xff] %v1425_v16 }
  0xc4   :  { %v1144_v19 = vpop.f32.mrf.mxu1 }
  0xc9   :  { %v1131_v20 = vpop.f32.mrf.mxu0 }
  0xca   :  { %v1132_v21 = vadd.f32 %v1131_v20, %v3305_v59 }
  0xcc   :  { %v1145_v22 = vadd.f32 %v1144_v19, %v1132_v21  ;;  %v1146_v25 = vpop.f32.mrf.mxu1 }
  0xce   :  { %v1413_v26 = vmax.f32 %v1145_v22, 0.0 }
  0xd1   :  { %v1105_v23 = vpop.f32.mrf.mxu2  ;;  %v1133_v28 = vpop.f32.mrf.mxu0 }
  0xd2   :  { %v1106_v24 = vadd.f32 %v1105_v23, %v3305_v59 }
  0xd4   :  { %v1119_v27 = vadd.f32 %v1118_v6, %v1106_v24  ;;  %v1183_v34 = vpop.f32.mrf.mxu1 }
  0xd5   :  { %v1184_v36 = vadd.f32 %v1183_v34, %v3305_v59 }
  0xd6   :  { %v1412_v29 = vmax.f32 %v1119_v27, 0.0 }
  0xd7   :  { %v1157_v32 = vpop.f32.mrf.mxu3 }
  0xd8   :  { %v1426_v30 = vpack.c.bf16 %v1413_v26, %v1412_v29  ;;  %v1158_v35 = vadd.f32 %v1157_v32, %v3305_v59 }
  0xd9   :  { %v1107_v31 = vpop.f32.mrf.mxu2  ;;  %v1196_v33 = vpop.f32.mrf.mxu0 }
  0xda   :  { %1434 = vst [vmem:[%s3350_s3 + $0x10] sm:$0xff] %v1426_v30  ;;  %v1197_v38 = vadd.f32 %v1196_v33, %v1184_v36 }
  0xdc   :  { %v1415_v41 = vmax.f32 %v1197_v38, 0.0  ;;  %v1185_v45 = vpop.f32.mrf.mxu1 }
  0xdf   :  { %v1159_v40 = vpop.f32.mrf.mxu3 }
  0xe1   :  { %v1170_v39 = vpop.f32.mrf.mxu2  ;;  %v1198_v44 = vpop.f32.mrf.mxu0 }
  0xe2   :  { %v1171_v42 = vadd.f32 %v1170_v39, %v1158_v35 }
  0xe4   :  { %v1414_v43 = vmax.f32 %v1171_v42, 0.0  ;;  %v1248_v49 = vpop.f32.mrf.mxu1 }
  0xe6   :  { %v1427_v46 = vpack.c.bf16 %v1415_v41, %v1414_v43 }
  0xe7   :  { %v1222_v48 = vpop.f32.mrf.mxu3 }
  0xe8   :  { %1435 = vst [vmem:[%s3350_s3 + $0x18] sm:$0xff] %v1427_v46 }
  0xe9   :  { %v1172_v37 = vpop.f32.mrf.mxu2 }
  0xec   :  { %v1250_v57 = vpop.f32.mrf.mxu1 }
  0xef   :  { %v1224_v53 = vpop.f32.mrf.mxu3 }
  0xf1   :  { %v1235_v50 = vpop.f32.mrf.mxu0 }
  0xf2   :  { %v1236_v51 = vadd.f32 %v1235_v50, %v3305_v59 }
  0xf4   :  { %v1249_v54 = vadd.f32 %v1248_v49, %v1236_v51 }
  0xf6   :  { %v1417_v58 = vmax.f32 %v1249_v54, 0.0 }
  0xf9   :  { %v1209_v55 = vpop.f32.mrf.mxu2  ;;  %v1237_v61 = vpop.f32.mrf.mxu0 }
  0xfa   :  { %v1210_v56 = vadd.f32 %v1209_v55, %v3305_v59 }
  0xfc   :  { %v1223_v60 = vadd.f32 %v1222_v48, %v1210_v56  ;;  %v1287_v1 = vpop.f32.mrf.mxu1 }
  0xfd   :  { %v1288_v2 = vadd.f32 %v1287_v1, %v3305_v59 }
  0xfe   :  { %v1416_v62 = vmax.f32 %v1223_v60, 0.0 }
  0xff   :  { %v1261_v52 = vpop.f32.mrf.mxu3 }
 0x100   :  { %v1428_v63 = vpack.c.bf16 %v1417_v58, %v1416_v62  ;;  %v1262_v4 = vadd.f32 %v1261_v52, %v3305_v59 }
 0x101   :  { %v1211_v0 = vpop.f32.mrf.mxu2  ;;  %v1300_v3 = vpop.f32.mrf.mxu0 }
 0x102   :  { %1436 = vst [vmem:[%s3350_s3 + $0x20] sm:$0xff] %v1428_v63  ;;  %v1301_v5 = vadd.f32 %v1300_v3, %v1288_v2 }
 0x104   :  { %v1289_v7 = vpop.f32.mrf.mxu1  ;;  %v1419_v8 = vmax.f32 %v1301_v5, 0.0 }
 0x107   :  { %v1263_v47 = vpop.f32.mrf.mxu3 }
 0x109   :  { %v1274_v6 = vpop.f32.mrf.mxu2  ;;  %v1302_v11 = vpop.f32.mrf.mxu0 }
 0x10a   :  { %v1275_v9 = vadd.f32 %v1274_v6, %v1262_v4 }
 0x10c   :  { %v1418_v10 = vmax.f32 %v1275_v9, 0.0  ;;  %v1352_v15 = vpop.f32.mrf.mxu1 }
 0x10e   :  { %v1429_v12 = vpack.c.bf16 %v1419_v8, %v1418_v10 }
 0x10f   :  { %v1326_v14 = vpop.f32.mrf.mxu3 }
 0x110   :  { %1437 = vst [vmem:[%s3350_s3 + $0x28] sm:$0xff] %v1429_v12 }
 0x111   :  { %v1276_v13 = vpop.f32.mrf.mxu2 }
 0x114   :  { %v1354_v19 = vpop.f32.mrf.mxu1 }
 0x117   :  { %v1328_v18 = vpop.f32.mrf.mxu3 }
 0x119   :  { %v1339_v16 = vpop.f32.mrf.mxu0 }
 0x11a   :  { %v1340_v17 = vadd.f32 %v1339_v16, %v3305_v59 }
 0x11c   :  { %v1353_v21 = vadd.f32 %v1352_v15, %v1340_v17 }
 0x11e   :  { %v1421_v25 = vmax.f32 %v1353_v21, 0.0 }
 0x121   :  { %v1313_v20 = vpop.f32.mrf.mxu2  ;;  %v1341_v23 = vpop.f32.mrf.mxu0 }
 0x122   :  { %v1314_v22 = vadd.f32 %v1313_v20, %v3305_v59 }
 0x124   :  { %v1327_v24 = vadd.f32 %v1326_v14, %v1314_v22  ;;  %v1391_v29 = vpop.f32.mrf.mxu1 }
 0x125   :  { %v1392_v31 = vadd.f32 %v1391_v29, %v3305_v59 }
 0x126   :  { %v1420_v26 = vmax.f32 %v1327_v24, 0.0 }
 0x127   :  { %v1365_v28 = vpop.f32.mrf.mxu3 }
 0x128   :  { %v1430_v27 = vpack.c.bf16 %v1421_v25, %v1420_v26  ;;  %v1366_v33 = vadd.f32 %v1365_v28, %v3305_v59 }
 0x129   :  { %v1315_v30 = vpop.f32.mrf.mxu2  ;;  %v1404_v32 = vpop.f32.mrf.mxu0 }
 0x12a   :  { %1438 = vst [vmem:[%s3350_s3 + $0x30] sm:$0xff] %v1430_v27  ;;  %v1405_v34 = vadd.f32 %v1404_v32, %v1392_v31 }
 0x12c   :  { %v1393_v36 = vpop.f32.mrf.mxu1  ;;  %v1423_v39 = vmax.f32 %v1405_v34, 0.0 }
 0x12f   :  { %v1367_v35 = vpop.f32.mrf.mxu3 }
 0x131   :  { %v1378_v38 = vpop.f32.mrf.mxu2  ;;  %v1406_v41 = vpop.f32.mrf.mxu0 }
 0x132   :  { %v1379_v40 = vadd.f32 %v1378_v38, %v1366_v33 }
 0x134   :  { %v1422_v42 = vmax.f32 %v1379_v40, 0.0 }
 0x136   :  { %v1431_v43 = vpack.c.bf16 %v1423_v39, %v1422_v42 }
 0x138   :  { %1439 = vst [vmem:[%s3350_s3 + $0x38] sm:$0xff] %v1431_v43 }
 0x139   :  { %v1380_v44 = vpop.f32.mrf.mxu2 }

// kernel: qvitdr_forward.4
= control target key start
LH: loop header
LB: loop body
LE: loop exit
PB: predicated region body
PF: predicated region fallthrough
CT: control target
= control target key end

     0   :  { %v425_v3 = vmov 0   ;;  %vm74_vm0 = vcmask 654336   ;;  %s518_s1 = inlined_call_operand.vmem [shape: bf16[4,80,128], index: 1, kind: input, shape index: {}]   ;;  %s519_s2 = inlined_call_operand.vmem [shape: f32[16,1], index: 2, kind: input, shape index: {}]   ;;  %s520_s0 = inlined_call_operand.vmem [shape: bf16[16,80], index: 0, kind: input, shape index: {}]   ;;  %s521_s3 = inlined_call_operand.vmem [shape: bf16[16,128], index: 3, kind: output, shape index: {}]  }
   0x1   :  { %v402_v0 = vld [vmem:[%s518_s1 + $0x20] sm:$0xff]  ;;  %v407_v1 = vld [vmem:[%s518_s1 + $0x48] sm:$0xff]  ;;  %v412_v2 = vld [vmem:[%s518_s1 + $0x70] sm:$0xff]  ;;  %424 = vset.pattern.permute.xlu0 %v425_v3 }
   0x2   :  { %v417_v4 = vld [vmem:[%s518_s1 + $0x98] sm:$0xff]  ;;  %81 = vmatpush.bf16.msra.mxu0 %v402_v0  ;;  %138 = vmatpush.bf16.msra.mxu1 %v407_v1  ;;  %v406_v6 = vld [vmem:[%s518_s1 + $0x40] sm:$0xff]  ;;  %v411_v7 = vld [vmem:[%s518_s1 + $0x68] sm:$0xff] }
   0x3   :  { %v401_v5 = vld [vmem:[%s518_s1 + $0x18] sm:$0xff]  ;;  %197 = vmatpush.bf16.msra.mxu2 %v412_v2  ;;  %256 = vmatpush.bf16.msra.mxu3 %v417_v4  ;;  %v416_v8 = vld [vmem:[%s518_s1 + $0x90] sm:$0xff]  ;;  %v410_v11 = vld [vmem:[%s518_s1 + $0x60] sm:$0xff] }
   0x4   :  { %v400_v9 = vld [vmem:[%s518_s1 + $0x10] sm:$0xff]  ;;  %v405_v10 = vld [vmem:[%s518_s1 + $0x38] sm:$0xff]  ;;  %v415_v12 = vld [vmem:[%s518_s1 + $0x88] sm:$0xff] }
   0x5   :  { %v27_v13 = vld [vmem:[%s519_s2] sm:$0xff]  ;;  %v399_v14 = vld [vmem:[%s518_s1 + $0x8] sm:$0xff]  ;;  %v404_v15 = vld [vmem:[%s518_s1 + $0x30] sm:$0xff] }
   0x6   :  { %82 = vmatpush.bf16.msra.mxu0 %v401_v5  ;;  %139 = vmatpush.bf16.msra.mxu1 %v406_v6  ;;  %v409_v16 = vld [vmem:[%s518_s1 + $0x58] sm:$0xff]  ;;  %v414_v17 = vld [vmem:[%s518_s1 + $0x80] sm:$0xff]  ;;  %v28_v18 = vld [vmem:[%s519_s2 + $0x8] sm:$0xff] }
   0x7   :  { %198 = vmatpush.bf16.msra.mxu2 %v411_v7  ;;  %257 = vmatpush.bf16.msra.mxu3 %v416_v8  ;;  %v398_v19 = vld [vmem:[%s518_s1] sm:$0xff]  ;;  %v403_v20 = vld [vmem:[%s518_s1 + $0x28] sm:$0xff]  ;;  %v408_v21 = vld [vmem:[%s518_s1 + $0x50] sm:$0xff] }
   0x8   :  { %31 = vperm.xlu0 %424, %v27_v13   ;;  %v413_v22 = vld [vmem:[%s518_s1 + $0x78] sm:$0xff]  ;;  %v397_v23 = vld [vmem:[%s520_s0] sm:$0xff] }
   0xa   :  { %83 = vmatpush.bf16.msra.mxu0 %v400_v9  ;;  %140 = vmatpush.bf16.msra.mxu1 %v405_v10 }
   0xb   :  { %199 = vmatpush.bf16.msra.mxu2 %v410_v11  ;;  %258 = vmatpush.bf16.msra.mxu3 %v415_v12 }
   0xe   :  { %84 = vmatpush.bf16.msra.mxu0 %v399_v14  ;;  %141 = vmatpush.bf16.msra.mxu1 %v404_v15 }
   0xf   :  { %200 = vmatpush.bf16.msra.mxu2 %v409_v16  ;;  %259 = vmatpush.bf16.msra.mxu3 %v414_v17 }
  0x10   :  { %36 = vperm.xlu0 %424, %v28_v18  }
  0x12   :  { %85 = vmatpush.bf16.msra.mxu0 %v398_v19  ;;  %142 = vmatpush.bf16.msra.mxu1 %v403_v20 }
  0x13   :  { %201 = vmatpush.bf16.msra.mxu2 %v408_v21  ;;  %260 = vmatpush.bf16.msra.mxu3 %v413_v22 }
  0x15   :  { %303 = vmatmul.msk.bf16.vlgmr.msra.gmra.mxu0 %vm74_vm0, %v397_v23  ;;  %334 = vmatmul.msk.bf16.vlgmr.msra.gmra.mxu1 %vm74_vm0, %v397_v23 }
  0x16   :  { %365 = vmatmul.msk.bf16.vlgmr.msra.gmra.mxu2 %vm74_vm0, %v397_v23  ;;  %396 = vmatmul.msk.bf16.vlgmr.msra.gmra.mxu3 %vm74_vm0, %v397_v23 }
  0x7a   :  { %v32_v24 = vpop.permute.xlu0 %31 }
  0x82   :  { %v37_v34 = vpop.permute.xlu0 %36 }
  0x92   :  { %v87_v25 = vpop.f32.mrf.mxu0  ;;  %v144_v26 = vpop.f32.mrf.mxu1 }
  0x93   :  { %v88_v27 = vadd.f32 %v87_v25, %v32_v24  ;;  %v145_v28 = vadd.f32 %v144_v26, %v32_v24 }
  0x95   :  { %v92_v33 = vmax.f32 %v88_v27, 0.0  ;;  %v149_v35 = vmax.f32 %v145_v28, 0.0 }
  0x97   :  { %v151_v39 = vmax.f32 %v92_v33, %v149_v35 }
  0x99   :  { %v203_v29 = vpop.f32.mrf.mxu2  ;;  %v262_v30 = vpop.f32.mrf.mxu3 }
  0x9a   :  { %v89_v31 = vpop.f32.mrf.mxu0  ;;  %v146_v32 = vpop.f32.mrf.mxu1  ;;  %v204_v36 = vadd.f32 %v203_v29, %v32_v24  ;;  %v263_v45 = vadd.f32 %v262_v30, %v32_v24 }
  0x9b   :  { %v90_v37 = vadd.f32 %v89_v31, %v37_v34  ;;  %v147_v38 = vadd.f32 %v146_v32, %v37_v34 }
  0x9c   :  { %v208_v40 = vmax.f32 %v204_v36, 0.0  ;;  %v267_v51 = vmax.f32 %v263_v45, 0.0 }
  0x9d   :  { %v93_v41 = vmax.f32 %v90_v37, 0.0  ;;  %v150_v42 = vmax.f32 %v147_v38, 0.0 }
  0x9e   :  { %v210_v48 = vmax.f32 %v151_v39, %v208_v40 }
  0x9f   :  { %v152_v49 = vmax.f32 %v93_v41, %v150_v42 }
  0xa0   :  { %v269_v54 = vmax.f32 %v210_v48, %v267_v51 }
  0xa1   :  { %v205_v43 = vpop.f32.mrf.mxu2  ;;  %v264_v44 = vpop.f32.mrf.mxu3 }
  0xa2   :  { %v206_v46 = vadd.f32 %v205_v43, %v37_v34  ;;  %v265_v47 = vadd.f32 %v264_v44, %v37_v34 }
  0xa4   :  { %v209_v50 = vmax.f32 %v206_v46, 0.0  ;;  %v268_v53 = vmax.f32 %v265_v47, 0.0 }
  0xa6   :  { %v211_v52 = vmax.f32 %v152_v49, %v209_v50 }
  0xa8   :  { %v270_v55 = vmax.f32 %v211_v52, %v268_v53 }
  0xaa   :  { %v421_v56 = vpack.c.bf16 %v270_v55, %v269_v54 }
  0xac   :  { %422 = vst [vmem:[%s521_s3] sm:$0xff] %v421_v56  }

// kernel: qvitdr_forward.5
= control target key start
LH: loop header
LB: loop body
LE: loop exit
PB: predicated region body
PF: predicated region fallthrough
CT: control target
= control target key end

     0   :  { %vm243_vm0 = vcmask 130048   ;;  %s7759_s18 = smov 64   ;;  %vm1274_vm1 = vcmask 261120   ;;  %vm2477_vm2 = vcmask 1043456   ;;  %vm2464_vm3 = vcmask 64512   ;;  %s7764_s22 = smov 124   ;;  %s11132_s1 = inlined_call_operand.vmem [shape: bf16[9,128,128], index: 1, kind: input, shape index: {}]   ;;  %s11133_s0 = inlined_call_operand.vmem [shape: bf16[16,128], index: 0, kind: input, shape index: {}]   ;;  %s11134_s2 = inlined_call_operand.vmem [shape: bf16[9,32,16], index: 2, kind: input, shape index: {}]   ;;  %s11135_s3 = inlined_call_operand.vmem [shape: f32[32,1], index: 3, kind: input, shape index: {}]   ;;  %s11136_s6 = inlined_call_operand.vmem [shape: f32[64,1], index: 6, kind: input, shape index: {}]   ;;  %s11137_s4 = inlined_call_operand.vmem [shape: bf16[9,32,32], index: 4, kind: input, shape index: {}]   ;;  %s11138_s5 = inlined_call_operand.vmem [shape: bf16[9,64,32], index: 5, kind: input, shape index: {}]   ;;  %s11139_s7 = inlined_call_operand.vmem [shape: bf16[9,8,8], index: 7, kind: input, shape index: {}]   ;;  %s11140_s9 = inlined_call_operand.vmem [shape: f32[64,1], index: 9, kind: input, shape index: {}]   ;;  %s11141_s8 = inlined_call_operand.vmem [shape: bf16[9,64,64], index: 8, kind: input, shape index: {}]   ;;  %s11142_s10 = inlined_call_operand.vmem [shape: f32[2,2], index: 10, kind: input, shape index: {}]   ;;  %s11143_s12 = inlined_call_operand.vmem [shape: f32[64,1], index: 12, kind: input, shape index: {}]   ;;  %s11144_s14 = inlined_call_operand.vmem [shape: f32[512,1], index: 14, kind: input, shape index: {}]   ;;  %s11145_s16 = inlined_call_operand.vmem [shape: f32[5,1], index: 16, kind: input, shape index: {}]   ;;  %s11146_s11 = inlined_call_operand.vmem [shape: f32[64,64], index: 11, kind: input, shape index: {}]   ;;  %s11147_s13 = inlined_call_operand.vmem [shape: f32[512,64], index: 13, kind: input, shape index: {}]   ;;  %s11148_s15 = inlined_call_operand.vmem [shape: f32[5,512], index: 15, kind: input, shape index: {}]   ;;  %s11149_s17 = inlined_call_operand.vmem [shape: f32[5,2], index: 17, kind: output, shape index: {}]  }
   0x1   :  { %11188 = sst [smem:[#allocation58_spill]] %s11132_s1  ;;  %v7461_v31 = vld [vmem:[%s11134_s2 + $0x10] sm:$0xff]  ;;  %v7451_v33 = vld [vmem:[%s11134_s2] sm:$0xff]  ;;  %v7462_v38 = vld [vmem:[%s11134_s2 + $0x18] sm:$0xff]  ;;  %vm11184_vm4 = vcmask 523264   ;;  %vm3710_vm5 = vcmask 1041408  }
   0x2   :  { %11189 = sst [smem:[#allocation59_spill]] %s11133_s0  ;;  %v7452_v39 = vld [vmem:[%s11134_s2 + $0x8] sm:$0xff]  ;;  %v7481_v48 = vld [vmem:[%s11134_s2 + $0x30] sm:$0xff]  ;;  %v7482_v57 = vld [vmem:[%s11134_s2 + $0x38] sm:$0xff]  ;;  %vm3685_vm6 = vcmask 15360  }
   0x3   :  { %s11190_s26 = sld [smem:[#allocation58_spill]] }
   0x4   :  { %s11191_s19 = sld [smem:[#allocation59_spill]] }
   0x9   :  { %v7460_v0 = vld [vmem:[%s11190_s26 + $0x78] sm:$0xff]  ;;  %v7459_v2 = vld [vmem:[%s11190_s26 + $0x70] sm:$0xff]  ;;  %v7458_v4 = vld [vmem:[%s11190_s26 + $0x68] sm:$0xff] }
   0xa   :  { %v7450_v1 = vld [vmem:[%s11190_s26 + $0x38] sm:$0xff]  ;;  %213 = vmatpush.bf16.msra.mxu1 %v7460_v0  ;;  %v7449_v3 = vld [vmem:[%s11190_s26 + $0x30] sm:$0xff]  ;;  %v7448_v5 = vld [vmem:[%s11190_s26 + $0x28] sm:$0xff] }
   0xb   :  { %129 = vmatpush.bf16.msra.mxu0 %v7450_v1  ;;  %v7457_v6 = vld [vmem:[%s11190_s26 + $0x60] sm:$0xff]  ;;  %v7456_v8 = vld [vmem:[%s11190_s26 + $0x58] sm:$0xff]  ;;  %v7455_v10 = vld [vmem:[%s11190_s26 + $0x50] sm:$0xff] }
   0xc   :  { %v7447_v7 = vld [vmem:[%s11190_s26 + $0x20] sm:$0xff]  ;;  %v7446_v9 = vld [vmem:[%s11190_s26 + $0x18] sm:$0xff]  ;;  %v7445_v11 = vld [vmem:[%s11190_s26 + $0x10] sm:$0xff] }
   0xd   :  { %v7454_v12 = vld [vmem:[%s11190_s26 + $0x48] sm:$0xff]  ;;  %v7453_v14 = vld [vmem:[%s11190_s26 + $0x40] sm:$0xff]  ;;  %v7480_v16 = vld [vmem:[%s11190_s26 + $0xf8] sm:$0xff] }
   0xe   :  { %214 = vmatpush.bf16.msra.mxu1 %v7459_v2  ;;  %v7444_v13 = vld [vmem:[%s11190_s26 + $0x8] sm:$0xff]  ;;  %v7443_v15 = vld [vmem:[%s11190_s26] sm:$0xff]  ;;  %v7479_v18 = vld [vmem:[%s11190_s26 + $0xf0] sm:$0xff] }
   0xf   :  { %130 = vmatpush.bf16.msra.mxu0 %v7449_v3  ;;  %v7916_v17 = vld [vmem:[%s11191_s19] sm:$0xff]  ;;  %v7478_v19 = vld [vmem:[%s11190_s26 + $0xe8] sm:$0xff]  ;;  %v7476_v21 = vld [vmem:[%s11190_s26 + $0xd8] sm:$0xff]  ;;  %s7762_s19 = smov 120  }
  0x10   :  { %v7477_v20 = vld [vmem:[%s11190_s26 + $0xe0] sm:$0xff]  ;;  %v7475_v22 = vld [vmem:[%s11190_s26 + $0xd0] sm:$0xff]  ;;  %v7474_v23 = vld [vmem:[%s11190_s26 + $0xc8] sm:$0xff] }
  0x11   :  { %v7473_v24 = vld [vmem:[%s11190_s26 + $0xc0] sm:$0xff]  ;;  %v7470_v28 = vld [vmem:[%s11190_s26 + $0xb8] sm:$0xff]  ;;  %v7469_v34 = vld [vmem:[%s11190_s26 + $0xb0] sm:$0xff] }
  0x12   :  { %215 = vmatpush.bf16.msra.mxu1 %v7458_v4  ;;  %v7468_v35 = vld [vmem:[%s11190_s26 + $0xa8] sm:$0xff]  ;;  %v7467_v36 = vld [vmem:[%s11190_s26 + $0xa0] sm:$0xff]  ;;  %v7466_v37 = vld [vmem:[%s11190_s26 + $0x98] sm:$0xff] }
  0x13   :  { %131 = vmatpush.bf16.msra.mxu0 %v7448_v5  ;;  %v7465_v40 = vld [vmem:[%s11190_s26 + $0x90] sm:$0xff]  ;;  %v7464_v42 = vld [vmem:[%s11190_s26 + $0x88] sm:$0xff]  ;;  %v7463_v43 = vld [vmem:[%s11190_s26 + $0x80] sm:$0xff] }
  0x14   :  { %v7490_v44 = vld [vmem:[%s11190_s26 + $0x138] sm:$0xff]  ;;  %v7489_v49 = vld [vmem:[%s11190_s26 + $0x130] sm:$0xff]  ;;  %v7488_v51 = vld [vmem:[%s11190_s26 + $0x128] sm:$0xff] }
  0x15   :  { %v7500_v46 = vld [vmem:[%s11190_s26 + $0x178] sm:$0xff]  ;;  %v7499_v50 = vld [vmem:[%s11190_s26 + $0x170] sm:$0xff]  ;;  %v7498_v52 = vld [vmem:[%s11190_s26 + $0x168] sm:$0xff] }
  0x16   :  { %216 = vmatpush.bf16.msra.mxu1 %v7457_v6  ;;  %v7487_v53 = vld [vmem:[%s11190_s26 + $0x120] sm:$0xff]  ;;  %v7486_v55 = vld [vmem:[%s11190_s26 + $0x118] sm:$0xff]  ;;  %v7485_v58 = vld [vmem:[%s11190_s26 + $0x110] sm:$0xff] }
  0x17   :  { %132 = vmatpush.bf16.msra.mxu0 %v7447_v7  ;;  %v7497_v54 = vld [vmem:[%s11190_s26 + $0x160] sm:$0xff]  ;;  %v7496_v56 = vld [vmem:[%s11190_s26 + $0x158] sm:$0xff]  ;;  %v7495_v59 = vld [vmem:[%s11190_s26 + $0x150] sm:$0xff] }
  0x18   :  { %v7484_v60 = vld [vmem:[%s11190_s26 + $0x108] sm:$0xff]  ;;  %v7483_v62 = vld [vmem:[%s11190_s26 + $0x100] sm:$0xff]  ;;  %v7510_v63 = vld [vmem:[%s11190_s26 + $0x1b8] sm:$0xff] }
  0x19   :  { %v7494_v61 = vld [vmem:[%s11190_s26 + $0x148] sm:$0xff]  ;;  %v7493_v0 = vld [vmem:[%s11190_s26 + $0x140] sm:$0xff]  ;;  %v7509_v1 = vld [vmem:[%s11190_s26 + $0x1b0] sm:$0xff] }
  0x1a   :  { %217 = vmatpush.bf16.msra.mxu1 %v7456_v8  ;;  %v7508_v2 = vld [vmem:[%s11190_s26 + $0x1a8] sm:$0xff]  ;;  %v7507_v3 = vld [vmem:[%s11190_s26 + $0x1a0] sm:$0xff]  ;;  %v7506_v4 = vld [vmem:[%s11190_s26 + $0x198] sm:$0xff] }
  0x1b   :  { %133 = vmatpush.bf16.msra.mxu0 %v7446_v9  ;;  %v7505_v5 = vld [vmem:[%s11190_s26 + $0x190] sm:$0xff]  ;;  %v7504_v6 = vld [vmem:[%s11190_s26 + $0x188] sm:$0xff]  ;;  %v7503_v7 = vld [vmem:[%s11190_s26 + $0x180] sm:$0xff] }
  0x1e   :  { %218 = vmatpush.bf16.msra.mxu1 %v7455_v10 }
  0x1f   :  { %134 = vmatpush.bf16.msra.mxu0 %v7445_v11 }
  0x22   :  { %219 = vmatpush.bf16.msra.mxu1 %v7454_v12 }
  0x23   :  { %135 = vmatpush.bf16.msra.mxu0 %v7444_v13 }
  0x26   :  { %220 = vmatpush.bf16.msra.mxu1 %v7453_v14 }
  0x27   :  { %136 = vmatpush.bf16.msra.mxu0 %v7443_v15 }
  0x29   :  { %221 = vmatmul.bf16.vlgmr.msra.gmra.mxu1 %v7916_v17 }
  0x2a   :  { %137 = vmatmul.bf16.vlgmr.msra.gmra.mxu0 %v7916_v17 }
  0x2b   :  { %493 = vmatpush.bf16.msrb.mxu0 %v7480_v16 }
  0x2f   :  { %494 = vmatpush.bf16.msrb.mxu0 %v7479_v18 }
  0x33   :  { %495 = vmatpush.bf16.msrb.mxu0 %v7478_v19 }
  0x37   :  { %496 = vmatpush.bf16.msrb.mxu0 %v7477_v20 }
  0x3b   :  { %497 = vmatpush.bf16.msrb.mxu0 %v7476_v21 }
  0x3f   :  { %498 = vmatpush.bf16.msrb.mxu0 %v7475_v22 }
  0x43   :  { %499 = vmatpush.bf16.msrb.mxu0 %v7474_v23 }
  0x47   :  { %500 = vmatpush.bf16.msrb.mxu0 %v7473_v24  ;;  %v7471_v24 = vld [vmem:[%s11134_s2 + $0x20] sm:$0xff] }
  0x4a   :  { %501 = vmatmul.bf16.vlgmr.msrb.gmra.mxu0 %v7916_v17 }
  0xa6   :  { %v222_v25 = vpop.f32.mrf.mxu1 }
  0xa7   :  { %v138_v26 = vpop.f32.mrf.mxu0 }
  0xae   :  { %v224_v27 = vpop.f32.mrf.mxu1 }
  0xaf   :  { %v227_v29 = vpack.c.bf16 %v224_v27, %v222_v25  ;;  %v140_v30 = vpop.f32.mrf.mxu0  ;;  %v7472_v27 = vld [vmem:[%s11134_s2 + $0x28] sm:$0xff] }
  0xb0   :  { %v143_v32 = vpack.c.bf16 %v140_v30, %v138_v26 }
  0xb1   :  { %257 = vmatpush.bf16.msra.mxu2 %v227_v29 }
  0xb2   :  { %292 = vmatpush.bf16.msra.mxu3 %v143_v32  ;;  %v7520_v32 = vld [vmem:[%s11190_s26 + $0x1f8] sm:$0xff] }
  0xb4   :  { %6229 = vmatmul.msk.bf16.vlgmr.msra.gmra.mxu2 %vm243_vm0, %v7461_v31 }
  0xb5   :  { %369 = vmatpush.bf16.msrb.mxu2 %v7470_v28  ;;  %6239 = vmatmul.msk.bf16.vlgmr.msra.gmra.mxu3 %vm243_vm0, %v7451_v33  ;;  %v7501_v33 = vld [vmem:[%s11134_s2 + $0x50] sm:$0xff] }
  0xb9   :  { %370 = vmatpush.bf16.msrb.mxu2 %v7469_v34 }
  0xbd   :  { %371 = vmatpush.bf16.msrb.mxu2 %v7468_v35  ;;  %v7519_v35 = vld [vmem:[%s11190_s26 + $0x1f0] sm:$0xff] }
  0xc1   :  { %372 = vmatpush.bf16.msrb.mxu2 %v7467_v36  ;;  %v7491_v36 = vld [vmem:[%s11134_s2 + $0x40] sm:$0xff] }
  0xc4   :  { %6230 = vmatmul.msk.bf16.gmra.mxu2 %vm243_vm0, %v7462_v38  ;;  %v7517_v38 = vld [vmem:[%s11190_s26 + $0x1e0] sm:$0xff] }
  0xc5   :  { %373 = vmatpush.bf16.msrb.mxu2 %v7466_v37  ;;  %6240 = vmatmul.msk.bf16.gmra.mxu3 %vm243_vm0, %v7452_v39  ;;  %v7518_v37 = vld [vmem:[%s11190_s26 + $0x1e8] sm:$0xff]  ;;  %v7502_v39 = vld [vmem:[%s11134_s2 + $0x58] sm:$0xff] }
  0xc7   :  { %v502_v41 = vpop.f32.mrf.mxu0 }
  0xc9   :  { %374 = vmatpush.bf16.msrb.mxu2 %v7465_v40  ;;  %v7516_v40 = vld [vmem:[%s11190_s26 + $0x1d8] sm:$0xff] }
  0xcd   :  { %375 = vmatpush.bf16.msrb.mxu2 %v7464_v42  ;;  %v7515_v42 = vld [vmem:[%s11190_s26 + $0x1d0] sm:$0xff] }
  0xcf   :  { %v504_v45 = vpop.f32.mrf.mxu0 }
  0xd0   :  { %v507_v47 = vpack.c.bf16 %v504_v45, %v502_v41 }
  0xd1   :  { %376 = vmatpush.bf16.msrb.mxu2 %v7463_v43  ;;  %v7492_v43 = vld [vmem:[%s11134_s2 + $0x48] sm:$0xff] }
  0xd2   :  { %536 = vmatpush.bf16.msrb.mxu1 %v507_v47  ;;  %v7513_v47 = vld [vmem:[%s11190_s26 + $0x1c0] sm:$0xff] }
  0xd4   :  { %377 = vmatmul.bf16.vlgmr.msrb.gmra.mxu2 %v7916_v17 }
  0xd5   :  { %617 = vmatpush.bf16.msra.mxu2 %v7490_v44  ;;  %6363 = vmatmul.msk.bf16.vlgmr.msrb.gmra.mxu1 %vm243_vm0, %v7481_v48  ;;  %v7514_v44 = vld [vmem:[%s11190_s26 + $0x1c8] sm:$0xff] }
  0xd6   :  { %741 = vmatpush.bf16.msra.mxu1 %v7500_v46  ;;  %v7530_v46 = vld [vmem:[%s11190_s26 + $0x238] sm:$0xff] }
  0xd9   :  { %618 = vmatpush.bf16.msra.mxu2 %v7489_v49  ;;  %v7511_v49 = vld [vmem:[%s11134_s2 + $0x60] sm:$0xff] }
  0xda   :  { %742 = vmatpush.bf16.msra.mxu1 %v7499_v50  ;;  %v7529_v50 = vld [vmem:[%s11190_s26 + $0x230] sm:$0xff] }
  0xdd   :  { %619 = vmatpush.bf16.msra.mxu2 %v7488_v51  ;;  %v7528_v51 = vld [vmem:[%s11190_s26 + $0x228] sm:$0xff] }
  0xde   :  { %743 = vmatpush.bf16.msra.mxu1 %v7498_v52  ;;  %v7527_v52 = vld [vmem:[%s11190_s26 + $0x220] sm:$0xff] }
  0xe1   :  { %620 = vmatpush.bf16.msra.mxu2 %v7487_v53  ;;  %v7526_v53 = vld [vmem:[%s11190_s26 + $0x218] sm:$0xff] }
  0xe2   :  { %744 = vmatpush.bf16.msra.mxu1 %v7497_v54  ;;  %v7512_v54 = vld [vmem:[%s11134_s2 + $0x68] sm:$0xff] }
  0xe5   :  { %621 = vmatpush.bf16.msra.mxu2 %v7486_v55  ;;  %6364 = vmatmul.msk.bf16.gmra.mxu1 %vm243_vm0, %v7482_v57  ;;  %v7525_v55 = vld [vmem:[%s11190_s26 + $0x210] sm:$0xff]  ;;  %v7523_v57 = vld [vmem:[%s11190_s26 + $0x200] sm:$0xff] }
  0xe6   :  { %745 = vmatpush.bf16.msra.mxu1 %v7496_v56  ;;  %v7524_v56 = vld [vmem:[%s11190_s26 + $0x208] sm:$0xff] }
  0xe9   :  { %622 = vmatpush.bf16.msra.mxu2 %v7485_v58 }
  0xea   :  { %746 = vmatpush.bf16.msra.mxu1 %v7495_v59 }
  0xed   :  { %623 = vmatpush.bf16.msra.mxu2 %v7484_v60 }
  0xee   :  { %747 = vmatpush.bf16.msra.mxu1 %v7494_v61 }
  0xf1   :  { %624 = vmatpush.bf16.msra.mxu2 %v7483_v62 }
  0xf2   :  { %748 = vmatpush.bf16.msra.mxu1 %v7493_v0 }
  0xf4   :  { %625 = vmatmul.bf16.vlgmr.msra.gmra.mxu2 %v7916_v17 }
  0xf5   :  { %865 = vmatpush.bf16.msrb.mxu2 %v7510_v63  ;;  %749 = vmatmul.bf16.vlgmr.msra.gmra.mxu1 %v7916_v17 }
  0xf9   :  { %866 = vmatpush.bf16.msrb.mxu2 %v7509_v1 }
  0xfd   :  { %867 = vmatpush.bf16.msrb.mxu2 %v7508_v2 }
 0x101   :  { %868 = vmatpush.bf16.msrb.mxu2 %v7507_v3 }
 0x105   :  { %869 = vmatpush.bf16.msrb.mxu2 %v7506_v4 }
 0x109   :  { %870 = vmatpush.bf16.msrb.mxu2 %v7505_v5 }
 0x10d   :  { %871 = vmatpush.bf16.msrb.mxu2 %v7504_v6 }
 0x111   :  { %872 = vmatpush.bf16.msrb.mxu2 %v7503_v7 }
 0x114   :  { %873 = vmatmul.bf16.vlgmr.msrb.gmra.mxu2 %v7916_v17 }
 0x137   :  { %v259_v8 = vpop.f32.mrf.mxu2 }
 0x138   :  { %v294_v9 = vpop.f32.mrf.mxu3 }
 0x139   :  { %v8066_v10 = vadd.f32 %v294_v9, %v259_v8 }
 0x13f   :  { %v8068_v11 = vpop.f32.mrf.mxu2 }
 0x140   :  { %v8070_v12 = vpop.f32.mrf.mxu3 }
 0x147   :  { %v264_v13 = vpop.f32.mrf.mxu2 }
 0x148   :  { %v299_v14 = vpop.f32.mrf.mxu3 }
 0x149   :  { %v8072_v15 = vadd.f32 %v299_v14, %v264_v13 }
 0x14f   :  { %v8074_v16 = vpop.f32.mrf.mxu2 }
 0x150   :  { %v8166_v58 = vpop.f32.mrf.mxu3 }
 0x152   :  { %v8076_v18 = vpop.f32.mrf.mxu1 }
 0x157   :  { %v378_v19 = vpop.f32.mrf.mxu2 }
 0x15a   :  { %v8078_v20 = vpop.f32.mrf.mxu1 }
 0x15f   :  { %v380_v21 = vpop.f32.mrf.mxu2 }
 0x160   :  { %v383_v23 = vpack.c.bf16 %v380_v21, %v378_v19 }
 0x162   :  { %v8080_v22 = vpop.f32.mrf.mxu1  ;;  %412 = vmatpush.bf16.msrb.mxu3 %v383_v23 }
 0x165   :  { %6301 = vmatmul.msk.bf16.vlgmr.msrb.gmra.mxu3 %vm243_vm0, %v7471_v24  ;;  %v11151_v24 = vmov 0  }
 0x166   :  { %7663 = vset.pattern.permute.xlu0 %v11151_v24  ;;  %7664 = vset.pattern.permute.xlu1 %v11151_v24 }
 0x167   :  { %7695 = vset.pattern.permute.xlu2 %v11151_v24 }
 0x16a   :  { %v8086_v25 = vpop.f32.mrf.mxu1 }
 0x172   :  { %v750_v26 = vpop.f32.mrf.mxu1 }
 0x175   :  { %6302 = vmatmul.msk.bf16.gmra.mxu3 %vm243_vm0, %v7472_v27 }
 0x177   :  { %v626_v28 = vpop.f32.mrf.mxu2 }
 0x17a   :  { %v752_v29 = vpop.f32.mrf.mxu1 }
 0x17b   :  { %v755_v30 = vpack.c.bf16 %v752_v29, %v750_v26 }
 0x17d   :  { %784 = vmatpush.bf16.msra.mxu0 %v755_v30  ;;  %v7521_v30 = vld [vmem:[%s11134_s2 + $0x70] sm:$0xff] }
 0x17f   :  { %v628_v31 = vpop.f32.mrf.mxu2 }
 0x180   :  { %v631_v34 = vpack.c.bf16 %v628_v31, %v626_v28  ;;  %6487 = vmatmul.msk.bf16.vlgmr.msra.gmra.mxu0 %vm243_vm0, %v7501_v33  ;;  %v1173_v31 = vld [vmem:[%s11135_s3 + $0x8] sm:$0xff] }
 0x182   :  { %660 = vmatpush.bf16.msra.mxu3 %v631_v34  ;;  %v1175_v34 = vld [vmem:[%s11135_s3 + $0x18] sm:$0xff] }
 0x185   :  { %6425 = vmatmul.msk.bf16.vlgmr.msra.gmra.mxu3 %vm243_vm0, %v7491_v36 }
 0x186   :  { %989 = vmatpush.bf16.msrb.mxu3 %v7520_v32  ;;  %v1174_v32 = vld [vmem:[%s11135_s3 + $0x10] sm:$0xff] }
 0x187   :  { %1188 = vperm.xlu1 %7664, %v1174_v32  }
 0x18a   :  { %990 = vmatpush.bf16.msrb.mxu3 %v7519_v35 }
 0x18e   :  { %991 = vmatpush.bf16.msrb.mxu3 %v7518_v37  ;;  %v7522_v37 = vld [vmem:[%s11134_s2 + $0x78] sm:$0xff] }
 0x18f   :  { %1193 = vperm.xlu1 %7664, %v1175_v34  }
 0x190   :  { %6488 = vmatmul.msk.bf16.gmra.mxu0 %vm243_vm0, %v7502_v39  ;;  %v7532_v39 = vld [vmem:[%s11134_s2 + $0x88] sm:$0xff] }
 0x192   :  { %992 = vmatpush.bf16.msrb.mxu3 %v7517_v38  ;;  %v7531_v38 = vld [vmem:[%s11134_s2 + $0x80] sm:$0xff]  ;;  %s7757_s2 = smov 32  }
 0x195   :  { %6426 = vmatmul.msk.bf16.gmra.mxu3 %vm243_vm0, %v7492_v43 }
 0x196   :  { %993 = vmatpush.bf16.msrb.mxu3 %v7516_v40 }
 0x197   :  { %v874_v41 = vpop.f32.mrf.mxu2 }
 0x19a   :  { %994 = vmatpush.bf16.msrb.mxu3 %v7515_v42  ;;  %v297_v42 = vadd.f32 %v8070_v12, %v8068_v11 }
 0x19e   :  { %995 = vmatpush.bf16.msrb.mxu3 %v7514_v44 }
 0x19f   :  { %v876_v45 = vpop.f32.mrf.mxu2 }
 0x1a0   :  { %v879_v48 = vpack.c.bf16 %v876_v45, %v874_v41 }
 0x1a2   :  { %908 = vmatpush.bf16.msrb.mxu1 %v879_v48  ;;  %996 = vmatpush.bf16.msrb.mxu3 %v7513_v47 }
 0x1a5   :  { %6549 = vmatmul.msk.bf16.vlgmr.msrb.gmra.mxu1 %vm243_vm0, %v7511_v49  ;;  %997 = vmatmul.bf16.vlgmr.msrb.gmra.mxu3 %v7916_v17 }
 0x1a6   :  { %1113 = vmatpush.bf16.msra.mxu1 %v7530_v46 }
 0x1aa   :  { %1114 = vmatpush.bf16.msra.mxu1 %v7529_v50 }
 0x1ae   :  { %1115 = vmatpush.bf16.msra.mxu1 %v7528_v51 }
 0x1b2   :  { %1116 = vmatpush.bf16.msra.mxu1 %v7527_v52 }
 0x1b5   :  { %6550 = vmatmul.msk.bf16.gmra.mxu1 %vm243_vm0, %v7512_v54 }
 0x1b6   :  { %1117 = vmatpush.bf16.msra.mxu1 %v7526_v53  ;;  %v302_v53 = vadd.f32 %v8166_v58, %v8074_v16 }
 0x1ba   :  { %1118 = vmatpush.bf16.msra.mxu1 %v7525_v55 }
 0x1be   :  { %1119 = vmatpush.bf16.msra.mxu1 %v7524_v56 }
 0x1c2   :  { %1120 = vmatpush.bf16.msra.mxu1 %v7523_v57 }
 0x1c5   :  { %1121 = vmatmul.bf16.vlgmr.msra.gmra.mxu1 %v7916_v17 }
 0x1e8   :  { %v414_v59 = vpop.f32.mrf.mxu3 }
 0x1e9   :  { %v424_v60 = vadd.f32 %v414_v59, %v8066_v10 }
 0x1eb   :  { %v548_v1 = vadd.f32 %v8076_v18, %v424_v60 }
 0x1f0   :  { %v416_v61 = vpop.f32.mrf.mxu3 }
 0x1f1   :  { %v425_v43 = vadd.f32 %v416_v61, %v297_v42  ;;  %v7545_v42 = vld [vmem:[%s11137_s4 + $0x20] sm:$0xff] }
 0x1f3   :  { %v549_v44 = vadd.f32 %v8078_v20, %v425_v43 }
 0x1f8   :  { %v419_v62 = vpop.f32.mrf.mxu3 }
 0x1f9   :  { %v426_v63 = vadd.f32 %v419_v62, %v8072_v15  ;;  %v1172_v15 = vld [vmem:[%s11135_s3] sm:$0xff]  ;;  %s7758_s3 = smov 96  }
 0x1fa   :  { %1178 = vperm.xlu0 %7663, %v1172_v15   ;;  %v2294_v15 = vld [vmem:[%s11136_s6 + $0x18] sm:$0xff] }
 0x1fb   :  { %v550_v6 = vadd.f32 %v8080_v22, %v426_v63 }
 0x1fd   :  { %v786_v5 = vpop.f32.mrf.mxu0 }
 0x200   :  { %v8170_v0 = vpop.f32.mrf.mxu3 }
 0x201   :  { %v427_v56 = vadd.f32 %v8170_v0, %v302_v53 }
 0x202   :  { %1183 = vperm.xlu0 %7663, %v1173_v31  }
 0x203   :  { %v551_v60 = vadd.f32 %v8086_v25, %v427_v56 }
 0x205   :  { %v788_v10 = vpop.f32.mrf.mxu0 }
 0x208   :  { %v662_v2 = vpop.f32.mrf.mxu3 }
 0x209   :  { %v672_v3 = vadd.f32 %v662_v2, %v548_v1  ;;  %v1189_v2 = vpop.permute.xlu1 %1188 }
 0x20b   :  { %v796_v17 = vadd.f32 %v786_v5, %v672_v3 }
 0x20d   :  { %v791_v21 = vpop.f32.mrf.mxu0 }
 0x210   :  { %v664_v4 = vpop.f32.mrf.mxu3 }
 0x211   :  { %v673_v45 = vadd.f32 %v664_v4, %v549_v44  ;;  %v1194_v25 = vpop.permute.xlu1 %1193 }
 0x213   :  { %v797_v49 = vadd.f32 %v788_v10, %v673_v45 }
 0x215   :  { %v793_v40 = vpop.f32.mrf.mxu0 }
 0x218   :  { %v667_v7 = vpop.f32.mrf.mxu3 }
 0x219   :  { %v674_v8 = vadd.f32 %v667_v7, %v550_v6 }
 0x21b   :  { %v798_v18 = vadd.f32 %v791_v21, %v674_v8  ;;  %v2293_v21 = vld [vmem:[%s11136_s6 + $0x10] sm:$0xff] }
 0x220   :  { %v669_v14 = vpop.f32.mrf.mxu3 }
 0x221   :  { %v675_v63 = vadd.f32 %v669_v14, %v551_v60  ;;  %v7552_v60 = vld [vmem:[%s11137_s4 + $0x38] sm:$0xff] }
 0x222   :  { %v910_v9 = vpop.f32.mrf.mxu1 }
 0x223   :  { %v920_v13 = vadd.f32 %v910_v9, %v796_v17  ;;  %v799_v16 = vadd.f32 %v793_v40, %v675_v63 }
 0x228   :  { %v998_v23 = vpop.f32.mrf.mxu3 }
 0x22a   :  { %v912_v19 = vpop.f32.mrf.mxu1 }
 0x22b   :  { %v921_v51 = vadd.f32 %v912_v19, %v797_v49  ;;  %v2291_v19 = vld [vmem:[%s11136_s6] sm:$0xff] }
 0x230   :  { %v1000_v27 = vpop.f32.mrf.mxu3 }
 0x231   :  { %v1003_v28 = vpack.c.bf16 %v1000_v27, %v998_v23  ;;  %v7534_v23 = vld [vmem:[%s11137_s4 + $0x8] sm:$0xff]  ;;  %v7539_v27 = vld [vmem:[%s11137_s4 + $0x10] sm:$0xff] }
 0x232   :  { %v915_v22 = vpop.f32.mrf.mxu1  ;;  %1287 = vmatpush.bf16.msra.mxu3 %v7534_v23 }
 0x233   :  { %v922_v26 = vadd.f32 %v915_v22, %v798_v18  ;;  %1032 = vmatpush.bf16.msrb.mxu0 %v1003_v28  ;;  %v2296_v18 = vld [vmem:[%s11136_s6 + $0x28] sm:$0xff]  ;;  %v7540_v22 = vld [vmem:[%s11137_s4 + $0x18] sm:$0xff] }
 0x236   :  { %6611 = vmatmul.msk.bf16.vlgmr.msrb.gmra.mxu0 %vm243_vm0, %v7521_v30 }
 0x237   :  { %1333 = vmatpush.bf16.msra.mxu0 %v7540_v22  ;;  %v7537_v22 = vld [vmem:[%s11138_s5 + $0x10] sm:$0xff] }
 0x23a   :  { %v917_v29 = vpop.f32.mrf.mxu1 }
 0x23b   :  { %v923_v4 = vadd.f32 %v917_v29, %v799_v16  ;;  %1334 = vmatpush.bf16.msra.mxu0 %v7539_v27  ;;  %v7557_v27 = vld [vmem:[%s11137_s4 + $0x40] sm:$0xff] }
 0x242   :  { %v1122_v33 = vpop.f32.mrf.mxu1 }
 0x246   :  { %6612 = vmatmul.msk.bf16.gmra.mxu0 %vm243_vm0, %v7522_v37  ;;  %v7546_v37 = vld [vmem:[%s11137_s4 + $0x28] sm:$0xff] }
 0x24a   :  { %v1124_v35 = vpop.f32.mrf.mxu1 }
 0x24b   :  { %v1127_v36 = vpack.c.bf16 %v1124_v35, %v1122_v33 }
 0x24d   :  { %1156 = vmatpush.bf16.msra.mxu2 %v1127_v36 }
 0x250   :  { %6673 = vmatmul.msk.bf16.vlgmr.msra.gmra.mxu2 %vm243_vm0, %v7531_v38 }
 0x260   :  { %6674 = vmatmul.msk.bf16.gmra.mxu2 %vm243_vm0, %v7532_v39 }
 0x26c   :  { %v1179_v46 = vpop.permute.xlu0 %1178 }
 0x274   :  { %v1184_v59 = vpop.permute.xlu0 %1183 }
 0x2b3   :  { %v1034_v41 = vpop.f32.mrf.mxu0 }
 0x2b4   :  { %v1044_v50 = vadd.f32 %v1034_v41, %v920_v13 }
 0x2bb   :  { %v1036_v47 = vpop.f32.mrf.mxu0 }
 0x2bc   :  { %v1045_v54 = vadd.f32 %v1036_v47, %v921_v51 }
 0x2c3   :  { %v1039_v12 = vpop.f32.mrf.mxu0 }
 0x2c4   :  { %v1046_v58 = vadd.f32 %v1039_v12, %v922_v26  ;;  %v7533_v26 = vld [vmem:[%s11137_s4] sm:$0xff] }
 0x2c5   :  { %1288 = vmatpush.bf16.msra.mxu3 %v7533_v26  ;;  %v7547_v26 = vld [vmem:[%s11138_s5 + $0x40] sm:$0xff] }
 0x2c9   :  { %1502 = vmatpush.bf16.msrb.mxu3 %v7546_v37 }
 0x2cb   :  { %v1041_v0 = vpop.f32.mrf.mxu0 }
 0x2cc   :  { %v1047_v6 = vadd.f32 %v1041_v0, %v923_v4 }
 0x2cd   :  { %1503 = vmatpush.bf16.msrb.mxu3 %v7545_v42  ;;  %v7554_v42 = vld [vmem:[%s11138_s5 + $0x68] sm:$0xff] }
 0x2d3   :  { %v1158_v48 = vpop.f32.mrf.mxu2 }
 0x2d4   :  { %v1168_v52 = vadd.f32 %v1158_v48, %v1044_v50 }
 0x2d6   :  { %v1196_v57 = vadd.f32 %v1179_v46, %v1168_v52 }
 0x2d8   :  { %v1200_v61 = vmax.f32 %v1196_v57, 0.0 }
 0x2db   :  { %v1160_v55 = vpop.f32.mrf.mxu2 }
 0x2dc   :  { %v1169_v11 = vadd.f32 %v1160_v55, %v1045_v54 }
 0x2de   :  { %v1197_v20 = vadd.f32 %v1184_v59, %v1169_v11 }
 0x2e0   :  { %v1201_v62 = vmax.f32 %v1197_v20, 0.0 }
 0x2e2   :  { %v7675_v1 = vpack.i.bf16 %v1201_v62, %v1200_v61 }
 0x2e3   :  { %v1163_v3 = vpop.f32.mrf.mxu2 }
 0x2e4   :  { %7676 = vrot.lane.b32.xlu0 %v7675_v1, %s7757_s2  ;;  %7666 = vrot.lane.b32.xlu2 %v7675_v1, %s7758_s3  ;;  %v1170_v5 = vadd.f32 %v1163_v3, %v1046_v58 }
 0x2e6   :  { %v1198_v7 = vadd.f32 %v1189_v2, %v1170_v5 }
 0x2e8   :  { %v1202_v13 = vmax.f32 %v1198_v7, 0.0 }
 0x2eb   :  { %v1165_v17 = vpop.f32.mrf.mxu2 }
 0x2ec   :  { %v1171_v8 = vadd.f32 %v1165_v17, %v1047_v6  ;;  %7671 = vrot.lane.b32.xlu2 %v7675_v1, %s7759_s18  ;;  %v7541_v6 = vld [vmem:[%s11138_s5 + $0x20] sm:$0xff] }
 0x2ee   :  { %v1199_v9 = vadd.f32 %v1194_v25, %v1171_v8  ;;  %v7535_v8 = vld [vmem:[%s11138_s5] sm:$0xff] }
 0x2f0   :  { %v1203_v10 = vmax.f32 %v1199_v9, 0.0 }
 0x2f2   :  { %v7680_v14 = vpack.i.bf16 %v1203_v10, %v1202_v13 }
 0x2f4   :  { %7681 = vrot.lane.b32.xlu1 %v7680_v14, %s7758_s3  ;;  %7691 = vrot.lane.b32.xlu0 %v7680_v14, %s7757_s2 }
 0x2f5   :  { %7686 = vrot.lane.b32.xlu2 %v7680_v14, %s7759_s18  ;;  %s7761_s18 = smov 112  }
 0x2fc   :  { %2301 = vperm.xlu1 %7664, %v2291_v19   ;;  %2311 = vperm.xlu0 %7663, %v2293_v21   ;;  %v7543_v21 = vld [vmem:[%s11138_s5 + $0x30] sm:$0xff] }
 0x304   :  { %2316 = vperm.xlu1 %7664, %v2294_v15   ;;  %2326 = vperm.xlu0 %7663, %v2296_v18   ;;  %v7558_v18 = vld [vmem:[%s11137_s4 + $0x48] sm:$0xff] }
 0x33e   :  { %v7667_v28 = vpop.permute.xlu2 %7666 }
 0x33f   :  { %v7669_v30 = vunpack.i.h.bf16 %v7667_v28  ;;  %v7668_v31 = vunpack.i.l.bf16 %v7667_v28 }
 0x341   :  { %v1221_v34 = vmax.f32 %v1201_v62, %v7669_v30  ;;  %v1220_v35 = vmax.f32 %v1200_v61, %v7668_v31  ;;  %v7551_v61 = vld [vmem:[%s11137_s4 + $0x30] sm:$0xff]  ;;  %v7544_v30 = vld [vmem:[%s11138_s5 + $0x38] sm:$0xff] }
 0x342   :  { %v7538_v31 = vld [vmem:[%s11138_s5 + $0x18] sm:$0xff] }
 0x346   :  { %v7672_v29 = vpop.permute.xlu2 %7671 }
 0x347   :  { %v7674_v32 = vunpack.i.h.bf16 %v7672_v29  ;;  %v7673_v33 = vunpack.i.l.bf16 %v7672_v29 }
 0x349   :  { %v1236_v38 = vmax.f32 %v1220_v35, %v7673_v33  ;;  %v1237_v39 = vmax.f32 %v1221_v34, %v7674_v32  ;;  %v7548_v32 = vld [vmem:[%s11138_s5 + $0x48] sm:$0xff]  ;;  %v7564_v34 = vld [vmem:[%s11137_s4 + $0x58] sm:$0xff]  ;;  %v7563_v35 = vld [vmem:[%s11137_s4 + $0x50] sm:$0xff] }
 0x34f   :  { %v7687_v46 = vpop.permute.xlu2 %7686 }
 0x350   :  { %v7689_v51 = vunpack.i.h.bf16 %v7687_v46  ;;  %v7688_v52 = vunpack.i.l.bf16 %v7687_v46  ;;  %v7555_v46 = vld [vmem:[%s11138_s5 + $0x70] sm:$0xff] }
 0x356   :  { %v7677_v36 = vpop.permute.xlu0 %7676 }
 0x357   :  { %v7679_v40 = vunpack.i.h.bf16 %v7677_v36  ;;  %v7678_v41 = vunpack.i.l.bf16 %v7677_v36 }
 0x359   :  { %v1252_v43 = vmax.f32 %v1236_v38, %v7678_v41  ;;  %v1253_v44 = vmax.f32 %v1237_v39, %v7679_v40  ;;  %v7549_v39 = vld [vmem:[%s11138_s5 + $0x50] sm:$0xff]  ;;  %v7553_v40 = vld [vmem:[%s11138_s5 + $0x60] sm:$0xff]  ;;  %v7550_v41 = vld [vmem:[%s11138_s5 + $0x58] sm:$0xff] }
 0x35b   :  { %v8242_v45 = vpack.c.bf16 %v1253_v44, %v1252_v43  ;;  %v7570_v43 = vld [vmem:[%s11137_s4 + $0x68] sm:$0xff]  ;;  %v7569_v44 = vld [vmem:[%s11137_s4 + $0x60] sm:$0xff] }
 0x35d   :  { %6683 = vmatmul.msk.bf16.vlgmr.msra.gmra.mxu3 %vm1274_vm1, %v8242_v45  ;;  %6697 = vmatmul.msk.bf16.vlgmr.msra.gmra.mxu0 %vm1274_vm1, %v8242_v45 }
 0x35e   :  { %1618 = vmatpush.bf16.msra.mxu3 %v7552_v60 }
 0x362   :  { %1619 = vmatpush.bf16.msra.mxu3 %v7551_v61 }
 0x366   :  { %v7682_v47 = vpop.permute.xlu1 %7681  ;;  %v7692_v50 = vpop.permute.xlu0 %7691 }
 0x367   :  { %v7684_v48 = vunpack.i.h.bf16 %v7682_v47  ;;  %v7683_v49 = vunpack.i.l.bf16 %v7682_v47  ;;  %v7694_v55 = vunpack.i.h.bf16 %v7692_v50  ;;  %v7693_v56 = vunpack.i.l.bf16 %v7692_v50  ;;  %v7556_v47 = vld [vmem:[%s11138_s5 + $0x78] sm:$0xff] }
 0x369   :  { %v1223_v53 = vmax.f32 %v1203_v10, %v7684_v48  ;;  %v1222_v54 = vmax.f32 %v1202_v13, %v7683_v49  ;;  %v7542_v13 = vld [vmem:[%s11138_s5 + $0x28] sm:$0xff] }
 0x36a   :  { %v7536_v10 = vld [vmem:[%s11138_s5 + $0x8] sm:$0xff] }
 0x36b   :  { %v1238_v57 = vmax.f32 %v1222_v54, %v7688_v52  ;;  %v1239_v11 = vmax.f32 %v1223_v53, %v7689_v51 }
 0x36d   :  { %v1254_v12 = vmax.f32 %v1238_v57, %v7693_v56  ;;  %v1255_v59 = vmax.f32 %v1239_v11, %v7694_v55 }
 0x36f   :  { %v8248_v20 = vpack.c.bf16 %v1255_v59, %v1254_v12 }
 0x371   :  { %6684 = vmatmul.msk.bf16.gmra.mxu3 %vm1274_vm1, %v8248_v20  ;;  %6698 = vmatmul.msk.bf16.gmra.mxu0 %vm1274_vm1, %v8248_v20 }
 0x381   :  { %6759 = vmatmul.msk.bf16.vlgmr.msrb.gmra.mxu3 %vm1274_vm1, %v8242_v45 }
 0x391   :  { %6760 = vmatmul.msk.bf16.gmra.mxu3 %vm1274_vm1, %v8248_v20 }
 0x3a1   :  { %6801 = vmatmul.msk.bf16.vlgmr.msra.gmra.mxu3 %vm1274_vm1, %v8242_v45 }
 0x3b1   :  { %6802 = vmatmul.msk.bf16.gmra.mxu3 %vm1274_vm1, %v8248_v20 }
 0x3da   :  { %v1336_v62 = vpop.f32.mrf.mxu0 }
 0x3e0   :  { %v1290_v63 = vpop.f32.mrf.mxu3 }
 0x3e2   :  { %v1338_v1 = vpop.f32.mrf.mxu0 }
 0x3e3   :  { %v1346_v4 = vpack.c.bf16 %v1338_v1, %v1336_v62 }
 0x3e8   :  { %v1292_v2 = vpop.f32.mrf.mxu3 }
 0x3e9   :  { %v1300_v7 = vpack.c.bf16 %v1292_v2, %v1290_v63 }
 0x3ee   :  { %v1341_v3 = vpop.f32.mrf.mxu0 }
 0x3f4   :  { %v1295_v16 = vpop.f32.mrf.mxu3 }
 0x3f6   :  { %v1343_v58 = vpop.f32.mrf.mxu0 }
 0x3f7   :  { %v1347_v0 = vpack.c.bf16 %v1343_v58, %v1341_v3 }
 0x3f9   :  { %1395 = vmatpush.bf16.msrb.mxu1 %v1347_v0 }
 0x3fc   :  { %v1297_v5 = vpop.f32.mrf.mxu3 }
 0x3fd   :  { %v1301_v17 = vpack.c.bf16 %v1297_v5, %v1295_v16  ;;  %1396 = vmatpush.bf16.msrb.mxu1 %v1346_v4 }
 0x3ff   :  { %1456 = vmatpush.bf16.msrb.mxu2 %v1301_v17 }
 0x400   :  { %6723 = vmatmul.msk.bf16.vlgmr.msrb.gmra.mxu1 %vm1274_vm1, %v7541_v6 }
 0x403   :  { %1457 = vmatpush.bf16.msrb.mxu2 %v1300_v7 }
 0x404   :  { %v1505_v25 = vpop.f32.mrf.mxu3 }
 0x406   :  { %6743 = vmatmul.msk.bf16.vlgmr.msrb.gmra.mxu2 %vm1274_vm1, %v7535_v8 }
 0x407   :  { %1734 = vmatpush.bf16.msra.mxu2 %v7558_v18 }
 0x40b   :  { %1735 = vmatpush.bf16.msra.mxu2 %v7557_v27 }
 0x40c   :  { %v1507_v9 = vpop.f32.mrf.mxu3 }
 0x40d   :  { %v1515_v23 = vpack.c.bf16 %v1507_v9, %v1505_v25 }
 0x410   :  { %6724 = vmatmul.msk.bf16.gmra.mxu1 %vm1274_vm1, %v7542_v13 }
 0x414   :  { %v1510_v14 = vpop.f32.mrf.mxu3 }
 0x416   :  { %6744 = vmatmul.msk.bf16.gmra.mxu2 %vm1274_vm1, %v7536_v10 }
 0x41c   :  { %v1512_v19 = vpop.f32.mrf.mxu3 }
 0x41d   :  { %v1516_v15 = vpack.c.bf16 %v1512_v19, %v1510_v14 }
 0x41f   :  { %1564 = vmatpush.bf16.msrb.mxu0 %v1516_v15 }
 0x420   :  { %6725 = vmatmul.msk.bf16.gmra.mxu1 %vm1274_vm1, %v7543_v21 }
 0x423   :  { %1565 = vmatpush.bf16.msrb.mxu0 %v1515_v23 }
 0x424   :  { %v1621_v28 = vpop.f32.mrf.mxu3 }
 0x426   :  { %6745 = vmatmul.msk.bf16.gmra.mxu2 %vm1274_vm1, %v7537_v22  ;;  %6785 = vmatmul.msk.bf16.vlgmr.msrb.gmra.mxu0 %vm1274_vm1, %v7547_v26 }
 0x427   :  { %1850 = vmatpush.bf16.msra.mxu0 %v7564_v34 }
 0x42b   :  { %1851 = vmatpush.bf16.msra.mxu0 %v7563_v35 }
 0x42c   :  { %v1623_v29 = vpop.f32.mrf.mxu3 }
 0x42d   :  { %v1631_v38 = vpack.c.bf16 %v1623_v29, %v1621_v28 }
 0x42f   :  { %1966 = vmatpush.bf16.msrb.mxu0 %v7570_v43  ;;  %v7565_v43 = vld [vmem:[%s11138_s5 + $0xa0] sm:$0xff] }
 0x430   :  { %6726 = vmatmul.msk.bf16.gmra.mxu1 %vm1274_vm1, %v7544_v30 }
 0x433   :  { %1967 = vmatpush.bf16.msrb.mxu0 %v7569_v44  ;;  %v7576_v44 = vld [vmem:[%s11137_s4 + $0x78] sm:$0xff] }
 0x434   :  { %v1626_v33 = vpop.f32.mrf.mxu3 }
 0x436   :  { %6746 = vmatmul.msk.bf16.gmra.mxu2 %vm1274_vm1, %v7538_v31  ;;  %6786 = vmatmul.msk.bf16.gmra.mxu0 %vm1274_vm1, %v7548_v32 }
 0x43c   :  { %v1628_v36 = vpop.f32.mrf.mxu3 }
 0x43d   :  { %v1632_v37 = vpack.c.bf16 %v1628_v36, %v1626_v33  ;;  %v7559_v33 = vld [vmem:[%s11138_s5 + $0x80] sm:$0xff] }
 0x43f   :  { %1680 = vmatpush.bf16.msra.mxu1 %v1632_v37 }
 0x443   :  { %1681 = vmatpush.bf16.msra.mxu1 %v1631_v38 }
 0x446   :  { %6787 = vmatmul.msk.bf16.gmra.mxu0 %vm1274_vm1, %v7549_v39  ;;  %6827 = vmatmul.msk.bf16.vlgmr.msra.gmra.mxu1 %vm1274_vm1, %v7553_v40  ;;  %v7560_v39 = vld [vmem:[%s11138_s5 + $0x88] sm:$0xff] }
 0x447   :  { %6843 = vmatmul.msk.bf16.vlgmr.msra.gmra.mxu2 %vm1274_vm1, %v8242_v45 }
 0x456   :  { %6788 = vmatmul.msk.bf16.gmra.mxu0 %vm1274_vm1, %v7550_v41  ;;  %6828 = vmatmul.msk.bf16.gmra.mxu1 %vm1274_vm1, %v7554_v42 }
 0x457   :  { %6844 = vmatmul.msk.bf16.gmra.mxu2 %vm1274_vm1, %v8248_v20 }
 0x466   :  { %6829 = vmatmul.msk.bf16.gmra.mxu1 %vm1274_vm1, %v7555_v46  ;;  %6885 = vmatmul.msk.bf16.vlgmr.msra.gmra.mxu0 %vm1274_vm1, %v8242_v45 }
 0x476   :  { %6830 = vmatmul.msk.bf16.gmra.mxu1 %vm1274_vm1, %v7556_v47  ;;  %6886 = vmatmul.msk.bf16.gmra.mxu0 %vm1274_vm1, %v8248_v20  ;;  %v7575_v47 = vld [vmem:[%s11137_s4 + $0x70] sm:$0xff] }
 0x47d   :  { %v1398_v48 = vpop.f32.mrf.mxu1 }
 0x485   :  { %v8358_v49 = vpop.f32.mrf.mxu1 }
 0x486   :  { %6927 = vmatmul.msk.bf16.vlgmr.msrb.gmra.mxu0 %vm1274_vm1, %v8242_v45 }
 0x489   :  { %v1459_v50 = vpop.f32.mrf.mxu2 }
 0x48a   :  { %v1460_v51 = vadd.f32 %v1459_v50, %v1398_v48  ;;  %v7561_v48 = vld [vmem:[%s11138_s5 + $0x90] sm:$0xff] }
 0x48d   :  { %v1403_v52 = vpop.f32.mrf.mxu1 }
 0x491   :  { %v8362_v53 = vpop.f32.mrf.mxu2 }
 0x495   :  { %v8364_v54 = vpop.f32.mrf.mxu1 }
 0x496   :  { %6928 = vmatmul.msk.bf16.gmra.mxu0 %vm1274_vm1, %v8248_v20 }
 0x499   :  { %v1464_v55 = vpop.f32.mrf.mxu2 }
 0x49a   :  { %v1465_v56 = vadd.f32 %v1464_v55, %v1403_v52  ;;  %v7562_v55 = vld [vmem:[%s11138_s5 + $0x98] sm:$0xff] }
 0x49d   :  { %v1408_v57 = vpop.f32.mrf.mxu1 }
 0x4a1   :  { %v8368_v11 = vpop.f32.mrf.mxu2 }
 0x4a3   :  { %v1567_v12 = vpop.f32.mrf.mxu0 }
 0x4a4   :  { %v1587_v59 = vadd.f32 %v1567_v12, %v1460_v51  ;;  %v7566_v51 = vld [vmem:[%s11138_s5 + $0xa8] sm:$0xff] }
 0x4a5   :  { %v8370_v60 = vpop.f32.mrf.mxu1  ;;  %v7582_v12 = vld [vmem:[%s11137_s4 + $0x88] sm:$0xff] }
 0x4a9   :  { %v1469_v61 = vpop.f32.mrf.mxu2 }
 0x4aa   :  { %v1470_v62 = vadd.f32 %v1469_v61, %v1408_v57 }
 0x4ab   :  { %v8372_v63 = vpop.f32.mrf.mxu0 }
 0x4ad   :  { %v1413_v1 = vpop.f32.mrf.mxu1 }
 0x4b1   :  { %v8374_v2 = vpop.f32.mrf.mxu2 }
 0x4b3   :  { %v1572_v3 = vpop.f32.mrf.mxu0 }
 0x4b4   :  { %v1589_v16 = vadd.f32 %v1572_v3, %v1465_v56  ;;  %v7568_v3 = vld [vmem:[%s11138_s5 + $0xb8] sm:$0xff] }
 0x4b5   :  { %v8376_v0 = vpop.f32.mrf.mxu1 }
 0x4b9   :  { %v1474_v58 = vpop.f32.mrf.mxu2 }
 0x4ba   :  { %v1475_v4 = vadd.f32 %v1474_v58, %v1413_v1  ;;  %v7571_v1 = vld [vmem:[%s11138_s5 + $0xc0] sm:$0xff]  ;;  %v7573_v58 = vld [vmem:[%s11138_s5 + $0xd0] sm:$0xff] }
 0x4bb   :  { %v8378_v5 = vpop.f32.mrf.mxu0 }
 0x4c1   :  { %v8380_v6 = vpop.f32.mrf.mxu2 }
 0x4c3   :  { %v1577_v17 = vpop.f32.mrf.mxu0  ;;  %v1683_v7 = vpop.f32.mrf.mxu1 }
 0x4c4   :  { %v1591_v8 = vadd.f32 %v1577_v17, %v1470_v62  ;;  %v8382_v25 = vadd.f32 %v1683_v7, %v1587_v59  ;;  %v7581_v59 = vld [vmem:[%s11137_s4 + $0x80] sm:$0xff]  ;;  %v7567_v62 = vld [vmem:[%s11138_s5 + $0xb0] sm:$0xff] }
 0x4ca   :  { %v1737_v9 = vpop.f32.mrf.mxu2 }
 0x4cb   :  { %v8384_v13 = vpop.f32.mrf.mxu0  ;;  %v8386_v10 = vpop.f32.mrf.mxu1 }
 0x4d2   :  { %v1739_v14 = vpop.f32.mrf.mxu2 }
 0x4d3   :  { %v1582_v19 = vpop.f32.mrf.mxu0  ;;  %v1688_v21 = vpop.f32.mrf.mxu1  ;;  %v1747_v32 = vpack.c.bf16 %v1739_v14, %v1737_v9 }
 0x4d4   :  { %v1593_v15 = vadd.f32 %v1582_v19, %v1475_v4  ;;  %v8388_v18 = vadd.f32 %v1688_v21, %v1589_v16  ;;  %v7572_v16 = vld [vmem:[%s11138_s5 + $0xc8] sm:$0xff]  ;;  %v7574_v4 = vld [vmem:[%s11138_s5 + $0xd8] sm:$0xff] }
 0x4da   :  { %v1742_v23 = vpop.f32.mrf.mxu2 }
 0x4db   :  { %v8390_v22 = vpop.f32.mrf.mxu0  ;;  %v8392_v26 = vpop.f32.mrf.mxu1 }
 0x4e2   :  { %v1744_v27 = vpop.f32.mrf.mxu2 }
 0x4e3   :  { %v1748_v28 = vpack.c.bf16 %v1744_v27, %v1742_v23  ;;  %v1693_v29 = vpop.f32.mrf.mxu1  ;;  %v1853_v30 = vpop.f32.mrf.mxu0 }
 0x4e4   :  { %v8394_v31 = vadd.f32 %v1693_v29, %v1591_v8 }
 0x4e5   :  { %1796 = vmatpush.bf16.msrb.mxu3 %v1748_v28 }
 0x4e9   :  { %1797 = vmatpush.bf16.msrb.mxu3 %v1747_v32 }
 0x4eb   :  { %v8399_v34 = vpop.f32.mrf.mxu1  ;;  %v1855_v35 = vpop.f32.mrf.mxu0 }
 0x4ec   :  { %6869 = vmatmul.msk.bf16.vlgmr.msrb.gmra.mxu3 %vm1274_vm1, %v7559_v33  ;;  %v1863_v42 = vpack.c.bf16 %v1855_v35, %v1853_v30 }
 0x4ed   :  { %2082 = vmatpush.bf16.msra.mxu3 %v7576_v44 }
 0x4f1   :  { %2083 = vmatpush.bf16.msra.mxu3 %v7575_v47  ;;  %v7577_v47 = vld [vmem:[%s11138_s5 + $0xe0] sm:$0xff] }
 0x4f3   :  { %v1698_v36 = vpop.f32.mrf.mxu1  ;;  %v1858_v37 = vpop.f32.mrf.mxu0 }
 0x4f4   :  { %v8402_v38 = vadd.f32 %v1698_v36, %v1593_v15 }
 0x4fb   :  { %v1860_v40 = vpop.f32.mrf.mxu0 }
 0x4fc   :  { %6870 = vmatmul.msk.bf16.gmra.mxu3 %vm1274_vm1, %v7560_v39  ;;  %v1864_v41 = vpack.c.bf16 %v1860_v40, %v1858_v37 }
 0x4fe   :  { %1912 = vmatpush.bf16.msrb.mxu2 %v1864_v41 }
 0x502   :  { %1913 = vmatpush.bf16.msrb.mxu2 %v1863_v42 }
 0x503   :  { %v1969_v46 = vpop.f32.mrf.mxu0 }
 0x505   :  { %6911 = vmatmul.msk.bf16.vlgmr.msrb.gmra.mxu2 %vm1274_vm1, %v7565_v43 }
 0x506   :  { %2198 = vmatpush.bf16.msra.mxu2 %v7582_v12  ;;  %v2292_v12 = vld [vmem:[%s11136_s6 + $0x8] sm:$0xff] }
 0x507   :  { %2306 = vperm.xlu2 %7695, %v2292_v12   ;;  %v2297_v12 = vld [vmem:[%s11136_s6 + $0x30] sm:$0xff] }
 0x50a   :  { %2199 = vmatpush.bf16.msra.mxu2 %v7581_v59  ;;  %v7579_v59 = vld [vmem:[%s11138_s5 + $0xf0] sm:$0xff] }
 0x50b   :  { %v1971_v50 = vpop.f32.mrf.mxu0 }
 0x50c   :  { %6871 = vmatmul.msk.bf16.gmra.mxu3 %vm1274_vm1, %v7561_v48  ;;  %v1979_v61 = vpack.c.bf16 %v1971_v50, %v1969_v46 }
 0x513   :  { %v1974_v52 = vpop.f32.mrf.mxu0 }
 0x515   :  { %6912 = vmatmul.msk.bf16.gmra.mxu2 %vm1274_vm1, %v7566_v51  ;;  %v7578_v51 = vld [vmem:[%s11138_s5 + $0xe8] sm:$0xff] }
 0x51b   :  { %v1976_v56 = vpop.f32.mrf.mxu0 }
 0x51c   :  { %6872 = vmatmul.msk.bf16.gmra.mxu3 %vm1274_vm1, %v7562_v55  ;;  %v1980_v57 = vpack.c.bf16 %v1976_v56, %v1974_v52 }
 0x51e   :  { %2028 = vmatpush.bf16.msrb.mxu1 %v1980_v57  ;;  %v7583_v57 = vld [vmem:[%s11138_s5 + $0x100] sm:$0xff] }
 0x522   :  { %2029 = vmatpush.bf16.msrb.mxu1 %v1979_v61  ;;  %v7584_v61 = vld [vmem:[%s11138_s5 + $0x108] sm:$0xff] }
 0x525   :  { %6913 = vmatmul.msk.bf16.gmra.mxu2 %vm1274_vm1, %v7567_v62  ;;  %6953 = vmatmul.msk.bf16.vlgmr.msrb.gmra.mxu1 %vm1274_vm1, %v7571_v1  ;;  %v2295_v62 = vld [vmem:[%s11136_s6 + $0x20] sm:$0xff]  ;;  %v7580_v1 = vld [vmem:[%s11138_s5 + $0xf8] sm:$0xff] }
 0x526   :  { %2321 = vperm.xlu2 %7695, %v2295_v62  }
 0x52c   :  { %6969 = vmatmul.msk.bf16.vlgmr.msra.gmra.mxu3 %vm1274_vm1, %v8242_v45 }
 0x535   :  { %6914 = vmatmul.msk.bf16.gmra.mxu2 %vm1274_vm1, %v7568_v3  ;;  %6954 = vmatmul.msk.bf16.gmra.mxu1 %vm1274_vm1, %v7572_v16  ;;  %v7585_v3 = vld [vmem:[%s11138_s5 + $0x110] sm:$0xff]  ;;  %v7586_v16 = vld [vmem:[%s11138_s5 + $0x118] sm:$0xff]  ;;  %s7760_s5 = smov 104  }
 0x53c   :  { %6970 = vmatmul.msk.bf16.gmra.mxu3 %vm1274_vm1, %v8248_v20 }
 0x545   :  { %6955 = vmatmul.msk.bf16.gmra.mxu1 %vm1274_vm1, %v7573_v58  ;;  %7011 = vmatmul.msk.bf16.vlgmr.msra.gmra.mxu2 %vm1274_vm1, %v8242_v45  ;;  %v8532_v58 = vpop.f32.mrf.mxu1 }
 0x555   :  { %6956 = vmatmul.msk.bf16.gmra.mxu1 %vm1274_vm1, %v7574_v4  ;;  %7012 = vmatmul.msk.bf16.gmra.mxu2 %vm1274_vm1, %v8248_v20 }
 0x56f   :  { %v1799_v17 = vpop.f32.mrf.mxu3 }
 0x570   :  { %v1819_v7 = vadd.f32 %v1799_v17, %v8382_v25 }
 0x577   :  { %v8469_v8 = vpop.f32.mrf.mxu3 }
 0x57f   :  { %v1804_v9 = vpop.f32.mrf.mxu3 }
 0x580   :  { %v1821_v14 = vadd.f32 %v1804_v9, %v8388_v18  ;;  %v1462_v9 = vadd.f32 %v8362_v53, %v8358_v49 }
 0x587   :  { %v8472_v19 = vpop.f32.mrf.mxu3 }
 0x588   :  { %v1915_v45 = vpop.f32.mrf.mxu2 }
 0x589   :  { %v8474_v21 = vadd.f32 %v1915_v45, %v1819_v7  ;;  %v1588_v45 = vadd.f32 %v8372_v63, %v1462_v9  ;;  %v2307_v63 = vpop.permute.xlu2 %2306 }
 0x58f   :  { %v1809_v15 = vpop.f32.mrf.mxu3 }
 0x590   :  { %v1823_v23 = vadd.f32 %v1809_v15, %v8394_v31  ;;  %v1917_v27 = vpop.f32.mrf.mxu2  ;;  %v1704_v15 = vadd.f32 %v8386_v10, %v1588_v45  ;;  %v1467_v10 = vadd.f32 %v8368_v11, %v8364_v54 }
 0x597   :  { %v8477_v28 = vpop.f32.mrf.mxu3 }
 0x598   :  { %v1920_v20 = vpop.f32.mrf.mxu2 }
 0x599   :  { %v8479_v29 = vadd.f32 %v1920_v20, %v1821_v14  ;;  %v1820_v20 = vadd.f32 %v8469_v8, %v1704_v15  ;;  %v1590_v8 = vadd.f32 %v8378_v5, %v1467_v10 }
 0x59f   :  { %v1814_v25 = vpop.f32.mrf.mxu3 }
 0x5a0   :  { %v1825_v30 = vadd.f32 %v1814_v25, %v8402_v38  ;;  %v8482_v32 = vpop.f32.mrf.mxu2 }
 0x5a2   :  { %v2031_v4 = vpop.f32.mrf.mxu1 }
 0x5a3   :  { %v2051_v25 = vadd.f32 %v2031_v4, %v8474_v21 }
 0x5a7   :  { %v8484_v18 = vpop.f32.mrf.mxu3 }
 0x5a8   :  { %v1925_v33 = vpop.f32.mrf.mxu2 }
 0x5a9   :  { %v8486_v35 = vadd.f32 %v1925_v33, %v1823_v23 }
 0x5aa   :  { %v2033_v7 = vpop.f32.mrf.mxu1 }
 0x5af   :  { %v2085_v36 = vpop.f32.mrf.mxu3 }
 0x5b0   :  { %v8488_v37 = vpop.f32.mrf.mxu2 }
 0x5b7   :  { %v2087_v31 = vpop.f32.mrf.mxu3 }
 0x5b8   :  { %v1930_v39 = vpop.f32.mrf.mxu2  ;;  %v2095_v46 = vpack.c.bf16 %v2087_v31, %v2085_v36  ;;  %v2036_v36 = vpop.f32.mrf.mxu1 }
 0x5b9   :  { %v8490_v40 = vadd.f32 %v1930_v39, %v1825_v30  ;;  %v1936_v30 = vadd.f32 %v1917_v27, %v1820_v20  ;;  %v2053_v11 = vadd.f32 %v2036_v36, %v8479_v29  ;;  %v2322_v36 = vpop.permute.xlu2 %2321 }
 0x5bb   :  { %v2052_v31 = vadd.f32 %v2033_v7, %v1936_v30 }
 0x5bf   :  { %v2090_v41 = vpop.f32.mrf.mxu3 }
 0x5c0   :  { %v8492_v42 = vpop.f32.mrf.mxu2 }
 0x5c7   :  { %v2092_v43 = vpop.f32.mrf.mxu3 }
 0x5c8   :  { %v2096_v44 = vpack.c.bf16 %v2092_v43, %v2090_v41  ;;  %v2201_v38 = vpop.f32.mrf.mxu2 }
 0x5ca   :  { %2144 = vmatpush.bf16.msra.mxu0 %v2096_v44  ;;  %v2302_v44 = vpop.permute.xlu1 %2301 }
 0x5ce   :  { %2145 = vmatpush.bf16.msra.mxu0 %v2095_v46 }
 0x5d0   :  { %v2203_v48 = vpop.f32.mrf.mxu2 }
 0x5d1   :  { %6995 = vmatmul.msk.bf16.vlgmr.msra.gmra.mxu0 %vm1274_vm1, %v7577_v47  ;;  %v2211_v56 = vpack.c.bf16 %v2203_v48, %v2201_v38  ;;  %v2038_v47 = vpop.f32.mrf.mxu1  ;;  %v1706_v48 = vadd.f32 %v8392_v26, %v1590_v8 }
 0x5d3   :  { %v1822_v54 = vadd.f32 %v8472_v19, %v1706_v48  ;;  %v2298_v19 = vld [vmem:[%s11136_s6 + $0x38] sm:$0xff]  ;;  %v1477_v48 = vadd.f32 %v8380_v6, %v8376_v0  ;;  %s7765_s6 = smov 126  }
 0x5d5   :  { %v1938_v5 = vadd.f32 %v8482_v32, %v1822_v54  ;;  %v2317_v32 = vpop.permute.xlu1 %2316 }
 0x5d8   :  { %v2206_v50 = vpop.f32.mrf.mxu2 }
 0x5e0   :  { %v2208_v52 = vpop.f32.mrf.mxu2 }
 0x5e1   :  { %6996 = vmatmul.msk.bf16.gmra.mxu0 %vm1274_vm1, %v7578_v51  ;;  %v2212_v55 = vpack.c.bf16 %v2208_v52, %v2206_v50 }
 0x5e3   :  { %2260 = vmatpush.bf16.msrb.mxu3 %v2212_v55  ;;  %v2054_v55 = vadd.f32 %v2038_v47, %v1938_v5 }
 0x5e7   :  { %2261 = vmatpush.bf16.msrb.mxu3 %v2211_v56 }
 0x5ea   :  { %7037 = vmatmul.msk.bf16.vlgmr.msrb.gmra.mxu3 %vm1274_vm1, %v7583_v57  ;;  %v2312_v57 = vpop.permute.xlu0 %2311 }
 0x5f1   :  { %6997 = vmatmul.msk.bf16.gmra.mxu0 %vm1274_vm1, %v7579_v59  ;;  %v2041_v59 = vpop.f32.mrf.mxu1 }
 0x5fa   :  { %7038 = vmatmul.msk.bf16.gmra.mxu3 %vm1274_vm1, %v7584_v61 }
 0x601   :  { %6998 = vmatmul.msk.bf16.gmra.mxu0 %vm1274_vm1, %v7580_v1 }
 0x60a   :  { %7039 = vmatmul.msk.bf16.gmra.mxu3 %vm1274_vm1, %v7585_v3 }
 0x61a   :  { %7040 = vmatmul.msk.bf16.gmra.mxu3 %vm1274_vm1, %v7586_v16  ;;  %v1472_v16 = vadd.f32 %v8374_v2, %v8370_v60  ;;  %v2055_v60 = vadd.f32 %v2041_v59, %v8486_v35  ;;  %v2043_v2 = vpop.f32.mrf.mxu1  ;;  %v2327_v35 = vpop.permute.xlu0 %2326 }
 0x622   :  { %v2046_v8 = vpop.f32.mrf.mxu1 }
 0x623   :  { %v2057_v59 = vadd.f32 %v2046_v8, %v8490_v40  ;;  %v3509_v8 = vld [vmem:[%s11140_s9 + $0x28] sm:$0xff] }
 0x62a   :  { %v2048_v5 = vpop.f32.mrf.mxu1 }
 0x64e   :  { %v2147_v17 = vpop.f32.mrf.mxu0 }
 0x64f   :  { %v2167_v33 = vadd.f32 %v2147_v17, %v2051_v25  ;;  %v1592_v17 = vadd.f32 %v8384_v13, %v1472_v16 }
 0x656   :  { %v2149_v14 = vpop.f32.mrf.mxu0 }
 0x657   :  { %v2168_v43 = vadd.f32 %v2149_v14, %v2052_v31  ;;  %v1708_v14 = vadd.f32 %v8399_v34, %v1592_v17 }
 0x65e   :  { %v2152_v41 = vpop.f32.mrf.mxu0 }
 0x65f   :  { %v2169_v26 = vadd.f32 %v2152_v41, %v2053_v11 }
 0x666   :  { %v2154_v51 = vpop.f32.mrf.mxu0 }
 0x667   :  { %v2170_v29 = vadd.f32 %v2154_v51, %v2054_v55  ;;  %v1594_v51 = vadd.f32 %v8390_v22, %v1477_v48  ;;  %v3507_v48 = vld [vmem:[%s11140_s9 + $0x18] sm:$0xff] }
 0x66d   :  { %v2263_v23 = vpop.f32.mrf.mxu3 }
 0x66e   :  { %v2283_v39 = vadd.f32 %v2263_v23, %v2167_v33  ;;  %v2157_v3 = vpop.f32.mrf.mxu0  ;;  %v1824_v23 = vadd.f32 %v8477_v28, %v1708_v14 }
 0x66f   :  { %v2171_v34 = vadd.f32 %v2157_v3, %v2055_v60 }
 0x670   :  { %v8540_v49 = vadd.f32 %v2302_v44, %v2283_v39  ;;  %v1940_v13 = vadd.f32 %v8488_v37, %v1824_v23 }
 0x672   :  { %v2347_v21 = vmax.f32 %v8540_v49, 0.0  ;;  %v2056_v25 = vadd.f32 %v2043_v2, %v1940_v13 }
 0x675   :  { %v2265_v38 = vpop.f32.mrf.mxu3 }
 0x676   :  { %v2284_v53 = vadd.f32 %v2265_v38, %v2168_v43  ;;  %v2159_v20 = vpop.f32.mrf.mxu0  ;;  %v2463_v38 = vld [vmem:[%s11139_s7] sm:$0xf] }
 0x677   :  { %v2172_v33 = vadd.f32 %v2159_v20, %v2056_v25 }
 0x678   :  { %v8544_v46 = vadd.f32 %v2307_v63, %v2284_v53  ;;  %v7045_v53 = vld [vmem:[%s11139_s7 + $0x4] sm:$0xf]  ;;  %v2479_v63 = vsel %vm2477_vm2, %v2463_v38, 0 }
 0x679   :  { %v2525_v10 = vsel %vm2477_vm2, %v7045_v53, 0  ;;  %2488 = vmatpush.bf16.msra.mxu1 %v2479_v63  ;;  %v3506_v63 = vld [vmem:[%s11140_s9 + $0x10] sm:$0xff] }
 0x67a   :  { %v2348_v27 = vmax.f32 %v8544_v46, 0.0  ;;  %2534 = vmatpush.bf16.msrb.mxu2 %v2525_v10  ;;  %v3505_v10 = vld [vmem:[%s11140_s9 + $0x8] sm:$0xff] }
 0x67c   :  { %v7706_v50 = vpack.i.bf16 %v2348_v27, %v2347_v21 }
 0x67d   :  { %v2268_v52 = vpop.f32.mrf.mxu3 }
 0x67e   :  { %7707 = vrot.lane.b32.xlu0 %v7706_v50, %s7760_s5  ;;  %7702 = vrot.lane.b32.xlu2 %v7706_v50, %s7761_s18  ;;  %v2285_v56 = vadd.f32 %v2268_v52, %v2169_v26  ;;  %v2162_v47 = vpop.f32.mrf.mxu0  ;;  %v1710_v52 = vadd.f32 %v8532_v58, %v1594_v51 }
 0x67f   :  { %7697 = vrot.lane.b32.xlu1 %v7706_v50, %s7762_s19 }
 0x680   :  { %v8566_v62 = vadd.f32 %v2312_v57, %v2285_v56  ;;  %v1826_v11 = vadd.f32 %v8484_v18, %v1710_v52 }
 0x682   :  { %v2349_v7 = vmax.f32 %v8566_v62, 0.0  ;;  %v1942_v26 = vadd.f32 %v8492_v42, %v1826_v11 }
 0x684   :  { %v2058_v56 = vadd.f32 %v2048_v5, %v1942_v26 }
 0x685   :  { %v2270_v61 = vpop.f32.mrf.mxu3 }
 0x686   :  { %v2286_v1 = vadd.f32 %v2270_v61, %v2170_v29  ;;  %2336 = vperm.xlu2 %7695, %v2298_v19   ;;  %v2164_v55 = vpop.f32.mrf.mxu0 }
 0x687   :  { %2331 = vperm.xlu1 %7664, %v2297_v12   ;;  %v2174_v0 = vadd.f32 %v2164_v55, %v2058_v56 }
 0x688   :  { %v8570_v4 = vadd.f32 %v2317_v32, %v2286_v1  ;;  %v2173_v1 = vadd.f32 %v2162_v47, %v2057_v59  ;;  %v3508_v47 = vld [vmem:[%s11140_s9 + $0x20] sm:$0xff] }
 0x68a   :  { %v2350_v9 = vmax.f32 %v8570_v4, 0.0  ;;  %v3504_v4 = vld [vmem:[%s11140_s9] sm:$0xff] }
 0x68c   :  { %v7711_v45 = vpack.i.bf16 %v2350_v9, %v2349_v7 }
 0x68d   :  { %v2273_v15 = vpop.f32.mrf.mxu3 }
 0x68e   :  { %7712 = vrot.lane.b32.xlu0 %v7711_v45, %s7762_s19  ;;  %7722 = vrot.lane.b32.xlu2 %v7711_v45, %s7760_s5  ;;  %v2287_v30 = vadd.f32 %v2273_v15, %v2171_v34 }
 0x68f   :  { %7717 = vrot.lane.b32.xlu1 %v7711_v45, %s7761_s18 }
 0x690   :  { %v8586_v39 = vadd.f32 %v2322_v36, %v2287_v30 }
 0x692   :  { %v2351_v43 = vmax.f32 %v8586_v39, 0.0  ;;  %v7098_v39 = vld [vmem:[%s11139_s7 + $0x8] sm:$0xf] }
 0x695   :  { %v2275_v31 = vpop.f32.mrf.mxu3 }
 0x696   :  { %v2288_v28 = vadd.f32 %v2275_v31, %v2172_v33 }
 0x698   :  { %v8588_v41 = vadd.f32 %v2327_v35, %v2288_v28 }
 0x69a   :  { %v2352_v44 = vmax.f32 %v8588_v41, 0.0  ;;  %v2695_v41 = vsel %vm2477_vm2, %v7098_v39, 0 }
 0x69b   :  { %2704 = vmatpush.bf16.msrb.mxu1 %v2695_v41  ;;  %v7593_v41 = vld [vmem:[%s11141_s8 + $0x30] sm:$0xff] }
 0x69c   :  { %v7726_v37 = vpack.i.bf16 %v2352_v44, %v2351_v43 }
 0x69d   :  { %v2278_v50 = vpop.f32.mrf.mxu3 }
 0x69e   :  { %7727 = vrot.lane.b32.xlu0 %v7726_v37, %s7762_s19  ;;  %7737 = vrot.lane.b32.xlu2 %v7726_v37, %s7760_s5  ;;  %v2289_v45 = vadd.f32 %v2278_v50, %v2173_v1 }
 0x69f   :  { %7732 = vrot.lane.b32.xlu1 %v7726_v37, %s7761_s18 }
 0x6a5   :  { %v2280_v57 = vpop.f32.mrf.mxu3 }
 0x6a6   :  { %v2290_v42 = vadd.f32 %v2280_v57, %v2174_v0 }
 0x6d8   :  { %v7703_v54 = vpop.permute.xlu2 %7702 }
 0x6d9   :  { %v7705_v61 = vunpack.i.h.bf16 %v7703_v54  ;;  %v7704_v22 = vunpack.i.l.bf16 %v7703_v54 }
 0x6e0   :  { %v2337_v32 = vpop.permute.xlu2 %2336 }
 0x6e1   :  { %v8618_v15 = vadd.f32 %v2337_v32, %v2290_v42 }
 0x6e3   :  { %v2354_v49 = vmax.f32 %v8618_v15, 0.0  ;;  %v7164_v15 = vld [vmem:[%s11139_s7 + $0x10] sm:$0xf] }
 0x6e8   :  { %v7723_v30 = vpop.permute.xlu2 %7722 }
 0x6e9   :  { %v7725_v35 = vunpack.i.h.bf16 %v7723_v30  ;;  %v7724_v37 = vunpack.i.l.bf16 %v7723_v30 }
 0x6f0   :  { %v7708_v6 = vpop.permute.xlu0 %7707 }
 0x6f1   :  { %v7698_v19 = vpop.permute.xlu1 %7697  ;;  %v7710_v3 = vunpack.i.h.bf16 %v7708_v6  ;;  %v7709_v16 = vunpack.i.l.bf16 %v7708_v6 }
 0x6f2   :  { %v7700_v29 = vunpack.i.h.bf16 %v7698_v19  ;;  %v7699_v12 = vunpack.i.l.bf16 %v7698_v19 }
 0x6f4   :  { %v2388_v58 = vmax.f32 %v2348_v27, %v7700_v29  ;;  %v2387_v18 = vmax.f32 %v2347_v21, %v7699_v12 }
 0x6f6   :  { %v2420_v17 = vmax.f32 %v2388_v58, %v7705_v61  ;;  %v2419_v14 = vmax.f32 %v2387_v18, %v7704_v22 }
 0x6f8   :  { %v2452_v40 = vmax.f32 %v2420_v17, %v7710_v3  ;;  %v2451_v23 = vmax.f32 %v2419_v14, %v7709_v16  ;;  %v7738_v11 = vpop.permute.xlu2 %7737 }
 0x6f9   :  { %v2332_v60 = vpop.permute.xlu1 %2331  ;;  %v7740_v19 = vunpack.i.h.bf16 %v7738_v11  ;;  %v7739_v57 = vunpack.i.l.bf16 %v7738_v11  ;;  %v7591_v11 = vld [vmem:[%s11141_s8 + $0x20] sm:$0xff] }
 0x6fa   :  { %v8620_v2 = vpack.c.bf16 %v2452_v40, %v2451_v23  ;;  %v8622_v46 = vadd.f32 %v2332_v60, %v2289_v45  ;;  %v2927_v60 = vsel %vm2477_vm2, %v7164_v15, 0  ;;  %v7597_v15 = vld [vmem:[%s11141_s8 + $0x50] sm:$0xff] }
 0x6fc   :  { %v2353_v21 = vmax.f32 %v8622_v46, 0.0  ;;  %7041 = vmatmul.msk.bf16.vlgmr.msra.gmra.mxu1 %vm2464_vm3, %v8620_v2  ;;  %7046 = vmatmul.msk.bf16.vlgmr.msrb.gmra.mxu2 %vm2464_vm3, %v8620_v2 }
 0x6fd   :  { %2936 = vmatpush.bf16.msra.mxu1 %v2927_v60 }
 0x6fe   :  { %v7751_v27 = vpack.i.bf16 %v2354_v49, %v2353_v21 }
 0x700   :  { %7752 = vrot.lane.b32.xlu2 %v7751_v27, %s7760_s5  ;;  %7747 = vrot.lane.b32.xlu1 %v7751_v27, %s7761_s18  ;;  %v7713_v13 = vpop.permute.xlu0 %7712 }
 0x701   :  { %7742 = vrot.lane.b32.xlu0 %v7751_v27, %s7762_s19  ;;  %v7715_v34 = vunpack.i.h.bf16 %v7713_v13  ;;  %v7714_v20 = vunpack.i.l.bf16 %v7713_v13  ;;  %v7718_v25 = vpop.permute.xlu1 %7717 }
 0x702   :  { %v7720_v31 = vunpack.i.h.bf16 %v7718_v25  ;;  %v7719_v28 = vunpack.i.l.bf16 %v7718_v25 }
 0x703   :  { %v2390_v33 = vmax.f32 %v2350_v9, %v7715_v34  ;;  %v2389_v36 = vmax.f32 %v2349_v7, %v7714_v20 }
 0x705   :  { %v2422_v38 = vmax.f32 %v2390_v33, %v7720_v31  ;;  %v2421_v53 = vmax.f32 %v2389_v36, %v7719_v28  ;;  %v7230_v33 = vld [vmem:[%s11139_s7 + $0x18] sm:$0xf] }
 0x706   :  { %v3159_v36 = vsel %vm2477_vm2, %v7230_v33, 0 }
 0x707   :  { %v2454_v62 = vmax.f32 %v2422_v38, %v7725_v35  ;;  %v2453_v7 = vmax.f32 %v2421_v53, %v7724_v37 }
 0x708   :  { %3524 = vperm.xlu2 %7695, %v3506_v63   ;;  %3519 = vperm.xlu1 %7664, %v3505_v10  }
 0x709   :  { %v8650_v9 = vpack.c.bf16 %v2454_v62, %v2453_v7  ;;  %3514 = vperm.xlu0 %7663, %v3504_v4  }
 0x70c   :  { %7042 = vmatmul.msk.bf16.gmra.mxu1 %vm2464_vm3, %v8650_v9  ;;  %7047 = vmatmul.msk.bf16.gmra.mxu2 %vm2464_vm3, %v8650_v9 }
 0x710   :  { %3539 = vperm.xlu2 %7695, %v3509_v8   ;;  %3534 = vperm.xlu1 %7664, %v3508_v47   ;;  %v7728_v50 = vpop.permute.xlu0 %7727 }
 0x711   :  { %3529 = vperm.xlu0 %7663, %v3507_v48   ;;  %v7730_v51 = vunpack.i.h.bf16 %v7728_v50  ;;  %v7729_v52 = vunpack.i.l.bf16 %v7728_v50  ;;  %v7733_v54 = vpop.permute.xlu1 %7732  ;;  %v7587_v50 = vld [vmem:[%s11141_s8] sm:$0xff] }
 0x712   :  { %v7735_v55 = vunpack.i.h.bf16 %v7733_v54  ;;  %v7734_v56 = vunpack.i.l.bf16 %v7733_v54 }
 0x713   :  { %v2392_v5 = vmax.f32 %v2352_v44, %v7730_v51  ;;  %v2391_v26 = vmax.f32 %v2351_v43, %v7729_v52 }
 0x715   :  { %v2424_v29 = vmax.f32 %v2392_v5, %v7735_v55  ;;  %v2423_v12 = vmax.f32 %v2391_v26, %v7734_v56  ;;  %v7588_v26 = vld [vmem:[%s11141_s8 + $0x8] sm:$0xff] }
 0x716   :  { %v7592_v56 = vld [vmem:[%s11141_s8 + $0x28] sm:$0xff] }
 0x717   :  { %v2456_v59 = vmax.f32 %v2424_v29, %v7740_v19  ;;  %v2455_v0 = vmax.f32 %v2423_v12, %v7739_v57  ;;  %v7296_v19 = vld [vmem:[%s11139_s7 + $0x20] sm:$0xf]  ;;  %v7589_v12 = vld [vmem:[%s11141_s8 + $0x10] sm:$0xff] }
 0x718   :  { %v3391_v57 = vsel %vm2477_vm2, %v7296_v19, 0 }
 0x719   :  { %v8669_v6 = vpack.c.bf16 %v2456_v59, %v2455_v0  ;;  %v7131_v0 = vld [vmem:[%s11139_s7 + $0xc] sm:$0xf] }
 0x71a   :  { %v2811_v39 = vsel %vm2477_vm2, %v7131_v0, 0 }
 0x71c   :  { %7043 = vmatmul.msk.bf16.gmra.mxu1 %vm2464_vm3, %v8669_v6  ;;  %7048 = vmatmul.msk.bf16.gmra.mxu2 %vm2464_vm3, %v8669_v6 }
 0x75a   :  { %v7753_v58 = vpop.permute.xlu2 %7752 }
 0x75b   :  { %v7755_v3 = vunpack.i.h.bf16 %v7753_v58  ;;  %v7754_v16 = vunpack.i.l.bf16 %v7753_v58  ;;  %v7594_v58 = vld [vmem:[%s11141_s8 + $0x38] sm:$0xff] }
 0x772   :  { %v7748_v44 = vpop.permute.xlu1 %7747 }
 0x773   :  { %v7743_v43 = vpop.permute.xlu0 %7742  ;;  %v7750_v42 = vunpack.i.h.bf16 %v7748_v44  ;;  %v7749_v32 = vunpack.i.l.bf16 %v7748_v44  ;;  %v7590_v44 = vld [vmem:[%s11141_s8 + $0x18] sm:$0xff] }
 0x774   :  { %v7745_v61 = vunpack.i.h.bf16 %v7743_v43  ;;  %v7744_v22 = vunpack.i.l.bf16 %v7743_v43 }
 0x776   :  { %v2394_v18 = vmax.f32 %v2354_v49, %v7745_v61  ;;  %v2393_v1 = vmax.f32 %v2353_v21, %v7744_v22 }
 0x778   :  { %v2426_v17 = vmax.f32 %v2394_v18, %v7750_v42  ;;  %v2425_v14 = vmax.f32 %v2393_v1, %v7749_v32 }
 0x779   :  { %v2490_v46 = vpop.f32.mrf.mxu1 }
 0x77a   :  { %v2458_v45 = vmax.f32 %v2426_v17, %v7755_v3  ;;  %v2457_v40 = vmax.f32 %v2425_v14, %v7754_v16  ;;  %v7595_v3 = vld [vmem:[%s11141_s8 + $0x40] sm:$0xff]  ;;  %v7596_v14 = vld [vmem:[%s11141_s8 + $0x48] sm:$0xff] }
 0x77c   :  { %v8683_v23 = vpack.c.bf16 %v2458_v45, %v2457_v40 }
 0x77e   :  { %7044 = vmatmul.msk.bf16.gmra.mxu1 %vm2464_vm3, %v8683_v23  ;;  %7049 = vmatmul.msk.bf16.gmra.mxu2 %vm2464_vm3, %v8683_v23 }
 0x77f   :  { %v2536_v49 = vpop.f32.mrf.mxu2 }
 0x781   :  { %v2492_v21 = vpop.f32.mrf.mxu1 }
 0x782   :  { %v2510_v48 = vpack.c.bf16 %v2492_v21, %v2490_v46  ;;  %v7197_v46 = vld [vmem:[%s11139_s7 + $0x14] sm:$0xf] }
 0x787   :  { %v2538_v27 = vpop.f32.mrf.mxu2 }
 0x788   :  { %v2556_v54 = vpack.c.bf16 %v2538_v27, %v2536_v49  ;;  %v3043_v49 = vsel %vm2477_vm2, %v7197_v46, 0  ;;  %v7598_v27 = vld [vmem:[%s11141_s8 + $0x58] sm:$0xff] }
 0x789   :  { %v2495_v13 = vpop.f32.mrf.mxu1 }
 0x78e   :  { %7099 = vmatmul.msk.bf16.vlgmr.msrb.gmra.mxu1 %vm2464_vm3, %v8620_v2 }
 0x78f   :  { %v2541_v34 = vpop.f32.mrf.mxu2  ;;  %3168 = vmatpush.bf16.msrb.mxu1 %v3159_v36 }
 0x791   :  { %v2497_v20 = vpop.f32.mrf.mxu1 }
 0x792   :  { %v2511_v8 = vpack.c.bf16 %v2497_v20, %v2495_v13 }
 0x797   :  { %v2543_v25 = vpop.f32.mrf.mxu2 }
 0x798   :  { %v2557_v51 = vpack.c.bf16 %v2543_v25, %v2541_v34 }
 0x799   :  { %v2500_v30 = vpop.f32.mrf.mxu1 }
 0x79e   :  { %7100 = vmatmul.msk.bf16.gmra.mxu1 %vm2464_vm3, %v8650_v9 }
 0x79f   :  { %v2546_v31 = vpop.f32.mrf.mxu2 }
 0x7a1   :  { %v2502_v28 = vpop.f32.mrf.mxu1 }
 0x7a2   :  { %v2512_v10 = vpack.c.bf16 %v2502_v28, %v2500_v30 }
 0x7a7   :  { %v2548_v35 = vpop.f32.mrf.mxu2 }
 0x7a8   :  { %v2558_v47 = vpack.c.bf16 %v2548_v35, %v2546_v31 }
 0x7ae   :  { %7101 = vmatmul.msk.bf16.gmra.mxu1 %vm2464_vm3, %v8669_v6 }
 0x7be   :  { %7102 = vmatmul.msk.bf16.gmra.mxu1 %vm2464_vm3, %v8683_v23 }
 0x7ce   :  { %7165 = vmatmul.msk.bf16.vlgmr.msra.gmra.mxu1 %vm2464_vm3, %v8620_v2 }
 0x7cf   :  { %3400 = vmatpush.bf16.msra.mxu1 %v3391_v57 }
 0x7de   :  { %7166 = vmatmul.msk.bf16.gmra.mxu1 %vm2464_vm3, %v8650_v9 }
 0x7ee   :  { %7167 = vmatmul.msk.bf16.gmra.mxu1 %vm2464_vm3, %v8669_v6 }
 0x7fb   :  { %v2505_v37 = vpop.f32.mrf.mxu1 }
 0x7fe   :  { %7168 = vmatmul.msk.bf16.gmra.mxu1 %vm2464_vm3, %v8683_v23 }
 0x801   :  { %v2551_v38 = vpop.f32.mrf.mxu2 }
 0x803   :  { %v2507_v53 = vpop.f32.mrf.mxu1 }
 0x804   :  { %v2513_v63 = vpack.c.bf16 %v2507_v53, %v2505_v37 }
 0x806   :  { %2667 = vmatpush.bf16.msra.mxu3 %v2513_v63 }
 0x809   :  { %v2553_v4 = vpop.f32.mrf.mxu2 }
 0x80a   :  { %v2559_v62 = vpack.c.bf16 %v2553_v4, %v2551_v38  ;;  %2668 = vmatpush.bf16.msra.mxu3 %v2512_v10 }
 0x80b   :  { %v2706_v7 = vpop.f32.mrf.mxu1 }
 0x80c   :  { %2606 = vmatpush.bf16.msrb.mxu0 %v2559_v62 }
 0x80e   :  { %2669 = vmatpush.bf16.msra.mxu3 %v2511_v8  ;;  %7231 = vmatmul.msk.bf16.vlgmr.msrb.gmra.mxu1 %vm2464_vm3, %v8620_v2 }
 0x810   :  { %2607 = vmatpush.bf16.msrb.mxu0 %v2558_v47 }
 0x812   :  { %2670 = vmatpush.bf16.msra.mxu3 %v2510_v48 }
 0x813   :  { %v2708_v52 = vpop.f32.mrf.mxu1 }
 0x814   :  { %2608 = vmatpush.bf16.msrb.mxu0 %v2557_v51  ;;  %v2726_v32 = vpack.c.bf16 %v2708_v52, %v2706_v7 }
 0x815   :  { %7094 = vmatmul.msk.bf16.vlgmr.msra.gmra.mxu3 %vm11184_vm4, %v7587_v50  ;;  %v7263_v50 = vld [vmem:[%s11139_s7 + $0x1c] sm:$0xf] }
 0x816   :  { %v3275_v51 = vsel %vm2477_vm2, %v7263_v50, 0  ;;  %v7606_v50 = vld [vmem:[%s11141_s8 + $0x98] sm:$0xff] }
 0x818   :  { %2609 = vmatpush.bf16.msrb.mxu0 %v2556_v54 }
 0x81b   :  { %7074 = vmatmul.msk.bf16.vlgmr.msrb.gmra.mxu0 %vm11184_vm4, %v7591_v11  ;;  %v2711_v5 = vpop.f32.mrf.mxu1 }
 0x81c   :  { %2820 = vmatpush.bf16.msra.mxu0 %v2811_v39 }
 0x81e   :  { %7232 = vmatmul.msk.bf16.gmra.mxu1 %vm2464_vm3, %v8650_v9 }
 0x820   :  { %3052 = vmatpush.bf16.msrb.mxu0 %v3043_v49 }
 0x823   :  { %v2713_v55 = vpop.f32.mrf.mxu1 }
 0x824   :  { %v2727_v42 = vpack.c.bf16 %v2713_v55, %v2711_v5 }
 0x825   :  { %7095 = vmatmul.msk.bf16.gmra.mxu3 %vm11184_vm4, %v7588_v26 }
 0x82b   :  { %7075 = vmatmul.msk.bf16.gmra.mxu0 %vm11184_vm4, %v7592_v56  ;;  %v2716_v29 = vpop.f32.mrf.mxu1 }
 0x82e   :  { %7233 = vmatmul.msk.bf16.gmra.mxu1 %vm2464_vm3, %v8669_v6 }
 0x833   :  { %v2718_v59 = vpop.f32.mrf.mxu1 }
 0x834   :  { %v2728_v18 = vpack.c.bf16 %v2718_v59, %v2716_v29 }
 0x835   :  { %7096 = vmatmul.msk.bf16.gmra.mxu3 %vm11184_vm4, %v7589_v12 }
 0x83b   :  { %7076 = vmatmul.msk.bf16.gmra.mxu0 %vm11184_vm4, %v7593_v41  ;;  %v2721_v43 = vpop.f32.mrf.mxu1 }
 0x83e   :  { %7234 = vmatmul.msk.bf16.gmra.mxu1 %vm2464_vm3, %v8683_v23 }
 0x843   :  { %v2723_v61 = vpop.f32.mrf.mxu1 }
 0x844   :  { %v2729_v22 = vpack.c.bf16 %v2723_v61, %v2721_v43 }
 0x845   :  { %7097 = vmatmul.msk.bf16.gmra.mxu3 %vm11184_vm4, %v7590_v44 }
 0x846   :  { %2775 = vmatpush.bf16.msra.mxu2 %v2729_v22 }
 0x84a   :  { %2776 = vmatpush.bf16.msra.mxu2 %v2728_v18 }
 0x84b   :  { %7077 = vmatmul.msk.bf16.gmra.mxu0 %vm11184_vm4, %v7594_v58  ;;  %v2938_v1 = vpop.f32.mrf.mxu1 }
 0x84e   :  { %2777 = vmatpush.bf16.msra.mxu2 %v2727_v42  ;;  %7297 = vmatmul.msk.bf16.vlgmr.msra.gmra.mxu1 %vm2464_vm3, %v8620_v2 }
 0x852   :  { %2778 = vmatpush.bf16.msra.mxu2 %v2726_v32 }
 0x853   :  { %v2940_v16 = vpop.f32.mrf.mxu1 }
 0x854   :  { %v2958_v33 = vpack.c.bf16 %v2940_v16, %v2938_v1 }
 0x855   :  { %7127 = vmatmul.msk.bf16.vlgmr.msra.gmra.mxu2 %vm11184_vm4, %v7595_v3  ;;  %v7603_v3 = vld [vmem:[%s11141_s8 + $0x80] sm:$0xff] }
 0x85b   :  { %7132 = vmatmul.msk.bf16.vlgmr.msra.gmra.mxu0 %vm2464_vm3, %v8620_v2  ;;  %v2943_v17 = vpop.f32.mrf.mxu1 }
 0x85c   :  { %3284 = vmatpush.bf16.msra.mxu0 %v3275_v51  ;;  %v7600_v51 = vld [vmem:[%s11141_s8 + $0x68] sm:$0xff] }
 0x85e   :  { %7298 = vmatmul.msk.bf16.gmra.mxu1 %vm2464_vm3, %v8650_v9 }
 0x863   :  { %v2945_v45 = vpop.f32.mrf.mxu1 }
 0x864   :  { %v2959_v30 = vpack.c.bf16 %v2945_v45, %v2943_v17 }
 0x865   :  { %7128 = vmatmul.msk.bf16.gmra.mxu2 %vm11184_vm4, %v7596_v14 }
 0x86b   :  { %7133 = vmatmul.msk.bf16.gmra.mxu0 %vm2464_vm3, %v8650_v9  ;;  %v2948_v40 = vpop.f32.mrf.mxu1 }
 0x86e   :  { %7299 = vmatmul.msk.bf16.gmra.mxu1 %vm2464_vm3, %v8669_v6 }
 0x873   :  { %v2950_v60 = vpop.f32.mrf.mxu1 }
 0x874   :  { %v2960_v20 = vpack.c.bf16 %v2950_v60, %v2948_v40 }
 0x875   :  { %7129 = vmatmul.msk.bf16.gmra.mxu2 %vm11184_vm4, %v7597_v15 }
 0x87b   :  { %7134 = vmatmul.msk.bf16.gmra.mxu0 %vm2464_vm3, %v8669_v6  ;;  %v2953_v21 = vpop.f32.mrf.mxu1 }
 0x87e   :  { %7300 = vmatmul.msk.bf16.gmra.mxu1 %vm2464_vm3, %v8683_v23 }
 0x883   :  { %v2955_v13 = vpop.f32.mrf.mxu1 }
 0x884   :  { %v2961_v34 = vpack.c.bf16 %v2955_v13, %v2953_v21 }
 0x885   :  { %7130 = vmatmul.msk.bf16.gmra.mxu2 %vm11184_vm4, %v7598_v27 }
 0x886   :  { %3007 = vmatpush.bf16.msrb.mxu2 %v2961_v34 }
 0x88a   :  { %3008 = vmatpush.bf16.msrb.mxu2 %v2960_v20 }
 0x88b   :  { %7135 = vmatmul.msk.bf16.gmra.mxu0 %vm2464_vm3, %v8683_v23  ;;  %v3170_v25 = vpop.f32.mrf.mxu1 }
 0x88e   :  { %3009 = vmatpush.bf16.msrb.mxu2 %v2959_v30 }
 0x892   :  { %3010 = vmatpush.bf16.msrb.mxu2 %v2958_v33  ;;  %v7604_v33 = vld [vmem:[%s11141_s8 + $0x88] sm:$0xff] }
 0x893   :  { %v3172_v36 = vpop.f32.mrf.mxu1 }
 0x894   :  { %v3190_v41 = vpack.c.bf16 %v3172_v36, %v3170_v25 }
 0x895   :  { %7193 = vmatmul.msk.bf16.vlgmr.msrb.gmra.mxu2 %vm11184_vm4, %v7603_v3  ;;  %v7608_v3 = vld [vmem:[%s11141_s8 + $0xa8] sm:$0xff] }
 0x898   :  { %v2611_v31 = vpop.f32.mrf.mxu0  ;;  %v2672_v28 = vpop.f32.mrf.mxu3 }
 0x899   :  { %v2673_v35 = vadd.f32 %v2672_v28, %v2611_v31 }
 0x89b   :  { %7198 = vmatmul.msk.bf16.vlgmr.msrb.gmra.mxu0 %vm2464_vm3, %v8620_v2  ;;  %v3175_v37 = vpop.f32.mrf.mxu1 }
 0x8a0   :  { %v8799_v38 = vpop.f32.mrf.mxu0  ;;  %v8801_v53 = vpop.f32.mrf.mxu3 }
 0x8a3   :  { %v3177_v63 = vpop.f32.mrf.mxu1 }
 0x8a4   :  { %v3191_v39 = vpack.c.bf16 %v3177_v63, %v3175_v37 }
 0x8a5   :  { %7194 = vmatmul.msk.bf16.gmra.mxu2 %vm11184_vm4, %v7604_v33 }
 0x8a8   :  { %v2616_v10 = vpop.f32.mrf.mxu0  ;;  %v2677_v4 = vpop.f32.mrf.mxu3 }
 0x8a9   :  { %v2678_v62 = vadd.f32 %v2677_v4, %v2616_v10  ;;  %v7605_v10 = vld [vmem:[%s11141_s8 + $0x90] sm:$0xff] }
 0x8ab   :  { %7199 = vmatmul.msk.bf16.gmra.mxu0 %vm2464_vm3, %v8650_v9  ;;  %v3180_v7 = vpop.f32.mrf.mxu1 }
 0x8b0   :  { %v8805_v8 = vpop.f32.mrf.mxu0  ;;  %v8807_v47 = vpop.f32.mrf.mxu3 }
 0x8b3   :  { %v3182_v48 = vpop.f32.mrf.mxu1 }
 0x8b4   :  { %v3192_v57 = vpack.c.bf16 %v3182_v48, %v3180_v7 }
 0x8b5   :  { %7195 = vmatmul.msk.bf16.gmra.mxu2 %vm11184_vm4, %v7605_v10 }
 0x8b8   :  { %v2621_v52 = vpop.f32.mrf.mxu0  ;;  %v2682_v54 = vpop.f32.mrf.mxu3 }
 0x8b9   :  { %v2683_v11 = vadd.f32 %v2682_v54, %v2621_v52 }
 0x8bb   :  { %7200 = vmatmul.msk.bf16.gmra.mxu0 %vm2464_vm3, %v8669_v6  ;;  %v3185_v5 = vpop.f32.mrf.mxu1 }
 0x8c0   :  { %v8815_v26 = vpop.f32.mrf.mxu0  ;;  %v8817_v55 = vpop.f32.mrf.mxu3 }
 0x8c3   :  { %v3187_v56 = vpop.f32.mrf.mxu1 }
 0x8c4   :  { %v3193_v19 = vpack.c.bf16 %v3187_v56, %v3185_v5  ;;  %v7601_v5 = vld [vmem:[%s11141_s8 + $0x70] sm:$0xff] }
 0x8c5   :  { %7196 = vmatmul.msk.bf16.gmra.mxu2 %vm11184_vm4, %v7606_v50 }
 0x8c6   :  { %3239 = vmatpush.bf16.msra.mxu2 %v3193_v19 }
 0x8c8   :  { %v2626_v29 = vpop.f32.mrf.mxu0  ;;  %v2687_v12 = vpop.f32.mrf.mxu3 }
 0x8c9   :  { %v2688_v59 = vadd.f32 %v2687_v12, %v2626_v29  ;;  %v7602_v29 = vld [vmem:[%s11141_s8 + $0x78] sm:$0xff] }
 0x8ca   :  { %3240 = vmatpush.bf16.msra.mxu2 %v3192_v57  ;;  %v7612_v57 = vld [vmem:[%s11141_s8 + $0xc8] sm:$0xff] }
 0x8cb   :  { %7201 = vmatmul.msk.bf16.gmra.mxu0 %vm2464_vm3, %v8683_v23  ;;  %v3402_v0 = vpop.f32.mrf.mxu1 }
 0x8ce   :  { %3241 = vmatpush.bf16.msra.mxu2 %v3191_v39 }
 0x8d0   :  { %v8821_v43 = vpop.f32.mrf.mxu0 }
 0x8d2   :  { %3242 = vmatpush.bf16.msra.mxu2 %v3190_v41  ;;  %v7613_v41 = vld [vmem:[%s11141_s8 + $0xd0] sm:$0xff] }
 0x8d3   :  { %v3404_v44 = vpop.f32.mrf.mxu1 }
 0x8d4   :  { %v3422_v31 = vpack.c.bf16 %v3404_v44, %v3402_v0 }
 0x8d8   :  { %v2780_v61 = vpop.f32.mrf.mxu2  ;;  %v2822_v22 = vpop.f32.mrf.mxu0 }
 0x8d9   :  { %v8823_v58 = vadd.f32 %v2780_v61, %v2673_v35 }
 0x8db   :  { %7264 = vmatmul.msk.bf16.vlgmr.msra.gmra.mxu0 %vm2464_vm3, %v8620_v2  ;;  %v3407_v18 = vpop.f32.mrf.mxu1 }
 0x8e0   :  { %v8827_v1 = vpop.f32.mrf.mxu2  ;;  %v2824_v42 = vpop.f32.mrf.mxu0 }
 0x8e3   :  { %v3409_v32 = vpop.f32.mrf.mxu1 }
 0x8e8   :  { %v2785_v16 = vpop.f32.mrf.mxu2  ;;  %v2827_v17 = vpop.f32.mrf.mxu0 }
 0x8e9   :  { %v8833_v14 = vadd.f32 %v2785_v16, %v2678_v62  ;;  %v7599_v62 = vld [vmem:[%s11141_s8 + $0x60] sm:$0xff] }
 0x8eb   :  { %7265 = vmatmul.msk.bf16.gmra.mxu0 %vm2464_vm3, %v8650_v9  ;;  %v3412_v45 = vpop.f32.mrf.mxu1 }
 0x8f0   :  { %v8837_v2 = vpop.f32.mrf.mxu2  ;;  %v2829_v40 = vpop.f32.mrf.mxu0 }
 0x8f1   :  { %v2843_v4 = vpack.c.bf16 %v2829_v40, %v2827_v17  ;;  %v7619_v40 = vld [vmem:[%s11141_s8 + $0x100] sm:$0xff] }
 0x8f3   :  { %v3414_v15 = vpop.f32.mrf.mxu1 }
 0x8f4   :  { %v3424_v9 = vpack.c.bf16 %v3414_v15, %v3412_v45 }
 0x8f8   :  { %v2790_v60 = vpop.f32.mrf.mxu2  ;;  %v2832_v46 = vpop.f32.mrf.mxu0 }
 0x8f9   :  { %v8839_v49 = vadd.f32 %v2790_v60, %v2683_v11  ;;  %v7611_v11 = vld [vmem:[%s11141_s8 + $0xc0] sm:$0xff]  ;;  %v7609_v60 = vld [vmem:[%s11141_s8 + $0xb0] sm:$0xff] }
 0x8fa   :  { %7259 = vmatmul.msk.bf16.vlgmr.msra.gmra.mxu2 %vm11184_vm4, %v7611_v11 }
 0x8fb   :  { %7266 = vmatmul.msk.bf16.gmra.mxu0 %vm2464_vm3, %v8669_v6  ;;  %v3417_v21 = vpop.f32.mrf.mxu1  ;;  %v3423_v6 = vpack.c.bf16 %v3409_v32, %v3407_v18  ;;  %v7614_v32 = vld [vmem:[%s11141_s8 + $0xd8] sm:$0xff] }
 0x900   :  { %v8843_v27 = vpop.f32.mrf.mxu2  ;;  %v2834_v13 = vpop.f32.mrf.mxu0 }
 0x901   :  { %v2844_v37 = vpack.c.bf16 %v2834_v13, %v2832_v46 }
 0x903   :  { %v3419_v34 = vpop.f32.mrf.mxu1 }
 0x904   :  { %v3425_v20 = vpack.c.bf16 %v3419_v34, %v3417_v21  ;;  %v7610_v34 = vld [vmem:[%s11141_s8 + $0xb8] sm:$0xff] }
 0x906   :  { %3471 = vmatpush.bf16.msrb.mxu2 %v3425_v20 }
 0x908   :  { %v2795_v25 = vpop.f32.mrf.mxu2  ;;  %v2837_v30 = vpop.f32.mrf.mxu0 }
 0x909   :  { %v8848_v36 = vadd.f32 %v2795_v25, %v2688_v59 }
 0x90a   :  { %3472 = vmatpush.bf16.msrb.mxu2 %v3424_v9 }
 0x90b   :  { %7267 = vmatmul.msk.bf16.gmra.mxu0 %vm2464_vm3, %v8683_v23  ;;  %v2842_v23 = vpack.c.bf16 %v2824_v42, %v2822_v22  ;;  %7260 = vmatmul.msk.bf16.gmra.mxu2 %vm11184_vm4, %v7612_v57  ;;  %v7607_v22 = vld [vmem:[%s11141_s8 + $0xa0] sm:$0xff]  ;;  %v7618_v57 = vld [vmem:[%s11141_s8 + $0xf8] sm:$0xff] }
 0x90e   :  { %3473 = vmatpush.bf16.msrb.mxu2 %v3423_v6 }
 0x910   :  { %v2839_v28 = vpop.f32.mrf.mxu0  ;;  %v8901_v17 = vpop.f32.mrf.mxu2 }
 0x911   :  { %v2845_v35 = vpack.c.bf16 %v2839_v28, %v2837_v30  ;;  %v7620_v30 = vld [vmem:[%s11141_s8 + $0x108] sm:$0xff]  ;;  %v8927_v28 = vpop.f32.mrf.mxu3 }
 0x912   :  { %3474 = vmatpush.bf16.msrb.mxu2 %v3422_v31 }
 0x913   :  { %2891 = vmatpush.bf16.msrb.mxu3 %v2845_v35 }
 0x917   :  { %2892 = vmatpush.bf16.msrb.mxu3 %v2844_v37  ;;  %v7615_v37 = vld [vmem:[%s11141_s8 + $0xe0] sm:$0xff] }
 0x918   :  { %v3054_v63 = vpop.f32.mrf.mxu0  ;;  %v8907_v15 = vpop.f32.mrf.mxu2 }
 0x91b   :  { %2893 = vmatpush.bf16.msrb.mxu3 %v2843_v4  ;;  %7261 = vmatmul.msk.bf16.gmra.mxu2 %vm11184_vm4, %v7613_v41 }
 0x91f   :  { %2894 = vmatpush.bf16.msrb.mxu3 %v2842_v23 }
 0x920   :  { %v3056_v7 = vpop.f32.mrf.mxu0  ;;  %v8913_v21 = vpop.f32.mrf.mxu2 }
 0x921   :  { %v3074_v61 = vpack.c.bf16 %v3056_v7, %v3054_v63  ;;  %v7621_v63 = vld [vmem:[%s11141_s8 + $0x110] sm:$0xff] }
 0x922   :  { %7160 = vmatmul.msk.bf16.vlgmr.msrb.gmra.mxu3 %vm11184_vm4, %v7599_v62  ;;  %v7616_v62 = vld [vmem:[%s11141_s8 + $0xe8] sm:$0xff] }
 0x928   :  { %v3059_v48 = vpop.f32.mrf.mxu0  ;;  %v8918_v25 = vpop.f32.mrf.mxu2 }
 0x92b   :  { %7262 = vmatmul.msk.bf16.gmra.mxu2 %vm11184_vm4, %v7614_v32 }
 0x930   :  { %v3061_v52 = vpop.f32.mrf.mxu0  ;;  %v8925_v31 = vpop.f32.mrf.mxu2 }
 0x931   :  { %v3075_v44 = vpack.c.bf16 %v3061_v52, %v3059_v48  ;;  %v7622_v48 = vld [vmem:[%s11141_s8 + $0x118] sm:$0xff] }
 0x932   :  { %7161 = vmatmul.msk.bf16.gmra.mxu3 %vm11184_vm4, %v7600_v51 }
 0x938   :  { %v3064_v54 = vpop.f32.mrf.mxu0  ;;  %v8937_v4 = vpop.f32.mrf.mxu2 }
 0x93b   :  { %7325 = vmatmul.msk.bf16.vlgmr.msrb.gmra.mxu2 %vm11184_vm4, %v7619_v40 }
 0x940   :  { %v3066_v56 = vpop.f32.mrf.mxu0  ;;  %v8942_v7 = vpop.f32.mrf.mxu2 }
 0x941   :  { %v3076_v0 = vpack.c.bf16 %v3066_v56, %v3064_v54  ;;  %v7617_v54 = vld [vmem:[%s11141_s8 + $0xf0] sm:$0xff]  ;;  %s7763_s8 = smov 122  }
 0x942   :  { %7162 = vmatmul.msk.bf16.gmra.mxu3 %vm11184_vm4, %v7601_v5 }
 0x948   :  { %v3069_v19 = vpop.f32.mrf.mxu0  ;;  %v8949_v51 = vpop.f32.mrf.mxu2 }
 0x94b   :  { %7326 = vmatmul.msk.bf16.gmra.mxu2 %vm11184_vm4, %v7620_v30 }
 0x950   :  { %v3071_v12 = vpop.f32.mrf.mxu0  ;;  %v8955_v11 = vpop.f32.mrf.mxu2 }
 0x951   :  { %v3077_v59 = vpack.c.bf16 %v3071_v12, %v3069_v19 }
 0x952   :  { %7163 = vmatmul.msk.bf16.gmra.mxu3 %vm11184_vm4, %v7602_v29 }
 0x953   :  { %3123 = vmatpush.bf16.msra.mxu3 %v3077_v59 }
 0x957   :  { %3124 = vmatpush.bf16.msra.mxu3 %v3076_v0 }
 0x958   :  { %v3286_v39 = vpop.f32.mrf.mxu0 }
 0x95b   :  { %3125 = vmatpush.bf16.msra.mxu3 %v3075_v44  ;;  %7327 = vmatmul.msk.bf16.gmra.mxu2 %vm11184_vm4, %v7621_v63 }
 0x95f   :  { %3126 = vmatpush.bf16.msra.mxu3 %v3074_v61 }
 0x960   :  { %v3288_v18 = vpop.f32.mrf.mxu0 }
 0x961   :  { %v3306_v35 = vpack.c.bf16 %v3288_v18, %v3286_v39 }
 0x962   :  { %7226 = vmatmul.msk.bf16.vlgmr.msra.gmra.mxu3 %vm11184_vm4, %v7607_v22 }
 0x968   :  { %v3291_v42 = vpop.f32.mrf.mxu0 }
 0x96b   :  { %7328 = vmatmul.msk.bf16.gmra.mxu2 %vm11184_vm4, %v7622_v48 }
 0x970   :  { %v3293_v16 = vpop.f32.mrf.mxu0 }
 0x971   :  { %v3307_v6 = vpack.c.bf16 %v3293_v16, %v3291_v42 }
 0x972   :  { %7227 = vmatmul.msk.bf16.gmra.mxu3 %vm11184_vm4, %v7608_v3 }
 0x978   :  { %v3296_v45 = vpop.f32.mrf.mxu0 }
 0x97d   :  { %v3244_v19 = vpop.f32.mrf.mxu2 }
 0x980   :  { %v3298_v46 = vpop.f32.mrf.mxu0 }
 0x981   :  { %v3308_v33 = vpack.c.bf16 %v3298_v46, %v3296_v45 }
 0x982   :  { %7228 = vmatmul.msk.bf16.gmra.mxu3 %vm11184_vm4, %v7609_v60 }
 0x985   :  { %v3246_v12 = vpop.f32.mrf.mxu2 }
 0x988   :  { %v3301_v13 = vpop.f32.mrf.mxu0 }
 0x98e   :  { %v3249_v0 = vpop.f32.mrf.mxu2 }
 0x990   :  { %v3303_v20 = vpop.f32.mrf.mxu0 }
 0x991   :  { %v3309_v9 = vpack.c.bf16 %v3303_v20, %v3301_v13 }
 0x992   :  { %7229 = vmatmul.msk.bf16.gmra.mxu3 %vm11184_vm4, %v7610_v34  ;;  %v2675_v34 = vadd.f32 %v8801_v53, %v8799_v38 }
 0x993   :  { %3355 = vmatpush.bf16.msrb.mxu3 %v3309_v9 }
 0x994   :  { %v2801_v9 = vadd.f32 %v8827_v1, %v2675_v34  ;;  %v2680_v1 = vadd.f32 %v8807_v47, %v8805_v8  ;;  %v3520_v47 = vpop.permute.xlu1 %3519 }
 0x996   :  { %v8969_v41 = vpop.f32.mrf.mxu2 }
 0x997   :  { %3356 = vmatpush.bf16.msrb.mxu3 %v3308_v33 }
 0x99b   :  { %3357 = vmatpush.bf16.msrb.mxu3 %v3307_v6 }
 0x99e   :  { %v8971_v22 = vpop.f32.mrf.mxu2 }
 0x99f   :  { %3358 = vmatpush.bf16.msrb.mxu3 %v3306_v35 }
 0x9a2   :  { %7292 = vmatmul.msk.bf16.vlgmr.msrb.gmra.mxu3 %vm11184_vm4, %v7615_v37 }
 0x9a5   :  { %v2896_v10 = vpop.f32.mrf.mxu3 }
 0x9a6   :  { %v8973_v42 = vpop.f32.mrf.mxu2  ;;  %v2916_v60 = vadd.f32 %v2896_v10, %v8823_v58  ;;  %v3515_v10 = vpop.permute.xlu0 %3514 }
 0x9a8   :  { %v3032_v20 = vadd.f32 %v8907_v15, %v2916_v60 }
 0x9ad   :  { %v2898_v23 = vpop.f32.mrf.mxu3 }
 0x9ae   :  { %v8977_v3 = vpop.f32.mrf.mxu2  ;;  %v2917_v33 = vadd.f32 %v2898_v23, %v2801_v9 }
 0x9b0   :  { %v3033_v37 = vadd.f32 %v8913_v21, %v2917_v33  ;;  %v2803_v21 = vadd.f32 %v8837_v2, %v2680_v1 }
 0x9b2   :  { %7293 = vmatmul.msk.bf16.gmra.mxu3 %vm11184_vm4, %v7616_v62 }
 0x9b5   :  { %v2901_v50 = vpop.f32.mrf.mxu3 }
 0x9b6   :  { %v8981_v45 = vpop.f32.mrf.mxu2 }
 0x9bd   :  { %v2903_v52 = vpop.f32.mrf.mxu3 }
 0x9be   :  { %v3476_v13 = vpop.f32.mrf.mxu2 }
 0x9c2   :  { %7294 = vmatmul.msk.bf16.gmra.mxu3 %vm11184_vm4, %v7617_v54  ;;  %v2918_v54 = vadd.f32 %v2901_v50, %v8833_v14 }
 0x9c4   :  { %v3034_v15 = vadd.f32 %v8918_v25, %v2918_v54  ;;  %v2919_v25 = vadd.f32 %v2903_v52, %v2803_v21 }
 0x9c5   :  { %v8957_v5 = vpop.f32.mrf.mxu3 }
 0x9c6   :  { %v3478_v62 = vpop.f32.mrf.mxu2 }
 0x9cd   :  { %v8959_v56 = vpop.f32.mrf.mxu3 }
 0x9ce   :  { %v3481_v14 = vpop.f32.mrf.mxu2 }
 0x9d2   :  { %7295 = vmatmul.msk.bf16.gmra.mxu3 %vm11184_vm4, %v7618_v57 }
 0x9d5   :  { %v8965_v29 = vpop.f32.mrf.mxu3 }
 0x9d6   :  { %v2922_v21 = vadd.f32 %v8965_v29, %v8848_v36 }
 0x9dd   :  { %v8967_v59 = vpop.f32.mrf.mxu3 }
 0x9e5   :  { %v3128_v39 = vpop.f32.mrf.mxu3 }
 0x9e6   :  { %v3148_v30 = vadd.f32 %v3128_v39, %v3032_v20  ;;  %v3483_v20 = vpop.f32.mrf.mxu2 }
 0x9e8   :  { %v3264_v6 = vadd.f32 %v3244_v19, %v3148_v30 }
 0x9ed   :  { %v3130_v44 = vpop.f32.mrf.mxu3 }
 0x9ee   :  { %v3149_v48 = vadd.f32 %v3130_v44, %v3033_v37  ;;  %v3510_v44 = vld [vmem:[%s11140_s9 + $0x30] sm:$0xff] }
 0x9f0   :  { %v3265_v38 = vadd.f32 %v3246_v12, %v3149_v48 }
 0x9f5   :  { %v3133_v61 = vpop.f32.mrf.mxu3 }
 0x9f6   :  { %v3150_v50 = vadd.f32 %v3133_v61, %v3034_v15  ;;  %v3525_v61 = vpop.permute.xlu2 %3524 }
 0x9f8   :  { %v3266_v39 = vadd.f32 %v3249_v0, %v3150_v50  ;;  %v2920_v0 = vadd.f32 %v8957_v5, %v8839_v49  ;;  %v2690_v50 = vadd.f32 %v8927_v28, %v8821_v43 }
 0x9fd   :  { %v3135_v18 = vpop.f32.mrf.mxu3 }
 0x9fe   :  { %v3540_v15 = vpop.permute.xlu2 %3539 }
 0xa05   :  { %v8975_v32 = vpop.f32.mrf.mxu3 }
 0xa0d   :  { %v8979_v16 = vpop.f32.mrf.mxu3 }
 0xa15   :  { %v8983_v40 = vpop.f32.mrf.mxu3 }
 0xa1d   :  { %v8986_v46 = vpop.f32.mrf.mxu3 }
 0xa25   :  { %v3360_v35 = vpop.f32.mrf.mxu3 }
 0xa26   :  { %v3380_v63 = vadd.f32 %v3360_v35, %v3264_v6  ;;  %v2685_v35 = vadd.f32 %v8817_v55, %v8815_v26  ;;  %v3486_v26 = vpop.f32.mrf.mxu2 }
 0xa28   :  { %v3496_v58 = vadd.f32 %v3476_v13, %v3380_v63  ;;  %v3035_v13 = vadd.f32 %v8925_v31, %v2919_v25  ;;  %v3511_v31 = vld [vmem:[%s11140_s9 + $0x38] sm:$0xff]  ;;  %v2805_v49 = vadd.f32 %v8843_v27, %v2685_v35  ;;  %v2807_v25 = vadd.f32 %v8901_v17, %v2690_v50 }
 0xa2a   :  { %v3552_v57 = vadd.f32 %v3515_v10, %v3496_v58  ;;  %v3151_v2 = vadd.f32 %v3135_v18, %v3035_v13  ;;  %v3036_v18 = vadd.f32 %v8937_v4, %v2920_v0 }
 0xa2c   :  { %v8994_v24 = vmax.f32 %v3552_v57, 0.0  ;;  %v3267_v33 = vadd.f32 %v8969_v41, %v3151_v2  ;;  %v3152_v5 = vadd.f32 %v8975_v32, %v3036_v18  ;;  %v3530_v41 = vpop.permute.xlu0 %3529  ;;  %v3535_v32 = vpop.permute.xlu1 %3534 }
 0xa2d   :  { %v3362_v53 = vpop.f32.mrf.mxu3 }
 0xa2e   :  { %v3381_v23 = vadd.f32 %v3362_v53, %v3265_v38  ;;  %3640 = vrot.lane.b32.xlu2 %v8994_v24, %s7763_s8  ;;  %3608 = vrot.lane.b32.xlu1 %v8994_v24, %s7764_s22  ;;  %v3268_v4 = vadd.f32 %v8971_v22, %v3152_v5  ;;  %v3488_v53 = vpop.f32.mrf.mxu2 }
 0xa2f   :  { %3576 = vrot.lane.b32.xlu0 %v8994_v24, %s7765_s6 }
 0xa30   :  { %v3497_v8 = vadd.f32 %v3478_v62, %v3381_v23  ;;  %v2921_v62 = vadd.f32 %v8959_v56, %v2805_v49 }
 0xa32   :  { %v3553_v19 = vadd.f32 %v3520_v47, %v3497_v8  ;;  %v3037_v10 = vadd.f32 %v8942_v7, %v2921_v62  ;;  %v3038_v47 = vadd.f32 %v8949_v51, %v2922_v21  ;;  %v3764_v21 = vld [vmem:[%s11143_s12 + $0x8] sm:$0xff] }
 0xa34   :  { %v9006_v12 = vmax.f32 %v3553_v19, 0.0  ;;  %v3153_v27 = vadd.f32 %v8979_v16, %v3037_v10  ;;  %v3154_v19 = vadd.f32 %v8983_v40, %v3038_v47 }
 0xa35   :  { %v3365_v60 = vpop.f32.mrf.mxu3 }
 0xa36   :  { %v3382_v34 = vadd.f32 %v3365_v60, %v3266_v39  ;;  %3610 = vrot.lane.b32.xlu2 %v9006_v12, %s7764_s22  ;;  %3578 = vrot.lane.b32.xlu1 %v9006_v12, %s7765_s6  ;;  %v3269_v22 = vadd.f32 %v8973_v42, %v3153_v27  ;;  %v3684_v42 = vld [vmem:[%s11142_s10] sm:$0x3]  ;;  %v3491_v2 = vpop.f32.mrf.mxu2 }
 0xa37   :  { %3544 = vperm.xlu0 %7663, %v3510_v44   ;;  %7329 = vmatpush.msk.msrb.mxu0 %vm3710_vm5, %v3684_v42  ;;  %v2923_v44 = vadd.f32 %v8967_v59, %v2807_v25 }
 0xa38   :  { %v3498_v52 = vadd.f32 %v3481_v14, %v3382_v34  ;;  %v3270_v34 = vadd.f32 %v8977_v3, %v3154_v19  ;;  %v5191_v19 = vld [vmem:[%s11144_s14 + $0x18] sm:$0xff] }
 0xa39   :  { %v3039_v29 = vadd.f32 %v8955_v11, %v2923_v44 }
 0xa3a   :  { %v3554_v9 = vadd.f32 %v3525_v61, %v3498_v52 }
 0xa3b   :  { %v3155_v51 = vadd.f32 %v8986_v46, %v3039_v29  ;;  %v5195_v29 = vld [vmem:[%s11144_s14 + $0x38] sm:$0xff] }
 0xa3c   :  { %v9021_v30 = vmax.f32 %v3554_v9, 0.0 }
 0xa3d   :  { %v3367_v6 = vpop.f32.mrf.mxu3 }
 0xa3e   :  { %v3383_v37 = vadd.f32 %v3367_v6, %v3267_v33  ;;  %3580 = vrot.lane.b32.xlu2 %v9021_v30, %s7765_s6  ;;  %3549 = vperm.xlu1 %7664, %v3511_v31  }
 0xa3f   :  { %3642 = vrot.lane.b32.xlu0 %v9006_v12, %s7763_s8 }
 0xa40   :  { %v3499_v63 = vadd.f32 %v3483_v20, %v3383_v37  ;;  %v3271_v20 = vadd.f32 %v8981_v45, %v3155_v51  ;;  %v5198_v51 = vld [vmem:[%s11144_s14 + $0x50] sm:$0xff] }
 0xa42   :  { %v3555_v48 = vadd.f32 %v3530_v41, %v3499_v63 }
 0xa44   :  { %v9034_v55 = vmax.f32 %v3555_v48, 0.0  ;;  %v3768_v48 = vld [vmem:[%s11143_s12 + $0x28] sm:$0xff] }
 0xa45   :  { %v3370_v58 = vpop.f32.mrf.mxu3 }
 0xa46   :  { %v3384_v54 = vadd.f32 %v3370_v58, %v3268_v4  ;;  %3582 = vrot.lane.b32.xlu2 %v9034_v55, %s7765_s6  ;;  %3644 = vrot.lane.b32.xlu1 %v9021_v30, %s7763_s8  ;;  %v3770_v58 = vld [vmem:[%s11143_s12 + $0x38] sm:$0xff] }
 0xa47   :  { %3612 = vrot.lane.b32.xlu0 %v9021_v30, %s7764_s22 }
 0xa48   :  { %v3500_v56 = vadd.f32 %v3486_v26, %v3384_v54  ;;  %v3769_v26 = vld [vmem:[%s11143_s12 + $0x30] sm:$0xff] }
 0xa4a   :  { %v3556_v57 = vadd.f32 %v3535_v32, %v3500_v56  ;;  %v3765_v32 = vld [vmem:[%s11143_s12 + $0x10] sm:$0xff] }
 0xa4c   :  { %v9045_v38 = vmax.f32 %v3556_v57, 0.0  ;;  %v3766_v57 = vld [vmem:[%s11143_s12 + $0x18] sm:$0xff] }
 0xa4d   :  { %v3372_v7 = vpop.f32.mrf.mxu3 }
 0xa4e   :  { %v3385_v1 = vadd.f32 %v3372_v7, %v3269_v22  ;;  %3584 = vrot.lane.b32.xlu2 %v9045_v38, %s7765_s6  ;;  %3646 = vrot.lane.b32.xlu1 %v9034_v55, %s7763_s8  ;;  %v3767_v7 = vld [vmem:[%s11143_s12 + $0x20] sm:$0xff] }
 0xa4f   :  { %3614 = vrot.lane.b32.xlu0 %v9034_v55, %s7764_s22 }
 0xa50   :  { %v3501_v16 = vadd.f32 %v3488_v53, %v3385_v1 }
 0xa52   :  { %v3557_v23 = vadd.f32 %v3540_v15, %v3501_v16  ;;  %v5188_v15 = vld [vmem:[%s11144_s14] sm:$0xff] }
 0xa54   :  { %v9054_v14 = vmax.f32 %v3557_v23, 0.0  ;;  %v3763_v23 = vld [vmem:[%s11143_s12] sm:$0xff] }
 0xa55   :  { %v3375_v39 = vpop.f32.mrf.mxu3 }
 0xa56   :  { %3586 = vrot.lane.b32.xlu2 %v9054_v14, %s7765_s6  ;;  %3648 = vrot.lane.b32.xlu1 %v9045_v38, %s7763_s8  ;;  %v3386_v43 = vadd.f32 %v3375_v39, %v3270_v34  ;;  %v5190_v39 = vld [vmem:[%s11144_s14 + $0x10] sm:$0xff]  ;;  %v5192_v34 = vld [vmem:[%s11144_s14 + $0x20] sm:$0xff] }
 0xa57   :  { %3616 = vrot.lane.b32.xlu0 %v9045_v38, %s7764_s22 }
 0xa58   :  { %v3502_v40 = vadd.f32 %v3491_v2, %v3386_v43  ;;  %v5197_v2 = vld [vmem:[%s11144_s14 + $0x48] sm:$0xff]  ;;  %v5200_v43 = vld [vmem:[%s11144_s14 + $0x60] sm:$0xff] }
 0xa5d   :  { %v3377_v61 = vpop.f32.mrf.mxu3 }
 0xa5e   :  { %3650 = vrot.lane.b32.xlu1 %v9054_v14, %s7763_s8  ;;  %v3387_v9 = vadd.f32 %v3377_v61, %v3271_v20  ;;  %v5206_v61 = vld [vmem:[%s11144_s14 + $0x90] sm:$0xff]  ;;  %v5204_v20 = vld [vmem:[%s11144_s14 + $0x80] sm:$0xff] }
 0xa5f   :  { %3618 = vrot.lane.b32.xlu0 %v9054_v14, %s7764_s22 }
 0xa88   :  { %v3641_v8 = vpop.permute.xlu2 %3640 }
 0xa90   :  { %v3611_v52 = vpop.permute.xlu2 %3610 }
 0xa98   :  { %v3581_v33 = vpop.permute.xlu2 %3580 }
 0xaa0   :  { %v3609_v60 = vpop.permute.xlu1 %3608  ;;  %v3583_v63 = vpop.permute.xlu2 %3582 }
 0xaa1   :  { %v3577_v13 = vpop.permute.xlu0 %3576 }
 0xaa2   :  { %v3600_v36 = vmax.f32 %v8994_v24, %v3577_v13  ;;  %v3493_v24 = vpop.f32.mrf.mxu2  ;;  %v5193_v13 = vld [vmem:[%s11144_s14 + $0x28] sm:$0xff] }
 0xaa3   :  { %v3503_v46 = vadd.f32 %v3493_v24, %v3387_v9  ;;  %v5207_v9 = vld [vmem:[%s11144_s14 + $0x98] sm:$0xff]  ;;  %v5212_v24 = vld [vmem:[%s11144_s14 + $0xc0] sm:$0xff] }
 0xaa4   :  { %v3632_v28 = vmax.f32 %v3600_v36, %v3609_v60  ;;  %v5189_v60 = vld [vmem:[%s11144_s14 + $0x8] sm:$0xff]  ;;  %v5196_v36 = vld [vmem:[%s11144_s14 + $0x40] sm:$0xff] }
 0xaa6   :  { %v3664_v17 = vmax.f32 %v3632_v28, %v3641_v8  ;;  %v5199_v28 = vld [vmem:[%s11144_s14 + $0x58] sm:$0xff] }
 0xaa8   :  { %7330 = vmatmul.msk.f32.vlgmr.msrb.gmra.mxu0 %vm3685_vm6, %v3664_v17  ;;  %v3579_v59 = vpop.permute.xlu1 %3578  ;;  %v3585_v56 = vpop.permute.xlu2 %3584  ;;  %v5202_v17 = vld [vmem:[%s11144_s14 + $0x70] sm:$0xff] }
 0xaa9   :  { %v3545_v3 = vpop.permute.xlu0 %3544  ;;  %v3601_v11 = vmax.f32 %v9006_v12, %v3579_v59  ;;  %v3602_v12 = vmax.f32 %v9021_v30, %v3581_v33  ;;  %v3603_v30 = vmax.f32 %v9034_v55, %v3583_v63  ;;  %v3604_v55 = vmax.f32 %v9045_v38, %v3585_v56  ;;  %v5205_v59 = vld [vmem:[%s11144_s14 + $0x88] sm:$0xff]  ;;  %v5215_v33 = vld [vmem:[%s11144_s14 + $0xd8] sm:$0xff] }
 0xaaa   :  { %v3558_v0 = vadd.f32 %v3545_v3, %v3502_v40  ;;  %v5201_v40 = vld [vmem:[%s11144_s14 + $0x68] sm:$0xff] }
 0xaab   :  { %v3633_v6 = vmax.f32 %v3601_v11, %v3611_v52  ;;  %v5203_v52 = vld [vmem:[%s11144_s14 + $0x78] sm:$0xff]  ;;  %v5209_v3 = vld [vmem:[%s11144_s14 + $0xa8] sm:$0xff] }
 0xaac   :  { %v9084_v31 = vmax.f32 %v3558_v0, 0.0  ;;  %v5208_v0 = vld [vmem:[%s11144_s14 + $0xa0] sm:$0xff]  ;;  %v5211_v11 = vld [vmem:[%s11144_s14 + $0xb8] sm:$0xff] }
 0xaae   :  { %3652 = vrot.lane.b32.xlu1 %v9084_v31, %s7763_s8  ;;  %3620 = vrot.lane.b32.xlu0 %v9084_v31, %s7764_s22 }
 0xaaf   :  { %3588 = vrot.lane.b32.xlu2 %v9084_v31, %s7765_s6 }
 0xab0   :  { %v3550_v45 = vpop.permute.xlu1 %3549  ;;  %v3587_v50 = vpop.permute.xlu2 %3586 }
 0xab1   :  { %v3559_v35 = vadd.f32 %v3550_v45, %v3503_v46  ;;  %v3643_v18 = vpop.permute.xlu0 %3642  ;;  %v3605_v38 = vmax.f32 %v9054_v14, %v3587_v50  ;;  %v5194_v14 = vld [vmem:[%s11144_s14 + $0x30] sm:$0xff]  ;;  %v5227_v50 = vld [vmem:[%s11144_s14 + $0x138] sm:$0xff] }
 0xab2   :  { %v3665_v37 = vmax.f32 %v3633_v6, %v3643_v18  ;;  %v5210_v46 = vld [vmem:[%s11144_s14 + $0xb0] sm:$0xff]  ;;  %v5213_v6 = vld [vmem:[%s11144_s14 + $0xc8] sm:$0xff]  ;;  %v5235_v18 = vld [vmem:[%s11144_s14 + $0x178] sm:$0xff] }
 0xab3   :  { %v9092_v49 = vmax.f32 %v3559_v35, 0.0  ;;  %v5214_v45 = vld [vmem:[%s11144_s14 + $0xd0] sm:$0xff] }
 0xab4   :  { %7331 = vmatmul.msk.f32.gmra.mxu0 %vm3685_vm6, %v3665_v37  ;;  %v5217_v37 = vld [vmem:[%s11144_s14 + $0xe8] sm:$0xff] }
 0xab6   :  { %3654 = vrot.lane.b32.xlu1 %v9092_v49, %s7763_s8  ;;  %3622 = vrot.lane.b32.xlu0 %v9092_v49, %s7764_s22 }
 0xab7   :  { %3590 = vrot.lane.b32.xlu2 %v9092_v49, %s7765_s6 }
 0xab8   :  { %v3645_v5 = vpop.permute.xlu1 %3644 }
 0xab9   :  { %v3613_v41 = vpop.permute.xlu0 %3612 }
 0xaba   :  { %v3634_v62 = vmax.f32 %v3602_v12, %v3613_v41  ;;  %v5216_v12 = vld [vmem:[%s11144_s14 + $0xe0] sm:$0xff] }
 0xabc   :  { %v3666_v4 = vmax.f32 %v3634_v62, %v3645_v5 }
 0xabe   :  { %3798 = vperm.xlu1 %7664, %v3768_v48   ;;  %3803 = vperm.xlu0 %7663, %v3769_v26   ;;  %v5219_v26 = vld [vmem:[%s11144_s14 + $0xf8] sm:$0xff] }
 0xabf   :  { %3808 = vperm.xlu2 %7695, %v3770_v58   ;;  %7332 = vmatmul.msk.f32.gmra.mxu0 %vm3685_vm6, %v3666_v4  ;;  %v5251_v4 = vld [vmem:[%s11144_s14 + $0x1f8] sm:$0xff] }
 0xac0   :  { %v3647_v10 = vpop.permute.xlu1 %3646 }
 0xac1   :  { %v3615_v54 = vpop.permute.xlu0 %3614 }
 0xac2   :  { %v3635_v27 = vmax.f32 %v3603_v30, %v3615_v54  ;;  %v5234_v30 = vld [vmem:[%s11144_s14 + $0x170] sm:$0xff] }
 0xac4   :  { %v3667_v22 = vmax.f32 %v3635_v27, %v3647_v10 }
 0xac6   :  { %3783 = vperm.xlu1 %7664, %v3765_v32   ;;  %3788 = vperm.xlu0 %7663, %v3766_v57   ;;  %v5218_v32 = vld [vmem:[%s11144_s14 + $0xf0] sm:$0xff] }
 0xac7   :  { %3793 = vperm.xlu2 %7695, %v3767_v7   ;;  %7333 = vmatmul.msk.f32.gmra.mxu0 %vm3685_vm6, %v3667_v22  ;;  %v5250_v57 = vld [vmem:[%s11144_s14 + $0x1f0] sm:$0xff]  ;;  %v5233_v22 = vld [vmem:[%s11144_s14 + $0x168] sm:$0xff] }
 0xac8   :  { %v3649_v53 = vpop.permute.xlu1 %3648  ;;  %v5249_v7 = vld [vmem:[%s11144_s14 + $0x1e8] sm:$0xff] }
 0xac9   :  { %v3617_v1 = vpop.permute.xlu0 %3616 }
 0xaca   :  { %v3636_v16 = vmax.f32 %v3604_v55, %v3617_v1  ;;  %v5232_v55 = vld [vmem:[%s11144_s14 + $0x160] sm:$0xff]  ;;  %v5230_v1 = vld [vmem:[%s11144_s14 + $0x150] sm:$0xff] }
 0xacc   :  { %v3668_v42 = vmax.f32 %v3636_v16, %v3649_v53  ;;  %v5247_v53 = vld [vmem:[%s11144_s14 + $0x1d8] sm:$0xff]  ;;  %v5248_v16 = vld [vmem:[%s11144_s14 + $0x1e0] sm:$0xff] }
 0xace   :  { %5254 = vperm.xlu1 %7664, %v5188_v15   ;;  %3773 = vperm.xlu0 %7663, %v3763_v23   ;;  %v5228_v15 = vld [vmem:[%s11144_s14 + $0x140] sm:$0xff]  ;;  %v5246_v23 = vld [vmem:[%s11144_s14 + $0x1d0] sm:$0xff] }
 0xacf   :  { %3778 = vperm.xlu2 %7695, %v3764_v21   ;;  %7334 = vmatmul.msk.f32.gmra.mxu0 %vm3685_vm6, %v3668_v42  ;;  %v5229_v42 = vld [vmem:[%s11144_s14 + $0x148] sm:$0xff]  ;;  %v5244_v21 = vld [vmem:[%s11144_s14 + $0x1c0] sm:$0xff] }
 0xad0   :  { %v3651_v25 = vpop.permute.xlu1 %3650 }
 0xad1   :  { %v3619_v8 = vpop.permute.xlu0 %3618 }
 0xad2   :  { %v3637_v47 = vmax.f32 %v3605_v38, %v3619_v8  ;;  %v5245_v38 = vld [vmem:[%s11144_s14 + $0x1c8] sm:$0xff] }
 0xad3   :  { %v5225_v8 = vld [vmem:[%s11144_s14 + $0x128] sm:$0xff] }
 0xad4   :  { %v3669_v44 = vmax.f32 %v3637_v47, %v3651_v25  ;;  %v5243_v47 = vld [vmem:[%s11144_s14 + $0x1b8] sm:$0xff]  ;;  %v5226_v25 = vld [vmem:[%s11144_s14 + $0x130] sm:$0xff] }
 0xad6   :  { %5269 = vperm.xlu1 %7664, %v5191_v19   ;;  %5264 = vperm.xlu0 %7663, %v5190_v39   ;;  %v5241_v19 = vld [vmem:[%s11144_s14 + $0x1a8] sm:$0xff]  ;;  %v5224_v39 = vld [vmem:[%s11144_s14 + $0x120] sm:$0xff] }
 0xad7   :  { %5259 = vperm.xlu2 %7695, %v5189_v60   ;;  %7335 = vmatmul.msk.f32.gmra.mxu0 %vm3685_vm6, %v3669_v44  ;;  %v5242_v44 = vld [vmem:[%s11144_s14 + $0x1b0] sm:$0xff] }
 0xad8   :  { %v5222_v60 = vld [vmem:[%s11144_s14 + $0x110] sm:$0xff] }
 0xade   :  { %5284 = vperm.xlu1 %7664, %v5194_v14   ;;  %5279 = vperm.xlu0 %7663, %v5193_v13   ;;  %v5240_v14 = vld [vmem:[%s11144_s14 + $0x1a0] sm:$0xff]  ;;  %v5223_v13 = vld [vmem:[%s11144_s14 + $0x118] sm:$0xff] }
 0xadf   :  { %5274 = vperm.xlu2 %7695, %v5192_v34   ;;  %v5238_v34 = vld [vmem:[%s11144_s14 + $0x190] sm:$0xff] }
 0xae6   :  { %5299 = vperm.xlu1 %7664, %v5197_v2   ;;  %5294 = vperm.xlu0 %7663, %v5196_v36   ;;  %v5221_v2 = vld [vmem:[%s11144_s14 + $0x108] sm:$0xff] }
 0xae7   :  { %5289 = vperm.xlu2 %7695, %v5195_v29   ;;  %v5239_v29 = vld [vmem:[%s11144_s14 + $0x198] sm:$0xff] }
 0xaee   :  { %5314 = vperm.xlu1 %7664, %v5200_v43   ;;  %5309 = vperm.xlu0 %7663, %v5199_v28   ;;  %v5236_v43 = vld [vmem:[%s11144_s14 + $0x180] sm:$0xff]  ;;  %v5237_v28 = vld [vmem:[%s11144_s14 + $0x188] sm:$0xff] }
 0xaef   :  { %5304 = vperm.xlu2 %7695, %v5198_v51  }
 0xaf6   :  { %5329 = vperm.xlu1 %7664, %v5203_v52   ;;  %5324 = vperm.xlu0 %7663, %v5202_v17   ;;  %v5220_v52 = vld [vmem:[%s11144_s14 + $0x100] sm:$0xff] }
 0xaf7   :  { %5319 = vperm.xlu2 %7695, %v5201_v40   ;;  %v6041_v40 = vld [vmem:[%s11145_s16] sm:$0x1f] }
 0xafe   :  { %5344 = vperm.xlu1 %7664, %v5206_v61   ;;  %5339 = vperm.xlu0 %7663, %v5205_v59  }
 0xaff   :  { %5334 = vperm.xlu2 %7695, %v5204_v20  }
 0xb06   :  { %5359 = vperm.xlu1 %7664, %v5209_v3   ;;  %5354 = vperm.xlu0 %7663, %v5208_v0  }
 0xb07   :  { %5349 = vperm.xlu2 %7695, %v5207_v9   ;;  %v3755_v9 = vld [vmem:[%s11146_s11] sm:$0xff] }
 0xb09   :  { %v3589_v35 = vpop.permute.xlu2 %3588 }
 0xb0a   :  { %v3606_v5 = vmax.f32 %v9084_v31, %v3589_v35  ;;  %v3762_v35 = vld [vmem:[%s11146_s11 + $0x38] sm:$0xff] }
 0xb0e   :  { %5374 = vperm.xlu1 %7664, %v5212_v24   ;;  %5369 = vperm.xlu0 %7663, %v5211_v11   ;;  %v3756_v24 = vld [vmem:[%s11146_s11 + $0x8] sm:$0xff]  ;;  %v3757_v11 = vld [vmem:[%s11146_s11 + $0x10] sm:$0xff] }
 0xb0f   :  { %5364 = vperm.xlu2 %7695, %v5210_v46   ;;  %v3758_v46 = vld [vmem:[%s11146_s11 + $0x18] sm:$0xff] }
 0xb11   :  { %v3591_v58 = vpop.permute.xlu2 %3590 }
 0xb12   :  { %v3607_v31 = vmax.f32 %v9092_v49, %v3591_v58  ;;  %v5231_v49 = vld [vmem:[%s11144_s14 + $0x158] sm:$0xff] }
 0xb16   :  { %5389 = vperm.xlu1 %7664, %v5215_v33   ;;  %5384 = vperm.xlu0 %7663, %v5214_v45   ;;  %v3759_v33 = vld [vmem:[%s11146_s11 + $0x20] sm:$0xff]  ;;  %v3760_v45 = vld [vmem:[%s11146_s11 + $0x28] sm:$0xff] }
 0xb17   :  { %5379 = vperm.xlu2 %7695, %v5213_v6   ;;  %v3761_v6 = vld [vmem:[%s11146_s11 + $0x30] sm:$0xff] }
 0xb1e   :  { %5489 = vperm.xlu1 %7664, %v5235_v18   ;;  %5399 = vperm.xlu0 %7663, %v5217_v37   ;;  %v9366_v37 = vpop.permute.xlu2 %3808 }
 0xb1f   :  { %5394 = vperm.xlu2 %7695, %v5216_v12  }
 0xb20   :  { %v3653_v63 = vpop.permute.xlu1 %3652  ;;  %v3621_v41 = vpop.permute.xlu0 %3620 }
 0xb21   :  { %v3638_v62 = vmax.f32 %v3606_v5, %v3621_v41 }
 0xb23   :  { %v3670_v48 = vmax.f32 %v3638_v62, %v3653_v63 }
 0xb25   :  { %7336 = vmatmul.msk.f32.gmra.mxu0 %vm3685_vm6, %v3670_v48  ;;  %v3731_v36 = vpop.f32.mrf.mxu0 }
 0xb26   :  { %5409 = vperm.xlu1 %7664, %v5219_v26   ;;  %5569 = vperm.xlu0 %7663, %v5251_v4   ;;  %v9370_v5 = vpop.permute.xlu2 %3793 }
 0xb27   :  { %5484 = vperm.xlu2 %7695, %v5234_v30  }
 0xb28   :  { %v3623_v10 = vpop.permute.xlu0 %3622  ;;  %v3655_v27 = vpop.permute.xlu1 %3654 }
 0xb29   :  { %v3639_v54 = vmax.f32 %v3607_v31, %v3623_v10 }
 0xb2b   :  { %v3671_v56 = vmax.f32 %v3639_v54, %v3655_v27 }
 0xb2d   :  { %7337 = vmatmul.msk.f32.gmra.mxu0 %vm3685_vm6, %v3671_v56 }
 0xb2e   :  { %5404 = vperm.xlu1 %7664, %v5218_v32   ;;  %5564 = vperm.xlu0 %7663, %v5250_v57   ;;  %v3779_v30 = vpop.permute.xlu2 %3778 }
 0xb2f   :  { %5479 = vperm.xlu2 %7695, %v5233_v22  }
 0xb30   :  { %v9364_v18 = vpop.permute.xlu0 %3803 }
 0xb31   :  { %v3734_v51 = vpop.f32.mrf.mxu0 }
 0xb36   :  { %5469 = vperm.xlu1 %7664, %v5231_v49   ;;  %5559 = vperm.xlu0 %7663, %v5249_v7  }
 0xb37   :  { %5474 = vperm.xlu2 %7695, %v5232_v55  }
 0xb38   :  { %v9368_v12 = vpop.permute.xlu0 %3788 }
 0xb3c   :  { %v3737_v17 = vpop.f32.mrf.mxu0 }
 0xb3e   :  { %5549 = vperm.xlu1 %7664, %v5247_v53   ;;  %5464 = vperm.xlu0 %7663, %v5230_v1  }
 0xb3f   :  { %5554 = vperm.xlu2 %7695, %v5248_v16   ;;  %v11167_v16 = vmov 683565275  }
 0xb40   :  { %v3774_v63 = vpop.permute.xlu0 %3773 }
 0xb44   :  { %v3740_v61 = vpop.f32.mrf.mxu0 }
 0xb46   :  { %5454 = vperm.xlu1 %7664, %v5228_v15   ;;  %5544 = vperm.xlu0 %7663, %v5246_v23   ;;  %v11165_v23 = vmov 2475754826  }
 0xb47   :  { %5459 = vperm.xlu2 %7695, %v5229_v42  }
 0xb4c   :  { %v3743_v59 = vpop.f32.mrf.mxu0 }
 0xb4e   :  { %5534 = vperm.xlu1 %7664, %v5244_v21   ;;  %5449 = vperm.xlu0 %7663, %v5227_v50  }
 0xb4f   :  { %5539 = vperm.xlu2 %7695, %v5245_v38   ;;  %v11163_v38 = vmov 2131351028  }
 0xb54   :  { %v3746_v20 = vpop.f32.mrf.mxu0 }
 0xb56   :  { %5439 = vperm.xlu1 %7664, %v5225_v8   ;;  %5529 = vperm.xlu0 %7663, %v5243_v47  }
 0xb57   :  { %5444 = vperm.xlu2 %7695, %v5226_v25   ;;  %v11161_v25 = vmov 2102212464  }
 0xb5e   :  { %5519 = vperm.xlu1 %7664, %v5241_v19   ;;  %5434 = vperm.xlu0 %7663, %v5224_v39  }
 0xb5f   :  { %5524 = vperm.xlu2 %7695, %v5242_v44   ;;  %v11159_v44 = vmov 920167782  }
 0xb66   :  { %5424 = vperm.xlu1 %7664, %v5222_v60   ;;  %5514 = vperm.xlu0 %7663, %v5240_v14  }
 0xb67   :  { %5429 = vperm.xlu2 %7695, %v5223_v13   ;;  %v11157_v13 = vmov 1326507024  }
 0xb6e   :  { %5504 = vperm.xlu1 %7664, %v5238_v34   ;;  %5419 = vperm.xlu0 %7663, %v5221_v2  }
 0xb6f   :  { %5509 = vperm.xlu2 %7695, %v5239_v29  }
 0xb76   :  { %5494 = vperm.xlu1 %7664, %v5236_v43   ;;  %5499 = vperm.xlu0 %7663, %v5237_v28  }
 0xb77   :  { %5414 = vperm.xlu2 %7695, %v5220_v52  }
 0xb7f   :  { %6044 = vperm.xlu2 %7695, %v6041_v40  }
 0xba2   :  { %v3749_v3 = vpop.f32.mrf.mxu0 }
 0xbaa   :  { %v3752_v0 = vpop.f32.mrf.mxu0 }
 0xbab   :  { %3843 = vmatpush.msra.mxu3 %v3752_v0 }
 0xbad   :  { %3844 = vmatpush.msra.mxu3 %v3749_v3 }
 0xbaf   :  { %3845 = vmatpush.msra.mxu3 %v3746_v20 }
 0xbb1   :  { %3846 = vmatpush.msra.mxu3 %v3743_v59 }
 0xbb3   :  { %3847 = vmatpush.msra.mxu3 %v3740_v61 }
 0xbb5   :  { %3848 = vmatpush.msra.mxu3 %v3737_v17 }
 0xbb7   :  { %3849 = vmatpush.msra.mxu3 %v3734_v51 }
 0xbb9   :  { %3850 = vmatpush.msra.mxu3 %v3731_v36 }
 0xbba   :  { %7338 = vmatmul.msk.f32.vlgmr.msra.gmra.mxu3 %vm11184_vm4, %v3755_v9 }
 0xbc2   :  { %7339 = vmatmul.msk.f32.gmra.mxu3 %vm11184_vm4, %v3756_v24 }
 0xbca   :  { %7340 = vmatmul.msk.f32.gmra.mxu3 %vm11184_vm4, %v3757_v11 }
 0xbd2   :  { %7341 = vmatmul.msk.f32.gmra.mxu3 %vm11184_vm4, %v3758_v46 }
 0xbda   :  { %7342 = vmatmul.msk.f32.gmra.mxu3 %vm11184_vm4, %v3759_v33 }
 0xbe2   :  { %7343 = vmatmul.msk.f32.gmra.mxu3 %vm11184_vm4, %v3760_v45 }
 0xbea   :  { %7344 = vmatmul.msk.f32.gmra.mxu3 %vm11184_vm4, %v3761_v6 }
 0xbf2   :  { %7345 = vmatmul.msk.f32.gmra.mxu3 %vm11184_vm4, %v3762_v35 }
 0xc3d   :  { %v3852_v41 = vpop.f32.mrf.mxu3 }
 0xc3e   :  { %v3853_v62 = vadd.f32 %v3852_v41, %v3774_v63 }
 0xc40   :  { %v9372_v48 = vadd.f32 -0.09966865, %v3853_v62 }
 0xc42   :  { %11192 = vst [vmem:[#allocation2_spill] sm:$0xff] %v9372_v48  ;;  %v3887_v26 = vand.u32 2139095040, %v9372_v48  ;;  %v3884_v4 = vand.u32 2147483647, %v9372_v48 }
 0xc44   :  { %v3888_v58 = vshrl.u32 %v3887_v26, 23  ;;  %v3891_v27 = vand.u32 8388607, %v3884_v4 }
 0xc45   :  { %v3855_v31 = vpop.f32.mrf.mxu3 }
 0xc46   :  { %v7354_v10 = vadd.s32 4294967169, %v3888_v58  ;;  %v3856_v54 = vadd.f32 %v3855_v31, %v3779_v30  ;;  %v3892_v57 = vor.u32 8388608, %v3891_v27 }
 0xc48   :  { %v3894_v56 = vadd.s32 1, %v7354_v10  ;;  %v9378_v32 = vadd.f32 -0.09966865, %v3856_v54  ;;  %v9387_v21 = vshll.u32 %v3892_v57, 8 }
 0xc4a   :  { %11193 = vst [vmem:[#allocation3_spill] sm:$0xff] %v9378_v32  ;;  %vm3895_vm7 = vcmp.gt.s32.totalorder %v3894_v56, 0  ;;  %v4041_v49 = vand.u32 2139095040, %v9378_v32  ;;  %v4038_v52 = vand.u32 2147483647, %v9378_v32  ;;  %v3933_v61 = vand.u32 65535, %v9387_v21 }
 0xc4b   :  { %v3896_v22 = vsel %vm3895_vm7, %v3894_v56, 0  ;;  %v3934_v24 = vshrl.u32 %v9387_v21, 16 }
 0xc4c   :  { %v3898_v7 = vand.u32 31, %v3896_v22  ;;  %v4042_v53 = vshrl.u32 %v4041_v49, 23  ;;  %v9383_v1 = vshrl.u32 %v3896_v22, 5  ;;  %v4045_v33 = vand.u32 8388607, %v4038_v52 }
 0xc4e   :  { %v9381_v55 = vsub.s32 32, %v3898_v7  ;;  %v3901_v15 = vshll.u32 %v11167_v16, %v3898_v7  ;;  %v3904_v42 = vshll.u32 %v11165_v23, %v3898_v7  ;;  %v3907_v47 = vshll.u32 %v11163_v38, %v3898_v7 }
 0xc4f   :  { %v3910_v39 = vshll.u32 %v11161_v25, %v3898_v7  ;;  %v3913_v14 = vshll.u32 %v11159_v44, %v3898_v7  ;;  %v7357_v43 = vadd.s32 4294967169, %v4042_v53  ;;  %vm3916_vm8 = vcmp.lt.s32.totalorder %v9383_v1, 1 }
 0xc50   :  { %v3902_v50 = vshrl.u32 %v11165_v23, %v9381_v55  ;;  %v3905_v8 = vshrl.u32 %v11163_v38, %v9381_v55  ;;  %v3908_v19 = vshrl.u32 %v11161_v25, %v9381_v55  ;;  %v3911_v60 = vshrl.u32 %v11159_v44, %v9381_v55 }
 0xc51   :  { %v3914_v34 = vshrl.u32 %v11157_v13, %v9381_v55  ;;  %vm3919_vm9 = vcmp.lt.s32.totalorder %v9383_v1, 4  ;;  %vm3918_vm10 = vcmp.lt.s32.totalorder %v9383_v1, 3  ;;  %v4048_v3 = vadd.s32 1, %v7357_v43 }
 0xc52   :  { %v9402_v2 = vor.u32 %v3902_v50, %v3901_v15  ;;  %v9404_v36 = vor.u32 %v3905_v8, %v3904_v42  ;;  %v9406_v29 = vor.u32 %v3908_v19, %v3907_v47  ;;  %v3912_v28 = vor.u32 %v3911_v60, %v3910_v39 }
 0xc53   :  { %v3915_v51 = vor.u32 %v3914_v34, %v3913_v14  ;;  %vm3917_vm11 = vcmp.lt.s32.totalorder %v9383_v1, 2  ;;  %vm4049_vm12 = vcmp.gt.s32.totalorder %v4048_v3, 0  ;;  %v4046_v54 = vor.u32 8388608, %v4045_v33 }
 0xc54   :  { %v3924_v17 = vsel %vm3916_vm8, %v9402_v2, %v9404_v36  ;;  %v3928_v40 = vsel %vm3916_vm8, %v9404_v36, %v9406_v29  ;;  %v3925_v59 = vsel %vm3919_vm9, %v3912_v28, 920167782  ;;  %v4050_v30 = vsel %vm4049_vm12, %v4048_v3, 0 }
 0xc55   :  { %v3929_v20 = vsel %vm3919_vm9, %v3915_v51, 1326507024  ;;  %v3926_v0 = vsel %vm3918_vm10, %v9406_v29, %v3925_v59  ;;  %v4052_v53 = vand.u32 31, %v4050_v30  ;;  %v11194_v15 = vmov 0  }
 0xc56   :  { %v3930_v9 = vsel %vm3918_vm10, %v3912_v28, %v3929_v20  ;;  %v3927_v11 = vsel %vm3917_vm11, %v3924_v17, %v3926_v0  ;;  %v9455_v43 = vshrl.u32 %v4050_v30, 5  ;;  %v9457_v28 = vshll.u32 %v4046_v54, 8 }
 0xc57   :  { %v3931_v46 = vsel %vm3917_vm11, %v3928_v40, %v3930_v9  ;;  %v3957_v35 = vand.u32 65535, %v3927_v11  ;;  %v3958_v63 = vshrl.u32 %v3927_v11, 16  ;;  %v9448_v39 = vsub.s32 32, %v4052_v53  ;;  %v9468_v9 = vpop.permute.xlu1 %3798 }
 0xc58   :  { %v3935_v45 = vand.u32 65535, %v3931_v46  ;;  %v3936_v6 = vshrl.u32 %v3931_v46, 16  ;;  %v4055_v51 = vshll.u32 %v11167_v16, %v4052_v53  ;;  %v4058_v40 = vshll.u32 %v11165_v23, %v4052_v53 }
 0xc59   :  { %v3960_v26 = vmul.u32 %v3958_v63, %v3933_v61  ;;  %v9440_v58 = vmul.u32 %v3957_v35, %v3934_v24  ;;  %v3959_v56 = vmul.u32 %v3957_v35, %v3933_v61  ;;  %v3962_v57 = vmul.u32 %v3958_v63, %v3934_v24 }
 0xc5a   :  { %v3938_v41 = vmul.u32 %v3936_v6, %v3933_v61  ;;  %v9438_v62 = vmul.u32 %v3935_v45, %v3934_v24  ;;  %v3937_v31 = vmul.u32 %v3935_v45, %v3933_v61  ;;  %v3940_v27 = vmul.u32 %v3936_v6, %v3934_v24 }
 0xc5b   :  { %v3963_v22 = vshll.u32 %v3960_v26, 16  ;;  %v3965_v50 = vshll.u32 %v9440_v58, 16  ;;  %v4056_v17 = vshrl.u32 %v11165_v23, %v9448_v39  ;;  %v4059_v61 = vshrl.u32 %v11163_v38, %v9448_v39 }
 0xc5c   :  { %v3941_v10 = vshll.u32 %v3938_v41, 16  ;;  %v3943_v49 = vshll.u32 %v9438_v62, 16  ;;  %v4061_v3 = vshll.u32 %v11163_v38, %v4052_v53  ;;  %v4062_v0 = vshrl.u32 %v11161_v25, %v9448_v39 }
 0xc5d   :  { %vm3967_vm14 = vc.u32 %v3959_v56, %v3963_v22  ;;  %v9445_v8 = vadd.s32 %v3963_v22, %v3959_v56  ;;  %v9470_v24 = vor.u32 %v4056_v17, %v4055_v51  ;;  %v9472_v11 = vor.u32 %v4059_v61, %v4058_v40  ;;  %v3858_v40 = vpop.f32.mrf.mxu3 }
 0xc5e   :  { %vm3945_vm13 = vc.u32 %v3937_v31, %v3941_v10  ;;  %v3947_v7 = vadd.s32 %v3941_v10, %v3937_v31  ;;  %v3968_v19 = vsel %vm3967_vm14, 1, %v11194_v15  ;;  %v4064_v46 = vshll.u32 %v11161_v25, %v4052_v53 }
 0xc5f   :  { %v3946_v42 = vsel %vm3945_vm13, 1, %v11194_v15  ;;  %v3970_v14 = vadd.s32 %v3968_v19, %v3962_v57  ;;  %vm3971_vm0 = vc.u32 %v9445_v8, %v3965_v50  ;;  %v4065_v33 = vshrl.u32 %v11159_v44, %v9448_v39 }
 0xc60   :  { %v3948_v47 = vadd.s32 %v3946_v42, %v3940_v27  ;;  %vm3949_vm15 = vc.u32 %v3947_v7, %v3943_v49  ;;  %v3972_v34 = vsel %vm3971_vm0, 1, %v11194_v15  ;;  %v9477_v45 = vor.u32 %v4062_v0, %v4061_v3  ;;  %v3784_v3 = vpop.permute.xlu1 %3783 }
 0xc61   :  { %v3950_v60 = vsel %vm3949_vm15, 1, %v11194_v15  ;;  %v3974_v20 = vadd.s32 %v3972_v34, %v3970_v14  ;;  %v4067_v6 = vshll.u32 %v11159_v44, %v4052_v53  ;;  %v4068_v35 = vshrl.u32 %v11157_v13, %v9448_v39 }
 0xc62   :  { %v3952_v59 = vadd.s32 %v3950_v60, %v3948_v47  ;;  %v3900_v63 = vshrl.u32 %v11167_v16, %v9381_v55  ;;  %v3942_v30 = vshrl.u32 %v3938_v41, 16  ;;  %v3964_v31 = vshrl.u32 %v3960_v26, 16 }
 0xc63   :  { %v4066_v10 = vor.u32 %v4065_v33, %v4064_v46  ;;  %v3921_v54 = vsel %vm3919_vm9, %v9406_v29, 2102212464  ;;  %v4069_v27 = vor.u32 %v4068_v35, %v4067_v6  ;;  %vm4070_vm1 = vcmp.lt.s32.totalorder %v9455_v43, 1 }
 0xc64   :  { %v4087_v56 = vand.u32 65535, %v9457_v28  ;;  %v3953_v57 = vadd.s32 %v3952_v59, %v3942_v30  ;;  %v3975_v22 = vadd.s32 %v3974_v20, %v3964_v31  ;;  %vm4073_vm2 = vcmp.lt.s32.totalorder %v9455_v43, 4 }
 0xc65   :  { %v4078_v55 = vsel %vm4070_vm1, %v9470_v24, %v9472_v11  ;;  %vm4072_vm3 = vcmp.lt.s32.totalorder %v9455_v43, 3  ;;  %v4079_v41 = vsel %vm4073_vm2, %v4066_v10, 920167782  ;;  %v4082_v29 = vsel %vm4070_vm1, %v9472_v11, %v9477_v45 }
 0xc66   :  { %v4083_v26 = vsel %vm4073_vm2, %v4069_v27, 1326507024  ;;  %vm4071_vm5 = vcmp.lt.s32.totalorder %v9455_v43, 2  ;;  %v4080_v49 = vsel %vm4072_vm3, %v9477_v45, %v4079_v41  ;;  %v4088_v53 = vshrl.u32 %v9457_v28, 16 }
 0xc67   :  { %v4084_v7 = vsel %vm4072_vm3, %v4066_v10, %v4083_v26  ;;  %v3944_v42 = vshrl.u32 %v9438_v62, 16  ;;  %v3966_v47 = vshrl.u32 %v9440_v58, 16  ;;  %v4081_v19 = vsel %vm4071_vm5, %v4078_v55, %v4080_v49 }
 0xc68   :  { %v4085_v60 = vsel %vm4071_vm5, %v4082_v29, %v4084_v7  ;;  %v4111_v51 = vand.u32 65535, %v4081_v19  ;;  %v4112_v17 = vshrl.u32 %v4081_v19, 16  ;;  %v3920_v61 = vsel %vm3916_vm8, %v3900_v63, %v9402_v2 }
 0xc69   :  { %v4089_v14 = vand.u32 65535, %v4085_v60  ;;  %v4090_v34 = vshrl.u32 %v4085_v60, 16  ;;  %v3922_v62 = vsel %vm3918_vm10, %v9404_v36, %v3921_v54  ;;  %v9522_v59 = vadd.s32 %v3953_v57, %v3944_v42 }
 0xc6a   :  { %v3976_v20 = vadd.s32 %v3975_v22, %v3966_v47  ;;  %v9527_v33 = vadd.s32 %v9445_v8, %v3965_v50  ;;  %v4114_v6 = vmul.u32 %v4112_v17, %v4087_v56  ;;  %v4115_v35 = vmul.u32 %v4111_v51, %v4088_v53 }
 0xc6b   :  { %v4092_v0 = vmul.u32 %v4090_v34, %v4087_v56  ;;  %v4093_v46 = vmul.u32 %v4089_v14, %v4088_v53  ;;  %v3859_v30 = vadd.f32 %v3858_v40, %v3784_v3  ;;  %v3923_v2 = vsel %vm3917_vm11, %v3920_v61, %v3922_v62 }
 0xc6c   :  { %v4091_v63 = vmul.u32 %v4089_v14, %v4087_v56  ;;  %vm3979_vm6 = vc.u32 %v9522_v59, %v9527_v33  ;;  %v3980_v36 = vadd.s32 1, %v3976_v20  ;;  %v4094_v10 = vmul.u32 %v4090_v34, %v4088_v53 }
 0xc6d   :  { %v4095_v31 = vshll.u32 %v4092_v0, 16  ;;  %v4117_v54 = vshll.u32 %v4114_v6, 16  ;;  %v4097_v27 = vshll.u32 %v4093_v46, 16  ;;  %v4113_v57 = vmul.u32 %v4111_v51, %v4087_v56 }
 0xc6e   :  { %v4116_v8 = vmul.u32 %v4112_v17, %v4088_v53  ;;  %v4119_v22 = vshll.u32 %v4115_v35, 16  ;;  %v9534_v55 = vadd.f32 -0.09966865, %v3859_v30  ;;  %v3981_v29 = vsel %vm3979_vm6, %v3980_v36, %v3976_v20 }
 0xc6f   :  { %vm4099_vm7 = vc.u32 %v4091_v63, %v4095_v31  ;;  %v4101_v58 = vadd.s32 %v4095_v31, %v4091_v63  ;;  %vm4121_vm9 = vc.u32 %v4113_v57, %v4117_v54  ;;  %v4123_v41 = vadd.s32 %v4117_v54, %v4113_v57 }
 0xc70   :  { %v4100_v50 = vsel %vm4099_vm7, 1, %v11194_v15  ;;  %v4122_v49 = vsel %vm4121_vm9, 1, %v11194_v15  ;;  %v3977_v56 = vmul.u32 %v9387_v21, %v3923_v2  ;;  %v4195_v42 = vand.u32 2139095040, %v9534_v55 }
 0xc71   :  { %v4102_v1 = vadd.s32 %v4100_v50, %v4094_v10  ;;  %vm4103_vm8 = vc.u32 %v4101_v58, %v4097_v27  ;;  %v4124_v7 = vadd.s32 %v4122_v49, %v4116_v8  ;;  %vm4125_vm10 = vc.u32 %v4123_v41, %v4119_v22  ;;  %v3861_v49 = vpop.f32.mrf.mxu3 }
 0xc72   :  { %v4104_v26 = vsel %vm4103_vm8, 1, %v11194_v15  ;;  %v4126_v53 = vsel %vm4125_vm10, 1, %v11194_v15  ;;  %v3982_v47 = vadd.s32 %v3981_v29, %v3977_v56  ;;  %v4196_v14 = vshrl.u32 %v4195_v42, 23 }
 0xc73   :  { %v4106_v19 = vadd.s32 %v4104_v26, %v4102_v1  ;;  %v4128_v60 = vadd.s32 %v4126_v53, %v4124_v7  ;;  %v4096_v34 = vshrl.u32 %v4092_v0, 16  ;;  %v4118_v51 = vshrl.u32 %v4114_v6, 16 }
 0xc74   :  { %v7360_v17 = vadd.s32 4294967169, %v4196_v14  ;;  %v3983_v40 = vadd.s32 536870912, %v3982_v47  ;;  %v4098_v3 = vshrl.u32 %v4093_v46, 16  ;;  %v4120_v30 = vshrl.u32 %v4115_v35, 16 }
 0xc75   :  { %v4107_v61 = vadd.s32 %v4106_v19, %v4096_v34  ;;  %v4129_v62 = vadd.s32 %v4128_v60, %v4118_v51  ;;  %v4075_v31 = vsel %vm4073_vm2, %v9477_v45, 2102212464  ;;  %v4054_v6 = vshrl.u32 %v11167_v16, %v9448_v39 }
 0xc76   :  { %v4202_v20 = vadd.s32 1, %v7360_v17  ;;  %v9544_v21 = vshrl.u32 %v3983_v40, 30  ;;  %v9553_v10 = vadd.s32 %v4123_v41, %v4119_v22  ;;  %v11154_v46 = vand.u32 2147483647, %v9534_v55 }
 0xc77   :  { %v9546_v2 = vadd.s32 %v4107_v61, %v4098_v3  ;;  %v4130_v36 = vadd.s32 %v4129_v62, %v4120_v30  ;;  %v4074_v27 = vsel %vm4070_vm1, %v4054_v6, %v9470_v24  ;;  %v4076_v45 = vsel %vm4072_vm3, %v9472_v11, %v4075_v31 }
 0xc78   :  { %vm4203_vm11 = vcmp.gt.s32.totalorder %v4202_v20, 0  ;;  %v3985_v54 = vshll.u32 %v9544_v21, 30  ;;  %v4077_v1 = vsel %vm4071_vm5, %v4074_v27, %v4076_v45  ;;  %v4199_v41 = vand.u32 8388607, %v11154_v46 }
 0xc79   :  { %v4204_v63 = vsel %vm4203_vm11, %v4202_v20, 0  ;;  %vm4133_vm12 = vc.u32 %v9546_v2, %v9553_v10  ;;  %v4134_v39 = vadd.s32 1, %v4130_v36  ;;  %v4131_v34 = vmul.u32 %v9457_v28, %v4077_v1 }
 0xc7a   :  { %v4206_v0 = vand.u32 31, %v4204_v63  ;;  %v9582_v29 = vshrl.u32 %v4204_v63, 5  ;;  %v9597_v14 = vsub.s32 %v3982_v47, %v3985_v54  ;;  %v3862_v51 = vadd.f32 %v3861_v49, %v9368_v12 }
 0xc7b   :  { %v4135_v43 = vsel %vm4133_vm12, %v4134_v39, %v4130_v36  ;;  %v4200_v17 = vor.u32 8388608, %v4199_v41 }
 0xc7c   :  { %v9556_v35 = vsub.s32 32, %v4206_v0  ;;  %v4209_v58 = vshll.u32 %v11167_v16, %v4206_v0  ;;  %v4212_v8 = vshll.u32 %v11165_v23, %v4206_v0  ;;  %v4218_v22 = vshll.u32 %v11161_v25, %v4206_v0 }
 0xc7d   :  { %v4215_v26 = vshll.u32 %v11163_v38, %v4206_v0  ;;  %v4221_v60 = vshll.u32 %v11159_v44, %v4206_v0  ;;  %vm4224_vm13 = vcmp.lt.s32.totalorder %v9582_v29, 1  ;;  %vm4227_vm14 = vcmp.lt.s32.totalorder %v9582_v29, 4 }
 0xc7e   :  { %v4210_v57 = vshrl.u32 %v11165_v23, %v9556_v35  ;;  %v4213_v50 = vshrl.u32 %v11163_v38, %v9556_v35  ;;  %v4216_v24 = vshrl.u32 %v11161_v25, %v9556_v35  ;;  %v4219_v11 = vshrl.u32 %v11159_v44, %v9556_v35 }
 0xc7f   :  { %v4222_v42 = vshrl.u32 %v11157_v13, %v9556_v35  ;;  %v4136_v61 = vadd.s32 %v4135_v43, %v4131_v34  ;;  %vm4226_vm15 = vcmp.lt.s32.totalorder %v9582_v29, 3  ;;  %vm4225_vm0 = vcmp.lt.s32.totalorder %v9582_v29, 2 }
 0xc80   :  { %v9585_v56 = vor.u32 %v4210_v57, %v4209_v58  ;;  %v9587_v7 = vor.u32 %v4213_v50, %v4212_v8  ;;  %v4220_v53 = vor.u32 %v4219_v11, %v4218_v22  ;;  %v9594_v19 = vor.u32 %v4216_v24, %v4215_v26 }
 0xc81   :  { %v4223_v40 = vor.u32 %v4222_v42, %v4221_v60  ;;  %v9618_v20 = vadd.f32 -0.09966865, %v3862_v51  ;;  %v9624_v63 = vshll.u32 %v4200_v17, 8  ;;  %v3988_v31 = vsub.s32 0, %v9597_v14 }
 0xc82   :  { %v4232_v62 = vsel %vm4224_vm13, %v9585_v56, %v9587_v7  ;;  %v4233_v47 = vsel %vm4227_vm14, %v4220_v53, 920167782  ;;  %v4236_v28 = vsel %vm4224_vm13, %v9587_v7, %v9594_v19  ;;  %v4137_v36 = vadd.s32 536870912, %v4136_v61 }
 0xc83   :  { %v4234_v12 = vsel %vm4226_vm15, %v9594_v19, %v4233_v47  ;;  %v4237_v30 = vsel %vm4227_vm14, %v4223_v40, 1326507024  ;;  %vm3987_vm1 = vcmp.lt.s32.totalorder %v9597_v14, 0  ;;  %v4349_v45 = vand.u32 2139095040, %v9618_v20 }
 0xc84   :  { %v4235_v3 = vsel %vm4225_vm0, %v4232_v62, %v4234_v12  ;;  %v4238_v0 = vsel %vm4226_vm15, %v4220_v53, %v4237_v30  ;;  %v4241_v39 = vand.u32 65535, %v9624_v63  ;;  %v3989_v58 = vsel %vm3987_vm1, %v3988_v31, %v9597_v14 }
 0xc85   :  { %v4239_v6 = vsel %vm4225_vm0, %v4236_v28, %v4238_v0  ;;  %v4266_v27 = vshrl.u32 %v4235_v3, 16  ;;  %v9635_v57 = vshrl.u32 %v4137_v36, 30  ;;  %v4350_v22 = vshrl.u32 %v4349_v45, 23 }
 0xc86   :  { %v4244_v54 = vshrl.u32 %v4239_v6, 16  ;;  %v4243_v50 = vand.u32 65535, %v4239_v6  ;;  %v3990_v11 = vclz %v3989_v58  ;;  %v4242_v1 = vshrl.u32 %v9624_v63, 16 }
 0xc87   :  { %v9639_v24 = vmul.u32 %v4266_v27, %v4241_v39  ;;  %v4139_v26 = vshll.u32 %v9635_v57, 30  ;;  %v4265_v49 = vand.u32 65535, %v4235_v3  ;;  %v7363_v60 = vadd.s32 4294967169, %v4350_v22 }
 0xc88   :  { %v9637_v8 = vmul.u32 %v4244_v54, %v4241_v39  ;;  %v4245_v53 = vmul.u32 %v4243_v50, %v4241_v39  ;;  %v9644_v42 = vmul.u32 %v4243_v50, %v4242_v1  ;;  %v7355_v34 = vadd.s32 4294967294, %v3990_v11 }
 0xc89   :  { %v4271_v43 = vshll.u32 %v9639_v24, 16  ;;  %v9647_v17 = vsub.s32 %v4136_v61, %v4139_v26  ;;  %v4267_v40 = vmul.u32 %v4265_v49, %v4241_v39  ;;  %v9649_v62 = vmul.u32 %v4265_v49, %v4242_v1 }
 0xc8a   :  { %v4249_v41 = vshll.u32 %v9637_v8, 16  ;;  %v4251_v47 = vshll.u32 %v9644_v42, 16  ;;  %v4356_v3 = vadd.s32 1, %v7363_v60  ;;  %vm7356_vm3 = vcmp.lt.s32.totalorder %v7355_v34, 0 }
 0xc8b   :  { %v9653_v28 = vadd.s32 %v4271_v43, %v4267_v40  ;;  %v4248_v30 = vmul.u32 %v4244_v54, %v4242_v1  ;;  %vm4275_vm6 = vc.u32 %v4267_v40, %v4271_v43  ;;  %v4142_v31 = vsub.s32 0, %v9647_v17 }
 0xc8c   :  { %vm4253_vm2 = vc.u32 %v4245_v53, %v4249_v41  ;;  %v4255_v51 = vadd.s32 %v4249_v41, %v4245_v53  ;;  %v4273_v36 = vshll.u32 %v9649_v62, 16  ;;  %v11153_v61 = vand.u32 2147483647, %v9618_v20 }
 0xc8d   :  { %v4254_v12 = vsel %vm4253_vm2, 1, %v11194_v15  ;;  %vm4357_vm7 = vcmp.gt.s32.totalorder %v4356_v3, 0  ;;  %vm4141_vm8 = vcmp.lt.s32.totalorder %v9647_v17, 0  ;;  %v4276_v39 = vsel %vm4275_vm6, 1, %v11194_v15 }
 0xc8e   :  { %vm4257_vm5 = vc.u32 %v4255_v51, %v4251_v47  ;;  %v4256_v0 = vadd.s32 %v4254_v12, %v4248_v30  ;;  %v4358_v6 = vsel %vm4357_vm7, %v4356_v3, 0  ;;  %vm4279_vm9 = vc.u32 %v9653_v28, %v4273_v36 }
 0xc8f   :  { %v4258_v45 = vsel %vm4257_vm5, 1, %v11194_v15  ;;  %v4360_v54 = vand.u32 31, %v4358_v6  ;;  %v9664_v58 = vsel %vm7356_vm3, 0, %v7355_v34  ;;  %v4270_v50 = vmul.u32 %v4266_v27, %v4242_v1 }
 0xc90   :  { %v4143_v22 = vsel %vm4141_vm8, %v4142_v31, %v9647_v17  ;;  %v4208_v11 = vshrl.u32 %v11167_v16, %v9556_v35  ;;  %v4353_v41 = vand.u32 8388607, %v11153_v61  ;;  %v4260_v49 = vadd.s32 %v4258_v45, %v4256_v0 }
 0xc91   :  { %v9671_v26 = vsub.s32 32, %v4360_v54  ;;  %v4278_v53 = vadd.s32 %v4276_v39, %v4270_v50  ;;  %v4280_v43 = vsel %vm4279_vm9, 1, %v11194_v15  ;;  %v9674_v60 = vshrl.u32 %v4358_v6, 5 }
 0xc92   :  { %v4363_v34 = vshll.u32 %v11167_v16, %v4360_v54  ;;  %v4366_v1 = vshll.u32 %v11165_v23, %v4360_v54  ;;  %v4369_v35 = vshll.u32 %v11163_v38, %v4360_v54  ;;  %v4372_v47 = vshll.u32 %v11161_v25, %v4360_v54 }
 0xc93   :  { %v4364_v27 = vshrl.u32 %v11165_v23, %v9671_v26  ;;  %v4367_v51 = vshrl.u32 %v11163_v38, %v9671_v26  ;;  %v4370_v40 = vshrl.u32 %v11161_v25, %v9671_v26  ;;  %v4373_v12 = vshrl.u32 %v11159_v44, %v9671_v26 }
 0xc94   :  { %v4354_v3 = vor.u32 8388608, %v4353_v41  ;;  %v4375_v31 = vshll.u32 %v11159_v44, %v4360_v54  ;;  %v4376_v0 = vshrl.u32 %v11157_v13, %v9671_v26  ;;  %v4229_v6 = vsel %vm4227_vm14, %v9594_v19, 2102212464 }
 0xc95   :  { %v9688_v30 = vor.u32 %v4364_v27, %v4363_v34  ;;  %v9696_v45 = vor.u32 %v4367_v51, %v4366_v1  ;;  %v9698_v39 = vor.u32 %v4370_v40, %v4369_v35  ;;  %v4374_v50 = vor.u32 %v4373_v12, %v4372_v47 }
 0xc96   :  { %v4250_v61 = vshrl.u32 %v9637_v8, 16  ;;  %v4282_v46 = vadd.s32 %v4280_v43, %v4278_v53  ;;  %v4377_v41 = vor.u32 %v4376_v0, %v4375_v31  ;;  %vm4378_vm10 = vcmp.lt.s32.totalorder %v9674_v60, 1 }
 0xc97   :  { %v4144_v34 = vclz %v4143_v22  ;;  %v4272_v54 = vshrl.u32 %v9639_v24, 16  ;;  %vm4381_vm11 = vcmp.lt.s32.totalorder %v9674_v60, 4  ;;  %v4386_v19 = vsel %vm4378_vm10, %v9688_v30, %v9696_v45 }
 0xc98   :  { %v4261_v27 = vadd.s32 %v4260_v49, %v4250_v61  ;;  %vm4380_vm12 = vcmp.lt.s32.totalorder %v9674_v60, 3  ;;  %v4387_v8 = vsel %vm4381_vm11, %v4374_v50, 920167782  ;;  %v9711_v53 = vshll.u32 %v4354_v3, 8 }
 0xc99   :  { %v4228_v22 = vsel %vm4224_vm13, %v4208_v11, %v9585_v56  ;;  %vm4379_vm14 = vcmp.lt.s32.totalorder %v9674_v60, 2  ;;  %v4388_v24 = vsel %vm4380_vm12, %v9698_v39, %v4387_v8  ;;  %v4390_v61 = vsel %vm4378_vm10, %v9696_v45, %v9698_v39 }
 0xc9a   :  { %v4252_v49 = vshrl.u32 %v9644_v42, 16  ;;  %v4283_v43 = vadd.s32 %v4282_v46, %v4272_v54  ;;  %v4389_v1 = vsel %vm4379_vm14, %v4386_v19, %v4388_v24  ;;  %v4391_v56 = vsel %vm4381_vm11, %v4377_v41, 1326507024 }
 0xc9b   :  { %v7358_v11 = vadd.s32 4294967294, %v4144_v34  ;;  %v4230_v35 = vsel %vm4226_vm15, %v9587_v7, %v4229_v6  ;;  %v4274_v51 = vshrl.u32 %v9649_v62, 16  ;;  %v4392_v40 = vsel %vm4380_vm12, %v4374_v50, %v4391_v56  ;;  %v3864_v34 = vpop.f32.mrf.mxu3 }
 0xc9c   :  { %v9735_v47 = vadd.s32 %v4261_v27, %v4252_v49  ;;  %v4393_v46 = vsel %vm4379_vm14, %v4390_v61, %v4392_v40  ;;  %v4395_v42 = vand.u32 65535, %v9711_v53  ;;  %v4420_v12 = vshrl.u32 %v4389_v1, 16 }
 0xc9d   :  { %v4396_v3 = vshrl.u32 %v9711_v53, 16  ;;  %v4397_v31 = vand.u32 65535, %v4393_v46  ;;  %v4398_v0 = vshrl.u32 %v4393_v46, 16  ;;  %v4419_v41 = vand.u32 65535, %v4389_v1 }
 0xc9e   :  { %v9744_v7 = vadd.s32 %v9653_v28, %v4273_v36  ;;  %v4284_v6 = vadd.s32 %v4283_v43, %v4274_v51  ;;  %v4422_v50 = vmul.u32 %v4420_v12, %v4395_v42  ;;  %v3998_v54 = vsub.s32 4294967266, %v9664_v58 }
 0xc9f   :  { %v4231_v19 = vsel %vm4225_vm0, %v4228_v22, %v4230_v35  ;;  %v4400_v27 = vmul.u32 %v4398_v0, %v4395_v42  ;;  %v4401_v8 = vmul.u32 %v4397_v31, %v4396_v3  ;;  %vm7359_vm13 = vcmp.lt.s32.totalorder %v7358_v11, 0 }
 0xca0   :  { %vm4287_vm15 = vc.u32 %v9735_v47, %v9744_v7  ;;  %v4425_v24 = vshll.u32 %v4422_v50, 16  ;;  %v3865_v61 = vadd.f32 %v3864_v34, %v9370_v5  ;;  %v4399_v62 = vmul.u32 %v4397_v31, %v4395_v42 }
 0xca1   :  { %v4403_v49 = vshll.u32 %v4400_v27, 16  ;;  %v4421_v28 = vmul.u32 %v4419_v41, %v4395_v42  ;;  %v4423_v36 = vmul.u32 %v4419_v41, %v4396_v3  ;;  %v4288_v43 = vadd.s32 1, %v4284_v6 }
 0xca2   :  { %v4402_v1 = vmul.u32 %v4398_v0, %v4396_v3  ;;  %v4405_v56 = vshll.u32 %v4401_v8, 16  ;;  %v4424_v51 = vmul.u32 %v4420_v12, %v4396_v3  ;;  %v9753_v35 = vsel %vm7359_vm13, 0, %v7358_v11 }
 0xca3   :  { %vm4407_vm1 = vc.u32 %v4399_v62, %v4403_v49  ;;  %v4409_v29 = vadd.s32 %v4403_v49, %v4399_v62  ;;  %vm4429_vm0 = vc.u32 %v4421_v28, %v4425_v24  ;;  %v4431_v22 = vadd.s32 %v4425_v24, %v4421_v28 }
 0xca4   :  { %v4408_v40 = vsel %vm4407_vm1, 1, %v11194_v15  ;;  %v4430_v46 = vsel %vm4429_vm0, 1, %v11194_v15  ;;  %v9757_v5 = vadd.f32 -0.09966865, %v3865_v61  ;;  %v4427_v42 = vshll.u32 %v4423_v36, 16 }
 0xca5   :  { %v4410_v31 = vadd.s32 %v4408_v40, %v4402_v1  ;;  %vm4411_vm2 = vc.u32 %v4409_v29, %v4405_v56  ;;  %v4432_v41 = vadd.s32 %v4430_v46, %v4424_v51  ;;  %v3994_v0 = vsub.s32 32, %v9664_v58 }
 0xca6   :  { %v3999_v12 = vadd.s32 127, %v3998_v54  ;;  %v4289_v3 = vsel %vm4287_vm15, %v4288_v43, %v4284_v6  ;;  %v4412_v11 = vsel %vm4411_vm2, 1, %v11194_v15  ;;  %v4285_v34 = vmul.u32 %v9624_v63, %v4231_v19 }
 0xca7   :  { %v4404_v24 = vshrl.u32 %v4400_v27, 16  ;;  %v4414_v62 = vadd.s32 %v4412_v11, %v4410_v31  ;;  %vm4433_vm3 = vc.u32 %v4431_v22, %v4427_v42  ;;  %v3978_v61 = vadd.s32 %v9527_v33, %v9522_v59 }
 0xca8   :  { %v4152_v49 = vsub.s32 4294967266, %v9753_v35  ;;  %v4434_v28 = vsel %vm4433_vm3, 1, %v11194_v15  ;;  %v4503_v54 = vand.u32 2139095040, %v9757_v5  ;;  %v9770_v1 = vadd.s32 %v4289_v3, %v4285_v34 }
 0xca9   :  { %v4415_v56 = vadd.s32 %v4414_v62, %v4404_v24  ;;  %v4426_v6 = vshrl.u32 %v4422_v50, 16  ;;  %v4436_v43 = vadd.s32 %v4434_v28, %v4432_v41  ;;  %v3996_v51 = vshrl.u32 %v3978_v61, %v3994_v0 }
 0xcaa   :  { %v4406_v29 = vshrl.u32 %v4401_v8, 16  ;;  %v4504_v63 = vshrl.u32 %v4503_v54, 23  ;;  %v4000_v19 = vshll.u32 %v3999_v12, 23  ;;  %v4383_v27 = vsel %vm4381_vm11, %v9698_v39, 2102212464 }
 0xcab   :  { %v4428_v59 = vshrl.u32 %v4423_v36, 16  ;;  %v4437_v33 = vadd.s32 %v4436_v43, %v4426_v6  ;;  %v4153_v40 = vadd.s32 127, %v4152_v49  ;;  %v4362_v46 = vshrl.u32 %v11167_v16, %v9671_v26 }
 0xcac   :  { %v9777_v31 = vadd.s32 %v4415_v56, %v4406_v29  ;;  %v7366_v3 = vadd.s32 4294967169, %v4504_v63  ;;  %v3995_v50 = vshll.u32 %v9597_v14, %v9664_v58  ;;  %v4291_v8 = vadd.s32 536870912, %v9770_v1 }
 0xcad   :  { %v4438_v41 = vadd.s32 %v4437_v33, %v4428_v59  ;;  %v11155_v0 = vand.u32 2147483647, %v9757_v5  ;;  %v4382_v39 = vsel %vm4378_vm10, %v4362_v46, %v9688_v30  ;;  %v4384_v36 = vsel %vm4380_vm12, %v9696_v45, %v4383_v27 }
 0xcae   :  { %v9789_v26 = vadd.s32 %v4431_v22, %v4427_v42  ;;  %v4510_v12 = vadd.s32 1, %v7366_v3  ;;  %v3997_v11 = vor.u32 %v3996_v51, %v3995_v50  ;;  %v4001_v34 = vor.u32 4788187, %v4000_v19  ;;  %v3867_v42 = vpop.f32.mrf.mxu3 }
 0xcaf   :  { %v4442_v24 = vadd.s32 1, %v4438_v41  ;;  %v4148_v14 = vsub.s32 32, %v9753_v35  ;;  %v4154_v58 = vshll.u32 %v4153_v40, 23  ;;  %v9794_v62 = vshrl.u32 %v4291_v8, 30 }
 0xcb0   :  { %vm4441_vm5 = vc.u32 %v9777_v31, %v9789_v26  ;;  %vm4511_vm6 = vcmp.gt.s32.totalorder %v4510_v12, 0  ;;  %v4385_v30 = vsel %vm4379_vm14, %v4382_v39, %v4384_v36  ;;  %v4507_v45 = vand.u32 8388607, %v11155_v0 }
 0xcb1   :  { %v4512_v22 = vsel %vm4511_vm6, %v4510_v12, 0  ;;  %v4002_v49 = vand.u32 2147483647, %v4001_v34  ;;  %v4004_v28 = vcvt.s32.f32 %v3997_v11  ;;  %v4132_v54 = vadd.s32 %v9553_v10, %v9546_v2 }
 0xcb2   :  { %v4514_v61 = vand.u32 31, %v4512_v22  ;;  %v4443_v56 = vsel %vm4441_vm5, %v4442_v24, %v4438_v41  ;;  %v4149_v6 = vshll.u32 %v9647_v17, %v9753_v35  ;;  %v4439_v43 = vmul.u32 %v9711_v53, %v4385_v30 }
 0xcb3   :  { %v3868_v60 = vadd.f32 %v3867_v42, %v9468_v9  ;;  %v4150_v29 = vshrl.u32 %v4132_v54, %v4148_v14  ;;  %v4155_v63 = vor.u32 4788187, %v4154_v58  ;;  %v4293_v19 = vshll.u32 %v9794_v62, 30 }
 0xcb4   :  { %v9805_v51 = vsub.s32 32, %v4514_v61  ;;  %v4508_v27 = vor.u32 8388608, %v4507_v45  ;;  %v9809_v59 = vadd.s32 %v4443_v56, %v4439_v43  ;;  %v4517_v33 = vshll.u32 %v11167_v16, %v4514_v61 }
 0xcb5   :  { %v4520_v10 = vshll.u32 %v11165_v23, %v4514_v61  ;;  %v4526_v53 = vshll.u32 %v11161_v25, %v4514_v61  ;;  %v9822_v40 = vshrl.u32 %v4512_v22, 5  ;;  %v4523_v46 = vshll.u32 %v11163_v38, %v4514_v61 }
 0xcb6   :  { %v4518_v2 = vshrl.u32 %v11165_v23, %v9805_v51  ;;  %v4521_v17 = vshrl.u32 %v11163_v38, %v9805_v51  ;;  %v4524_v9 = vshrl.u32 %v11161_v25, %v9805_v51  ;;  %v4527_v35 = vshrl.u32 %v11159_v44, %v9805_v51 }
 0xcb7   :  { %v4529_v3 = vshll.u32 %v11159_v44, %v4514_v61  ;;  %v9826_v50 = vadd.f32 -0.09966865, %v3868_v60  ;;  %v4530_v36 = vshrl.u32 %v11157_v13, %v9805_v51  ;;  %v4151_v12 = vor.u32 %v4150_v29, %v4149_v6 }
 0xcb8   :  { %v9828_v8 = vor.u32 %v4518_v2, %v4517_v33  ;;  %v9830_v41 = vor.u32 %v4521_v17, %v4520_v10  ;;  %v4528_v39 = vor.u32 %v4527_v35, %v4526_v53  ;;  %v4525_v11 = vor.u32 %v4524_v9, %v4523_v46 }
 0xcb9   :  { %v4005_v34 = vmul.f32 %v4004_v28, %v4002_v49  ;;  %v4156_v24 = vand.u32 2147483647, %v4155_v63  ;;  %v4445_v14 = vadd.s32 536870912, %v9809_v59  ;;  %v4531_v58 = vor.u32 %v4530_v36, %v4529_v3 }
 0xcba   :  { %v9836_v30 = vsub.s32 %v9770_v1, %v4293_v19  ;;  %vm4532_vm7 = vcmp.lt.s32.totalorder %v9822_v40, 1  ;;  %vm4535_vm8 = vcmp.lt.s32.totalorder %v9822_v40, 4  ;;  %v9840_v45 = vshll.u32 %v4508_v27, 8 }
 0xcbb   :  { %vm4534_vm9 = vcmp.lt.s32.totalorder %v9822_v40, 3  ;;  %v4540_v22 = vsel %vm4532_vm7, %v9828_v8, %v9830_v41  ;;  %v4541_v42 = vsel %vm4535_vm8, %v4528_v39, 920167782  ;;  %v4657_v61 = vand.u32 2139095040, %v9826_v50 }
 0xcbc   :  { %v4158_v1 = vcvt.s32.f32 %v4151_v12  ;;  %vm4533_vm10 = vcmp.lt.s32.totalorder %v9822_v40, 2  ;;  %v4542_v49 = vsel %vm4534_vm9, %v4525_v11, %v4541_v42  ;;  %v4544_v28 = vsel %vm4532_vm7, %v9830_v41, %v4525_v11 }
 0xcbd   :  { %v4006_v54 = vxor.u32 2147483648, %v4005_v34  ;;  %v9856_v56 = vshrl.u32 %v4445_v14, 30  ;;  %v4543_v6 = vsel %vm4533_vm10, %v4540_v22, %v4542_v49  ;;  %v4545_v43 = vsel %vm4535_vm8, %v4531_v58, 1326507024 }
 0xcbe   :  { %v9862_v60 = vmul.f32 %v4158_v1, %v4156_v24  ;;  %v4296_v29 = vsub.s32 0, %v9836_v30  ;;  %v4546_v63 = vsel %vm4534_vm9, %v4528_v39, %v4545_v43  ;;  %v4574_v19 = vshrl.u32 %v4543_v6, 16 }
 0xcbf   :  { %11195 = vst [vmem:[#allocation4_spill] sm:$0xff] %v9856_v56  ;;  %v4547_v27 = vsel %vm4533_vm10, %v4544_v28, %v4546_v63  ;;  %v4549_v33 = vand.u32 65535, %v9840_v45  ;;  %v4573_v2 = vand.u32 65535, %v4543_v6  ;;  %v4658_v10 = vshrl.u32 %v4657_v61, 23 }
 0xcc0   :  { %vm4295_vm11 = vcmp.lt.s32.totalorder %v9836_v30, 0  ;;  %v4551_v17 = vand.u32 65535, %v4547_v27  ;;  %v4552_v9 = vshrl.u32 %v4547_v27, 16  ;;  %v11156_v53 = vand.u32 2147483647, %v9826_v50 }
 0xcc1   :  { %vm3886_vm12 = vcmp.lt.s32.totalorder %v9372_v48, 0  ;;  %v4447_v35 = vshll.u32 %v9856_v56, 30  ;;  %v4550_v46 = vshrl.u32 %v9840_v45, 16  ;;  %v4576_v3 = vmul.u32 %v4574_v19, %v4549_v33 }
 0xcc2   :  { %v4007_v39 = vsel %vm3886_vm12, %v4006_v54, %v4005_v34  ;;  %v4160_v36 = vxor.u32 2147483648, %v9862_v60  ;;  %v4554_v12 = vmul.u32 %v4552_v9, %v4549_v33  ;;  %v9879_v24 = vsel %vm4295_vm11, %v4296_v29, %v9836_v30 }
 0xcc3   :  { %v4555_v14 = vmul.u32 %v4551_v17, %v4550_v46  ;;  %v4577_v58 = vmul.u32 %v4573_v2, %v4550_v46  ;;  %v7369_v22 = vadd.s32 4294967169, %v4658_v10  ;;  %v4553_v42 = vmul.u32 %v4551_v17, %v4549_v33 }
 0xcc4   :  { %v4557_v61 = vshll.u32 %v4554_v12, 16  ;;  %v4579_v1 = vshll.u32 %v4576_v3, 16  ;;  %v9883_v49 = vand.u32 8388607, %v11156_v53  ;;  %vm9887_vm14 = vcmp.le.f32.partialorder %v3884_v4, 0.7853982 }
 0xcc5   :  { %v11196_v34 = vmov 0  ;;  %v9892_v28 = vsub.s32 %v9809_v59, %v4447_v35  ;;  %v4516_v54 = vshrl.u32 %v11167_v16, %v9805_v51  ;;  %v4537_v6 = vsel %vm4535_vm8, %v4525_v11, 2102212464 }
 0xcc6   :  { %v11197_v34 = vsel %vm9887_vm14, 4294967295, %v11196_v34  ;;  %v4575_v43 = vmul.u32 %v4573_v2, %v4549_v33  ;;  %v4556_v29 = vmul.u32 %v4552_v9, %v4550_v46  ;;  %v4559_v63 = vshll.u32 %v4555_v14, 16 }
 0xcc7   :  { %11198 = vst [vmem:[#allocation5_spill] sm:$0xff] %v11197_v34  ;;  %vm4561_vm13 = vc.u32 %v4553_v42, %v4557_v61  ;;  %v4563_v27 = vadd.s32 %v4557_v61, %v4553_v42  ;;  %v4578_v4 = vmul.u32 %v4574_v19, %v4550_v46  ;;  %v4581_v17 = vshll.u32 %v4577_v58, 16 }
 0xcc8   :  { %v4562_v10 = vsel %vm4561_vm13, 1, %v11194_v15  ;;  %v4664_v0 = vadd.s32 1, %v7369_v22  ;;  %vm4583_vm1 = vc.u32 %v4575_v43, %v4579_v1  ;;  %v4585_v59 = vadd.s32 %v4579_v1, %v4575_v43 }
 0xcc9   :  { %v4564_v53 = vadd.s32 %v4562_v10, %v4556_v29  ;;  %vm4565_vm15 = vc.u32 %v4563_v27, %v4559_v63  ;;  %v4536_v51 = vsel %vm4532_vm7, %v4516_v54, %v9828_v8  ;;  %v4538_v11 = vsel %vm4534_vm9, %v9830_v41, %v4537_v6 }
 0xcca   :  { %v4566_v33 = vsel %vm4565_vm15, 1, %v11194_v15  ;;  %v4584_v2 = vsel %vm4583_vm1, 1, %v11194_v15  ;;  %v4558_v9 = vshrl.u32 %v4554_v12, 16  ;;  %vm4587_vm0 = vc.u32 %v4585_v59, %v4581_v17 }
 0xccb   :  { %v4568_v19 = vadd.s32 %v4566_v33, %v4564_v53  ;;  %v4586_v35 = vadd.s32 %v4584_v2, %v4578_v4  ;;  %v4450_v46 = vsub.s32 0, %v9892_v28  ;;  %v4560_v22 = vshrl.u32 %v4555_v14, 16 }
 0xccc   :  { %v4588_v42 = vsel %vm4587_vm0, 1, %v11194_v15  ;;  %vm4665_vm2 = vcmp.gt.s32.totalorder %v4664_v0, 0  ;;  %v4580_v8 = vshrl.u32 %v4576_v3, 16  ;;  %vm11187_vm3 = vcmp.lt.s32.totalorder %v9378_v32, 0 }
 0xccd   :  { %v4569_v61 = vadd.s32 %v4568_v19, %v4558_v9  ;;  %v4590_v1 = vadd.s32 %v4588_v42, %v4586_v35  ;;  %v4666_v54 = vsel %vm4665_vm2, %v4664_v0, 0  ;;  %vm4449_vm5 = vcmp.lt.s32.totalorder %v9892_v28, 0 }
 0xcce   :  { %v4539_v41 = vsel %vm4533_vm10, %v4536_v51, %v4538_v11  ;;  %v4668_v53 = vand.u32 31, %v4666_v54  ;;  %v9916_v12 = vsel %vm9887_vm14, %v9372_v48, %v4007_v39  ;;  %v4582_v6 = vshrl.u32 %v4577_v58, 16 }
 0xccf   :  { %11199 = vst [vmem:[#allocation6_spill] sm:$0xff] %v9916_v12  ;;  %v9918_v14 = vadd.s32 %v4569_v61, %v4560_v22  ;;  %v4591_v43 = vadd.s32 %v4590_v1, %v4580_v8  ;;  %v4161_v0 = vsel %vm11187_vm3, %v4160_v36, %v9862_v60  ;;  %v4298_v3 = vclz %v9879_v24 }
 0xcd0   :  { %v9924_v29 = vadd.s32 %v4585_v59, %v4581_v17  ;;  %v9926_v40 = vsub.s32 32, %v4668_v53  ;;  %v4451_v63 = vsel %vm4449_vm5, %v4450_v46, %v9892_v28  ;;  %v4593_v39 = vmul.u32 %v9840_v45, %v4539_v41  ;;  %v3870_v41 = vpop.f32.mrf.mxu3 }
 0xcd1   :  { %v4592_v27 = vadd.s32 %v4591_v43, %v4582_v6  ;;  %v4662_v10 = vor.u32 8388608, %v9883_v49  ;;  %v4671_v58 = vshll.u32 %v11167_v16, %v4668_v53  ;;  %v9938_v4 = vshrl.u32 %v4666_v54, 5 }
 0xcd2   :  { %vm4595_vm6 = vc.u32 %v9918_v14, %v9924_v29  ;;  %v4672_v60 = vshrl.u32 %v11165_v23, %v9926_v40  ;;  %v4675_v36 = vshrl.u32 %v11163_v38, %v9926_v40  ;;  %v4674_v17 = vshll.u32 %v11165_v23, %v4668_v53 }
 0xcd3   :  { %v4596_v24 = vadd.s32 1, %v4592_v27  ;;  %v4678_v45 = vshrl.u32 %v11161_v25, %v9926_v40  ;;  %v4677_v59 = vshll.u32 %v11163_v38, %v4668_v53  ;;  %v4680_v51 = vshll.u32 %v11161_v25, %v4668_v53 }
 0xcd4   :  { %v9943_v49 = vor.u32 %v4672_v60, %v4671_v58  ;;  %v4681_v11 = vshrl.u32 %v11159_v44, %v9926_v40  ;;  %v9949_v2 = vor.u32 %v4675_v36, %v4674_v17  ;;  %v4683_v9 = vshll.u32 %v11159_v44, %v4668_v53 }
 0xcd5   :  { %v4597_v33 = vsel %vm4595_vm6, %v4596_v24, %v4592_v27  ;;  %v4684_v19 = vshrl.u32 %v11157_v13, %v9926_v40  ;;  %vm9956_vm7 = vcmp.le.f32.partialorder %v4038_v52, 0.7853982  ;;  %v11200_v35 = vmov 0 }
 0xcd6   :  { %v11201_v35 = vsel %vm9956_vm7, 4294967295, %v11200_v35  ;;  %v4598_v46 = vadd.s32 %v4597_v33, %v4593_v39  ;;  %v9960_v22 = vor.u32 %v4678_v45, %v4677_v59  ;;  %v4682_v42 = vor.u32 %v4681_v11, %v4680_v51 }
 0xcd7   :  { %11202 = vst [vmem:[#allocation7_spill] sm:$0xff] %v11201_v35  ;;  %v9964_v61 = vmul.f32 %v9916_v12, %v9916_v12  ;;  %v9969_v8 = vsel %vm9956_vm7, %v9378_v32, %v4161_v0  ;;  %v7361_v1 = vadd.s32 4294967294, %v4298_v3  ;;  %v4685_v54 = vor.u32 %v4684_v19, %v4683_v9 }
 0xcd8   :  { %11203 = vst [vmem:[#allocation8_spill] sm:$0xff] %v9969_v8  ;;  %v4452_v52 = vclz %v4451_v63  ;;  %v4599_v53 = vadd.s32 536870912, %v4598_v46  ;;  %vm4686_vm8 = vcmp.lt.s32.totalorder %v9938_v4, 1  ;;  %vm4689_vm9 = vcmp.lt.s32.totalorder %v9938_v4, 4 }
 0xcd9   :  { %vm4688_vm10 = vcmp.lt.s32.totalorder %v9938_v4, 3  ;;  %v4694_v6 = vsel %vm4686_vm8, %v9943_v49, %v9949_v2  ;;  %v4695_v43 = vsel %vm4689_vm9, %v4682_v42, 920167782  ;;  %v9980_v0 = vshll.u32 %v4662_v10, 8 }
 0xcda   :  { %vm4687_vm11 = vcmp.lt.s32.totalorder %v9938_v4, 2  ;;  %v4696_v3 = vsel %vm4688_vm10, %v9960_v22, %v4695_v43  ;;  %v4698_v63 = vsel %vm4686_vm8, %v9949_v2, %v9960_v22  ;;  %v3871_v27 = vadd.f32 %v3870_v41, %v9364_v18 }
 0xcdb   :  { %v4020_v39 = vmul.f32 -0.00019511016, %v9964_v61  ;;  %v4697_v58 = vsel %vm4687_vm11, %v4694_v6, %v4696_v3  ;;  %v4699_v10 = vsel %vm4689_vm9, %v4685_v54, 1326507024  ;;  %v9998_v60 = vmul.f32 %v9969_v8, %v9969_v8 }
 0xcdc   :  { %v7364_v36 = vadd.s32 4294967294, %v4452_v52  ;;  %v10000_v24 = vshrl.u32 %v4599_v53, 30  ;;  %v4700_v17 = vsel %vm4688_vm10, %v4682_v42, %v4699_v10  ;;  %vm7362_vm13 = vcmp.lt.s32.totalorder %v7361_v1, 0 }
 0xcdd   :  { %v4701_v18 = vsel %vm4687_vm11, %v4698_v63, %v4700_v17  ;;  %v4703_v45 = vand.u32 65535, %v9980_v0  ;;  %v4728_v59 = vshrl.u32 %v4697_v58, 16  ;;  %v4727_v11 = vand.u32 65535, %v4697_v58 }
 0xcde   :  { %11204 = vst [vmem:[#allocation9_spill] sm:$0xff] %v10000_v24  ;;  %v4705_v51 = vand.u32 65535, %v4701_v18  ;;  %v10007_v33 = vadd.f32 -0.09966865, %v3871_v27  ;;  %v4704_v9 = vshrl.u32 %v9980_v0, 16  ;;  %v4706_v19 = vshrl.u32 %v4701_v18, 16 }
 0xcdf   :  { %v4730_v54 = vmul.u32 %v4728_v59, %v4703_v45  ;;  %v10010_v41 = vadd.f32 0.008332121, %v4020_v39  ;;  %v10012_v52 = vsel %vm7362_vm13, 0, %v7361_v1  ;;  %vm7365_vm15 = vcmp.lt.s32.totalorder %v7364_v36, 0 }
 0xce0   :  { %v4601_v42 = vshll.u32 %v10000_v24, 30  ;;  %v10016_v53 = vmul.f32 -0.00019511016, %v9998_v60  ;;  %v4286_v6 = vadd.s32 %v9744_v7, %v9735_v47  ;;  %v4708_v43 = vmul.u32 %v4706_v19, %v4703_v45 }
 0xce1   :  { %v4709_v3 = vmul.u32 %v4705_v51, %v4704_v9  ;;  %v4729_v63 = vmul.u32 %v4727_v11, %v4703_v45  ;;  %v4731_v27 = vmul.u32 %v4727_v11, %v4704_v9  ;;  %v4733_v58 = vshll.u32 %v4730_v54, 16 }
 0xce2   :  { %v4811_v10 = vand.u32 2139095040, %v10007_v33  ;;  %v4306_v39 = vsub.s32 4294967266, %v10012_v52  ;;  %v10022_v1 = vsel %vm7365_vm15, 0, %v7364_v36  ;;  %v4707_v17 = vmul.u32 %v4705_v51, %v4703_v45 }
 0xce3   :  { %v4711_v18 = vshll.u32 %v4708_v43, 16  ;;  %v10024_v13 = vsub.s32 %v4598_v46, %v4601_v42  ;;  %v4710_v44 = vmul.u32 %v4706_v19, %v4704_v9  ;;  %v4732_v25 = vmul.u32 %v4728_v59, %v4704_v9 }
 0xce4   :  { %vm4737_vm1 = vc.u32 %v4729_v63, %v4733_v58  ;;  %v4713_v38 = vshll.u32 %v4709_v3, 16  ;;  %v4735_v23 = vshll.u32 %v4731_v27, 16  ;;  %v4739_v16 = vadd.s32 %v4733_v58, %v4729_v63 }
 0xce5   :  { %vm4715_vm0 = vc.u32 %v4707_v17, %v4711_v18  ;;  %v4717_v47 = vadd.s32 %v4711_v18, %v4707_v17  ;;  %v4738_v7 = vsel %vm4737_vm1, 1, %v11194_v15  ;;  %v4812_v34 = vshrl.u32 %v4811_v10, 23 }
 0xce6   :  { %v4716_v11 = vsel %vm4715_vm0, 1, %v11194_v15  ;;  %v4302_v36 = vsub.s32 32, %v10012_v52  ;;  %v4740_v45 = vadd.s32 %v4738_v7, %v4732_v25  ;;  %v4307_v46 = vadd.s32 127, %v4306_v39 }
 0xce7   :  { %v4718_v35 = vadd.s32 %v4716_v11, %v4710_v44  ;;  %vm4719_vm2 = vc.u32 %v4717_v47, %v4713_v38  ;;  %v4460_v51 = vsub.s32 4294967266, %v10022_v1  ;;  %vm4741_vm5 = vc.u32 %v4739_v16, %v4735_v23 }
 0xce8   :  { %v4720_v59 = vsel %vm4719_vm2, 1, %v11194_v15  ;;  %v4604_v9 = vsub.s32 0, %v10024_v13  ;;  %v4691_v19 = vsel %vm4689_vm9, %v9960_v22, 2102212464  ;;  %v4712_v42 = vshrl.u32 %v4708_v43, 16 }
 0xce9   :  { %v4722_v63 = vadd.s32 %v4720_v59, %v4718_v35  ;;  %vm4603_vm6 = vcmp.lt.s32.totalorder %v10024_v13, 0  ;;  %v11205_v44 = vmov 683565275   ;;  %v4742_v25 = vsel %vm4741_vm5, 1, %v11194_v15 }
 0xcea   :  { %v4670_v38 = vshrl.u32 %v11205_v44, %v9926_v40  ;;  %v7372_v58 = vadd.s32 4294967169, %v4812_v34  ;;  %v4714_v10 = vshrl.u32 %v4709_v3, 16  ;;  %v4734_v17 = vshrl.u32 %v4730_v54, 16 }
 0xceb   :  { %v4723_v39 = vadd.s32 %v4722_v63, %v4712_v42  ;;  %v4744_v18 = vadd.s32 %v4742_v25, %v4740_v45  ;;  %v4303_v47 = vshll.u32 %v9836_v30, %v10012_v52  ;;  %v4692_v35 = vsel %vm4688_vm10, %v9949_v2, %v4691_v19 }
 0xcec   :  { %v4690_v22 = vsel %vm4686_vm8, %v4670_v38, %v9943_v49  ;;  %v4818_v43 = vadd.s32 1, %v7372_v58  ;;  %v4605_v40 = vsel %vm4603_vm6, %v4604_v9, %v10024_v13  ;;  %v4736_v34 = vshrl.u32 %v4731_v27, 16 }
 0xced   :  { %v10048_v7 = vadd.s32 %v4723_v39, %v4714_v10  ;;  %v4745_v3 = vadd.s32 %v4744_v18, %v4734_v17  ;;  %v4304_v54 = vshrl.u32 %v4286_v6, %v4302_v36  ;;  %v4308_v11 = vshll.u32 %v4307_v46, 23 }
 0xcee   :  { %v10050_v45 = vadd.s32 %v4739_v16, %v4735_v23  ;;  %vm4819_vm9 = vcmp.gt.s32.totalorder %v4818_v43, 0  ;;  %v4456_v30 = vsub.s32 32, %v10022_v1  ;;  %v4461_v52 = vadd.s32 127, %v4460_v51 }
 0xcef   :  { %v4693_v49 = vsel %vm4687_vm11, %v4690_v22, %v4692_v35  ;;  %v4746_v59 = vadd.s32 %v4745_v3, %v4736_v34  ;;  %v4606_v2 = vclz %v4605_v40  ;;  %v11171_v9 = vand.u32 2147483647, %v10007_v33 }
 0xcf0   :  { %vm4749_vm8 = vc.u32 %v10048_v7, %v10050_v45  ;;  %v4820_v27 = vsel %vm4819_vm9, %v4818_v43, 0  ;;  %v10059_v6 = vadd.f32 0.008332121, %v10016_v53  ;;  %v4440_v16 = vadd.s32 %v9789_v26, %v9777_v31 }
 0xcf1   :  { %v4750_v23 = vadd.s32 1, %v4746_v59  ;;  %v4822_v36 = vand.u32 31, %v4820_v27  ;;  %v4305_v46 = vor.u32 %v4304_v54, %v4303_v47  ;;  %v4309_v51 = vor.u32 4788187, %v4308_v11 }
 0xcf2   :  { %v4457_v4 = vshll.u32 %v9892_v28, %v10022_v1  ;;  %v4747_v19 = vmul.u32 %v9980_v0, %v4693_v49  ;;  %v4458_v42 = vshrl.u32 %v4440_v16, %v4456_v30  ;;  %v4462_v63 = vshll.u32 %v4461_v52, 23 }
 0xcf3   :  { %v4751_v38 = vsel %vm4749_vm8, %v4750_v23, %v4746_v59  ;;  %v10066_v25 = vsub.s32 32, %v4822_v36  ;;  %v7367_v58 = vadd.s32 4294967294, %v4606_v2  ;;  %v4815_v10 = vand.u32 8388607, %v11171_v9 }
 0xcf4   :  { %v4752_v53 = vadd.s32 %v4751_v38, %v4747_v19  ;;  %v10070_v31 = vshrl.u32 %v4820_v27, 5  ;;  %v4825_v26 = vshll.u32 %v11205_v44, %v4822_v36  ;;  %v11206_v39 = vmov 2475754826   ;;  %v3873_v27 = vpop.f32.mrf.mxu3 }
 0xcf5   :  { %v4826_v17 = vshrl.u32 %v11206_v39, %v10066_v25  ;;  %v4828_v28 = vshll.u32 %v11206_v39, %v4822_v36  ;;  %v11207_v0 = vmov 2131351028   ;;  %v11208_v47 = vmov 2102212464  }
 0xcf6   :  { %v4829_v1 = vshrl.u32 %v11207_v0, %v10066_v25  ;;  %v4753_v18 = vadd.s32 536870912, %v4752_v53  ;;  %v4832_v22 = vshrl.u32 %v11208_v47, %v10066_v25  ;;  %v4834_v35 = vshll.u32 %v11208_v47, %v4822_v36 }
 0xcf7   :  { %v11209_v43 = vmov 920167782   ;;  %v10083_v34 = vor.u32 %v4826_v17, %v4825_v26  ;;  %v4831_v54 = vshll.u32 %v11207_v0, %v4822_v36  ;;  %v11210_v11 = vmov 1326507024  }
 0xcf8   :  { %v4835_v40 = vshrl.u32 %v11209_v43, %v10066_v25  ;;  %v10085_v3 = vor.u32 %v4829_v1, %v4828_v28  ;;  %v4838_v30 = vshrl.u32 %v11210_v11, %v10066_v25  ;;  %v10090_v52 = vshrl.u32 %v4753_v18, 30 }
 0xcf9   :  { %v4816_v49 = vor.u32 8388608, %v4815_v10  ;;  %v4837_v2 = vshll.u32 %v11209_v43, %v4822_v36  ;;  %v4310_v16 = vand.u32 2147483647, %v4309_v51  ;;  %v4312_v23 = vcvt.s32.f32 %v4305_v46 }
 0xcfa   :  { %11211 = vst [vmem:[#allocation10_spill] sm:$0xff] %v10090_v52  ;;  %v4836_v59 = vor.u32 %v4835_v40, %v4834_v35  ;;  %v10093_v19 = vor.u32 %v4458_v42, %v4457_v4  ;;  %v4833_v38 = vor.u32 %v4832_v22, %v4831_v54  ;;  %vm7368_vm10 = vcmp.lt.s32.totalorder %v7367_v58, 0 }
 0xcfb   :  { %v4755_v26 = vshll.u32 %v10090_v52, 30  ;;  %v4839_v17 = vor.u32 %v4838_v30, %v4837_v2  ;;  %vm4840_vm11 = vcmp.lt.s32.totalorder %v10070_v31, 1  ;;  %v10097_v28 = vor.u32 4788187, %v4462_v63 }
 0xcfc   :  { %vm4843_vm13 = vcmp.lt.s32.totalorder %v10070_v31, 4  ;;  %v4848_v36 = vsel %vm4840_vm11, %v10083_v34, %v10085_v3  ;;  %v3874_v46 = vadd.f32 %v3873_v27, %v9366_v37  ;;  %vm4842_vm15 = vcmp.lt.s32.totalorder %v10070_v31, 3 }
 0xcfd   :  { %v10105_v51 = vsub.s32 %v4752_v53, %v4755_v26  ;;  %v4849_v4 = vsel %vm4843_vm13, %v4836_v59, 920167782  ;;  %v10110_v42 = vshll.u32 %v4816_v49, 8  ;;  %v10112_v63 = vsel %vm7368_vm10, 0, %v7367_v58 }
 0xcfe   :  { %vm4841_vm1 = vcmp.lt.s32.totalorder %v10070_v31, 2  ;;  %v4850_v10 = vsel %vm4842_vm15, %v4833_v38, %v4849_v4  ;;  %v4852_v37 = vsel %vm4840_vm11, %v10085_v3, %v4833_v38  ;;  %v4853_v58 = vsel %vm4843_vm13, %v4839_v17, 1326507024 }
 0xcff   :  { %vm4757_vm0 = vcmp.lt.s32.totalorder %v10105_v51, 0  ;;  %v4758_v53 = vsub.s32 0, %v10105_v51  ;;  %v4851_v1 = vsel %vm4841_vm1, %v4848_v36, %v4850_v10  ;;  %v10126_v18 = vmul.f32 %v4312_v23, %v4310_v16 }
 0xd00   :  { %v4854_v22 = vsel %vm4842_vm15, %v4836_v59, %v4853_v58  ;;  %v4882_v35 = vshrl.u32 %v4851_v1, 16  ;;  %v10130_v40 = vadd.f32 -0.09966865, %v3874_v46  ;;  %v4614_v54 = vsub.s32 4294967266, %v10112_v63 }
 0xd01   :  { %v4759_v30 = vsel %vm4757_vm0, %v4758_v53, %v10105_v51  ;;  %v4855_v49 = vsel %vm4841_vm1, %v4852_v37, %v4854_v22  ;;  %v4857_v2 = vand.u32 65535, %v10110_v42  ;;  %v4881_v16 = vand.u32 65535, %v4851_v1 }
 0xd02   :  { %v4760_v27 = vclz %v4759_v30  ;;  %v4859_v26 = vand.u32 65535, %v4855_v49  ;;  %v4860_v17 = vshrl.u32 %v4855_v49, 16  ;;  %v4464_v23 = vand.u32 2147483647, %v10097_v28 }
 0xd03   :  { %v4466_v59 = vcvt.s32.f32 %v10093_v19  ;;  %v4858_v36 = vshrl.u32 %v10110_v42, 16  ;;  %v4884_v46 = vmul.u32 %v4882_v35, %v4857_v2  ;;  %v4594_v4 = vadd.s32 %v9924_v29, %v9918_v14 }
 0xd04   :  { %v7370_v10 = vadd.s32 4294967294, %v4760_v27  ;;  %v4862_v53 = vmul.u32 %v4860_v17, %v4857_v2  ;;  %v4965_v37 = vand.u32 2139095040, %v10130_v40  ;;  %v4610_v58 = vsub.s32 32, %v10112_v63 }
 0xd05   :  { %v4615_v22 = vadd.s32 127, %v4614_v54  ;;  %v4863_v30 = vmul.u32 %v4859_v26, %v4858_v36  ;;  %v4887_v49 = vshll.u32 %v4884_v46, 16  ;;  %v4885_v28 = vmul.u32 %v4881_v16, %v4858_v36 }
 0xd06   :  { %vm7371_vm2 = vcmp.lt.s32.totalorder %v7370_v10, 0  ;;  %v4865_v1 = vshll.u32 %v4862_v53, 16  ;;  %v4845_v24 = vsel %vm4843_vm13, %v4833_v38, 2102212464  ;;  %v4861_v14 = vmul.u32 %v4859_v26, %v4857_v2 }
 0xd07   :  { %v10145_v9 = vsel %vm7371_vm2, 0, %v7370_v10  ;;  %v4883_v29 = vmul.u32 %v4881_v16, %v4857_v2  ;;  %v4864_v27 = vmul.u32 %v4860_v17, %v4858_v36  ;;  %v4867_v52 = vshll.u32 %v4863_v30, 16 }
 0xd08   :  { %v4886_v56 = vmul.u32 %v4882_v35, %v4858_v36  ;;  %v4966_v8 = vshrl.u32 %v4965_v37, 23  ;;  %v4768_v54 = vsub.s32 4294967266, %v10145_v9  ;;  %vm4869_vm5 = vc.u32 %v4861_v14, %v4865_v1 }
 0xd09   :  { %v4871_v12 = vadd.s32 %v4865_v1, %v4861_v14  ;;  %vm4891_vm6 = vc.u32 %v4883_v29, %v4887_v49  ;;  %v4824_v32 = vshrl.u32 %v11205_v44, %v10066_v25  ;;  %v4870_v10 = vsel %vm4869_vm5, 1, %v11194_v15 }
 0xd0a   :  { %v4889_v19 = vshll.u32 %v4885_v28, 16  ;;  %v4892_v48 = vsel %vm4891_vm6, 1, %v11194_v15  ;;  %v4872_v38 = vadd.s32 %v4870_v10, %v4864_v27  ;;  %v4893_v2 = vadd.s32 %v4887_v49, %v4883_v29 }
 0xd0b   :  { %vm4873_vm9 = vc.u32 %v4871_v12, %v4867_v52  ;;  %v4894_v26 = vadd.s32 %v4892_v48, %v4886_v56  ;;  %v4844_v35 = vsel %vm4840_vm11, %v4824_v32, %v10083_v34  ;;  %v4846_v17 = vsel %vm4842_vm15, %v10085_v3, %v4845_v24 }
 0xd0c   :  { %v4874_v16 = vsel %vm4873_vm9, 1, %v11194_v15  ;;  %v7375_v25 = vadd.s32 4294967169, %v4966_v8  ;;  %v4769_v36 = vadd.s32 127, %v4768_v54  ;;  %v4866_v37 = vshrl.u32 %v4862_v53, 16 }
 0xd0d   :  { %v4876_v1 = vadd.s32 %v4874_v16, %v4872_v38  ;;  %vm4895_vm8 = vc.u32 %v4893_v2, %v4889_v19  ;;  %v4616_v14 = vshll.u32 %v4615_v22, 23  ;;  %v11212_v48 = vand.u32 2147483647, %v10130_v40 }
 0xd0e   :  { %v4896_v12 = vsel %vm4895_vm8, 1, %v11194_v15  ;;  %v4972_v52 = vadd.s32 1, %v7375_v25  ;;  %v4868_v49 = vshrl.u32 %v4863_v30, 16  ;;  %v4888_v34 = vshrl.u32 %v4884_v46, 16 }
 0xd0f   :  { %v4969_v56 = vand.u32 8388607, %v11212_v48  ;;  %v4877_v32 = vadd.s32 %v4876_v1, %v4866_v37  ;;  %v4898_v29 = vadd.s32 %v4896_v12, %v4894_v26  ;;  %v4764_v24 = vsub.s32 32, %v10145_v9 }
 0xd10   :  { %v4847_v8 = vsel %vm4841_vm1, %v4844_v35, %v4846_v17  ;;  %v4890_v3 = vshrl.u32 %v4885_v28, 16  ;;  %vm4973_vm10 = vcmp.gt.s32.totalorder %v4972_v52, 0  ;;  %v4770_v53 = vshll.u32 %v4769_v36, 23 }
 0xd11   :  { %v10167_v27 = vadd.s32 %v4877_v32, %v4868_v49  ;;  %v4899_v22 = vadd.s32 %v4898_v29, %v4888_v34  ;;  %v4974_v54 = vsel %vm4973_vm10, %v4972_v52, 0  ;;  %v10169_v10 = vmul.f32 %v4466_v59, %v4464_v23 }
 0xd12   :  { %v4611_v30 = vshll.u32 %v10024_v13, %v10112_v63  ;;  %v10173_v38 = vadd.s32 %v4893_v2, %v4889_v19  ;;  %v4976_v46 = vand.u32 31, %v4974_v54  ;;  %v4612_v26 = vshrl.u32 %v4594_v4, %v4610_v58 }
 0xd13   :  { %v4617_v16 = vor.u32 4788187, %v4616_v14  ;;  %v4748_v31 = vadd.s32 %v10050_v45, %v10048_v7  ;;  %v4900_v28 = vadd.s32 %v4899_v22, %v4890_v3  ;;  %v4765_v35 = vshll.u32 %v10105_v51, %v10145_v9 }
 0xd14   :  { %v4901_v17 = vmul.u32 %v10110_v42, %v4847_v8  ;;  %vm4903_vm11 = vc.u32 %v10167_v27, %v10173_v38  ;;  %v10182_v23 = vsub.s32 32, %v4976_v46  ;;  %v4771_v63 = vor.u32 4788187, %v4770_v53 }
 0xd15   :  { %v4766_v13 = vshrl.u32 %v4748_v31, %v4764_v24  ;;  %v4904_v59 = vadd.s32 1, %v4900_v28  ;;  %v4970_v19 = vor.u32 8388608, %v4969_v56  ;;  %v4979_v4 = vshll.u32 %v11205_v44, %v4976_v46 }
 0xd16   :  { %v4980_v7 = vshrl.u32 %v11206_v39, %v10182_v23  ;;  %v4982_v45 = vshll.u32 %v11206_v39, %v4976_v46  ;;  %v4983_v9 = vshrl.u32 %v11207_v0, %v10182_v23  ;;  %v4986_v42 = vshrl.u32 %v11208_v47, %v10182_v23 }
 0xd17   :  { %v4905_v51 = vsel %vm4903_vm11, %v4904_v59, %v4900_v28  ;;  %v4988_v58 = vshll.u32 %v11208_v47, %v4976_v46  ;;  %v4989_v2 = vshrl.u32 %v11209_v43, %v10182_v23  ;;  %v10195_v36 = vshrl.u32 %v4974_v54, 5 }
 0xd18   :  { %v4906_v25 = vadd.s32 %v4905_v51, %v4901_v17  ;;  %v4985_v37 = vshll.u32 %v11207_v0, %v4976_v46  ;;  %v4991_v1 = vshll.u32 %v11209_v43, %v4976_v46  ;;  %v10199_v39 = vor.u32 %v4980_v7, %v4979_v4 }
 0xd19   :  { %v10201_v14 = vor.u32 %v4983_v9, %v4982_v45  ;;  %v4990_v12 = vor.u32 %v4989_v2, %v4988_v58  ;;  %v4992_v48 = vshrl.u32 %v11210_v11, %v10182_v23  ;;  %vm11186_vm13 = vcmp.lt.s32.totalorder %v9534_v55, 0 }
 0xd1a   :  { %v4314_v47 = vxor.u32 2147483648, %v10126_v18  ;;  %vm11185_vm15 = vcmp.lt.s32.totalorder %v9618_v20, 0  ;;  %v4613_v56 = vor.u32 %v4612_v26, %v4611_v30  ;;  %v4907_v52 = vadd.s32 536870912, %v4906_v25 }
 0xd1b   :  { %v10208_v49 = vor.u32 %v4986_v42, %v4985_v37  ;;  %v4468_v0 = vxor.u32 2147483648, %v10169_v10  ;;  %v4618_v43 = vand.u32 2147483647, %v4617_v16  ;;  %v4767_v32 = vor.u32 %v4766_v13, %v4765_v35 }
 0xd1c   :  { %v4993_v34 = vor.u32 %v4992_v48, %v4991_v1  ;;  %v10211_v29 = vshrl.u32 %v4907_v52, 30  ;;  %vm4994_vm1 = vcmp.lt.s32.totalorder %v10195_v36, 1  ;;  %vm4997_vm0 = vcmp.lt.s32.totalorder %v10195_v36, 4 }
 0xd1d   :  { %v10215_v11 = vshll.u32 %v4970_v19, 8  ;;  %v4772_v24 = vand.u32 2147483647, %v4771_v63  ;;  %v5002_v8 = vsel %vm4994_vm1, %v10199_v39, %v10201_v14  ;;  %v5003_v3 = vsel %vm4997_vm0, %v4990_v12, 920167782 }
 0xd1e   :  { %v5007_v53 = vsel %vm4997_vm0, %v4993_v34, 1326507024  ;;  %v4620_v22 = vcvt.s32.f32 %v4613_v56  ;;  %v4909_v54 = vshll.u32 %v10211_v29, 30  ;;  %vm4996_vm2 = vcmp.lt.s32.totalorder %v10195_v36, 3 }
 0xd1f   :  { %v5006_v30 = vsel %vm4994_vm1, %v10201_v14, %v10208_v49  ;;  %v4774_v46 = vcvt.s32.f32 %v4767_v32  ;;  %vm4995_vm5 = vcmp.lt.s32.totalorder %v10195_v36, 2  ;;  %v5004_v26 = vsel %vm4996_vm2, %v10208_v49, %v5003_v3 }
 0xd20   :  { %v5008_v16 = vsel %vm4996_vm2, %v4990_v12, %v5007_v53  ;;  %v10237_v31 = vmul.f32 %v4620_v22, %v4618_v43  ;;  %v10239_v28 = vsub.s32 %v4906_v25, %v4909_v54  ;;  %v5005_v35 = vsel %vm4995_vm5, %v5002_v8, %v5004_v26 }
 0xd21   :  { %v5011_v17 = vand.u32 65535, %v10215_v11  ;;  %v10244_v13 = vmul.f32 %v4774_v46, %v4772_v24  ;;  %v5009_v63 = vsel %vm4995_vm5, %v5006_v30, %v5008_v16  ;;  %v5035_v59 = vand.u32 65535, %v5005_v35 }
 0xd22   :  { %v5036_v19 = vshrl.u32 %v5005_v35, 16  ;;  %vm4911_vm6 = vcmp.lt.s32.totalorder %v10239_v28, 0  ;;  %v4912_v4 = vsub.s32 0, %v10239_v28  ;;  %v5012_v7 = vshrl.u32 %v10215_v11, 16 }
 0xd23   :  { %v5013_v45 = vand.u32 65535, %v5009_v63  ;;  %v4315_v9 = vsel %vm11186_vm13, %v4314_v47, %v10126_v18  ;;  %v10257_v51 = vsel %vm11185_vm15, %v4468_v0, %v10169_v10  ;;  %v5014_v42 = vshrl.u32 %v5009_v63, 16 }
 0xd24   :  { %v5038_v58 = vmul.u32 %v5036_v19, %v5011_v17  ;;  %v4622_v2 = vxor.u32 2147483648, %v10237_v31  ;;  %v4913_v25 = vsel %vm4911_vm6, %v4912_v4, %v10239_v28  ;;  %v5039_v1 = vmul.u32 %v5035_v59, %v5012_v7 }
 0xd25   :  { %v5017_v37 = vmul.u32 %v5013_v45, %v5012_v7  ;;  %v4776_v12 = vxor.u32 2147483648, %v10244_v13  ;;  %v4902_v48 = vadd.s32 %v10173_v38, %v10167_v27  ;;  %v4914_v56 = vclz %v4913_v25 }
 0xd26   :  { %v5016_v18 = vmul.u32 %v5014_v42, %v5011_v17  ;;  %v4978_v47 = vshrl.u32 %v11205_v44, %v10182_v23  ;;  %v5015_v10 = vmul.u32 %v5013_v45, %v5011_v17  ;;  %v5037_v52 = vmul.u32 %v5035_v59, %v5011_v17 }
 0xd27   :  { %v5041_v0 = vshll.u32 %v5038_v58, 16  ;;  %vm4656_vm9 = vcmp.lt.s32.totalorder %v9826_v50, 0  ;;  %v7373_v43 = vadd.s32 4294967294, %v4914_v56  ;;  %v5018_v32 = vmul.u32 %v5014_v42, %v5012_v7 }
 0xd28   :  { %v5019_v34 = vshll.u32 %v5016_v18, 16  ;;  %v5040_v24 = vmul.u32 %v5036_v19, %v5012_v7  ;;  %v11213_v8 = vand.u32 2147483647, %v9534_v55  ;;  %v5021_v27 = vshll.u32 %v5017_v37, 16 }
 0xd29   :  { %v5043_v38 = vshll.u32 %v5039_v1, 16  ;;  %vm5045_vm10 = vc.u32 %v5037_v52, %v5041_v0  ;;  %v5047_v53 = vadd.s32 %v5041_v0, %v5037_v52  ;;  %v11216_v44 = vand.u32 2147483647, %v9618_v20 }
 0xd2a   :  { %vm10269_vm8 = vcmp.le.f32.partialorder %v11213_v8, 0.7853982  ;;  %vm4502_vm6 = vcmp.lt.s32.totalorder %v9757_v5, 0  ;;  %vm7374_vm4 = vcmp.lt.s32.totalorder %v7373_v43, 0  ;;  %vm5023_vm15 = vc.u32 %v5015_v10, %v5019_v34 }
 0xd2b   :  { %vm10275_vm11 = vcmp.le.f32.partialorder %v11216_v44, 0.7853982  ;;  %v5025_v22 = vadd.s32 %v5019_v34, %v5015_v10  ;;  %v5046_v54 = vsel %vm5045_vm10, 1, %v11194_v15  ;;  %v4917_v30 = vsel %vm7374_vm4, 0, %v7373_v43 }
 0xd2c   :  { %v5024_v46 = vsel %vm5023_vm15, 1, %v11194_v15  ;;  %v5048_v26 = vadd.s32 %v5046_v54, %v5040_v24  ;;  %vm5049_vm13 = vc.u32 %v5047_v53, %v5043_v38  ;;  %v4918_v16 = vsub.s32 32, %v4917_v30 }
 0xd2d   :  { %v4922_v35 = vsub.s32 4294967266, %v4917_v30  ;;  %v4999_v17 = vsel %vm4997_vm0, %v10208_v49, 2102212464  ;;  %v5026_v63 = vadd.s32 %v5024_v46, %v5018_v32  ;;  %v4919_v59 = vshll.u32 %v10239_v28, %v4917_v30 }
 0xd2e   :  { %vm5027_vm3 = vc.u32 %v5025_v22, %v5021_v27  ;;  %v5042_v19 = vshrl.u32 %v5038_v58, 16  ;;  %v5050_v4 = vsel %vm5049_vm13, 1, %v11194_v15  ;;  %v4920_v7 = vshrl.u32 %v4902_v48, %v4918_v16 }
 0xd2f   :  { %v4923_v45 = vadd.s32 127, %v4922_v35  ;;  %v5028_v42 = vsel %vm5027_vm3, 1, %v11194_v15  ;;  %v5052_v25 = vadd.s32 %v5050_v4, %v5048_v26  ;;  %v4998_v56 = vsel %vm4994_vm1, %v4978_v47, %v10199_v39 }
 0xd30   :  { %v5000_v49 = vsel %vm4996_vm2, %v10201_v14, %v4999_v17  ;;  %v5020_v10 = vshrl.u32 %v5016_v18, 16  ;;  %v5030_v52 = vadd.s32 %v5028_v42, %v5026_v63  ;;  %v4921_v28 = vor.u32 %v4920_v7, %v4919_v59 }
 0xd31   :  { %v4924_v0 = vshll.u32 %v4923_v45, 23  ;;  %v5044_v58 = vshrl.u32 %v5039_v1, 16  ;;  %v5053_v43 = vadd.s32 %v5052_v25, %v5042_v19  ;;  %v11219_v48 = vand.u32 2147483647, %v9826_v50 }
 0xd32   :  { %v4777_v15 = vsel %vm4656_vm9, %v4776_v12, %v10244_v13  ;;  %v5022_v39 = vshrl.u32 %v5017_v37, 16  ;;  %v5031_v47 = vadd.s32 %v5030_v52, %v5020_v10  ;;  %v10306_v14 = vsel %vm10269_vm8, %v9534_v55, %v4315_v9 }
 0xd33   :  { %vm10296_vm4 = vcmp.le.f32.partialorder %v11219_v48, 0.7853982  ;;  %v4925_v18 = vor.u32 4788187, %v4924_v0  ;;  %v5001_v1 = vsel %vm4995_vm5, %v4998_v56, %v5000_v49  ;;  %v5054_v34 = vadd.s32 %v5053_v43, %v5044_v58 }
 0xd34   :  { %v10314_v24 = vsel %vm10275_vm11, %v9618_v20, %v10257_v51  ;;  %v4623_v13 = vsel %vm4502_vm6, %v4622_v2, %v10237_v31  ;;  %v10319_v37 = vadd.s32 %v5031_v47, %v5022_v39  ;;  %v10321_v12 = vadd.s32 %v5047_v53, %v5043_v38 }
 0xd35   :  { %v10326_v36 = vsel %vm10296_vm4, %v9826_v50, %v4777_v15  ;;  %v4926_v9 = vand.u32 2147483647, %v4925_v18  ;;  %v4928_v8 = vcvt.s32.f32 %v4921_v28  ;;  %v5058_v27 = vadd.s32 1, %v5054_v34 }
 0xd36   :  { %v10330_v51 = vmul.f32 %v10306_v14, %v10306_v14  ;;  %v5055_v44 = vmul.u32 %v10215_v11, %v5001_v1  ;;  %vm5057_vm3 = vc.u32 %v10319_v37, %v10321_v12  ;;  %v4022_v31 = vmul.f32 %v10010_v41, %v9964_v61 }
 0xd37   :  { %v11222_v2 = vand.u32 2147483647, %v9757_v5  ;;  %v4929_v53 = vmul.f32 %v4928_v8, %v4926_v9  ;;  %v5059_v22 = vsel %vm5057_vm3, %v5058_v27, %v5054_v34  ;;  %v10345_v54 = vmul.f32 %v10314_v24, %v10314_v24 }
 0xd38   :  { %v10354_v41 = vmul.f32 %v10326_v36, %v10326_v36  ;;  %v5060_v30 = vadd.s32 %v5059_v22, %v5055_v44  ;;  %v4176_v46 = vmul.f32 %v10059_v6, %v9998_v60  ;;  %v4328_v26 = vmul.f32 -0.00019511016, %v10330_v51 }
 0xd39   :  { %vm10339_vm13 = vcmp.le.f32.partialorder %v11222_v2, 0.7853982  ;;  %v4930_v16 = vxor.u32 2147483648, %v4929_v53  ;;  %v4023_v17 = vadd.f32 -0.16666654, %v4022_v31  ;;  %vm4810_vm15 = vcmp.lt.s32.totalorder %v10007_v33, 0 }
 0xd3a   :  { %v10350_v11 = vsel %vm10339_vm13, %v9757_v5, %v4623_v13  ;;  %v5061_v35 = vadd.s32 536870912, %v5060_v30  ;;  %v4482_v59 = vmul.f32 -0.00019511016, %v10345_v54  ;;  %v4790_v19 = vmul.f32 -0.00019511016, %v10354_v41 }
 0xd3b   :  { %v10361_v63 = vmul.f32 %v10350_v11, %v10350_v11  ;;  %v4177_v7 = vadd.f32 -0.16666654, %v4176_v46  ;;  %v4329_v45 = vadd.f32 0.008332121, %v4328_v26  ;;  %v4931_v6 = vsel %vm4810_vm15, %v4930_v16, %v4929_v53  ;;  %v11229_v26 = vld [vmem:[#allocation3_spill] sm:$0xff] }
 0xd3c   :  { %v10365_v4 = vshrl.u32 %v5061_v35, 30  ;;  %v4024_v25 = vmul.f32 %v4023_v17, %v9964_v61  ;;  %v4483_v49 = vadd.f32 0.008332121, %v4482_v59  ;;  %v4791_v10 = vadd.f32 0.008332121, %v4790_v19  ;;  %v11231_v59 = vld [vmem:[#allocation6_spill] sm:$0xff] }
 0xd3d   :  { %v4636_v56 = vmul.f32 -0.00019511016, %v10361_v63  ;;  %v11225_v52 = vand.u32 2147483647, %v10007_v33  ;;  %v4178_v58 = vmul.f32 %v4177_v7, %v9998_v60  ;;  %v4783_v48 = vmul.f32 -0.001358992, %v10354_v41 }
 0xd3e   :  { %v5063_v42 = vshll.u32 %v10365_v4, 30  ;;  %v4330_v15 = vmul.f32 %v4329_v45, %v10330_v51  ;;  %v4008_v47 = vsub.s32 4, %v9544_v21  ;;  %v4025_v18 = vadd.f32 1.0, %v4024_v25 }
 0xd3f   :  { %vm10375_vm1 = vcmp.le.f32.partialorder %v11225_v52, 0.7853982  ;;  %v4162_v1 = vsub.s32 4, %v9635_v57  ;;  %v4637_v34 = vadd.f32 0.008332121, %v4636_v56  ;;  %v4484_v13 = vmul.f32 %v4483_v49, %v10345_v54  ;;  %v11234_v49 = vld [vmem:[#allocation4_spill] sm:$0xff] }
 0xd40   :  { %v5064_v0 = vsub.s32 %v5060_v30, %v5063_v42  ;;  %v10383_v43 = vsel %vm10375_vm1, %v10007_v33, %v4931_v6  ;;  %v4792_v9 = vmul.f32 %v4791_v10, %v10354_v41  ;;  %v4179_v44 = vadd.f32 1.0, %v4178_v58  ;;  %v11228_v30 = vld [vmem:[#allocation2_spill] sm:$0xff]  ;;  %v11232_v42 = vld [vmem:[#allocation8_spill] sm:$0xff] }
 0xd41   :  { %v10393_v8 = vmul.f32 %v10383_v43, %v10383_v43  ;;  %v4316_v31 = vsub.s32 4, %v9794_v62  ;;  %v4784_v53 = vadd.f32 0.041655596, %v4783_v48  ;;  %v4331_v22 = vadd.f32 -0.16666654, %v4330_v15  ;;  %v11235_v52 = vld [vmem:[#allocation10_spill] sm:$0xff] }
 0xd42   :  { %vm5065_vm0 = vcmp.lt.s32.totalorder %v5064_v0, 0  ;;  %v5066_v39 = vsub.s32 0, %v5064_v0  ;;  %v10399_v46 = vsel %vm3886_vm12, %v4008_v47, %v9544_v21  ;;  %vm11230_vm2 = vcmp.lt.s32.totalorder %v11229_v26, 0 }
 0xd43   :  { %v10404_v16 = vsel %vm11230_vm2, %v4162_v1, %v9635_v57  ;;  %v4638_v35 = vmul.f32 %v4637_v34, %v10361_v63  ;;  %v10408_v19 = vmul.f32 %v4025_v18, %v11231_v59  ;;  %v4485_v7 = vadd.f32 -0.16666654, %v4484_v13 }
 0xd44   :  { %v5067_v27 = vsel %vm5065_vm0, %v5066_v39, %v5064_v0  ;;  %v4793_v45 = vadd.f32 -0.16666654, %v4792_v9  ;;  %v4944_v6 = vmul.f32 -0.00019511016, %v10393_v8  ;;  %v10412_v25 = vmul.f32 %v4179_v44, %v11232_v42 }
 0xd45   :  { %v5068_v2 = vclz %v5067_v27  ;;  %vm11233_vm12 = vcmp.lt.s32.totalorder %v9534_v55, 0  ;;  %v4785_v57 = vmul.f32 %v4784_v53, %v10354_v41  ;;  %v4332_v56 = vmul.f32 %v4331_v22, %v10330_v51  ;;  %v11236_v53 = vld [vmem:[#allocation9_spill] sm:$0xff] }
 0xd46   :  { %v10417_v21 = vsel %vm11233_vm12, %v4316_v31, %v9794_v62  ;;  %v4470_v10 = vsub.s32 4, %v11234_v49  ;;  %v4778_v58 = vsub.s32 4, %v11235_v52  ;;  %v4639_v15 = vadd.f32 -0.16666654, %v4638_v35 }
 0xd47   :  { %v7376_v17 = vadd.s32 4294967294, %v5068_v2  ;;  %v5056_v39 = vadd.s32 %v10321_v12, %v10319_v37  ;;  %v4486_v1 = vmul.f32 %v4485_v7, %v10345_v54  ;;  %v4794_v62 = vmul.f32 %v4793_v45, %v10354_v41 }
 0xd48   :  { %v4945_v34 = vadd.f32 0.008332121, %v4944_v6  ;;  %v4629_v13 = vmul.f32 -0.001358992, %v10361_v63  ;;  %v4786_v31 = vadd.f32 -0.4999988, %v4785_v57  ;;  %v4640_v12 = vmul.f32 %v4639_v15, %v10361_v63 }
 0xd49   :  { %vm7377_vm5 = vcmp.lt.s32.totalorder %v7376_v17, 0  ;;  %v4333_v2 = vadd.f32 1.0, %v4332_v56  ;;  %v4624_v22 = vsub.s32 4, %v11236_v53  ;;  %v4937_v35 = vmul.f32 -0.001358992, %v10393_v8 }
 0xd4a   :  { %v5071_v48 = vsel %vm7377_vm5, 0, %v7376_v17  ;;  %v4475_v37 = vmul.f32 -0.001358992, %v10345_v54  ;;  %v4779_v17 = vsel %vm4656_vm9, %v4778_v58, %v11235_v52  ;;  %v4487_v45 = vadd.f32 1.0, %v4486_v1 }
 0xd4b   :  { %v5072_v47 = vsub.s32 32, %v5071_v48  ;;  %v5076_v18 = vsub.s32 4294967266, %v5071_v48  ;;  %v5073_v9 = vshll.u32 %v5064_v0, %v5071_v48  ;;  %v4795_v0 = vadd.f32 1.0, %v4794_v62 }
 0xd4c   :  { %v4946_v6 = vmul.f32 %v4945_v34, %v10393_v8  ;;  %v4630_v42 = vadd.f32 0.041655596, %v4629_v13  ;;  %vm11237_vm10 = vcmp.lt.s32.totalorder %v9618_v20, 0  ;;  %v4932_v56 = vsub.s32 4, %v10211_v29 }
 0xd4d   :  { %v5074_v27 = vshrl.u32 %v5056_v39, %v5072_v47  ;;  %v5077_v44 = vadd.s32 127, %v5076_v18  ;;  %v10439_v57 = vsel %vm11237_vm10, %v4470_v10, %v11234_v49  ;;  %v4787_v15 = vmul.f32 %v4786_v31, %v10354_v41 }
 0xd4e   :  { %v10444_v39 = vmul.f32 %v4333_v2, %v10306_v14  ;;  %v4938_v52 = vadd.f32 0.041655596, %v4937_v35  ;;  %v4781_v58 = vsel %vm10296_vm4, 0, %v4779_v17  ;;  %v4476_v47 = vadd.f32 0.041655596, %v4475_v37 }
 0xd4f   :  { %v5075_v59 = vor.u32 %v5074_v27, %v5073_v9  ;;  %v5078_v7 = vshll.u32 %v5077_v44, 23  ;;  %v4625_v18 = vsel %vm4502_vm6, %v4624_v22, %v11236_v53  ;;  %v4641_v1 = vadd.f32 1.0, %v4640_v12 }
 0xd50   :  { %v10452_v62 = vmul.f32 %v4487_v45, %v10314_v24  ;;  %v4796_v41 = vmul.f32 %v4795_v0, %v10326_v36  ;;  %v4947_v34 = vadd.f32 -0.16666654, %v4946_v6  ;;  %v4631_v14 = vmul.f32 %v4630_v42, %v10361_v63 }
 0xd51   :  { %v5079_v48 = vor.u32 4788187, %v5078_v7  ;;  %v5082_v10 = vcvt.s32.f32 %v5075_v59  ;;  %v4933_v32 = vsel %vm4810_vm15, %v4932_v56, %v10211_v29  ;;  %v4788_v9 = vadd.f32 1.0, %v4787_v15 }
 0xd52   :  { %v4798_v27 = vand.u32 3, %v4781_v58  ;;  %v11238_v44 = vand.u32 2147483647, %v10130_v40  ;;  %v5086_v24 = vsub.s32 4, %v10365_v4  ;;  %v4939_v36 = vmul.f32 %v4938_v52, %v10393_v8 }
 0xd53   :  { %v5080_v49 = vand.u32 2147483647, %v5079_v48  ;;  %v4477_v2 = vmul.f32 %v4476_v47, %v10345_v54  ;;  %v10469_v53 = vmul.f32 %v4641_v1, %v10350_v11  ;;  %vm4964_vm6 = vcmp.lt.s32.totalorder %v10130_v40, 0 }
 0xd54   :  { %vm10461_vm9 = vcmp.le.f32.partialorder %v11238_v44, 0.7853982  ;;  %v4627_v22 = vsel %vm10339_vm13, 0, %v4625_v18  ;;  %v4948_v35 = vmul.f32 %v4947_v34, %v10393_v8  ;;  %v4935_v37 = vsel %vm10375_vm1, 0, %v4933_v32 }
 0xd55   :  { %v5083_v13 = vmul.f32 %v5082_v10, %v5080_v49  ;;  %v4801_v12 = vxor.u32 2147483648, %v4796_v41  ;;  %v4632_v17 = vadd.f32 -0.4999988, %v4631_v14  ;;  %vm4797_vm4 = vweird.f32 %v9826_v50 }
 0xd56   :  { %vm4799_vm3 = vcmp.lt.s32.totalorder %v4798_v27, 2  ;;  %vm4800_vm15 = vcmp.eq.s32.totalorder %v4798_v27, 0  ;;  %v4804_v11 = vxor.u32 2147483648, %v4788_v9  ;;  %v5087_v7 = vsel %vm4964_vm6, %v5086_v24, %v10365_v4 }
 0xd57   :  { %v5084_v29 = vxor.u32 2147483648, %v5083_v13  ;;  %v4940_v45 = vadd.f32 -0.4999988, %v4939_v36  ;;  %v4478_v0 = vadd.f32 -0.4999988, %v4477_v2  ;;  %v10486_v6 = vand.u32 3, %v4935_v37 }
 0xd58   :  { %vm4803_vm13 = vcmp.eq.s32.totalorder %v4798_v27, 2  ;;  %v4321_v42 = vmul.f32 -0.001358992, %v10330_v51  ;;  %v4949_v56 = vadd.f32 1.0, %v4948_v35  ;;  %v4802_v48 = vsel %vm4800_vm15, %v4788_v9, %v4801_v12 }
 0xd59   :  { %v5085_v59 = vsel %vm4964_vm6, %v5084_v29, %v5083_v13  ;;  %v4633_v15 = vmul.f32 %v4632_v17, %v10361_v63  ;;  %v10490_v4 = vand.u32 3, %v4627_v22  ;;  %v5089_v58 = vsel %vm10461_vm9, 0, %v5087_v7 }
 0xd5a   :  { %v10482_v38 = vsel %vm10461_vm9, %v10130_v40, %v5085_v59  ;;  %v4805_v18 = vsel %vm4803_vm13, %v4804_v11, %v4796_v41  ;;  %v4941_v1 = vmul.f32 %v4940_v45, %v10393_v8  ;;  %v4479_v49 = vmul.f32 %v4478_v0, %v10345_v54 }
 0xd5b   :  { %v5090_v28 = vmul.f32 %v10482_v38, %v10482_v38  ;;  %v4322_v10 = vadd.f32 0.041655596, %v4321_v42  ;;  %v4167_v34 = vmul.f32 -0.001358992, %v9998_v60  ;;  %vm4954_vm1 = vcmp.eq.s32.totalorder %v10486_v6, 0 }
 0xd5c   :  { %v4806_v63 = vsel %vm4799_vm3, %v4802_v48, %v4805_v18  ;;  %v4013_v13 = vmul.f32 -0.001358992, %v9964_v61  ;;  %v4950_v9 = vmul.f32 %v4949_v56, %v10383_v43  ;;  %v10501_v44 = vand.u32 3, %v5089_v58 }
 0xd5d   :  { %v5098_v52 = vmul.f32 -0.00019511016, %v5090_v28  ;;  %v5091_v47 = vmul.f32 -0.001358992, %v5090_v28  ;;  %v4323_v41 = vmul.f32 %v4322_v10, %v10330_v51  ;;  %v4168_v8 = vadd.f32 0.041655596, %v4167_v34 }
 0xd5e   :  { %vm4957_vm0 = vcmp.eq.s32.totalorder %v10486_v6, 2  ;;  %vm4649_vm2 = vcmp.eq.s32.totalorder %v10490_v4, 2  ;;  %v4473_v27 = vsel %vm10275_vm11, 0, %v10439_v57  ;;  %v4014_v24 = vadd.f32 0.041655596, %v4013_v13 }
 0xd5f   :  { %v5099_v14 = vadd.f32 0.008332121, %v5098_v52  ;;  %v5092_v32 = vadd.f32 0.041655596, %v5091_v47  ;;  %v4942_v36 = vadd.f32 1.0, %v4941_v1  ;;  %vm4953_vm12 = vcmp.lt.s32.totalorder %v10486_v6, 2 }
 0xd60   :  { %v10512_v43 = vsel %vm4797_vm4, nan, %v4806_v63  ;;  %v4634_v2 = vadd.f32 1.0, %v4633_v15  ;;  %v4169_v29 = vmul.f32 %v4168_v8, %v9998_v60  ;;  %vm4646_vm5 = vcmp.eq.s32.totalorder %v10490_v4, 0  ;;  %v5141_v47 = vld [vmem:[%s11147_s13 + $0x88] sm:$0xff] }
 0xd61   :  { %v5100_v31 = vmul.f32 %v5099_v14, %v5090_v28  ;;  %v5093_v54 = vmul.f32 %v5092_v32, %v5090_v28  ;;  %v4324_v37 = vadd.f32 -0.4999988, %v4323_v41  ;;  %v4015_v12 = vmul.f32 %v4014_v24, %v9964_v61 }
 0xd62   :  { %vm5108_vm11 = vcmp.eq.s32.totalorder %v10501_v44, 0  ;;  %v4955_v23 = vxor.u32 2147483648, %v4950_v9  ;;  %v4480_v57 = vadd.f32 1.0, %v4479_v49  ;;  %v4319_v50 = vsel %vm10269_vm8, 0, %v10417_v21 }
 0xd63   :  { %v5101_v22 = vadd.f32 -0.16666654, %v5100_v31  ;;  %v5094_v35 = vadd.f32 -0.4999988, %v5093_v54  ;;  %vm5107_vm10 = vcmp.lt.s32.totalorder %v10501_v44, 2  ;;  %vm4951_vm9 = vweird.f32 %v10007_v33 }
 0xd64   :  { %v4490_v11 = vand.u32 3, %v4473_v27  ;;  %v4170_v7 = vadd.f32 -0.4999988, %v4169_v29  ;;  %vm5105_vm6 = vweird.f32 %v10130_v40  ;;  %vm5111_vm4 = vcmp.eq.s32.totalorder %v10501_v44, 2 }
 0xd65   :  { %v5102_v17 = vmul.f32 %v5101_v22, %v5090_v28  ;;  %v5095_v59 = vmul.f32 %v5094_v35, %v5090_v28  ;;  %v4958_v45 = vxor.u32 2147483648, %v4942_v36  ;;  %v4650_v0 = vxor.u32 2147483648, %v4634_v2 }
 0xd66   :  { %v4165_v56 = vsel %vm9956_vm7, 0, %v10404_v16  ;;  %vm4645_vm8 = vcmp.lt.s32.totalorder %v10490_v4, 2  ;;  %v4325_v28 = vmul.f32 %v4324_v37, %v10330_v51  ;;  %v4016_v48 = vadd.f32 -0.4999988, %v4015_v12 }
 0xd67   :  { %v5103_v3 = vadd.f32 1.0, %v5102_v17  ;;  %v5096_v21 = vadd.f32 1.0, %v5095_v59  ;;  %v4956_v15 = vsel %vm4954_vm1, %v4942_v36, %v4955_v23  ;;  %v4647_v52 = vxor.u32 2147483648, %v10469_v53 }
 0xd68   :  { %v4336_v58 = vand.u32 3, %v4319_v50  ;;  %v4011_v18 = vsel %vm9887_vm14, 0, %v10399_v46  ;;  %vm4491_vm7 = vcmp.lt.s32.totalorder %v4490_v11, 2  ;;  %v4171_v49 = vmul.f32 %v4170_v7, %v9998_v60 }
 0xd69   :  { %v5104_v1 = vmul.f32 %v5103_v3, %v10482_v38  ;;  %v5112_v16 = vxor.u32 2147483648, %v5096_v21  ;;  %v4959_v51 = vsel %vm4957_vm0, %v4958_v45, %v4950_v9  ;;  %vm4643_vm3 = vweird.f32 %v9757_v5  ;;  %v5159_v3 = vld [vmem:[%s11147_s13 + $0x118] sm:$0xff] }
 0xd6a   :  { %v4651_v10 = vsel %vm4649_vm2, %v4650_v0, %v10469_v53  ;;  %vm4492_vm15 = vcmp.eq.s32.totalorder %v4490_v11, 0  ;;  %v4493_v34 = vxor.u32 2147483648, %v10452_v62  ;;  %v4960_v46 = vsel %vm4953_vm12, %v4956_v15, %v4959_v51  ;;  %v5160_v15 = vld [vmem:[%s11147_s13 + $0x120] sm:$0xff]  ;;  %v5162_v51 = vld [vmem:[%s11147_s13 + $0x130] sm:$0xff] }
 0xd6b   :  { %v5109_v14 = vxor.u32 2147483648, %v5104_v1  ;;  %v4326_v38 = vadd.f32 1.0, %v4325_v28  ;;  %v4017_v32 = vmul.f32 %v4016_v48, %v9964_v61  ;;  %v4648_v60 = vsel %vm4646_vm5, %v4634_v2, %v4647_v52  ;;  %v5125_v28 = vld [vmem:[%s11147_s13 + $0x8] sm:$0xff]  ;;  %v5140_v48 = vld [vmem:[%s11147_s13 + $0x80] sm:$0xff]  ;;  %v5175_v52 = vld [vmem:[%s11147_s13 + $0x198] sm:$0xff] }
 0xd6c   :  { %vm4489_vm14 = vweird.f32 %v9618_v20  ;;  %vm4495_vm13 = vcmp.eq.s32.totalorder %v4490_v11, 2  ;;  %v4496_v63 = vxor.u32 2147483648, %v4480_v57  ;;  %vm4337_vm1 = vcmp.lt.s32.totalorder %v4336_v58, 2 }
 0xd6d   :  { %v5110_v53 = vsel %vm5108_vm11, %v5096_v21, %v5109_v14  ;;  %v5113_v13 = vsel %vm5111_vm4, %v5112_v16, %v5104_v1  ;;  %v4339_v6 = vxor.u32 2147483648, %v10444_v39  ;;  %v4172_v9 = vadd.f32 1.0, %v4171_v49  ;;  %v5174_v21 = vld [vmem:[%s11147_s13 + $0x190] sm:$0xff]  ;;  %v5176_v1 = vld [vmem:[%s11147_s13 + $0x1a0] sm:$0xff]  ;;  %v5127_v16 = vld [vmem:[%s11147_s13 + $0x18] sm:$0xff] }
 0xd6e   :  { %v5114_v61 = vsel %vm5107_vm10, %v5110_v53, %v5113_v13  ;;  %v4961_v41 = vsel %vm4951_vm9, nan, %v4960_v46  ;;  %v4494_v8 = vsel %vm4492_vm15, %v4480_v57, %v4493_v34  ;;  %v4182_v31 = vand.u32 3, %v4165_v56  ;;  %v5124_v56 = vld [vmem:[%s11147_s13] sm:$0xff]  ;;  %v5142_v49 = vld [vmem:[%s11147_s13 + $0x90] sm:$0xff]  ;;  %v5143_v14 = vld [vmem:[%s11147_s13 + $0x98] sm:$0xff] }
 0xd6f   :  { %v5115_v54 = vsel %vm5105_vm6, nan, %v5114_v61  ;;  %v4342_v27 = vxor.u32 2147483648, %v4326_v38  ;;  %v4185_v24 = vxor.u32 2147483648, %v10412_v25  ;;  %v4018_v36 = vadd.f32 1.0, %v4017_v32  ;;  %v5128_v34 = vld [vmem:[%s11147_s13 + $0x20] sm:$0xff]  ;;  %v5163_v46 = vld [vmem:[%s11147_s13 + $0x138] sm:$0xff] }
 0xd70   :  { %v5123_v2 = vmul.f32 1.0049876, %v5115_v54  ;;  %v4652_v29 = vsel %vm4645_vm8, %v4648_v60, %v4651_v10  ;;  %vm4338_vm0 = vcmp.eq.s32.totalorder %v4336_v58, 0  ;;  %v4028_v44 = vand.u32 3, %v4011_v18  ;;  %v5161_v18 = vld [vmem:[%s11147_s13 + $0x128] sm:$0xff]  ;;  %v5144_v60 = vld [vmem:[%s11147_s13 + $0xa0] sm:$0xff]  ;;  %v10702_v54 = vpop.permute.xlu0 %5264 }
 0xd71   :  { %v4497_v33 = vsel %vm4495_vm13, %v4496_v63, %v10452_v62  ;;  %v4340_v22 = vsel %vm4338_vm0, %v4326_v38, %v4339_v6  ;;  %v4188_v35 = vxor.u32 2147483648, %v4172_v9  ;;  %v4031_v37 = vxor.u32 2147483648, %v10408_v19  ;;  %v5177_v10 = vld [vmem:[%s11147_s13 + $0x1a8] sm:$0xff]  ;;  %v5178_v38 = vld [vmem:[%s11147_s13 + $0x1b0] sm:$0xff]  ;;  %v5164_v63 = vld [vmem:[%s11147_s13 + $0x140] sm:$0xff]  ;;  %11271 = vst [vmem:[#allocation3_spill] sm:$0xff] %v10702_v54 }
 0xd72   :  { %5772 = vmatpush.msra.mxu0 %v5123_v2  ;;  %7623 = vmatpush.msrb.mxu1 %v5123_v2  ;;  %v5122_v40 = vmul.f32 1.0049876, %v4961_v41  ;;  %v4498_v12 = vsel %vm4491_vm7, %v4494_v8, %v4497_v33  ;;  %vm4341_vm2 = vcmp.eq.s32.totalorder %v4336_v58, 2  ;;  %vm4184_vm12 = vcmp.eq.s32.totalorder %v4182_v31, 0  ;;  %v5126_v58 = vld [vmem:[%s11147_s13 + $0x10] sm:$0xff]  ;;  %v5129_v32 = vld [vmem:[%s11147_s13 + $0x28] sm:$0xff]  ;;  %v10694_v41 = vpop.permute.xlu1 %5254 }
 0xd73   :  { %7624 = vmatpush.msra.mxu2 %v5123_v2  ;;  %7625 = vmatpush.msrb.mxu3 %v5123_v2  ;;  %v4653_v4 = vsel %vm4643_vm3, nan, %v4652_v29  ;;  %v4343_v23 = vsel %vm4341_vm2, %v4342_v27, %v10444_v39  ;;  %v4186_v57 = vsel %vm4184_vm12, %v4172_v9, %v4185_v24  ;;  %v4034_v62 = vxor.u32 2147483648, %v4018_v36  ;;  %v5179_v53 = vld [vmem:[%s11147_s13 + $0x1b8] sm:$0xff]  ;;  %v5130_v13 = vld [vmem:[%s11147_s13 + $0x30] sm:$0xff]  ;;  %v5145_v6 = vld [vmem:[%s11147_s13 + $0xa8] sm:$0xff]  ;;  %11270 = vst [vmem:[#allocation2_spill] sm:$0xff] %v10694_v41 }
 0xd74   :  { %5773 = vmatpush.msra.mxu0 %v5122_v40  ;;  %7626 = vmatpush.msrb.mxu1 %v5122_v40  ;;  %v5121_v50 = vmul.f32 1.0049876, %v10512_v43  ;;  %v4344_v17 = vsel %vm4337_vm1, %v4340_v22, %v4343_v23  ;;  %vm4187_vm5 = vcmp.eq.s32.totalorder %v4182_v31, 2  ;;  %vm4030_vm11 = vcmp.eq.s32.totalorder %v4028_v44, 0  ;;  %v5165_v9 = vld [vmem:[%s11147_s13 + $0x148] sm:$0xff]  ;;  %v5180_v61 = vld [vmem:[%s11147_s13 + $0x1c0] sm:$0xff]  ;;  %v10728_v22 = vpop.permute.xlu2 %5259 }
 0xd75   :  { %7627 = vmatpush.msra.mxu2 %v5122_v40  ;;  %7628 = vmatpush.msrb.mxu3 %v5122_v40  ;;  %v4499_v59 = vsel %vm4489_vm14, nan, %v4498_v12  ;;  %vm4183_vm10 = vcmp.lt.s32.totalorder %v4182_v31, 2  ;;  %v4189_v5 = vsel %vm4187_vm5, %v4188_v35, %v10412_v25  ;;  %v4032_v11 = vsel %vm4030_vm11, %v4018_v36, %v4031_v37  ;;  %v5131_v8 = vld [vmem:[%s11147_s13 + $0x38] sm:$0xff]  ;;  %v5146_v31 = vld [vmem:[%s11147_s13 + $0xb0] sm:$0xff]  ;;  %v5181_v24 = vld [vmem:[%s11147_s13 + $0x1c8] sm:$0xff]  ;;  %11276 = vst [vmem:[#allocation6_spill] sm:$0xff] %v10728_v22 }
 0xd76   :  { %5774 = vmatpush.msra.mxu0 %v5121_v50  ;;  %7629 = vmatpush.msrb.mxu1 %v5121_v50  ;;  %v5120_v39 = vmul.f32 1.0049876, %v4653_v4  ;;  %vm4335_vm9 = vweird.f32 %v9534_v55  ;;  %v4190_v7 = vsel %vm4183_vm10, %v4186_v57, %v4189_v5  ;;  %vm4033_vm6 = vcmp.eq.s32.totalorder %v4028_v44, 2  ;;  %v5166_v27 = vld [vmem:[%s11147_s13 + $0x150] sm:$0xff]  ;;  %v5132_v2 = vld [vmem:[%s11147_s13 + $0x40] sm:$0xff]  ;;  %v5147_v29 = vld [vmem:[%s11147_s13 + $0xb8] sm:$0xff] }
 0xd77   :  { %7630 = vmatpush.msra.mxu2 %v5121_v50  ;;  %7631 = vmatpush.msrb.mxu3 %v5121_v50  ;;  %v4345_v43 = vsel %vm4335_vm9, nan, %v4344_v17  ;;  %vm4029_vm4 = vcmp.lt.s32.totalorder %v4028_v44, 2  ;;  %v4035_v45 = vsel %vm4033_vm6, %v4034_v62, %v10408_v19  ;;  %v5119_v20 = vmul.f32 1.0049876, %v4499_v59  ;;  %v5167_v44 = vld [vmem:[%s11147_s13 + $0x158] sm:$0xff]  ;;  %v5182_v33 = vld [vmem:[%s11147_s13 + $0x1d0] sm:$0xff] }
 0xd78   :  { %5775 = vmatpush.msra.mxu0 %v5120_v39  ;;  %7632 = vmatpush.msrb.mxu1 %v5120_v39  ;;  %vm4181_vm8 = vweird.f32 %v11229_v26  ;;  %v4036_v25 = vsel %vm4029_vm4, %v4032_v11, %v4035_v45  ;;  %v5118_v55 = vmul.f32 1.0049876, %v4345_v43  ;;  %vm4027_vm7 = vweird.f32 %v11228_v30  ;;  %v5139_v30 = vld [vmem:[%s11147_s13 + $0x78] sm:$0xff]  ;;  %v10730_v35 = vpop.permute.xlu0 %5279  ;;  %v5133_v37 = vld [vmem:[%s11147_s13 + $0x48] sm:$0xff]  ;;  %v5148_v40 = vld [vmem:[%s11147_s13 + $0xc0] sm:$0xff] }
 0xd79   :  { %7633 = vmatpush.msra.mxu2 %v5120_v39  ;;  %7634 = vmatpush.msrb.mxu3 %v5120_v39  ;;  %v4191_v0 = vsel %vm4181_vm8, nan, %v4190_v7  ;;  %v4037_v42 = vsel %vm4027_vm7, nan, %v4036_v25  ;;  %vm11243_vm3 = vcmask 523264   ;;  %v5168_v12 = vld [vmem:[%s11147_s13 + $0x160] sm:$0xff]  ;;  %v5183_v4 = vld [vmem:[%s11147_s13 + $0x1d8] sm:$0xff]  ;;  %v5134_v50 = vld [vmem:[%s11147_s13 + $0x50] sm:$0xff] }
 0xd7a   :  { %5776 = vmatpush.msra.mxu0 %v5119_v20  ;;  %7635 = vmatpush.msrb.mxu1 %v5119_v20  ;;  %v5117_v19 = vmul.f32 1.0049876, %v4191_v0  ;;  %v5116_v26 = vmul.f32 1.0049876, %v4037_v42  ;;  %vm11244_vm15 = vmmov %vm11243_vm3  ;;  %v10714_v36 = vpop.permute.xlu1 %5269  ;;  %v5149_v17 = vld [vmem:[%s11147_s13 + $0xc8] sm:$0xff]  ;;  %v5184_v5 = vld [vmem:[%s11147_s13 + $0x1e0] sm:$0xff] }
 0xd7b   :  { %7636 = vmatpush.msra.mxu2 %v5119_v20  ;;  %7637 = vmatpush.msrb.mxu3 %v5119_v20  ;;  %vm11245_vm14 = vmmov %vm11243_vm3  ;;  %v5169_v59 = vld [vmem:[%s11147_s13 + $0x168] sm:$0xff]  ;;  %v5135_v43 = vld [vmem:[%s11147_s13 + $0x58] sm:$0xff] }
 0xd7c   :  { %5777 = vmatpush.msra.mxu0 %v5118_v55  ;;  %7638 = vmatpush.msrb.mxu1 %v5118_v55  ;;  %vm11246_vm13 = vmmov %vm11243_vm3  ;;  %v10754_v57 = vpop.permute.xlu2 %5274  ;;  %v5150_v45 = vld [vmem:[%s11147_s13 + $0xd0] sm:$0xff]  ;;  %v5185_v25 = vld [vmem:[%s11147_s13 + $0x1e8] sm:$0xff] }
 0xd7d   :  { %7639 = vmatpush.msra.mxu2 %v5118_v55  ;;  %7640 = vmatpush.msrb.mxu3 %v5118_v55  ;;  %vm11247_vm1 = vmmov %vm11243_vm3  ;;  %v5170_v20 = vld [vmem:[%s11147_s13 + $0x170] sm:$0xff]  ;;  %v5136_v55 = vld [vmem:[%s11147_s13 + $0x60] sm:$0xff] }
 0xd7e   :  { %5778 = vmatpush.msra.mxu0 %v5117_v19  ;;  %7641 = vmatpush.msrb.mxu1 %v5117_v19  ;;  %vm11248_vm0 = vmmov %vm11247_vm1  ;;  %v5151_v42 = vld [vmem:[%s11147_s13 + $0xd8] sm:$0xff] }
 0xd7f   :  { %7642 = vmatpush.msra.mxu2 %v5117_v19  ;;  %7643 = vmatpush.msrb.mxu3 %v5117_v19  ;;  %vm11249_vm2 = vmmov %vm11248_vm0 }
 0xd80   :  { %5779 = vmatpush.msra.mxu0 %v5116_v26  ;;  %7644 = vmatpush.msrb.mxu1 %v5116_v26  ;;  %vm11250_vm12 = vmmov %vm11248_vm0  ;;  %v10756_v62 = vpop.permute.xlu0 %5294 }
 0xd81   :  { %7645 = vmatpush.msra.mxu2 %v5116_v26  ;;  %7646 = vmatpush.msrb.mxu3 %v5116_v26  ;;  %vm11251_vm5 = vmmov %vm11248_vm0 }
 0xd82   :  { %7378 = vmatmul.msk.f32.vlgmr.msra.gmra.mxu0 %vm11243_vm3, %v5124_v56  ;;  %7393 = vmatmul.msk.f32.vlgmr.msrb.gmra.mxu1 %vm11244_vm15, %v5139_v30  ;;  %vm11252_vm11 = vmmov %vm11248_vm0  ;;  %v10748_v23 = vpop.permute.xlu1 %5284  ;;  %v5171_v56 = vld [vmem:[%s11147_s13 + $0x178] sm:$0xff]  ;;  %v5186_v30 = vld [vmem:[%s11147_s13 + $0x1f0] sm:$0xff] }
 0xd83   :  { %7413 = vmatmul.msk.f32.vlgmr.msra.gmra.mxu2 %vm11245_vm14, %v5159_v3  ;;  %7428 = vmatmul.msk.f32.vlgmr.msrb.gmra.mxu3 %vm11246_vm13, %v5174_v21  ;;  %vm11253_vm10 = vmmov %vm11248_vm0  ;;  %v5137_v21 = vld [vmem:[%s11147_s13 + $0x68] sm:$0xff] }
 0xd84   :  { %vm11254_vm9 = vmmov %vm11248_vm0  ;;  %v10776_v39 = vpop.permute.xlu2 %5289 }
 0xd85   :  { %vm11255_vm6 = vmmov %vm11248_vm0 }
 0xd86   :  { %vm11256_vm4 = vmmov %vm11248_vm0 }
 0xd87   :  { %vm11257_vm8 = vmmov %vm11248_vm0 }
 0xd88   :  { %vm11258_vm7 = vmmov %vm11248_vm0  ;;  %v10778_v7 = vpop.permute.xlu0 %5309 }
 0xd89   :  { %vm11259_vm3 = vmmov %vm11248_vm0 }
 0xd8a   :  { %7379 = vmatmul.msk.f32.gmra.mxu0 %vm11247_vm1, %v5125_v28  ;;  %7394 = vmatmul.msk.f32.gmra.mxu1 %vm11248_vm0, %v5140_v48  ;;  %vm11260_vm15 = vmmov %vm11248_vm0  ;;  %v10772_v11 = vpop.permute.xlu1 %5299  ;;  %v5152_v28 = vld [vmem:[%s11147_s13 + $0xe0] sm:$0xff] }
 0xd8b   :  { %7414 = vmatmul.msk.f32.gmra.mxu2 %vm11249_vm2, %v5160_v15  ;;  %7429 = vmatmul.msk.f32.gmra.mxu3 %vm11250_vm12, %v5175_v52  ;;  %vm11261_vm14 = vmmov %vm11248_vm0  ;;  %v5172_v48 = vld [vmem:[%s11147_s13 + $0x180] sm:$0xff]  ;;  %v5187_v15 = vld [vmem:[%s11147_s13 + $0x1f8] sm:$0xff] }
 0xd8c   :  { %vm11262_vm13 = vmmov %vm11248_vm0  ;;  %v10804_v19 = vpop.permute.xlu2 %5304 }
 0xd8d   :  { %vm11263_vm1 = vmmov %vm11248_vm0 }
 0xd8e   :  { %vm11264_vm2 = vmmov %vm11248_vm0 }
 0xd8f   :  { %vm11265_vm12 = vmmov %vm11248_vm0 }
 0xd90   :  { %v10806_v26 = vpop.permute.xlu0 %5324 }
 0xd92   :  { %7380 = vmatmul.msk.f32.gmra.mxu0 %vm11251_vm5, %v5126_v58  ;;  %7395 = vmatmul.msk.f32.gmra.mxu1 %vm11252_vm11, %v5141_v47  ;;  %vm11266_vm5 = vmmov %vm11248_vm0  ;;  %v10796_v0 = vpop.permute.xlu1 %5314  ;;  %v5138_v47 = vld [vmem:[%s11147_s13 + $0x70] sm:$0xff] }
 0xd93   :  { %7415 = vmatmul.msk.f32.gmra.mxu2 %vm11253_vm10, %v5161_v18  ;;  %7430 = vmatmul.msk.f32.gmra.mxu3 %vm11254_vm9, %v5176_v1  ;;  %vm11267_vm11 = vmmov %vm11248_vm0  ;;  %v5153_v18 = vld [vmem:[%s11147_s13 + $0xe8] sm:$0xff] }
 0xd94   :  { %vm11268_vm10 = vmmov %vm11248_vm0  ;;  %v10830_v52 = vpop.permute.xlu2 %5319  ;;  %v5173_v1 = vld [vmem:[%s11147_s13 + $0x188] sm:$0xff] }
 0xd95   :  { %vm11269_vm9 = vmmov %vm11248_vm0 }
 0xd98   :  { %v10832_v58 = vpop.permute.xlu0 %5339 }
 0xd99   :  { %11296 = vst [vmem:[#allocation8_spill] sm:$0xff] %v10832_v58 }
 0xd9a   :  { %7381 = vmatmul.msk.f32.gmra.mxu0 %vm11255_vm6, %v5127_v16  ;;  %7396 = vmatmul.msk.f32.gmra.mxu1 %vm11256_vm4, %v5142_v49  ;;  %vm11272_vm6 = vmmov %vm11248_vm0  ;;  %v5330_v3 = vpop.permute.xlu1 %5329 }
 0xd9b   :  { %7416 = vmatmul.msk.f32.gmra.mxu2 %vm11257_vm8, %v5162_v51  ;;  %7431 = vmatmul.msk.f32.gmra.mxu3 %vm11258_vm7, %v5177_v10  ;;  %vm11273_vm4 = vmmov %vm11248_vm0  ;;  %v5154_v10 = vld [vmem:[%s11147_s13 + $0xf0] sm:$0xff] }
 0xd9c   :  { %vm11274_vm8 = vmmov %vm11248_vm0  ;;  %v10852_v49 = vpop.permute.xlu2 %5334 }
 0xd9d   :  { %vm11275_vm7 = vmmov %vm11248_vm0  ;;  %11304 = vst [vmem:[#allocation10_spill] sm:$0xff] %v10852_v49 }
 0xda0   :  { %v10854_v51 = vpop.permute.xlu0 %5354 }
 0xda1   :  { %11305 = vst [vmem:[#allocation9_spill] sm:$0xff] %v10854_v51 }
 0xda2   :  { %7382 = vmatmul.msk.f32.gmra.mxu0 %vm11259_vm3, %v5128_v34  ;;  %7397 = vmatmul.msk.f32.gmra.mxu1 %vm11260_vm15, %v5143_v14  ;;  %vm11277_vm3 = vmmov %vm11248_vm0  ;;  %v10847_v16 = vpop.permute.xlu1 %5344 }
 0xda3   :  { %7417 = vmatmul.msk.f32.gmra.mxu2 %vm11261_vm14, %v5163_v46  ;;  %7432 = vmatmul.msk.f32.gmra.mxu3 %vm11262_vm13, %v5178_v38  ;;  %vm11278_vm15 = vmmov %vm11248_vm0  ;;  %11300 = vst [vmem:[#allocation4_spill] sm:$0xff] %v10847_v16 }
 0xda4   :  { %vm11279_vm14 = vmmov %vm11248_vm0  ;;  %v10862_v14 = vpop.permute.xlu2 %5349 }
 0xda5   :  { %vm11280_vm13 = vmmov %vm11248_vm0  ;;  %11308 = vst [vmem:[#allocation5_spill] sm:$0xff] %v10862_v14 }
 0xda8   :  { %v10864_v46 = vpop.permute.xlu0 %5369 }
 0xda9   :  { %11309 = vst [vmem:[#allocation11_spill] sm:$0xff] %v10864_v46 }
 0xdaa   :  { %7383 = vmatmul.msk.f32.gmra.mxu0 %vm11263_vm1, %v5129_v32  ;;  %7398 = vmatmul.msk.f32.gmra.mxu1 %vm11248_vm0, %v5144_v60  ;;  %vm11281_vm1 = vmmov %vm11248_vm0  ;;  %v10860_v34 = vpop.permute.xlu1 %5359  ;;  %v5155_v60 = vld [vmem:[%s11147_s13 + $0xf8] sm:$0xff] }
 0xdab   :  { %7418 = vmatmul.msk.f32.gmra.mxu2 %vm11264_vm2, %v5164_v63  ;;  %7433 = vmatmul.msk.f32.gmra.mxu3 %vm11265_vm12, %v5179_v53  ;;  %vm11282_vm2 = vmmov %vm11248_vm0  ;;  %11307 = vst [vmem:[#allocation7_spill] sm:$0xff] %v10860_v34 }
 0xdac   :  { %vm11283_vm12 = vmmov %vm11248_vm0 }
 0xdb2   :  { %7384 = vmatmul.msk.f32.gmra.mxu0 %vm11266_vm5, %v5130_v13  ;;  %7399 = vmatmul.msk.f32.gmra.mxu1 %vm11267_vm11, %v5145_v6  ;;  %vm11284_vm5 = vmmov %vm11248_vm0  ;;  %v10872_v13 = vpop.permute.xlu1 %5374 }
 0xdb3   :  { %7419 = vmatmul.msk.f32.gmra.mxu2 %vm11268_vm10, %v5165_v9  ;;  %7434 = vmatmul.msk.f32.gmra.mxu3 %vm11269_vm9, %v5180_v61  ;;  %vm11285_vm11 = vmmov %vm11248_vm0  ;;  %11312 = vst [vmem:[#allocation13_spill] sm:$0xff] %v10872_v13 }
 0xdb4   :  { %vm11286_vm10 = vmmov %vm11248_vm0 }
 0xdb5   :  { %vm11287_vm9 = vmmov %vm11248_vm0 }
 0xdba   :  { %7385 = vmatmul.msk.f32.gmra.mxu0 %vm11272_vm6, %v5131_v8  ;;  %7400 = vmatmul.msk.f32.gmra.mxu1 %vm11273_vm4, %v5146_v31  ;;  %vm11288_vm6 = vmmov %vm11248_vm0  ;;  %v5156_v31 = vld [vmem:[%s11147_s13 + $0x100] sm:$0xff] }
 0xdbb   :  { %7420 = vmatmul.msk.f32.gmra.mxu2 %vm11274_vm8, %v5166_v27  ;;  %7435 = vmatmul.msk.f32.gmra.mxu3 %vm11275_vm7, %v5181_v24  ;;  %vm11289_vm4 = vmmov %vm11248_vm0  ;;  %v10885_v27 = vpop.permute.xlu2 %5364  ;;  %v10887_v24 = vpop.permute.xlu0 %5384 }
 0xdbc   :  { %vm11290_vm8 = vmmov %vm11248_vm0  ;;  %11317 = vst [vmem:[#allocation18_spill] sm:$0xff] %v10885_v27 }
 0xdbd   :  { %vm11291_vm7 = vmmov %vm11248_vm0  ;;  %11318 = vst [vmem:[#allocation19_spill] sm:$0xff] %v10887_v24 }
 0xdc2   :  { %7386 = vmatmul.msk.f32.gmra.mxu0 %vm11277_vm3, %v5132_v2  ;;  %7401 = vmatmul.msk.f32.gmra.mxu1 %vm11278_vm15, %v5147_v29  ;;  %vm11292_vm3 = vmmov %vm11248_vm0 }
 0xdc3   :  { %7421 = vmatmul.msk.f32.gmra.mxu2 %vm11279_vm14, %v5167_v44  ;;  %7436 = vmatmul.msk.f32.gmra.mxu3 %vm11280_vm13, %v5182_v33  ;;  %vm11293_vm15 = vmmov %vm11248_vm0 }
 0xdc4   :  { %vm11294_vm14 = vmmov %vm11248_vm0 }
 0xdc5   :  { %vm11295_vm13 = vmmov %vm11248_vm0 }
 0xdca   :  { %7387 = vmatmul.msk.f32.gmra.mxu0 %vm11281_vm1, %v5133_v37  ;;  %7402 = vmatmul.msk.f32.gmra.mxu1 %vm11248_vm0, %v5148_v40  ;;  %vm11297_vm1 = vmmov %vm11248_vm0  ;;  %v5157_v37 = vld [vmem:[%s11147_s13 + $0x108] sm:$0xff]  ;;  %v10901_v40 = vpop.permute.xlu1 %5389 }
 0xdcb   :  { %7422 = vmatmul.msk.f32.gmra.mxu2 %vm11282_vm2, %v5168_v12  ;;  %7437 = vmatmul.msk.f32.gmra.mxu3 %vm11283_vm12, %v5183_v4  ;;  %vm11298_vm2 = vmmov %vm11248_vm0  ;;  %11324 = vst [vmem:[#allocation24_spill] sm:$0xff] %v10901_v40  ;;  %v10904_v12 = vpop.permute.xlu2 %5379  ;;  %v10906_v4 = vpop.permute.xlu0 %5399 }
 0xdcc   :  { %vm11299_vm12 = vmmov %vm11248_vm0  ;;  %11326 = vst [vmem:[#allocation25_spill] sm:$0xff] %v10904_v12 }
 0xdd2   :  { %7388 = vmatmul.msk.f32.gmra.mxu0 %vm11284_vm5, %v5134_v50  ;;  %7403 = vmatmul.msk.f32.gmra.mxu1 %vm11285_vm11, %v5149_v17  ;;  %vm11301_vm5 = vmmov %vm11248_vm0 }
 0xdd3   :  { %7423 = vmatmul.msk.f32.gmra.mxu2 %vm11286_vm10, %v5169_v59  ;;  %7438 = vmatmul.msk.f32.gmra.mxu3 %vm11287_vm9, %v5184_v5  ;;  %vm11302_vm11 = vmmov %vm11248_vm0 }
 0xdd4   :  { %vm11303_vm10 = vmmov %vm11248_vm0 }
 0xdd5   :  { %vm11306_vm9 = vmmov %vm11248_vm0 }
 0xdda   :  { %7389 = vmatmul.msk.f32.gmra.mxu0 %vm11288_vm6, %v5135_v43  ;;  %7404 = vmatmul.msk.f32.gmra.mxu1 %vm11289_vm4, %v5150_v45  ;;  %vm11311_vm6 = vmmov %vm11248_vm0  ;;  %v5158_v43 = vld [vmem:[%s11147_s13 + $0x110] sm:$0xff]  ;;  %v10920_v45 = vpop.permute.xlu1 %5489 }
 0xddb   :  { %7424 = vmatmul.msk.f32.gmra.mxu2 %vm11290_vm8, %v5170_v20  ;;  %7439 = vmatmul.msk.f32.gmra.mxu3 %vm11291_vm7, %v5185_v25  ;;  %vm11319_vm4 = vmmov %vm11248_vm0  ;;  %11330 = vst [vmem:[#allocation28_spill] sm:$0xff] %v10920_v45  ;;  %v10922_v20 = vpop.permute.xlu2 %5394  ;;  %v10924_v25 = vpop.permute.xlu0 %5569 }
 0xddc   :  { %vm11325_vm8 = vmmov %vm11248_vm0 }
 0xddd   :  { %vm11329_vm7 = vmmov %vm11248_vm0 }
 0xde2   :  { %7390 = vmatmul.msk.f32.gmra.mxu0 %vm11292_vm3, %v5136_v55  ;;  %7405 = vmatmul.msk.f32.gmra.mxu1 %vm11293_vm15, %v5151_v42  ;;  %vm6127_vm3 = vcmask 12288  }
 0xde3   :  { %7425 = vmatmul.msk.f32.gmra.mxu2 %vm11294_vm14, %v5171_v56  ;;  %7440 = vmatmul.msk.f32.gmra.mxu3 %vm11295_vm13, %v5186_v30 }
 0xdea   :  { %7391 = vmatmul.msk.f32.gmra.mxu0 %vm11297_vm1, %v5137_v21  ;;  %7406 = vmatmul.msk.f32.gmra.mxu1 %vm11248_vm0, %v5152_v28 }
 0xdeb   :  { %7426 = vmatmul.msk.f32.gmra.mxu2 %vm11298_vm2, %v5172_v48  ;;  %7441 = vmatmul.msk.f32.gmra.mxu3 %vm11299_vm12, %v5187_v15 }
 0xdf2   :  { %7392 = vmatmul.msk.f32.gmra.mxu0 %vm11301_vm5, %v5138_v47  ;;  %7407 = vmatmul.msk.f32.gmra.mxu1 %vm11302_vm11, %v5153_v18  ;;  %v10944_v47 = vpop.permute.xlu2 %5484  ;;  %v5565_v18 = vpop.permute.xlu0 %5564 }
 0xdf3   :  { %7427 = vmatmul.msk.f32.gmra.mxu2 %vm11303_vm10, %v5173_v1  ;;  %11335 = vst [vmem:[#allocation33_spill] sm:$0xff] %v10944_v47 }
 0xdfa   :  { %7408 = vmatmul.msk.f32.gmra.mxu1 %vm11306_vm9, %v5154_v10 }
 0xdff   :  { %v10866_v38 = vpop.f32.mrf.mxu0  ;;  %v5826_v32 = vpop.f32.mrf.mxu1 }
 0xe00   :  { %11310 = vst [vmem:[#allocation12_spill] sm:$0xff] %v10866_v38  ;;  %v5827_v63 = vadd.f32 %v5826_v32, %v5330_v3  ;;  %v10934_v3 = vpop.permute.xlu1 %5409 }
 0xe02   :  { %v5988_v53 = vmax.f32 %v5827_v63, 0.0  ;;  %7409 = vmatmul.msk.f32.gmra.mxu1 %vm11311_vm6, %v5155_v60 }
 0xe04   :  { %6047 = vmatpush.msrb.mxu2 %v5988_v53  ;;  %v10956_v53 = vpop.permute.xlu2 %5479 }
 0xe05   :  { %11338 = vst [vmem:[#allocation36_spill] sm:$0xff] %v10956_v53 }
 0xe06   :  { %v10874_v6 = vpop.f32.mrf.mxu2  ;;  %v10876_v9 = vpop.f32.mrf.mxu3 }
 0xe07   :  { %11313 = vst [vmem:[#allocation14_spill] sm:$0xff] %v10874_v6  ;;  %v10878_v61 = vpop.f32.mrf.mxu0  ;;  %v10880_v8 = vpop.f32.mrf.mxu1 }
 0xe08   :  { %11314 = vst [vmem:[#allocation15_spill] sm:$0xff] %v10876_v9  ;;  %v10954_v63 = vpop.permute.xlu1 %5404 }
 0xe09   :  { %11315 = vst [vmem:[#allocation16_spill] sm:$0xff] %v10878_v61 }
 0xe0a   :  { %11316 = vst [vmem:[#allocation17_spill] sm:$0xff] %v10880_v8  ;;  %7410 = vmatmul.msk.f32.gmra.mxu1 %vm11319_vm4, %v5156_v31  ;;  %v5560_v31 = vpop.permute.xlu0 %5559 }
 0xe0e   :  { %v10890_v2 = vpop.f32.mrf.mxu2  ;;  %v10892_v29 = vpop.f32.mrf.mxu3 }
 0xe0f   :  { %11320 = vst [vmem:[#allocation20_spill] sm:$0xff] %v10890_v2  ;;  %v10894_v44 = vpop.f32.mrf.mxu0  ;;  %v10896_v33 = vpop.f32.mrf.mxu1 }
 0xe10   :  { %11321 = vst [vmem:[#allocation21_spill] sm:$0xff] %v10892_v29 }
 0xe11   :  { %11322 = vst [vmem:[#allocation22_spill] sm:$0xff] %v10894_v44 }
 0xe12   :  { %11323 = vst [vmem:[#allocation23_spill] sm:$0xff] %v10896_v33  ;;  %7411 = vmatmul.msk.f32.gmra.mxu1 %vm11325_vm8, %v5157_v37 }
 0xe16   :  { %v10908_v50 = vpop.f32.mrf.mxu2  ;;  %v10910_v17 = vpop.f32.mrf.mxu3 }
 0xe17   :  { %11327 = vst [vmem:[#allocation26_spill] sm:$0xff] %v10908_v50  ;;  %v10912_v59 = vpop.f32.mrf.mxu0  ;;  %v10914_v5 = vpop.f32.mrf.mxu1 }
 0xe18   :  { %11328 = vst [vmem:[#allocation27_spill] sm:$0xff] %v10914_v5  ;;  %v10966_v50 = vpop.permute.xlu1 %5469 }
 0xe19   :  { %11341 = vst [vmem:[#allocation39_spill] sm:$0xff] %v10966_v50 }
 0xe1a   :  { %7412 = vmatmul.msk.f32.gmra.mxu1 %vm11329_vm7, %v5158_v43 }
 0xe1e   :  { %v10926_v55 = vpop.f32.mrf.mxu2  ;;  %v10928_v42 = vpop.f32.mrf.mxu3 }
 0xe1f   :  { %11331 = vst [vmem:[#allocation29_spill] sm:$0xff] %v10926_v55  ;;  %v10930_v56 = vpop.f32.mrf.mxu0  ;;  %v10932_v30 = vpop.f32.mrf.mxu1 }
 0xe20   :  { %11332 = vst [vmem:[#allocation30_spill] sm:$0xff] %v10932_v30  ;;  %v10968_v55 = vpop.permute.xlu2 %5474 }
 0xe21   :  { %11342 = vst [vmem:[#allocation40_spill] sm:$0xff] %v10968_v55 }
 0xe26   :  { %v10936_v21 = vpop.f32.mrf.mxu2  ;;  %v10938_v28 = vpop.f32.mrf.mxu3 }
 0xe27   :  { %11333 = vst [vmem:[#allocation31_spill] sm:$0xff] %v10936_v21  ;;  %v10940_v48 = vpop.f32.mrf.mxu0  ;;  %v10942_v15 = vpop.f32.mrf.mxu1 }
 0xe28   :  { %11334 = vst [vmem:[#allocation32_spill] sm:$0xff] %v10942_v15  ;;  %v5465_v21 = vpop.permute.xlu0 %5464  ;;  %v5555_v14 = vpop.permute.xlu2 %5554 }
 0xe2e   :  { %v10946_v1 = vpop.f32.mrf.mxu2  ;;  %v10948_v10 = vpop.f32.mrf.mxu3 }
 0xe2f   :  { %11336 = vst [vmem:[#allocation34_spill] sm:$0xff] %v10946_v1  ;;  %v10950_v32 = vpop.f32.mrf.mxu0  ;;  %v10952_v60 = vpop.f32.mrf.mxu1 }
 0xe30   :  { %11337 = vst [vmem:[#allocation35_spill] sm:$0xff] %v10952_v60  ;;  %v5545_v50 = vpop.permute.xlu0 %5544 }
 0xe36   :  { %v10958_v37 = vpop.f32.mrf.mxu2  ;;  %v10960_v43 = vpop.f32.mrf.mxu3 }
 0xe37   :  { %11339 = vst [vmem:[#allocation37_spill] sm:$0xff] %v10958_v37  ;;  %v10962_v6 = vpop.f32.mrf.mxu0  ;;  %v10964_v2 = vpop.f32.mrf.mxu1 }
 0xe38   :  { %11340 = vst [vmem:[#allocation38_spill] sm:$0xff] %v10964_v2  ;;  %v5550_v37 = vpop.permute.xlu1 %5549 }
 0xe3e   :  { %v5907_v8 = vpop.f32.mrf.mxu2  ;;  %v10970_v49 = vpop.f32.mrf.mxu3 }
 0xe3f   :  { %v10972_v1 = vadd.f32 %v5907_v8, %v5465_v21  ;;  %v10974_v33 = vpop.f32.mrf.mxu0  ;;  %v10976_v58 = vpop.f32.mrf.mxu1 }
 0xe40   :  { %11344 = vst [vmem:[#allocation42_spill] sm:$0xff] %v10976_v58  ;;  %v10982_v51 = vpop.permute.xlu1 %5454  ;;  %v10986_v8 = vpop.permute.xlu2 %5459 }
 0xe41   :  { %11343 = vst [vmem:[#allocation41_spill] sm:$0xff] %v10972_v1  ;;  %v10990_v1 = vpop.permute.xlu0 %5449 }
 0xe42   :  { %11347 = vst [vmem:[#allocation45_spill] sm:$0xff] %v10982_v51 }
 0xe43   :  { %11349 = vst [vmem:[#allocation47_spill] sm:$0xff] %v10986_v8 }
 0xe44   :  { %11351 = vst [vmem:[#allocation49_spill] sm:$0xff] %v10990_v1 }
 0xe46   :  { %v5955_v5 = vpop.f32.mrf.mxu3  ;;  %v10980_v15 = vpop.f32.mrf.mxu2 }
 0xe47   :  { %v5808_v16 = vpop.f32.mrf.mxu0  ;;  %v10978_v30 = vpop.f32.mrf.mxu1  ;;  %11346 = vst [vmem:[#allocation44_spill] sm:$0xff] %v10980_v15 }
 0xe48   :  { %11345 = vst [vmem:[#allocation43_spill] sm:$0xff] %v10978_v30  ;;  %v5535_v47 = vpop.permute.xlu1 %5534  ;;  %v5540_v58 = vpop.permute.xlu2 %5539 }
 0xe49   :  { %v5530_v30 = vpop.permute.xlu0 %5529 }
 0xe4e   :  { %v5958_v55 = vpop.f32.mrf.mxu3  ;;  %v10988_v21 = vpop.f32.mrf.mxu2 }
 0xe4f   :  { %v5811_v60 = vpop.f32.mrf.mxu0  ;;  %v10984_v34 = vpop.f32.mrf.mxu1  ;;  %11350 = vst [vmem:[#allocation48_spill] sm:$0xff] %v10988_v21 }
 0xe50   :  { %11348 = vst [vmem:[#allocation46_spill] sm:$0xff] %v10984_v34  ;;  %v10998_v13 = vpop.permute.xlu1 %5439  ;;  %v11000_v8 = vpop.permute.xlu2 %5444 }
 0xe51   :  { %11355 = vst [vmem:[#allocation53_spill] sm:$0xff] %v10998_v13  ;;  %v11006_v38 = vpop.permute.xlu0 %5434 }
 0xe52   :  { %11356 = vst [vmem:[#allocation54_spill] sm:$0xff] %v11000_v8 }
 0xe53   :  { %11359 = vst [vmem:[#allocation57_spill] sm:$0xff] %v11006_v38 }
 0xe56   :  { %v5961_v53 = vpop.f32.mrf.mxu3  ;;  %v10994_v15 = vpop.f32.mrf.mxu2 }
 0xe57   :  { %v5814_v2 = vpop.f32.mrf.mxu0  ;;  %v10992_v27 = vpop.f32.mrf.mxu1  ;;  %11353 = vst [vmem:[#allocation51_spill] sm:$0xff] %v10994_v15  ;;  %v5962_v54 = vadd.f32 %v5961_v53, %v5555_v14 }
 0xe58   :  { %11352 = vst [vmem:[#allocation50_spill] sm:$0xff] %v10992_v27  ;;  %v11008_v41 = vpop.permute.xlu1 %5519  ;;  %v5525_v13 = vpop.permute.xlu2 %5524 }
 0xe5e   :  { %v5964_v46 = vpop.f32.mrf.mxu3  ;;  %v11004_v12 = vpop.f32.mrf.mxu2 }
 0xe5f   :  { %v5817_v51 = vpop.f32.mrf.mxu0  ;;  %v10996_v45 = vpop.f32.mrf.mxu1  ;;  %11358 = vst [vmem:[#allocation56_spill] sm:$0xff] %v11004_v12 }
 0xe60   :  { %11354 = vst [vmem:[#allocation52_spill] sm:$0xff] %v10996_v45  ;;  %v5965_v45 = vadd.f32 %v5964_v46, %v5560_v31  ;;  %v5818_v12 = vadd.f32 %v5817_v51, %v10796_v0  ;;  %v5956_v0 = vadd.f32 %v5955_v5, %v5545_v50  ;;  %v6033_v51 = vmax.f32 %v5962_v54, 0.0  ;;  %v11364_v31 = vld [vmem:[#allocation24_spill] sm:$0xff] }
 0xe61   :  { %v5809_v46 = vadd.f32 %v5808_v16, %v10772_v11  ;;  %v5803_v11 = vadd.f32 %v10962_v6, %v10776_v39  ;;  %v5797_v50 = vadd.f32 %v10940_v48, %v10730_v35 }
 0xe62   :  { %v6031_v54 = vmax.f32 %v5956_v0, 0.0  ;;  %v11369_v0 = vld [vmem:[#allocation19_spill] sm:$0xff] }
 0xe63   :  { %v5982_v16 = vmax.f32 %v5809_v46, 0.0  ;;  %v5980_v5 = vmax.f32 %v5803_v11, 0.0  ;;  %v11373_v11 = vld [vmem:[#allocation25_spill] sm:$0xff] }
 0xe66   :  { %v5967_v21 = vpop.f32.mrf.mxu3  ;;  %v11016_v44 = vpop.f32.mrf.mxu2 }
 0xe67   :  { %v5820_v34 = vpop.f32.mrf.mxu0  ;;  %v11002_v1 = vpop.f32.mrf.mxu1  ;;  %v5968_v27 = vadd.f32 %v5967_v21, %v5565_v18  ;;  %v5959_v21 = vadd.f32 %v5958_v55, %v5550_v37  ;;  %v11365_v37 = vld [vmem:[#allocation52_spill] sm:$0xff] }
 0xe68   :  { %11357 = vst [vmem:[#allocation55_spill] sm:$0xff] %v11002_v1  ;;  %v5821_v8 = vadd.f32 %v5820_v34, %v10830_v52  ;;  %v5515_v18 = vpop.permute.xlu0 %5514  ;;  %v6034_v1 = vmax.f32 %v5965_v45, 0.0  ;;  %v11019_v52 = vpop.permute.xlu1 %5424  ;;  %v5985_v34 = vmax.f32 %v5818_v12, 0.0 }
 0xe69   :  { %v6035_v29 = vmax.f32 %v5968_v27, 0.0  ;;  %v5806_v27 = vadd.f32 %v10974_v33, %v10756_v62  ;;  %v5800_v62 = vadd.f32 %v10950_v32, %v10748_v23  ;;  %v5941_v23 = vadd.f32 %v10928_v42, %v11008_v41 }
 0xe6a   :  { %v5938_v35 = vadd.f32 %v10910_v17, %v5515_v18  ;;  %v5978_v41 = vmax.f32 %v5797_v50, 0.0 }
 0xe6b   :  { %v5981_v33 = vmax.f32 %v5806_v27, 0.0  ;;  %v11371_v27 = vld [vmem:[#allocation2_spill] sm:$0xff] }
 0xe6c   :  { %v6025_v18 = vmax.f32 %v5938_v35, 0.0 }
 0xe6e   :  { %v5970_v15 = vpop.f32.mrf.mxu3 }
 0xe6f   :  { %v5971_v24 = vadd.f32 %v5970_v15, %v10924_v25  ;;  %v5823_v61 = vpop.f32.mrf.mxu0  ;;  %v11011_v22 = vpop.f32.mrf.mxu1  ;;  %v5815_v25 = vadd.f32 %v5814_v2, %v10778_v7  ;;  %v5986_v15 = vmax.f32 %v5821_v8, 0.0  ;;  %v5953_v7 = vadd.f32 %v10970_v49, %v5540_v58  ;;  %v11360_v42 = vld [vmem:[#allocation55_spill] sm:$0xff] }
 0xe70   :  { %v5824_v9 = vadd.f32 %v5823_v61, %v10806_v26  ;;  %v5812_v26 = vadd.f32 %v5811_v60, %v10804_v19  ;;  %v11024_v61 = vpop.permute.xlu2 %5429  ;;  %v11031_v2 = vpop.f32.mrf.mxu2  ;;  %v5947_v58 = vadd.f32 %v10948_v10, %v5530_v30  ;;  %v5791_v10 = vadd.f32 %v10912_v59, %v10714_v36  ;;  %v11366_v59 = vld [vmem:[#allocation15_spill] sm:$0xff] }
 0xe71   :  { %v6036_v40 = vmax.f32 %v5971_v24, 0.0  ;;  %v5950_v24 = vadd.f32 %v10960_v43, %v5535_v47  ;;  %v6030_v49 = vmax.f32 %v5953_v7, 0.0  ;;  %v5505_v6 = vpop.permute.xlu1 %5504  ;;  %v5869_v47 = vadd.f32 %v11011_v22, %v10906_v4  ;;  %v11362_v4 = vld [vmem:[#allocation3_spill] sm:$0xff] }
 0xe72   :  { %v5987_v38 = vmax.f32 %v5824_v9, 0.0  ;;  %v5984_v9 = vmax.f32 %v5815_v25, 0.0  ;;  %v5983_v19 = vmax.f32 %v5812_v26, 0.0  ;;  %v6028_v30 = vmax.f32 %v5947_v58, 0.0 }
 0xe73   :  { %6107 = vmatpush.msra.mxu3 %v6036_v40  ;;  %v5944_v40 = vadd.f32 %v10938_v28, %v5525_v13  ;;  %v6029_v12 = vmax.f32 %v5950_v24, 0.0  ;;  %v5794_v13 = vadd.f32 %v10930_v56, %v10754_v57  ;;  %v5979_v28 = vmax.f32 %v5800_v62, 0.0  ;;  %v11361_v57 = vld [vmem:[#allocation21_spill] sm:$0xff] }
 0xe74   :  { %6048 = vmatpush.msrb.mxu2 %v5987_v38  ;;  %v6032_v38 = vmax.f32 %v5959_v21, 0.0  ;;  %v5866_v32 = vadd.f32 %v11360_v42, %v10922_v20  ;;  %v6026_v22 = vmax.f32 %v5941_v23, 0.0  ;;  %v5863_v43 = vadd.f32 %v11365_v37, %v11364_v31  ;;  %v11368_v21 = vld [vmem:[#allocation16_spill] sm:$0xff] }
 0xe75   :  { %6108 = vmatpush.msra.mxu3 %v6035_v29  ;;  %v11034_v29 = vpop.permute.xlu0 %5419  ;;  %v6027_v48 = vmax.f32 %v5944_v40, 0.0  ;;  %v5977_v53 = vmax.f32 %v5794_v13, 0.0  ;;  %v6002_v8 = vmax.f32 %v5869_v47, 0.0  ;;  %v5932_v20 = vadd.f32 %v11366_v59, %v5505_v6  ;;  %v11379_v13 = vld [vmem:[#allocation42_spill] sm:$0xff]  ;;  %v11388_v37 = vld [vmem:[#allocation40_spill] sm:$0xff]  ;;  %v11390_v59 = vld [vmem:[#allocation9_spill] sm:$0xff] }
 0xe76   :  { %6049 = vmatpush.msrb.mxu2 %v5986_v15  ;;  %v11367_v15 = vld [vmem:[#allocation6_spill] sm:$0xff]  ;;  %v6001_v46 = vmax.f32 %v5866_v32, 0.0 }
 0xe77   :  { %6109 = vmatpush.msra.mxu3 %v6034_v1  ;;  %v5871_v14 = vpop.f32.mrf.mxu1  ;;  %v5785_v26 = vadd.f32 %v11368_v21, %v11367_v15  ;;  %v6023_v62 = vmax.f32 %v5932_v20, 0.0  ;;  %v11391_v20 = vld [vmem:[#allocation32_spill] sm:$0xff]  ;;  %v11392_v15 = vld [vmem:[#allocation39_spill] sm:$0xff] }
 0xe78   :  { %6050 = vmatpush.msrb.mxu2 %v5985_v34  ;;  %v5872_v45 = vadd.f32 %v5871_v14, %v10954_v63  ;;  %v11363_v63 = vld [vmem:[#allocation22_spill] sm:$0xff]  ;;  %v5928_v36 = vpop.f32.mrf.mxu2  ;;  %v5976_v34 = vmax.f32 %v5791_v10, 0.0  ;;  %v11393_v21 = vld [vmem:[#allocation44_spill] sm:$0xff] }
 0xe79   :  { %6110 = vmatpush.msra.mxu3 %v6033_v51  ;;  %v5788_v17 = vadd.f32 %v11363_v63, %v11362_v4  ;;  %v11370_v51 = vld [vmem:[#allocation50_spill] sm:$0xff]  ;;  %v5974_v40 = vmax.f32 %v5785_v26, 0.0  ;;  %v6040_v4 = vld [vmem:[%s11148_s15 + $0x18] sm:$0x1f]  ;;  %v11386_v63 = vld [vmem:[#allocation7_spill] sm:$0xff]  ;;  %v5911_v26 = vadd.f32 %v11393_v21, %v11392_v15 }
 0xe7a   :  { %6051 = vmatpush.msrb.mxu2 %v5984_v9  ;;  %v6003_v60 = vmax.f32 %v5872_v45, 0.0  ;;  %v5860_v14 = vadd.f32 %v11370_v51, %v11369_v0  ;;  %v11382_v10 = vld [vmem:[#allocation18_spill] sm:$0xff]  ;;  %v11394_v0 = vld [vmem:[#allocation5_spill] sm:$0xff] }
 0xe7b   :  { %6111 = vmatpush.msra.mxu3 %v6032_v38  ;;  %v5495_v38 = vpop.permute.xlu1 %5494  ;;  %v11395_v51 = vld [vmem:[#allocation30_spill] sm:$0xff] }
 0xe7c   :  { %6052 = vmatpush.msrb.mxu2 %v5983_v19  ;;  %v11372_v19 = vld [vmem:[#allocation12_spill] sm:$0xff]  ;;  %v5999_v50 = vmax.f32 %v5860_v14, 0.0  ;;  %v5839_v14 = vadd.f32 %v11395_v51, %v11394_v0 }
 0xe7d   :  { %6112 = vmatpush.msra.mxu3 %v6031_v54  ;;  %v5500_v25 = vpop.permute.xlu0 %5499  ;;  %v5782_v24 = vadd.f32 %v11372_v19, %v11371_v27  ;;  %v5975_v54 = vmax.f32 %v5788_v17, 0.0  ;;  %v11387_v17 = vld [vmem:[#allocation35_spill] sm:$0xff] }
 0xe7e   :  { %6053 = vmatpush.msrb.mxu2 %v5982_v16  ;;  %v5929_v7 = vadd.f32 %v5928_v36, %v5500_v25  ;;  %v11374_v16 = vld [vmem:[#allocation46_spill] sm:$0xff] }
 0xe7f   :  { %6113 = vmatpush.msra.mxu3 %v6030_v49  ;;  %v5874_v39 = vpop.f32.mrf.mxu1  ;;  %v5857_v58 = vadd.f32 %v11374_v16, %v11373_v11  ;;  %v6000_v49 = vmax.f32 %v5863_v43, 0.0  ;;  %v5973_v23 = vmax.f32 %v5782_v24, 0.0  ;;  %v11389_v43 = vld [vmem:[#allocation48_spill] sm:$0xff]  ;;  %v11398_v24 = vld [vmem:[#allocation47_spill] sm:$0xff]  ;;  %v6016_v16 = vmax.f32 %v5911_v26, 0.0 }
 0xe80   :  { %v5875_v55 = vadd.f32 %v5874_v39, %v10934_v3  ;;  %6054 = vmatpush.msrb.mxu2 %v5981_v33  ;;  %v5510_v3 = vpop.permute.xlu2 %5509  ;;  %v5926_v33 = vadd.f32 %v11031_v2, %v5495_v38  ;;  %v11376_v39 = vld [vmem:[#allocation43_spill] sm:$0xff]  ;;  %v11381_v2 = vld [vmem:[#allocation56_spill] sm:$0xff] }
 0xe81   :  { %6114 = vmatpush.msra.mxu3 %v6029_v12  ;;  %v5935_v56 = vadd.f32 %v11361_v57, %v5510_v3  ;;  %v11375_v12 = vld [vmem:[#allocation13_spill] sm:$0xff]  ;;  %v5998_v47 = vmax.f32 %v5857_v58, 0.0  ;;  %v11385_v57 = vld [vmem:[#allocation51_spill] sm:$0xff] }
 0xe82   :  { %v6004_v1 = vmax.f32 %v5875_v55, 0.0  ;;  %6055 = vmatpush.msrb.mxu2 %v5980_v5  ;;  %v5854_v6 = vadd.f32 %v11376_v39, %v11375_v12  ;;  %v11377_v5 = vld [vmem:[#allocation28_spill] sm:$0xff]  ;;  %v6022_v55 = vmax.f32 %v5929_v7, 0.0  ;;  %v6021_v3 = vmax.f32 %v5926_v33, 0.0  ;;  %v11397_v38 = vld [vmem:[#allocation27_spill] sm:$0xff]  ;;  %v11402_v12 = vld [vmem:[#allocation45_spill] sm:$0xff] }
 0xe83   :  { %6115 = vmatpush.msra.mxu3 %v6028_v30  ;;  %v6024_v9 = vmax.f32 %v5935_v56, 0.0  ;;  %v5923_v45 = vadd.f32 %v11016_v44, %v11377_v5  ;;  %v11378_v30 = vld [vmem:[#allocation11_spill] sm:$0xff]  ;;  %v11396_v7 = vld [vmem:[#allocation4_spill] sm:$0xff]  ;;  %v11403_v39 = vld [vmem:[#allocation34_spill] sm:$0xff] }
 0xe84   :  { %6056 = vmatpush.msrb.mxu2 %v5979_v28  ;;  %6067 = vmatpush.msrb.mxu0 %v6004_v1  ;;  %v5851_v28 = vadd.f32 %v11379_v13, %v11378_v30  ;;  %v11380_v1 = vld [vmem:[#allocation33_spill] sm:$0xff]  ;;  %v5997_v32 = vmax.f32 %v5854_v6, 0.0  ;;  %v5836_v27 = vadd.f32 %v11397_v38, %v11396_v7  ;;  %v5902_v6 = vadd.f32 %v11403_v39, %v11402_v12 }
 0xe85   :  { %6116 = vmatpush.msra.mxu3 %v6027_v48  ;;  %v5920_v35 = vadd.f32 %v11381_v2, %v11380_v1  ;;  %v6037_v48 = vld [vmem:[%s11148_s15] sm:$0x1f]  ;;  %v11407_v13 = vld [vmem:[#allocation49_spill] sm:$0xff] }
 0xe86   :  { %6057 = vmatpush.msrb.mxu2 %v5978_v41  ;;  %6068 = vmatpush.msrb.mxu0 %v6003_v60  ;;  %v11383_v41 = vld [vmem:[#allocation38_spill] sm:$0xff]  ;;  %v11384_v60 = vld [vmem:[#allocation36_spill] sm:$0xff]  ;;  %v5996_v31 = vmax.f32 %v5851_v28, 0.0  ;;  %v5991_v30 = vmax.f32 %v5836_v27, 0.0  ;;  %v11408_v28 = vld [vmem:[#allocation31_spill] sm:$0xff] }
 0xe87   :  { %6117 = vmatpush.msra.mxu3 %v6026_v22  ;;  %v11080_v44 = vpop.f32.mrf.mxu1  ;;  %v5848_v42 = vadd.f32 %v11383_v41, %v11382_v10  ;;  %v5917_v56 = vadd.f32 %v11385_v57, %v11384_v60  ;;  %v6020_v22 = vmax.f32 %v5923_v45, 0.0  ;;  %v6019_v36 = vmax.f32 %v5920_v35, 0.0  ;;  %v11405_v45 = vld [vmem:[#allocation10_spill] sm:$0xff] }
 0xe88   :  { %6058 = vmatpush.msrb.mxu2 %v5977_v53  ;;  %6069 = vmatpush.msrb.mxu0 %v6002_v8  ;;  %v5845_v53 = vadd.f32 %v11387_v17, %v11386_v63  ;;  %v5914_v8 = vadd.f32 %v11389_v43, %v11388_v37  ;;  %v11409_v35 = vld [vmem:[#allocation54_spill] sm:$0xff]  ;;  %v6013_v10 = vmax.f32 %v5902_v6, 0.0 }
 0xe89   :  { %6118 = vmatpush.msra.mxu3 %v6025_v18  ;;  %v5842_v18 = vadd.f32 %v11391_v20, %v11390_v59  ;;  %v5995_v25 = vmax.f32 %v5848_v42, 0.0  ;;  %v11411_v42 = vld [vmem:[#allocation53_spill] sm:$0xff] }
 0xe8a   :  { %6059 = vmatpush.msrb.mxu2 %v5976_v34  ;;  %6070 = vmatpush.msrb.mxu0 %v6001_v46  ;;  %v6018_v34 = vmax.f32 %v5917_v56, 0.0  ;;  %v5994_v46 = vmax.f32 %v5845_v53, 0.0  ;;  %v6038_v56 = vld [vmem:[%s11148_s15 + $0x8] sm:$0x1f] }
 0xe8b   :  { %6119 = vmatpush.msra.mxu3 %v6024_v9  ;;  %v6017_v9 = vmax.f32 %v5914_v8, 0.0  ;;  %v5993_v19 = vmax.f32 %v5842_v18, 0.0  ;;  %v5415_v18 = vpop.permute.xlu2 %5414 }
 0xe8c   :  { %6060 = vmatpush.msrb.mxu2 %v5975_v54  ;;  %6071 = vmatpush.msrb.mxu0 %v6000_v49  ;;  %v11399_v54 = vld [vmem:[#allocation37_spill] sm:$0xff]  ;;  %v11400_v49 = vld [vmem:[#allocation8_spill] sm:$0xff] }
 0xe8d   :  { %6120 = vmatpush.msra.mxu3 %v6023_v62  ;;  %v5905_v11 = vadd.f32 %v11399_v54, %v11398_v24  ;;  %v11401_v62 = vld [vmem:[#allocation23_spill] sm:$0xff] }
 0xe8e   :  { %6061 = vmatpush.msrb.mxu2 %v5974_v40  ;;  %6072 = vmatpush.msrb.mxu0 %v5999_v50  ;;  %v5833_v33 = vadd.f32 %v11401_v62, %v11400_v49  ;;  %v5992_v40 = vmax.f32 %v5839_v14, 0.0  ;;  %v11404_v50 = vld [vmem:[#allocation41_spill] sm:$0xff] }
 0xe8f   :  { %6121 = vmatpush.msra.mxu3 %v6022_v55  ;;  %v5880_v58 = vpop.f32.mrf.mxu1  ;;  %v6015_v5 = vmax.f32 %v11404_v50, 0.0  ;;  %v11406_v55 = vld [vmem:[#allocation17_spill] sm:$0xff]  ;;  %v6014_v1 = vmax.f32 %v5905_v11, 0.0 }
 0xe90   :  { %6062 = vmatpush.msrb.mxu2 %v5973_v23  ;;  %6073 = vmatpush.msrb.mxu0 %v5998_v47  ;;  %v5830_v23 = vadd.f32 %v11406_v55, %v11405_v45  ;;  %v5899_v47 = vadd.f32 %v11408_v28, %v11407_v13  ;;  %v5990_v2 = vmax.f32 %v5833_v33, 0.0  ;;  %v5881_v20 = vadd.f32 %v5880_v58, %v11034_v29 }
 0xe91   :  { %6122 = vmatpush.msra.mxu3 %v6021_v3  ;;  %6063 = vmatmul.f32.vlgmr.msrb.gmra.mxu2 %v6037_v48  ;;  %v11410_v48 = vld [vmem:[#allocation29_spill] sm:$0xff] }
 0xe92   :  { %6087 = vmatpush.msra.mxu2 %v6020_v22  ;;  %6074 = vmatpush.msrb.mxu0 %v5997_v32  ;;  %v5896_v3 = vadd.f32 %v11410_v48, %v11409_v35  ;;  %v5989_v41 = vmax.f32 %v5830_v23, 0.0  ;;  %v11412_v32 = vld [vmem:[#allocation26_spill] sm:$0xff]  ;;  %v6012_v57 = vmax.f32 %v5899_v47, 0.0  ;;  %v11413_v22 = vld [vmem:[#allocation57_spill] sm:$0xff]  ;;  %v6006_v21 = vmax.f32 %v5881_v20, 0.0 }
 0xe93   :  { %6123 = vmatmul.f32.vlgmr.msra.gmra.mxu3 %v6040_v4  ;;  %v5893_v60 = vadd.f32 %v11412_v32, %v11411_v42  ;;  %v11414_v4 = vld [vmem:[#allocation20_spill] sm:$0xff] }
 0xe94   :  { %6088 = vmatpush.msra.mxu2 %v6019_v36  ;;  %6075 = vmatpush.msrb.mxu0 %v5996_v31  ;;  %v5890_v63 = vadd.f32 %v11414_v4, %v11413_v22  ;;  %v6011_v17 = vmax.f32 %v5896_v3, 0.0  ;;  %v11415_v31 = vld [vmem:[#allocation14_spill] sm:$0xff] }
 0xe95   :  { %v5887_v37 = vadd.f32 %v11415_v31, %v11024_v61  ;;  %v6010_v43 = vmax.f32 %v5893_v60, 0.0  ;;  %v6039_v61 = vld [vmem:[%s11148_s15 + $0x10] sm:$0x1f] }
 0xe96   :  { %6089 = vmatpush.msra.mxu2 %v6018_v34  ;;  %6076 = vmatpush.msrb.mxu0 %v5995_v25  ;;  %v6009_v8 = vmax.f32 %v5890_v63, 0.0  ;;  %v5878_v25 = vadd.f32 %v11080_v44, %v5415_v18  ;;  %v6045_v34 = vpop.permute.xlu2 %6044 }
 0xe97   :  { %v5883_v53 = vpop.f32.mrf.mxu1  ;;  %v6008_v59 = vmax.f32 %v5887_v37, 0.0 }
 0xe98   :  { %6090 = vmatpush.msra.mxu2 %v6017_v9  ;;  %6077 = vmatpush.msrb.mxu0 %v5994_v46  ;;  %v5884_v36 = vadd.f32 %v5883_v53, %v11019_v52  ;;  %v6005_v26 = vmax.f32 %v5878_v25, 0.0 }
 0xe9a   :  { %6091 = vmatpush.msra.mxu2 %v6016_v16  ;;  %6078 = vmatpush.msrb.mxu0 %v5993_v19  ;;  %v6007_v15 = vmax.f32 %v5884_v36, 0.0 }
 0xe9c   :  { %6092 = vmatpush.msra.mxu2 %v6015_v5  ;;  %6079 = vmatpush.msrb.mxu0 %v5992_v40 }
 0xe9e   :  { %6093 = vmatpush.msra.mxu2 %v6014_v1  ;;  %6080 = vmatpush.msrb.mxu0 %v5991_v30 }
 0xea0   :  { %6094 = vmatpush.msra.mxu2 %v6013_v10  ;;  %6081 = vmatpush.msrb.mxu0 %v5990_v2 }
 0xea2   :  { %6095 = vmatpush.msra.mxu2 %v6012_v57  ;;  %6082 = vmatpush.msrb.mxu0 %v5989_v41 }
 0xea3   :  { %6083 = vmatmul.f32.vlgmr.msrb.gmra.mxu0 %v6038_v56 }
 0xea4   :  { %6096 = vmatpush.msra.mxu2 %v6011_v17 }
 0xea6   :  { %6097 = vmatpush.msra.mxu2 %v6010_v43 }
 0xea8   :  { %6098 = vmatpush.msra.mxu2 %v6009_v8 }
 0xeaa   :  { %6099 = vmatpush.msra.mxu2 %v6008_v59 }
 0xeac   :  { %6100 = vmatpush.msra.mxu2 %v6007_v15 }
 0xeae   :  { %6101 = vmatpush.msra.mxu2 %v6006_v21 }
 0xeb0   :  { %6102 = vmatpush.msra.mxu2 %v6005_v26 }
 0xeb1   :  { %6103 = vmatmul.f32.vlgmr.msra.gmra.mxu2 %v6039_v61 }
 0xf14   :  { %v6064_v52 = vpop.f32.mrf.mxu2 }
 0xf15   :  { %v6065_v29 = vadd.f32 %v6064_v52, %v6045_v34 }
 0xf16   :  { %v6124_v46 = vpop.f32.mrf.mxu3 }
 0xf20   :  { %v6084_v0 = vpop.f32.mrf.mxu0 }
 0xf21   :  { %v6085_v51 = vadd.f32 %v6084_v0, %v6065_v29 }
 0xf34   :  { %v6104_v14 = vpop.f32.mrf.mxu2 }
 0xf35   :  { %v6105_v44 = vadd.f32 %v6104_v14, %v6085_v51 }
 0xf37   :  { %v6125_v9 = vadd.f32 %v6124_v46, %v6105_v44 }
 0xf39   :  { %6128 = vst.msk [vmem:[%s11149_s17] sm:$0x1f] %vm6127_vm3, %v6125_v9 }

</bundles_post_ra>
